<compile_context>
chip_gen: v7x
topology: tpu7x:2x2x1
jax: 0.10.0
libtpu: 0.0.40
codegen_flags: <defaults>
</compile_context>

<pallas_src>
import numpy as np
import jax
import jax.numpy as jnp
from jax import lax
from jax.experimental import pallas as pl
from jax.experimental.pallas import tpu as pltpu

LANE = 128
# 3x3 taps in (dy, dx) order; flattened index == (dy+1)*3 + (dx+1), matching
# the (9, Cp, Cp) weight layout produced by prepare_params().
_TAPS = tuple((dy, dx) for dy in (-1, 0, 1) for dx in (-1, 0, 1))


def _pad_channels(c):
    return ((c + LANE - 1) // LANE) * LANE


def _vmem_limit_bytes():
    """~75% of physical per-core VMEM (leaves headroom; portable to v7x)."""
    try:
        cap = pltpu.get_tpu_info().vmem_capacity_bytes
    except Exception:
        cap = 64 * 1024 * 1024          # conservative fallback (v7x-sized)
    return int(cap * 3 // 4)


def _make_kernel(H, W, halo):
    M = H * W

    def kernel(x_ref, w1_ref, s1_ref, b1_ref, w2_ref, s2_ref, b2_ref,
               out_ref, pad_ref):
        """One batch element per grid step.

        x_ref  : (1, M, Cp)        bf16  input, spatial flattened, lane-padded
        w1_ref : (9, Cp, Cp)       bf16  conv1 weights (tap-major, in x out)
        s1/b1  : (1, Cp)           f32   folded bn1 scale / bias
        w2_ref : (9, Cp, Cp)       bf16  conv2 weights
        s2/b2  : (1, Cp)           f32   folded bn2 scale / bias
        out_ref: (1, M, Cp)        bf16
        pad_ref: (M + 2*halo, Cp)  bf16  zero-haloed conv-input staging scratch
        """
        Cp = out_ref.shape[-1]

        # Zero the top/bottom halo rows (never written again; tiny).
        zeros_halo = jnp.zeros((halo, Cp), jnp.bfloat16)
        pad_ref[pl.ds(0, halo), :] = zeros_halo
        pad_ref[pl.ds(halo + M, halo), :] = zeros_halo

        # Stage conv1 input (already bf16 in HBM -> no cast).
        x_bf = x_ref[0]                                       # (M, Cp) bf16
        pad_ref[pl.ds(halo, M), :] = x_bf

        # Column masks for dx = +-1 taps, computed ONCE per step and shared by
        # both convs (dy taps need no mask: the zero halo covers the y bounds).
        col = lax.broadcasted_iota(jnp.int32, (M, 1), 0) % W
        mask_l = (col > 0).astype(jnp.bfloat16)               # dx = -1 taps
        mask_r = (col < W - 1).astype(jnp.bfloat16)           # dx = +1 taps

        def conv3x3(w_ref):
            """3x3 conv, stride 1, pad 1: 9 offset reads from the haloed
            scratch, each a lane-dense bf16 MXU matmul with f32 accumulation."""
            acc = jnp.zeros((M, Cp), jnp.float32)
            for t, (dy, dx) in enumerate(_TAPS):
                off = halo + dy * W + dx                      # static offset
                win = pad_ref[pl.ds(off, M), :]               # (M, Cp) bf16
                if dx == -1:
                    win = win * mask_l
                elif dx == 1:
                    win = win * mask_r
                acc = acc + jnp.dot(win, w_ref[t],
                                    preferred_element_type=jnp.float32)
            return acc

        # conv1 -> bn1 (folded) -> relu     (all post-matmul math in f32)
        out1 = conv3x3(w1_ref)
        out1 = jnp.maximum(out1 * s1_ref[...] + b1_ref[...], 0.0)

        # Stage conv2 input: exactly one f32 -> bf16 cast.
        pad_ref[pl.ds(halo, M), :] = out1.astype(jnp.bfloat16)

        # conv2 -> bn2 (folded)
        out2 = conv3x3(w2_ref)
        out2 = out2 * s2_ref[...] + b2_ref[...]

        # residual add (downsample=None -> identity is the input) + relu, f32.
        out_ref[0] = jnp.maximum(out2 + x_bf.astype(jnp.float32),
                                 0.0).astype(out_ref.dtype)

    return kernel


# ----------------------------------------------------------------------------
# Layout helpers: used ONCE at the network boundary, not per BasicBlock.
# ----------------------------------------------------------------------------
def to_block_layout(x_nchw, Cp=None):
    """NCHW f32 -> (N, H*W, Cp) bf16 channels-last, lane-padded."""
    N, C, H, W = x_nchw.shape
    Cp = Cp or _pad_channels(C)
    x = jnp.transpose(x_nchw, (0, 2, 3, 1)).reshape(N, H * W, C)
    x = jnp.pad(x, ((0, 0), (0, 0), (0, Cp - C)))
    return x.astype(jnp.bfloat16)


def from_block_layout(x_flat, C, H, W):
    """(N, H*W, Cp) -> NCHW f32."""
    N = x_flat.shape[0]
    x = x_flat[:, :, :C].astype(jnp.float32).reshape(N, H, W, C)
    return jnp.transpose(x, (0, 3, 1, 2))


def prepare_params(w1_oihw, s1, b1, w2_oihw, s2, b2, Cp):
    """One-time parameter prep: OIHW -> (9, Cp, Cp) bf16; BN vecs -> (1, Cp) f32."""
    def prep_w(w):
        O, I = w.shape[0], w.shape[1]
        w_hwio = jnp.transpose(w, (2, 3, 1, 0))               # (3, 3, Cin, Cout)
        w_pad = jnp.pad(w_hwio, ((0, 0), (0, 0), (0, Cp - I), (0, Cp - O)))
        return w_pad.reshape(9, Cp, Cp).astype(jnp.bfloat16)

    def prep_v(v):
        return jnp.pad(v, (0, Cp - v.shape[0])).reshape(1, Cp).astype(jnp.float32)

    return (prep_w(w1_oihw), prep_v(s1), prep_v(b1),
            prep_w(w2_oihw), prep_v(s2), prep_v(b2))


# ----------------------------------------------------------------------------
# BasicBlock forward in block layout (no per-block layout ops).
# ----------------------------------------------------------------------------
def basic_block_pallas(x_flat, params, H, W, *, stride=1, downsample=None):
    assert stride == 1, "TODO(synk): stride != 1 not implemented"
    assert downsample is None, "TODO(synk): downsample branch not implemented"
    w1p, s1p, b1p, w2p, s2p, b2p = params
    N, M, Cp = x_flat.shape
    assert M == H * W and Cp % LANE == 0
    assert w1p.shape == (9, Cp, Cp) and w2p.shape == (9, Cp, Cp)

    # Halo >= W+1 rows (covers every dy/dx offset), rounded up to a multiple of
    # 8 so dy-only taps read sublane-aligned windows when W % 8 == 0.
    halo = ((W + 1 + 7) // 8) * 8

    def build(single_buffer_consts):
        def const_spec(shape):
            idx = lambda n, _s=shape: (0,) * len(_s)
            if single_buffer_consts:
                # Grid-invariant operand: single VMEM buffer (saves VMEM;
                # most valuable at Cp=512 stages / on v7x's 64 MiB budget).
                return pl.BlockSpec(shape, idx, pipeline_mode=pl.Buffered(1))
            return pl.BlockSpec(shape, idx)

        return pl.pallas_call(
            _make_kernel(H, W, halo),
            out_shape=jax.ShapeDtypeStruct((N, M, Cp), jnp.bfloat16),
            grid_spec=pltpu.PrefetchScalarGridSpec(
                num_scalar_prefetch=0,
                grid=(N,),
                in_specs=[
                    pl.BlockSpec((1, M, Cp), lambda n: (n, 0, 0)),
                    const_spec((9, Cp, Cp)),
                    const_spec((1, Cp)),
                    const_spec((1, Cp)),
                    const_spec((9, Cp, Cp)),
                    const_spec((1, Cp)),
                    const_spec((1, Cp)),
                ],
                out_specs=pl.BlockSpec((1, M, Cp), lambda n: (n, 0, 0)),
                scratch_shapes=[pltpu.VMEM((M + 2 * halo, Cp), jnp.bfloat16)],
            ),
            compiler_params=pltpu.CompilerParams(
                dimension_semantics=("parallel",),
                vmem_limit_bytes=_vmem_limit_bytes()),
        )

    args = (x_flat, w1p, s1p, b1p, w2p, s2p, b2p)
    try:
        return build(True)(*args)
    except Exception:
        # pl.Buffered(1) not accepted by this jax version's auto-pipeliner:
        # fall back to default double-buffered weight blocks (correct, just
        # uses a little more VMEM).
        return build(False)(*args)


def basic_block_reference(x, w1, s1, b1, w2, s2, b2):
    """Pure-JAX f32 NCHW reference for verification."""
    dn = lax.conv_dimension_numbers(x.shape, w1.shape, ("NCHW", "OIHW", "NCHW"))
    o = lax.conv_general_dilated(x, w1, (1, 1), ((1, 1), (1, 1)),
                                 dimension_numbers=dn)
    o = o * s1[None, :, None, None] + b1[None, :, None, None]
    o = jnp.maximum(o, 0.0)
    o = lax.conv_general_dilated(o, w2, (1, 1), ((1, 1), (1, 1)),
                                 dimension_numbers=dn)
    o = o * s2[None, :, None, None] + b2[None, :, None, None]
    return jnp.maximum(o + x, 0.0)


if __name__ == "__main__":
    # Small shapes: batch=2, in_planes=planes=4, spatial=16 (stride=1, no downsample).
    N, C, H, W = 2, 4, 16, 16
    eps = 1e-5

    key = jax.random.PRNGKey(0)
    kx, kw1, kw2, kg1, kb1, km1, kv1, kg2, kb2, km2, kv2 = jax.random.split(key, 11)

    x = jax.random.normal(kx, (N, C, H, W), jnp.float32)

    # conv weights in PyTorch OIHW layout, kernel_size=3, bias=False.
    w1 = jax.random.normal(kw1, (C, C, 3, 3), jnp.float32) * 0.1
    w2 = jax.random.normal(kw2, (C, C, 3, 3), jnp.float32) * 0.1

    # BatchNorm2d parameters (inference): gamma, beta, running_mean, running_var.
    g1 = 1.0 + 0.1 * jax.random.normal(kg1, (C,), jnp.float32)
    be1 = 0.1 * jax.random.normal(kb1, (C,), jnp.float32)
    m1 = 0.1 * jax.random.normal(km1, (C,), jnp.float32)
    v1 = 1.0 + 0.1 * jax.random.uniform(kv1, (C,), jnp.float32)

    g2 = 1.0 + 0.1 * jax.random.normal(kg2, (C,), jnp.float32)
    be2 = 0.1 * jax.random.normal(kb2, (C,), jnp.float32)
    m2 = 0.1 * jax.random.normal(km2, (C,), jnp.float32)
    v2 = 1.0 + 0.1 * jax.random.uniform(kv2, (C,), jnp.float32)

    # Fold BN into per-channel scale/bias.
    s1 = g1 / jnp.sqrt(v1 + eps)
    b1 = be1 - m1 * s1
    s2 = g2 / jnp.sqrt(v2 + eps)
    b2 = be2 - m2 * s2

    # One-time boundary conversions (per-network, not per-block).
    Cp = _pad_channels(C)
    params = prepare_params(w1, s1, b1, w2, s2, b2, Cp)
    x_flat = to_block_layout(x, Cp)

    out_flat = basic_block_pallas(x_flat, params, H, W)
    out = jax.block_until_ready(from_block_layout(out_flat, C, H, W))
    ref = jax.block_until_ready(basic_block_reference(x, w1, s1, b1, w2, s2, b2))

    # bf16 activations in HBM + bf16 matmul operands (f32 accumulation) vs a
    # pure-f32 reference -> loose tolerance.
    np.testing.assert_allclose(np.asarray(out), np.asarray(ref),
                               rtol=5e-2, atol=5e-2)
    print("KERNEL_OK")
</pallas_src>

<mosaic_0001>
module attributes {stable_mosaic.version = 11 : i64} {
  func.func @kernel(%arg0: i32, %arg1: memref<1x256x128xbf16, #tpu.memory_space<vmem>>, %arg2: memref<9x128x128xbf16, #tpu.memory_space<vmem>>, %arg3: memref<1x128xf32, #tpu.memory_space<vmem>>, %arg4: memref<1x128xf32, #tpu.memory_space<vmem>>, %arg5: memref<9x128x128xbf16, #tpu.memory_space<vmem>>, %arg6: memref<1x128xf32, #tpu.memory_space<vmem>>, %arg7: memref<1x128xf32, #tpu.memory_space<vmem>>, %arg8: memref<1x256x128xbf16, #tpu.memory_space<vmem>>, %arg9: memref<304x128xbf16, #tpu.memory_space<vmem>>) attributes {dimension_semantics = [#tpu.dimension_semantics<parallel>], iteration_bounds = array<i64: 2>, scalar_prefetch = 0 : i64, scratch_operands = 1 : i64, tpu.core_type = #tpu.core_type<tc>, window_params = [{transform_indices = @transform_0, window_bounds = array<i64: 1, 256, 128>}, {pipeline_mode = #tpu.pipeline_mode<synchronous>, transform_indices = @transform_1, window_bounds = array<i64: 9, 128, 128>}, {pipeline_mode = #tpu.pipeline_mode<synchronous>, transform_indices = @transform_2, window_bounds = array<i64: 1, 128>}, {pipeline_mode = #tpu.pipeline_mode<synchronous>, transform_indices = @transform_3, window_bounds = array<i64: 1, 128>}, {pipeline_mode = #tpu.pipeline_mode<synchronous>, transform_indices = @transform_4, window_bounds = array<i64: 9, 128, 128>}, {pipeline_mode = #tpu.pipeline_mode<synchronous>, transform_indices = @transform_5, window_bounds = array<i64: 1, 128>}, {pipeline_mode = #tpu.pipeline_mode<synchronous>, transform_indices = @transform_6, window_bounds = array<i64: 1, 128>}, {transform_indices = @transform_7, window_bounds = array<i64: 1, 256, 128>}]} {
    %cst = arith.constant 0.000000e+00 : bf16
    %0 = vector.broadcast %cst : bf16 to vector<24x128xbf16>
    %c0 = arith.constant 0 : index
    %c0_0 = arith.constant 0 : index
    %1 = vector.load %arg9[%c0, %c0_0] : memref<304x128xbf16, #tpu.memory_space<vmem>>, vector<24x128xbf16>
    tpu.vector_store %arg9[%c0, %c0_0], %0 {strides = array<i32>} : memref<304x128xbf16, #tpu.memory_space<vmem>>, vector<24x128xbf16>,
    %c280 = arith.constant 280 : index
    %c0_1 = arith.constant 0 : index
    %2 = vector.load %arg9[%c280, %c0_1] : memref<304x128xbf16, #tpu.memory_space<vmem>>, vector<24x128xbf16>
    tpu.vector_store %arg9[%c280, %c0_1], %0 {strides = array<i32>} : memref<304x128xbf16, #tpu.memory_space<vmem>>, vector<24x128xbf16>,
    %c0_2 = arith.constant 0 : index
    %c0_3 = arith.constant 0 : index
    %c0_4 = arith.constant 0 : index
    %3 = vector.load %arg1[%c0_2, %c0_3, %c0_4] : memref<1x256x128xbf16, #tpu.memory_space<vmem>>, vector<1x256x128xbf16>
    %4 = vector.shape_cast %3 : vector<1x256x128xbf16> to vector<256x128xbf16>
    %c24 = arith.constant 24 : index
    %c0_5 = arith.constant 0 : index
    %5 = vector.load %arg9[%c24, %c0_5] : memref<304x128xbf16, #tpu.memory_space<vmem>>, vector<256x128xbf16>
    tpu.vector_store %arg9[%c24, %c0_5], %4 {strides = array<i32>} : memref<304x128xbf16, #tpu.memory_space<vmem>>, vector<256x128xbf16>,
    %6 = tpu.iota {dimensions = array<i32: 0>} : vector<256x1xi32>
    %c16_i32 = arith.constant 16 : i32
    %c0_i32 = arith.constant 0 : i32
    %7 = arith.cmpi eq, %c16_i32, %c0_i32 : i32
    %c1_i32 = arith.constant 1 : i32
    %8 = arith.select %7, %c1_i32, %c16_i32 : i32
    %9 = vector.broadcast %8 : i32 to vector<256x1xi32>
    %10 = arith.remsi %6, %9 : vector<256x1xi32>
    %c0_i32_6 = arith.constant 0 : i32
    %11 = vector.broadcast %c0_i32_6 : i32 to vector<256x1xi32>
    %12 = arith.cmpi ne, %10, %11 : vector<256x1xi32>
    %c0_i32_7 = arith.constant 0 : i32
    %13 = vector.broadcast %c0_i32_7 : i32 to vector<256x1xi32>
    %14 = arith.cmpi slt, %10, %13 : vector<256x1xi32>
    %c0_i32_8 = arith.constant 0 : i32
    %15 = arith.cmpi slt, %8, %c0_i32_8 : i32
    %16 = vector.broadcast %15 : i1 to vector<256x1xi1>
    %17 = vector.broadcast %16 : vector<256x1xi1> to vector<256x1xi1>
    %18 = arith.xori %14, %17 : vector<256x1xi1>
    %19 = arith.andi %18, %12 : vector<256x1xi1>
    %20 = vector.broadcast %8 : i32 to vector<256x1xi32>
    %21 = arith.addi %10, %20 : vector<256x1xi32>
    %22 = arith.select %19, %21, %10 : vector<256x1xi1>, vector<256x1xi32>
    %c0_i32_9 = arith.constant 0 : i32
    %23 = vector.broadcast %c0_i32_9 : i32 to vector<256x1xi32>
    %24 = arith.cmpi sgt, %22, %23 : vector<256x1xi32>
    %25 = arith.extui %24 : vector<256x1xi1> to vector<256x1xi32>
    %26 = arith.sitofp %25 : vector<256x1xi32> to vector<256x1xf32>
    %27 = arith.truncf %26 : vector<256x1xf32> to vector<256x1xbf16>
    %c15_i32 = arith.constant 15 : i32
    %28 = vector.broadcast %c15_i32 : i32 to vector<256x1xi32>
    %29 = arith.cmpi slt, %22, %28 : vector<256x1xi32>
    %30 = arith.extui %29 : vector<256x1xi1> to vector<256x1xi32>
    %31 = arith.sitofp %30 : vector<256x1xi32> to vector<256x1xf32>
    %32 = arith.truncf %31 : vector<256x1xf32> to vector<256x1xbf16>
    %cst_10 = arith.constant 0.000000e+00 : f32
    %33 = vector.broadcast %cst_10 : f32 to vector<256x128xf32>
    %c7 = arith.constant 7 : index
    %c0_11 = arith.constant 0 : index
    %34 = vector.load %arg9[%c7, %c0_11] : memref<304x128xbf16, #tpu.memory_space<vmem>>, vector<256x128xbf16>
    %35 = vector.broadcast %27 : vector<256x1xbf16> to vector<256x128xbf16>
    %36 = arith.mulf %34, %35 : vector<256x128xbf16>
    %c0_12 = arith.constant 0 : index
    %c0_13 = arith.constant 0 : index
    %c0_14 = arith.constant 0 : index
    %37 = vector.load %arg2[%c0_12, %c0_13, %c0_14] : memref<9x128x128xbf16, #tpu.memory_space<vmem>>, vector<1x128x128xbf16>
    %38 = vector.shape_cast %37 : vector<1x128x128xbf16> to vector<128x128xbf16>
    %cst_15 = arith.constant dense<0.000000e+00> : vector<256x128xf32>
    %39 = tpu.matmul %36, %38, %cst_15 {dimension_numbers = #tpu.dot_dimension_numbers<[1], [0], [0], [1], [0, 0, 1, 1], [], []>} : vector<256x128xbf16>, vector<128x128xbf16>, vector<256x128xf32> -> vector<256x128xf32>
    %40 = arith.addf %33, %39 : vector<256x128xf32>
    %c8 = arith.constant 8 : index
    %c0_16 = arith.constant 0 : index
    %41 = vector.load %arg9[%c8, %c0_16] : memref<304x128xbf16, #tpu.memory_space<vmem>>, vector<256x128xbf16>
    %c1 = arith.constant 1 : index
    %c0_17 = arith.constant 0 : index
    %c0_18 = arith.constant 0 : index
    %42 = vector.load %arg2[%c1, %c0_17, %c0_18] : memref<9x128x128xbf16, #tpu.memory_space<vmem>>, vector<1x128x128xbf16>
    %43 = vector.shape_cast %42 : vector<1x128x128xbf16> to vector<128x128xbf16>
    %cst_19 = arith.constant dense<0.000000e+00> : vector<256x128xf32>
    %44 = tpu.matmul %41, %43, %cst_19 {dimension_numbers = #tpu.dot_dimension_numbers<[1], [0], [0], [1], [0, 0, 1, 1], [], []>} : vector<256x128xbf16>, vector<128x128xbf16>, vector<256x128xf32> -> vector<256x128xf32>
    %45 = arith.addf %40, %44 : vector<256x128xf32>
    %c9 = arith.constant 9 : index
    %c0_20 = arith.constant 0 : index
    %46 = vector.load %arg9[%c9, %c0_20] : memref<304x128xbf16, #tpu.memory_space<vmem>>, vector<256x128xbf16>
    %47 = vector.broadcast %32 : vector<256x1xbf16> to vector<256x128xbf16>
    %48 = arith.mulf %46, %47 : vector<256x128xbf16>
    %c2 = arith.constant 2 : index
    %c0_21 = arith.constant 0 : index
    %c0_22 = arith.constant 0 : index
    %49 = vector.load %arg2[%c2, %c0_21, %c0_22] : memref<9x128x128xbf16, #tpu.memory_space<vmem>>, vector<1x128x128xbf16>
    %50 = vector.shape_cast %49 : vector<1x128x128xbf16> to vector<128x128xbf16>
    %cst_23 = arith.constant dense<0.000000e+00> : vector<256x128xf32>
    %51 = tpu.matmul %48, %50, %cst_23 {dimension_numbers = #tpu.dot_dimension_numbers<[1], [0], [0], [1], [0, 0, 1, 1], [], []>} : vector<256x128xbf16>, vector<128x128xbf16>, vector<256x128xf32> -> vector<256x128xf32>
    %52 = arith.addf %45, %51 : vector<256x128xf32>
    %c23 = arith.constant 23 : index
    %c0_24 = arith.constant 0 : index
    %53 = vector.load %arg9[%c23, %c0_24] : memref<304x128xbf16, #tpu.memory_space<vmem>>, vector<256x128xbf16>
    %54 = vector.broadcast %27 : vector<256x1xbf16> to vector<256x128xbf16>
    %55 = arith.mulf %53, %54 : vector<256x128xbf16>
    %c3 = arith.constant 3 : index
    %c0_25 = arith.constant 0 : index
    %c0_26 = arith.constant 0 : index
    %56 = vector.load %arg2[%c3, %c0_25, %c0_26] : memref<9x128x128xbf16, #tpu.memory_space<vmem>>, vector<1x128x128xbf16>
    %57 = vector.shape_cast %56 : vector<1x128x128xbf16> to vector<128x128xbf16>
    %cst_27 = arith.constant dense<0.000000e+00> : vector<256x128xf32>
    %58 = tpu.matmul %55, %57, %cst_27 {dimension_numbers = #tpu.dot_dimension_numbers<[1], [0], [0], [1], [0, 0, 1, 1], [], []>} : vector<256x128xbf16>, vector<128x128xbf16>, vector<256x128xf32> -> vector<256x128xf32>
    %59 = arith.addf %52, %58 : vector<256x128xf32>
    %c24_28 = arith.constant 24 : index
    %c0_29 = arith.constant 0 : index
    %60 = vector.load %arg9[%c24_28, %c0_29] : memref<304x128xbf16, #tpu.memory_space<vmem>>, vector<256x128xbf16>
    %c4 = arith.constant 4 : index
    %c0_30 = arith.constant 0 : index
    %c0_31 = arith.constant 0 : index
    %61 = vector.load %arg2[%c4, %c0_30, %c0_31] : memref<9x128x128xbf16, #tpu.memory_space<vmem>>, vector<1x128x128xbf16>
    %62 = vector.shape_cast %61 : vector<1x128x128xbf16> to vector<128x128xbf16>
    %cst_32 = arith.constant dense<0.000000e+00> : vector<256x128xf32>
    %63 = tpu.matmul %60, %62, %cst_32 {dimension_numbers = #tpu.dot_dimension_numbers<[1], [0], [0], [1], [0, 0, 1, 1], [], []>} : vector<256x128xbf16>, vector<128x128xbf16>, vector<256x128xf32> -> vector<256x128xf32>
    %64 = arith.addf %59, %63 : vector<256x128xf32>
    %c25 = arith.constant 25 : index
    %c0_33 = arith.constant 0 : index
    %65 = vector.load %arg9[%c25, %c0_33] : memref<304x128xbf16, #tpu.memory_space<vmem>>, vector<256x128xbf16>
    %66 = vector.broadcast %32 : vector<256x1xbf16> to vector<256x128xbf16>
    %67 = arith.mulf %65, %66 : vector<256x128xbf16>
    %c5 = arith.constant 5 : index
    %c0_34 = arith.constant 0 : index
    %c0_35 = arith.constant 0 : index
    %68 = vector.load %arg2[%c5, %c0_34, %c0_35] : memref<9x128x128xbf16, #tpu.memory_space<vmem>>, vector<1x128x128xbf16>
    %69 = vector.shape_cast %68 : vector<1x128x128xbf16> to vector<128x128xbf16>
    %cst_36 = arith.constant dense<0.000000e+00> : vector<256x128xf32>
    %70 = tpu.matmul %67, %69, %cst_36 {dimension_numbers = #tpu.dot_dimension_numbers<[1], [0], [0], [1], [0, 0, 1, 1], [], []>} : vector<256x128xbf16>, vector<128x128xbf16>, vector<256x128xf32> -> vector<256x128xf32>
    %71 = arith.addf %64, %70 : vector<256x128xf32>
    %c39 = arith.constant 39 : index
    %c0_37 = arith.constant 0 : index
    %72 = vector.load %arg9[%c39, %c0_37] : memref<304x128xbf16, #tpu.memory_space<vmem>>, vector<256x128xbf16>
    %73 = vector.broadcast %27 : vector<256x1xbf16> to vector<256x128xbf16>
    %74 = arith.mulf %72, %73 : vector<256x128xbf16>
    %c6 = arith.constant 6 : index
    %c0_38 = arith.constant 0 : index
    %c0_39 = arith.constant 0 : index
    %75 = vector.load %arg2[%c6, %c0_38, %c0_39] : memref<9x128x128xbf16, #tpu.memory_space<vmem>>, vector<1x128x128xbf16>
    %76 = vector.shape_cast %75 : vector<1x128x128xbf16> to vector<128x128xbf16>
    %cst_40 = arith.constant dense<0.000000e+00> : vector<256x128xf32>
    %77 = tpu.matmul %74, %76, %cst_40 {dimension_numbers = #tpu.dot_dimension_numbers<[1], [0], [0], [1], [0, 0, 1, 1], [], []>} : vector<256x128xbf16>, vector<128x128xbf16>, vector<256x128xf32> -> vector<256x128xf32>
    %78 = arith.addf %71, %77 : vector<256x128xf32>
    %c40 = arith.constant 40 : index
    %c0_41 = arith.constant 0 : index
    %79 = vector.load %arg9[%c40, %c0_41] : memref<304x128xbf16, #tpu.memory_space<vmem>>, vector<256x128xbf16>
    %c7_42 = arith.constant 7 : index
    %c0_43 = arith.constant 0 : index
    %c0_44 = arith.constant 0 : index
    %80 = vector.load %arg2[%c7_42, %c0_43, %c0_44] : memref<9x128x128xbf16, #tpu.memory_space<vmem>>, vector<1x128x128xbf16>
    %81 = vector.shape_cast %80 : vector<1x128x128xbf16> to vector<128x128xbf16>
    %cst_45 = arith.constant dense<0.000000e+00> : vector<256x128xf32>
    %82 = tpu.matmul %79, %81, %cst_45 {dimension_numbers = #tpu.dot_dimension_numbers<[1], [0], [0], [1], [0, 0, 1, 1], [], []>} : vector<256x128xbf16>, vector<128x128xbf16>, vector<256x128xf32> -> vector<256x128xf32>
    %83 = arith.addf %78, %82 : vector<256x128xf32>
    %c41 = arith.constant 41 : index
    %c0_46 = arith.constant 0 : index
    %84 = vector.load %arg9[%c41, %c0_46] : memref<304x128xbf16, #tpu.memory_space<vmem>>, vector<256x128xbf16>
    %85 = vector.broadcast %32 : vector<256x1xbf16> to vector<256x128xbf16>
    %86 = arith.mulf %84, %85 : vector<256x128xbf16>
    %c8_47 = arith.constant 8 : index
    %c0_48 = arith.constant 0 : index
    %c0_49 = arith.constant 0 : index
    %87 = vector.load %arg2[%c8_47, %c0_48, %c0_49] : memref<9x128x128xbf16, #tpu.memory_space<vmem>>, vector<1x128x128xbf16>
    %88 = vector.shape_cast %87 : vector<1x128x128xbf16> to vector<128x128xbf16>
    %cst_50 = arith.constant dense<0.000000e+00> : vector<256x128xf32>
    %89 = tpu.matmul %86, %88, %cst_50 {dimension_numbers = #tpu.dot_dimension_numbers<[1], [0], [0], [1], [0, 0, 1, 1], [], []>} : vector<256x128xbf16>, vector<128x128xbf16>, vector<256x128xf32> -> vector<256x128xf32>
    %90 = arith.addf %83, %89 : vector<256x128xf32>
    %c0_51 = arith.constant 0 : index
    %c0_52 = arith.constant 0 : index
    %91 = vector.load %arg3[%c0_51, %c0_52] : memref<1x128xf32, #tpu.memory_space<vmem>>, vector<1x128xf32>
    %92 = vector.broadcast %91 : vector<1x128xf32> to vector<256x128xf32>
    %93 = arith.mulf %90, %92 : vector<256x128xf32>
    %c0_53 = arith.constant 0 : index
    %c0_54 = arith.constant 0 : index
    %94 = vector.load %arg4[%c0_53, %c0_54] : memref<1x128xf32, #tpu.memory_space<vmem>>, vector<1x128xf32>
    %95 = vector.broadcast %94 : vector<1x128xf32> to vector<256x128xf32>
    %96 = arith.addf %93, %95 : vector<256x128xf32>
    %cst_55 = arith.constant 0.000000e+00 : f32
    %97 = vector.broadcast %cst_55 : f32 to vector<256x128xf32>
    %98 = arith.maximumf %96, %97 : vector<256x128xf32>
    %99 = arith.truncf %98 : vector<256x128xf32> to vector<256x128xbf16>
    %c24_56 = arith.constant 24 : index
    %c0_57 = arith.constant 0 : index
    %100 = vector.load %arg9[%c24_56, %c0_57] : memref<304x128xbf16, #tpu.memory_space<vmem>>, vector<256x128xbf16>
    tpu.vector_store %arg9[%c24_56, %c0_57], %99 {strides = array<i32>} : memref<304x128xbf16, #tpu.memory_space<vmem>>, vector<256x128xbf16>,
    %cst_58 = arith.constant 0.000000e+00 : f32
    %101 = vector.broadcast %cst_58 : f32 to vector<256x128xf32>
    %c7_59 = arith.constant 7 : index
    %c0_60 = arith.constant 0 : index
    %102 = vector.load %arg9[%c7_59, %c0_60] : memref<304x128xbf16, #tpu.memory_space<vmem>>, vector<256x128xbf16>
    %103 = vector.broadcast %27 : vector<256x1xbf16> to vector<256x128xbf16>
    %104 = arith.mulf %102, %103 : vector<256x128xbf16>
    %c0_61 = arith.constant 0 : index
    %c0_62 = arith.constant 0 : index
    %c0_63 = arith.constant 0 : index
    %105 = vector.load %arg5[%c0_61, %c0_62, %c0_63] : memref<9x128x128xbf16, #tpu.memory_space<vmem>>, vector<1x128x128xbf16>
    %106 = vector.shape_cast %105 : vector<1x128x128xbf16> to vector<128x128xbf16>
    %cst_64 = arith.constant dense<0.000000e+00> : vector<256x128xf32>
    %107 = tpu.matmul %104, %106, %cst_64 {dimension_numbers = #tpu.dot_dimension_numbers<[1], [0], [0], [1], [0, 0, 1, 1], [], []>} : vector<256x128xbf16>, vector<128x128xbf16>, vector<256x128xf32> -> vector<256x128xf32>
    %108 = arith.addf %101, %107 : vector<256x128xf32>
    %c8_65 = arith.constant 8 : index
    %c0_66 = arith.constant 0 : index
    %109 = vector.load %arg9[%c8_65, %c0_66] : memref<304x128xbf16, #tpu.memory_space<vmem>>, vector<256x128xbf16>
    %c1_67 = arith.constant 1 : index
    %c0_68 = arith.constant 0 : index
    %c0_69 = arith.constant 0 : index
    %110 = vector.load %arg5[%c1_67, %c0_68, %c0_69] : memref<9x128x128xbf16, #tpu.memory_space<vmem>>, vector<1x128x128xbf16>
    %111 = vector.shape_cast %110 : vector<1x128x128xbf16> to vector<128x128xbf16>
    %cst_70 = arith.constant dense<0.000000e+00> : vector<256x128xf32>
    %112 = tpu.matmul %109, %111, %cst_70 {dimension_numbers = #tpu.dot_dimension_numbers<[1], [0], [0], [1], [0, 0, 1, 1], [], []>} : vector<256x128xbf16>, vector<128x128xbf16>, vector<256x128xf32> -> vector<256x128xf32>
    %113 = arith.addf %108, %112 : vector<256x128xf32>
    %c9_71 = arith.constant 9 : index
    %c0_72 = arith.constant 0 : index
    %114 = vector.load %arg9[%c9_71, %c0_72] : memref<304x128xbf16, #tpu.memory_space<vmem>>, vector<256x128xbf16>
    %115 = vector.broadcast %32 : vector<256x1xbf16> to vector<256x128xbf16>
    %116 = arith.mulf %114, %115 : vector<256x128xbf16>
    %c2_73 = arith.constant 2 : index
    %c0_74 = arith.constant 0 : index
    %c0_75 = arith.constant 0 : index
    %117 = vector.load %arg5[%c2_73, %c0_74, %c0_75] : memref<9x128x128xbf16, #tpu.memory_space<vmem>>, vector<1x128x128xbf16>
    %118 = vector.shape_cast %117 : vector<1x128x128xbf16> to vector<128x128xbf16>
    %cst_76 = arith.constant dense<0.000000e+00> : vector<256x128xf32>
    %119 = tpu.matmul %116, %118, %cst_76 {dimension_numbers = #tpu.dot_dimension_numbers<[1], [0], [0], [1], [0, 0, 1, 1], [], []>} : vector<256x128xbf16>, vector<128x128xbf16>, vector<256x128xf32> -> vector<256x128xf32>
    %120 = arith.addf %113, %119 : vector<256x128xf32>
    %c23_77 = arith.constant 23 : index
    %c0_78 = arith.constant 0 : index
    %121 = vector.load %arg9[%c23_77, %c0_78] : memref<304x128xbf16, #tpu.memory_space<vmem>>, vector<256x128xbf16>
    %122 = vector.broadcast %27 : vector<256x1xbf16> to vector<256x128xbf16>
    %123 = arith.mulf %121, %122 : vector<256x128xbf16>
    %c3_79 = arith.constant 3 : index
    %c0_80 = arith.constant 0 : index
    %c0_81 = arith.constant 0 : index
    %124 = vector.load %arg5[%c3_79, %c0_80, %c0_81] : memref<9x128x128xbf16, #tpu.memory_space<vmem>>, vector<1x128x128xbf16>
    %125 = vector.shape_cast %124 : vector<1x128x128xbf16> to vector<128x128xbf16>
    %cst_82 = arith.constant dense<0.000000e+00> : vector<256x128xf32>
    %126 = tpu.matmul %123, %125, %cst_82 {dimension_numbers = #tpu.dot_dimension_numbers<[1], [0], [0], [1], [0, 0, 1, 1], [], []>} : vector<256x128xbf16>, vector<128x128xbf16>, vector<256x128xf32> -> vector<256x128xf32>
    %127 = arith.addf %120, %126 : vector<256x128xf32>
    %c24_83 = arith.constant 24 : index
    %c0_84 = arith.constant 0 : index
    %128 = vector.load %arg9[%c24_83, %c0_84] : memref<304x128xbf16, #tpu.memory_space<vmem>>, vector<256x128xbf16>
    %c4_85 = arith.constant 4 : index
    %c0_86 = arith.constant 0 : index
    %c0_87 = arith.constant 0 : index
    %129 = vector.load %arg5[%c4_85, %c0_86, %c0_87] : memref<9x128x128xbf16, #tpu.memory_space<vmem>>, vector<1x128x128xbf16>
    %130 = vector.shape_cast %129 : vector<1x128x128xbf16> to vector<128x128xbf16>
    %cst_88 = arith.constant dense<0.000000e+00> : vector<256x128xf32>
    %131 = tpu.matmul %128, %130, %cst_88 {dimension_numbers = #tpu.dot_dimension_numbers<[1], [0], [0], [1], [0, 0, 1, 1], [], []>} : vector<256x128xbf16>, vector<128x128xbf16>, vector<256x128xf32> -> vector<256x128xf32>
    %132 = arith.addf %127, %131 : vector<256x128xf32>
    %c25_89 = arith.constant 25 : index
    %c0_90 = arith.constant 0 : index
    %133 = vector.load %arg9[%c25_89, %c0_90] : memref<304x128xbf16, #tpu.memory_space<vmem>>, vector<256x128xbf16>
    %134 = vector.broadcast %32 : vector<256x1xbf16> to vector<256x128xbf16>
    %135 = arith.mulf %133, %134 : vector<256x128xbf16>
    %c5_91 = arith.constant 5 : index
    %c0_92 = arith.constant 0 : index
    %c0_93 = arith.constant 0 : index
    %136 = vector.load %arg5[%c5_91, %c0_92, %c0_93] : memref<9x128x128xbf16, #tpu.memory_space<vmem>>, vector<1x128x128xbf16>
    %137 = vector.shape_cast %136 : vector<1x128x128xbf16> to vector<128x128xbf16>
    %cst_94 = arith.constant dense<0.000000e+00> : vector<256x128xf32>
    %138 = tpu.matmul %135, %137, %cst_94 {dimension_numbers = #tpu.dot_dimension_numbers<[1], [0], [0], [1], [0, 0, 1, 1], [], []>} : vector<256x128xbf16>, vector<128x128xbf16>, vector<256x128xf32> -> vector<256x128xf32>
    %139 = arith.addf %132, %138 : vector<256x128xf32>
    %c39_95 = arith.constant 39 : index
    %c0_96 = arith.constant 0 : index
    %140 = vector.load %arg9[%c39_95, %c0_96] : memref<304x128xbf16, #tpu.memory_space<vmem>>, vector<256x128xbf16>
    %141 = vector.broadcast %27 : vector<256x1xbf16> to vector<256x128xbf16>
    %142 = arith.mulf %140, %141 : vector<256x128xbf16>
    %c6_97 = arith.constant 6 : index
    %c0_98 = arith.constant 0 : index
    %c0_99 = arith.constant 0 : index
    %143 = vector.load %arg5[%c6_97, %c0_98, %c0_99] : memref<9x128x128xbf16, #tpu.memory_space<vmem>>, vector<1x128x128xbf16>
    %144 = vector.shape_cast %143 : vector<1x128x128xbf16> to vector<128x128xbf16>
    %cst_100 = arith.constant dense<0.000000e+00> : vector<256x128xf32>
    %145 = tpu.matmul %142, %144, %cst_100 {dimension_numbers = #tpu.dot_dimension_numbers<[1], [0], [0], [1], [0, 0, 1, 1], [], []>} : vector<256x128xbf16>, vector<128x128xbf16>, vector<256x128xf32> -> vector<256x128xf32>
    %146 = arith.addf %139, %145 : vector<256x128xf32>
    %c40_101 = arith.constant 40 : index
    %c0_102 = arith.constant 0 : index
    %147 = vector.load %arg9[%c40_101, %c0_102] : memref<304x128xbf16, #tpu.memory_space<vmem>>, vector<256x128xbf16>
    %c7_103 = arith.constant 7 : index
    %c0_104 = arith.constant 0 : index
    %c0_105 = arith.constant 0 : index
    %148 = vector.load %arg5[%c7_103, %c0_104, %c0_105] : memref<9x128x128xbf16, #tpu.memory_space<vmem>>, vector<1x128x128xbf16>
    %149 = vector.shape_cast %148 : vector<1x128x128xbf16> to vector<128x128xbf16>
    %cst_106 = arith.constant dense<0.000000e+00> : vector<256x128xf32>
    %150 = tpu.matmul %147, %149, %cst_106 {dimension_numbers = #tpu.dot_dimension_numbers<[1], [0], [0], [1], [0, 0, 1, 1], [], []>} : vector<256x128xbf16>, vector<128x128xbf16>, vector<256x128xf32> -> vector<256x128xf32>
    %151 = arith.addf %146, %150 : vector<256x128xf32>
    %c41_107 = arith.constant 41 : index
    %c0_108 = arith.constant 0 : index
    %152 = vector.load %arg9[%c41_107, %c0_108] : memref<304x128xbf16, #tpu.memory_space<vmem>>, vector<256x128xbf16>
    %153 = vector.broadcast %32 : vector<256x1xbf16> to vector<256x128xbf16>
    %154 = arith.mulf %152, %153 : vector<256x128xbf16>
    %c8_109 = arith.constant 8 : index
    %c0_110 = arith.constant 0 : index
    %c0_111 = arith.constant 0 : index
    %155 = vector.load %arg5[%c8_109, %c0_110, %c0_111] : memref<9x128x128xbf16, #tpu.memory_space<vmem>>, vector<1x128x128xbf16>
    %156 = vector.shape_cast %155 : vector<1x128x128xbf16> to vector<128x128xbf16>
    %cst_112 = arith.constant dense<0.000000e+00> : vector<256x128xf32>
    %157 = tpu.matmul %154, %156, %cst_112 {dimension_numbers = #tpu.dot_dimension_numbers<[1], [0], [0], [1], [0, 0, 1, 1], [], []>} : vector<256x128xbf16>, vector<128x128xbf16>, vector<256x128xf32> -> vector<256x128xf32>
    %158 = arith.addf %151, %157 : vector<256x128xf32>
    %c0_113 = arith.constant 0 : index
    %c0_114 = arith.constant 0 : index
    %159 = vector.load %arg6[%c0_113, %c0_114] : memref<1x128xf32, #tpu.memory_space<vmem>>, vector<1x128xf32>
    %160 = vector.broadcast %159 : vector<1x128xf32> to vector<256x128xf32>
    %161 = arith.mulf %158, %160 : vector<256x128xf32>
    %c0_115 = arith.constant 0 : index
    %c0_116 = arith.constant 0 : index
    %162 = vector.load %arg7[%c0_115, %c0_116] : memref<1x128xf32, #tpu.memory_space<vmem>>, vector<1x128xf32>
    %163 = vector.broadcast %162 : vector<1x128xf32> to vector<256x128xf32>
    %164 = arith.addf %161, %163 : vector<256x128xf32>
    %165 = arith.extf %4 : vector<256x128xbf16> to vector<256x128xf32>
    %166 = arith.addf %164, %165 : vector<256x128xf32>
    %cst_117 = arith.constant 0.000000e+00 : f32
    %167 = vector.broadcast %cst_117 : f32 to vector<256x128xf32>
    %168 = arith.maximumf %166, %167 : vector<256x128xf32>
    %169 = arith.truncf %168 : vector<256x128xf32> to vector<256x128xbf16>
    %c0_118 = arith.constant 0 : index
    %c0_119 = arith.constant 0 : index
    %c0_120 = arith.constant 0 : index
    %170 = vector.load %arg8[%c0_118, %c0_119, %c0_120] : memref<1x256x128xbf16, #tpu.memory_space<vmem>>, vector<1x256x128xbf16>
    %171 = vector.shape_cast %170 : vector<1x256x128xbf16> to vector<256x128xbf16>
    %172 = vector.shape_cast %169 : vector<256x128xbf16> to vector<1x256x128xbf16>
    tpu.vector_store %arg8[%c0_118, %c0_119, %c0_120], %172 {strides = array<i32>} : memref<1x256x128xbf16, #tpu.memory_space<vmem>>, vector<1x256x128xbf16>,
    return
  }
  func.func @transform_0(%arg0: i32) -> (i32, i32, i32) {
    %c0_i32 = arith.constant 0 : i32
    %c0_i32_0 = arith.constant 0 : i32
    %c0_i32_1 = arith.constant 0 : i32
    return %arg0, %c0_i32, %c0_i32_0 : i32, i32, i32
  }
  func.func @transform_1(%arg0: i32) -> (i32, i32, i32) {
    %c0_i32 = arith.constant 0 : i32
    %c0_i32_0 = arith.constant 0 : i32
    %c0_i32_1 = arith.constant 0 : i32
    %c0_i32_2 = arith.constant 0 : i32
    return %c0_i32, %c0_i32_0, %c0_i32_1 : i32, i32, i32
  }
  func.func @transform_2(%arg0: i32) -> (i32, i32) {
    %c0_i32 = arith.constant 0 : i32
    %c0_i32_0 = arith.constant 0 : i32
    %c0_i32_1 = arith.constant 0 : i32
    return %c0_i32, %c0_i32_0 : i32, i32
  }
  func.func @transform_3(%arg0: i32) -> (i32, i32) {
    %c0_i32 = arith.constant 0 : i32
    %c0_i32_0 = arith.constant 0 : i32
    %c0_i32_1 = arith.constant 0 : i32
    return %c0_i32, %c0_i32_0 : i32, i32
  }
  func.func @transform_4(%arg0: i32) -> (i32, i32, i32) {
    %c0_i32 = arith.constant 0 : i32
    %c0_i32_0 = arith.constant 0 : i32
    %c0_i32_1 = arith.constant 0 : i32
    %c0_i32_2 = arith.constant 0 : i32
    return %c0_i32, %c0_i32_0, %c0_i32_1 : i32, i32, i32
  }
  func.func @transform_5(%arg0: i32) -> (i32, i32) {
    %c0_i32 = arith.constant 0 : i32
    %c0_i32_0 = arith.constant 0 : i32
    %c0_i32_1 = arith.constant 0 : i32
    return %c0_i32, %c0_i32_0 : i32, i32
  }
  func.func @transform_6(%arg0: i32) -> (i32, i32) {
    %c0_i32 = arith.constant 0 : i32
    %c0_i32_0 = arith.constant 0 : i32
    %c0_i32_1 = arith.constant 0 : i32
    return %c0_i32, %c0_i32_0 : i32, i32
  }
  func.func @transform_7(%arg0: i32) -> (i32, i32, i32) {
    %c0_i32 = arith.constant 0 : i32
    %c0_i32_0 = arith.constant 0 : i32
    %c0_i32_1 = arith.constant 0 : i32
    return %arg0, %c0_i32, %c0_i32_0 : i32, i32, i32
  }
}

module attributes {stable_mosaic.version = 11 : i64} {
  func.func @kernel(%arg0: i32, %arg1: memref<1x256x128xbf16, #tpu.memory_space<vmem>>, %arg2: memref<9x128x128xbf16, #tpu.memory_space<vmem>>, %arg3: memref<1x128xf32, #tpu.memory_space<vmem>>, %arg4: memref<1x128xf32, #tpu.memory_space<vmem>>, %arg5: memref<9x128x128xbf16, #tpu.memory_space<vmem>>, %arg6: memref<1x128xf32, #tpu.memory_space<vmem>>, %arg7: memref<1x128xf32, #tpu.memory_space<vmem>>, %arg8: memref<1x256x128xbf16, #tpu.memory_space<vmem>>, %arg9: memref<304x128xbf16, #tpu.memory_space<vmem>>) attributes {dimension_semantics = [#tpu.dimension_semantics<parallel>], iteration_bounds = array<i64: 2>, scalar_prefetch = 0 : i64, scratch_operands = 1 : i64, tpu.core_type = #tpu.core_type<tc>, window_params = [{transform_indices = @transform_0, window_bounds = array<i64: 1, 256, 128>}, {pipeline_mode = #tpu.pipeline_mode<synchronous>, transform_indices = @transform_1, window_bounds = array<i64: 9, 128, 128>}, {pipeline_mode = #tpu.pipeline_mode<synchronous>, transform_indices = @transform_2, window_bounds = array<i64: 1, 128>}, {pipeline_mode = #tpu.pipeline_mode<synchronous>, transform_indices = @transform_3, window_bounds = array<i64: 1, 128>}, {pipeline_mode = #tpu.pipeline_mode<synchronous>, transform_indices = @transform_4, window_bounds = array<i64: 9, 128, 128>}, {pipeline_mode = #tpu.pipeline_mode<synchronous>, transform_indices = @transform_5, window_bounds = array<i64: 1, 128>}, {pipeline_mode = #tpu.pipeline_mode<synchronous>, transform_indices = @transform_6, window_bounds = array<i64: 1, 128>}, {transform_indices = @transform_7, window_bounds = array<i64: 1, 256, 128>}]} {
    %cst = arith.constant 0.000000e+00 : bf16
    %0 = vector.broadcast %cst : bf16 to vector<24x128xbf16>
    %c0 = arith.constant 0 : index
    %c0_0 = arith.constant 0 : index
    %1 = vector.load %arg9[%c0, %c0_0] : memref<304x128xbf16, #tpu.memory_space<vmem>>, vector<24x128xbf16>
    tpu.vector_store %arg9[%c0, %c0_0], %0 {strides = array<i32>} : memref<304x128xbf16, #tpu.memory_space<vmem>>, vector<24x128xbf16>,
    %c280 = arith.constant 280 : index
    %c0_1 = arith.constant 0 : index
    %2 = vector.load %arg9[%c280, %c0_1] : memref<304x128xbf16, #tpu.memory_space<vmem>>, vector<24x128xbf16>
    tpu.vector_store %arg9[%c280, %c0_1], %0 {strides = array<i32>} : memref<304x128xbf16, #tpu.memory_space<vmem>>, vector<24x128xbf16>,
    %c0_2 = arith.constant 0 : index
    %c0_3 = arith.constant 0 : index
    %c0_4 = arith.constant 0 : index
    %3 = vector.load %arg1[%c0_2, %c0_3, %c0_4] : memref<1x256x128xbf16, #tpu.memory_space<vmem>>, vector<1x256x128xbf16>
    %4 = vector.shape_cast %3 : vector<1x256x128xbf16> to vector<256x128xbf16>
    %c24 = arith.constant 24 : index
    %c0_5 = arith.constant 0 : index
    %5 = vector.load %arg9[%c24, %c0_5] : memref<304x128xbf16, #tpu.memory_space<vmem>>, vector<256x128xbf16>
    tpu.vector_store %arg9[%c24, %c0_5], %4 {strides = array<i32>} : memref<304x128xbf16, #tpu.memory_space<vmem>>, vector<256x128xbf16>,
    %6 = tpu.iota {dimensions = array<i32: 0>} : vector<256x1xi32>
    %c16_i32 = arith.constant 16 : i32
    %c0_i32 = arith.constant 0 : i32
    %7 = arith.cmpi eq, %c16_i32, %c0_i32 : i32
    %c1_i32 = arith.constant 1 : i32
    %8 = arith.select %7, %c1_i32, %c16_i32 : i32
    %9 = vector.broadcast %8 : i32 to vector<256x1xi32>
    %10 = arith.remsi %6, %9 : vector<256x1xi32>
    %c0_i32_6 = arith.constant 0 : i32
    %11 = vector.broadcast %c0_i32_6 : i32 to vector<256x1xi32>
    %12 = arith.cmpi ne, %10, %11 : vector<256x1xi32>
    %c0_i32_7 = arith.constant 0 : i32
    %13 = vector.broadcast %c0_i32_7 : i32 to vector<256x1xi32>
    %14 = arith.cmpi slt, %10, %13 : vector<256x1xi32>
    %c0_i32_8 = arith.constant 0 : i32
    %15 = arith.cmpi slt, %8, %c0_i32_8 : i32
    %16 = vector.broadcast %15 : i1 to vector<256x1xi1>
    %17 = vector.broadcast %16 : vector<256x1xi1> to vector<256x1xi1>
    %18 = arith.xori %14, %17 : vector<256x1xi1>
    %19 = arith.andi %18, %12 : vector<256x1xi1>
    %20 = vector.broadcast %8 : i32 to vector<256x1xi32>
    %21 = arith.addi %10, %20 : vector<256x1xi32>
    %22 = arith.select %19, %21, %10 : vector<256x1xi1>, vector<256x1xi32>
    %c0_i32_9 = arith.constant 0 : i32
    %23 = vector.broadcast %c0_i32_9 : i32 to vector<256x1xi32>
    %24 = arith.cmpi sgt, %22, %23 : vector<256x1xi32>
    %25 = arith.extui %24 : vector<256x1xi1> to vector<256x1xi32>
    %26 = arith.sitofp %25 : vector<256x1xi32> to vector<256x1xf32>
    %27 = arith.truncf %26 : vector<256x1xf32> to vector<256x1xbf16>
    %c15_i32 = arith.constant 15 : i32
    %28 = vector.broadcast %c15_i32 : i32 to vector<256x1xi32>
    %29 = arith.cmpi slt, %22, %28 : vector<256x1xi32>
    %30 = arith.extui %29 : vector<256x1xi1> to vector<256x1xi32>
    %31 = arith.sitofp %30 : vector<256x1xi32> to vector<256x1xf32>
    %32 = arith.truncf %31 : vector<256x1xf32> to vector<256x1xbf16>
    %cst_10 = arith.constant 0.000000e+00 : f32
    %33 = vector.broadcast %cst_10 : f32 to vector<256x128xf32>
    %c7 = arith.constant 7 : index
    %c0_11 = arith.constant 0 : index
    %34 = vector.load %arg9[%c7, %c0_11] : memref<304x128xbf16, #tpu.memory_space<vmem>>, vector<256x128xbf16>
    %35 = vector.broadcast %27 : vector<256x1xbf16> to vector<256x128xbf16>
    %36 = arith.mulf %34, %35 : vector<256x128xbf16>
    %c0_12 = arith.constant 0 : index
    %c0_13 = arith.constant 0 : index
    %c0_14 = arith.constant 0 : index
    %37 = vector.load %arg2[%c0_12, %c0_13, %c0_14] : memref<9x128x128xbf16, #tpu.memory_space<vmem>>, vector<1x128x128xbf16>
    %38 = vector.shape_cast %37 : vector<1x128x128xbf16> to vector<128x128xbf16>
    %cst_15 = arith.constant dense<0.000000e+00> : vector<256x128xf32>
    %39 = tpu.matmul %36, %38, %cst_15 {dimension_numbers = #tpu.dot_dimension_numbers<[1], [0], [0], [1], [0, 0, 1, 1], [], []>} : vector<256x128xbf16>, vector<128x128xbf16>, vector<256x128xf32> -> vector<256x128xf32>
    %40 = arith.addf %33, %39 : vector<256x128xf32>
    %c8 = arith.constant 8 : index
    %c0_16 = arith.constant 0 : index
    %41 = vector.load %arg9[%c8, %c0_16] : memref<304x128xbf16, #tpu.memory_space<vmem>>, vector<256x128xbf16>
    %c1 = arith.constant 1 : index
    %c0_17 = arith.constant 0 : index
    %c0_18 = arith.constant 0 : index
    %42 = vector.load %arg2[%c1, %c0_17, %c0_18] : memref<9x128x128xbf16, #tpu.memory_space<vmem>>, vector<1x128x128xbf16>
    %43 = vector.shape_cast %42 : vector<1x128x128xbf16> to vector<128x128xbf16>
    %cst_19 = arith.constant dense<0.000000e+00> : vector<256x128xf32>
    %44 = tpu.matmul %41, %43, %cst_19 {dimension_numbers = #tpu.dot_dimension_numbers<[1], [0], [0], [1], [0, 0, 1, 1], [], []>} : vector<256x128xbf16>, vector<128x128xbf16>, vector<256x128xf32> -> vector<256x128xf32>
    %45 = arith.addf %40, %44 : vector<256x128xf32>
    %c9 = arith.constant 9 : index
    %c0_20 = arith.constant 0 : index
    %46 = vector.load %arg9[%c9, %c0_20] : memref<304x128xbf16, #tpu.memory_space<vmem>>, vector<256x128xbf16>
    %47 = vector.broadcast %32 : vector<256x1xbf16> to vector<256x128xbf16>
    %48 = arith.mulf %46, %47 : vector<256x128xbf16>
    %c2 = arith.constant 2 : index
    %c0_21 = arith.constant 0 : index
    %c0_22 = arith.constant 0 : index
    %49 = vector.load %arg2[%c2, %c0_21, %c0_22] : memref<9x128x128xbf16, #tpu.memory_space<vmem>>, vector<1x128x128xbf16>
    %50 = vector.shape_cast %49 : vector<1x128x128xbf16> to vector<128x128xbf16>
    %cst_23 = arith.constant dense<0.000000e+00> : vector<256x128xf32>
    %51 = tpu.matmul %48, %50, %cst_23 {dimension_numbers = #tpu.dot_dimension_numbers<[1], [0], [0], [1], [0, 0, 1, 1], [], []>} : vector<256x128xbf16>, vector<128x128xbf16>, vector<256x128xf32> -> vector<256x128xf32>
    %52 = arith.addf %45, %51 : vector<256x128xf32>
    %c23 = arith.constant 23 : index
    %c0_24 = arith.constant 0 : index
    %53 = vector.load %arg9[%c23, %c0_24] : memref<304x128xbf16, #tpu.memory_space<vmem>>, vector<256x128xbf16>
    %54 = vector.broadcast %27 : vector<256x1xbf16> to vector<256x128xbf16>
    %55 = arith.mulf %53, %54 : vector<256x128xbf16>
    %c3 = arith.constant 3 : index
    %c0_25 = arith.constant 0 : index
    %c0_26 = arith.constant 0 : index
    %56 = vector.load %arg2[%c3, %c0_25, %c0_26] : memref<9x128x128xbf16, #tpu.memory_space<vmem>>, vector<1x128x128xbf16>
    %57 = vector.shape_cast %56 : vector<1x128x128xbf16> to vector<128x128xbf16>
    %cst_27 = arith.constant dense<0.000000e+00> : vector<256x128xf32>
    %58 = tpu.matmul %55, %57, %cst_27 {dimension_numbers = #tpu.dot_dimension_numbers<[1], [0], [0], [1], [0, 0, 1, 1], [], []>} : vector<256x128xbf16>, vector<128x128xbf16>, vector<256x128xf32> -> vector<256x128xf32>
    %59 = arith.addf %52, %58 : vector<256x128xf32>
    %c24_28 = arith.constant 24 : index
    %c0_29 = arith.constant 0 : index
    %60 = vector.load %arg9[%c24_28, %c0_29] : memref<304x128xbf16, #tpu.memory_space<vmem>>, vector<256x128xbf16>
    %c4 = arith.constant 4 : index
    %c0_30 = arith.constant 0 : index
    %c0_31 = arith.constant 0 : index
    %61 = vector.load %arg2[%c4, %c0_30, %c0_31] : memref<9x128x128xbf16, #tpu.memory_space<vmem>>, vector<1x128x128xbf16>
    %62 = vector.shape_cast %61 : vector<1x128x128xbf16> to vector<128x128xbf16>
    %cst_32 = arith.constant dense<0.000000e+00> : vector<256x128xf32>
    %63 = tpu.matmul %60, %62, %cst_32 {dimension_numbers = #tpu.dot_dimension_numbers<[1], [0], [0], [1], [0, 0, 1, 1], [], []>} : vector<256x128xbf16>, vector<128x128xbf16>, vector<256x128xf32> -> vector<256x128xf32>
    %64 = arith.addf %59, %63 : vector<256x128xf32>
    %c25 = arith.constant 25 : index
    %c0_33 = arith.constant 0 : index
    %65 = vector.load %arg9[%c25, %c0_33] : memref<304x128xbf16, #tpu.memory_space<vmem>>, vector<256x128xbf16>
    %66 = vector.broadcast %32 : vector<256x1xbf16> to vector<256x128xbf16>
    %67 = arith.mulf %65, %66 : vector<256x128xbf16>
    %c5 = arith.constant 5 : index
    %c0_34 = arith.constant 0 : index
    %c0_35 = arith.constant 0 : index
    %68 = vector.load %arg2[%c5, %c0_34, %c0_35] : memref<9x128x128xbf16, #tpu.memory_space<vmem>>, vector<1x128x128xbf16>
    %69 = vector.shape_cast %68 : vector<1x128x128xbf16> to vector<128x128xbf16>
    %cst_36 = arith.constant dense<0.000000e+00> : vector<256x128xf32>
    %70 = tpu.matmul %67, %69, %cst_36 {dimension_numbers = #tpu.dot_dimension_numbers<[1], [0], [0], [1], [0, 0, 1, 1], [], []>} : vector<256x128xbf16>, vector<128x128xbf16>, vector<256x128xf32> -> vector<256x128xf32>
    %71 = arith.addf %64, %70 : vector<256x128xf32>
    %c39 = arith.constant 39 : index
    %c0_37 = arith.constant 0 : index
    %72 = vector.load %arg9[%c39, %c0_37] : memref<304x128xbf16, #tpu.memory_space<vmem>>, vector<256x128xbf16>
    %73 = vector.broadcast %27 : vector<256x1xbf16> to vector<256x128xbf16>
    %74 = arith.mulf %72, %73 : vector<256x128xbf16>
    %c6 = arith.constant 6 : index
    %c0_38 = arith.constant 0 : index
    %c0_39 = arith.constant 0 : index
    %75 = vector.load %arg2[%c6, %c0_38, %c0_39] : memref<9x128x128xbf16, #tpu.memory_space<vmem>>, vector<1x128x128xbf16>
    %76 = vector.shape_cast %75 : vector<1x128x128xbf16> to vector<128x128xbf16>
    %cst_40 = arith.constant dense<0.000000e+00> : vector<256x128xf32>
    %77 = tpu.matmul %74, %76, %cst_40 {dimension_numbers = #tpu.dot_dimension_numbers<[1], [0], [0], [1], [0, 0, 1, 1], [], []>} : vector<256x128xbf16>, vector<128x128xbf16>, vector<256x128xf32> -> vector<256x128xf32>
    %78 = arith.addf %71, %77 : vector<256x128xf32>
    %c40 = arith.constant 40 : index
    %c0_41 = arith.constant 0 : index
    %79 = vector.load %arg9[%c40, %c0_41] : memref<304x128xbf16, #tpu.memory_space<vmem>>, vector<256x128xbf16>
    %c7_42 = arith.constant 7 : index
    %c0_43 = arith.constant 0 : index
    %c0_44 = arith.constant 0 : index
    %80 = vector.load %arg2[%c7_42, %c0_43, %c0_44] : memref<9x128x128xbf16, #tpu.memory_space<vmem>>, vector<1x128x128xbf16>
    %81 = vector.shape_cast %80 : vector<1x128x128xbf16> to vector<128x128xbf16>
    %cst_45 = arith.constant dense<0.000000e+00> : vector<256x128xf32>
    %82 = tpu.matmul %79, %81, %cst_45 {dimension_numbers = #tpu.dot_dimension_numbers<[1], [0], [0], [1], [0, 0, 1, 1], [], []>} : vector<256x128xbf16>, vector<128x128xbf16>, vector<256x128xf32> -> vector<256x128xf32>
    %83 = arith.addf %78, %82 : vector<256x128xf32>
    %c41 = arith.constant 41 : index
    %c0_46 = arith.constant 0 : index
    %84 = vector.load %arg9[%c41, %c0_46] : memref<304x128xbf16, #tpu.memory_space<vmem>>, vector<256x128xbf16>
    %85 = vector.broadcast %32 : vector<256x1xbf16> to vector<256x128xbf16>
    %86 = arith.mulf %84, %85 : vector<256x128xbf16>
    %c8_47 = arith.constant 8 : index
    %c0_48 = arith.constant 0 : index
    %c0_49 = arith.constant 0 : index
    %87 = vector.load %arg2[%c8_47, %c0_48, %c0_49] : memref<9x128x128xbf16, #tpu.memory_space<vmem>>, vector<1x128x128xbf16>
    %88 = vector.shape_cast %87 : vector<1x128x128xbf16> to vector<128x128xbf16>
    %cst_50 = arith.constant dense<0.000000e+00> : vector<256x128xf32>
    %89 = tpu.matmul %86, %88, %cst_50 {dimension_numbers = #tpu.dot_dimension_numbers<[1], [0], [0], [1], [0, 0, 1, 1], [], []>} : vector<256x128xbf16>, vector<128x128xbf16>, vector<256x128xf32> -> vector<256x128xf32>
    %90 = arith.addf %83, %89 : vector<256x128xf32>
    %c0_51 = arith.constant 0 : index
    %c0_52 = arith.constant 0 : index
    %91 = vector.load %arg3[%c0_51, %c0_52] : memref<1x128xf32, #tpu.memory_space<vmem>>, vector<1x128xf32>
    %92 = vector.broadcast %91 : vector<1x128xf32> to vector<256x128xf32>
    %93 = arith.mulf %90, %92 : vector<256x128xf32>
    %c0_53 = arith.constant 0 : index
    %c0_54 = arith.constant 0 : index
    %94 = vector.load %arg4[%c0_53, %c0_54] : memref<1x128xf32, #tpu.memory_space<vmem>>, vector<1x128xf32>
    %95 = vector.broadcast %94 : vector<1x128xf32> to vector<256x128xf32>
    %96 = arith.addf %93, %95 : vector<256x128xf32>
    %cst_55 = arith.constant 0.000000e+00 : f32
    %97 = vector.broadcast %cst_55 : f32 to vector<256x128xf32>
    %98 = arith.maximumf %96, %97 : vector<256x128xf32>
    %99 = arith.truncf %98 : vector<256x128xf32> to vector<256x128xbf16>
    %c24_56 = arith.constant 24 : index
    %c0_57 = arith.constant 0 : index
    %100 = vector.load %arg9[%c24_56, %c0_57] : memref<304x128xbf16, #tpu.memory_space<vmem>>, vector<256x128xbf16>
    tpu.vector_store %arg9[%c24_56, %c0_57], %99 {strides = array<i32>} : memref<304x128xbf16, #tpu.memory_space<vmem>>, vector<256x128xbf16>,
    %cst_58 = arith.constant 0.000000e+00 : f32
    %101 = vector.broadcast %cst_58 : f32 to vector<256x128xf32>
    %c7_59 = arith.constant 7 : index
    %c0_60 = arith.constant 0 : index
    %102 = vector.load %arg9[%c7_59, %c0_60] : memref<304x128xbf16, #tpu.memory_space<vmem>>, vector<256x128xbf16>
    %103 = vector.broadcast %27 : vector<256x1xbf16> to vector<256x128xbf16>
    %104 = arith.mulf %102, %103 : vector<256x128xbf16>
    %c0_61 = arith.constant 0 : index
    %c0_62 = arith.constant 0 : index
    %c0_63 = arith.constant 0 : index
    %105 = vector.load %arg5[%c0_61, %c0_62, %c0_63] : memref<9x128x128xbf16, #tpu.memory_space<vmem>>, vector<1x128x128xbf16>
    %106 = vector.shape_cast %105 : vector<1x128x128xbf16> to vector<128x128xbf16>
    %cst_64 = arith.constant dense<0.000000e+00> : vector<256x128xf32>
    %107 = tpu.matmul %104, %106, %cst_64 {dimension_numbers = #tpu.dot_dimension_numbers<[1], [0], [0], [1], [0, 0, 1, 1], [], []>} : vector<256x128xbf16>, vector<128x128xbf16>, vector<256x128xf32> -> vector<256x128xf32>
    %108 = arith.addf %101, %107 : vector<256x128xf32>
    %c8_65 = arith.constant 8 : index
    %c0_66 = arith.constant 0 : index
    %109 = vector.load %arg9[%c8_65, %c0_66] : memref<304x128xbf16, #tpu.memory_space<vmem>>, vector<256x128xbf16>
    %c1_67 = arith.constant 1 : index
    %c0_68 = arith.constant 0 : index
    %c0_69 = arith.constant 0 : index
    %110 = vector.load %arg5[%c1_67, %c0_68, %c0_69] : memref<9x128x128xbf16, #tpu.memory_space<vmem>>, vector<1x128x128xbf16>
    %111 = vector.shape_cast %110 : vector<1x128x128xbf16> to vector<128x128xbf16>
    %cst_70 = arith.constant dense<0.000000e+00> : vector<256x128xf32>
    %112 = tpu.matmul %109, %111, %cst_70 {dimension_numbers = #tpu.dot_dimension_numbers<[1], [0], [0], [1], [0, 0, 1, 1], [], []>} : vector<256x128xbf16>, vector<128x128xbf16>, vector<256x128xf32> -> vector<256x128xf32>
    %113 = arith.addf %108, %112 : vector<256x128xf32>
    %c9_71 = arith.constant 9 : index
    %c0_72 = arith.constant 0 : index
    %114 = vector.load %arg9[%c9_71, %c0_72] : memref<304x128xbf16, #tpu.memory_space<vmem>>, vector<256x128xbf16>
    %115 = vector.broadcast %32 : vector<256x1xbf16> to vector<256x128xbf16>
    %116 = arith.mulf %114, %115 : vector<256x128xbf16>
    %c2_73 = arith.constant 2 : index
    %c0_74 = arith.constant 0 : index
    %c0_75 = arith.constant 0 : index
    %117 = vector.load %arg5[%c2_73, %c0_74, %c0_75] : memref<9x128x128xbf16, #tpu.memory_space<vmem>>, vector<1x128x128xbf16>
    %118 = vector.shape_cast %117 : vector<1x128x128xbf16> to vector<128x128xbf16>
    %cst_76 = arith.constant dense<0.000000e+00> : vector<256x128xf32>
    %119 = tpu.matmul %116, %118, %cst_76 {dimension_numbers = #tpu.dot_dimension_numbers<[1], [0], [0], [1], [0, 0, 1, 1], [], []>} : vector<256x128xbf16>, vector<128x128xbf16>, vector<256x128xf32> -> vector<256x128xf32>
    %120 = arith.addf %113, %119 : vector<256x128xf32>
    %c23_77 = arith.constant 23 : index
    %c0_78 = arith.constant 0 : index
    %121 = vector.load %arg9[%c23_77, %c0_78] : memref<304x128xbf16, #tpu.memory_space<vmem>>, vector<256x128xbf16>
    %122 = vector.broadcast %27 : vector<256x1xbf16> to vector<256x128xbf16>
    %123 = arith.mulf %121, %122 : vector<256x128xbf16>
    %c3_79 = arith.constant 3 : index
    %c0_80 = arith.constant 0 : index
    %c0_81 = arith.constant 0 : index
    %124 = vector.load %arg5[%c3_79, %c0_80, %c0_81] : memref<9x128x128xbf16, #tpu.memory_space<vmem>>, vector<1x128x128xbf16>
    %125 = vector.shape_cast %124 : vector<1x128x128xbf16> to vector<128x128xbf16>
    %cst_82 = arith.constant dense<0.000000e+00> : vector<256x128xf32>
    %126 = tpu.matmul %123, %125, %cst_82 {dimension_numbers = #tpu.dot_dimension_numbers<[1], [0], [0], [1], [0, 0, 1, 1], [], []>} : vector<256x128xbf16>, vector<128x128xbf16>, vector<256x128xf32> -> vector<256x128xf32>
    %127 = arith.addf %120, %126 : vector<256x128xf32>
    %c24_83 = arith.constant 24 : index
    %c0_84 = arith.constant 0 : index
    %128 = vector.load %arg9[%c24_83, %c0_84] : memref<304x128xbf16, #tpu.memory_space<vmem>>, vector<256x128xbf16>
    %c4_85 = arith.constant 4 : index
    %c0_86 = arith.constant 0 : index
    %c0_87 = arith.constant 0 : index
    %129 = vector.load %arg5[%c4_85, %c0_86, %c0_87] : memref<9x128x128xbf16, #tpu.memory_space<vmem>>, vector<1x128x128xbf16>
    %130 = vector.shape_cast %129 : vector<1x128x128xbf16> to vector<128x128xbf16>
    %cst_88 = arith.constant dense<0.000000e+00> : vector<256x128xf32>
    %131 = tpu.matmul %128, %130, %cst_88 {dimension_numbers = #tpu.dot_dimension_numbers<[1], [0], [0], [1], [0, 0, 1, 1], [], []>} : vector<256x128xbf16>, vector<128x128xbf16>, vector<256x128xf32> -> vector<256x128xf32>
    %132 = arith.addf %127, %131 : vector<256x128xf32>
    %c25_89 = arith.constant 25 : index
    %c0_90 = arith.constant 0 : index
    %133 = vector.load %arg9[%c25_89, %c0_90] : memref<304x128xbf16, #tpu.memory_space<vmem>>, vector<256x128xbf16>
    %134 = vector.broadcast %32 : vector<256x1xbf16> to vector<256x128xbf16>
    %135 = arith.mulf %133, %134 : vector<256x128xbf16>
    %c5_91 = arith.constant 5 : index
    %c0_92 = arith.constant 0 : index
    %c0_93 = arith.constant 0 : index
    %136 = vector.load %arg5[%c5_91, %c0_92, %c0_93] : memref<9x128x128xbf16, #tpu.memory_space<vmem>>, vector<1x128x128xbf16>
    %137 = vector.shape_cast %136 : vector<1x128x128xbf16> to vector<128x128xbf16>
    %cst_94 = arith.constant dense<0.000000e+00> : vector<256x128xf32>
    %138 = tpu.matmul %135, %137, %cst_94 {dimension_numbers = #tpu.dot_dimension_numbers<[1], [0], [0], [1], [0, 0, 1, 1], [], []>} : vector<256x128xbf16>, vector<128x128xbf16>, vector<256x128xf32> -> vector<256x128xf32>
    %139 = arith.addf %132, %138 : vector<256x128xf32>
    %c39_95 = arith.constant 39 : index
    %c0_96 = arith.constant 0 : index
    %140 = vector.load %arg9[%c39_95, %c0_96] : memref<304x128xbf16, #tpu.memory_space<vmem>>, vector<256x128xbf16>
    %141 = vector.broadcast %27 : vector<256x1xbf16> to vector<256x128xbf16>
    %142 = arith.mulf %140, %141 : vector<256x128xbf16>
    %c6_97 = arith.constant 6 : index
    %c0_98 = arith.constant 0 : index
    %c0_99 = arith.constant 0 : index
    %143 = vector.load %arg5[%c6_97, %c0_98, %c0_99] : memref<9x128x128xbf16, #tpu.memory_space<vmem>>, vector<1x128x128xbf16>
    %144 = vector.shape_cast %143 : vector<1x128x128xbf16> to vector<128x128xbf16>
    %cst_100 = arith.constant dense<0.000000e+00> : vector<256x128xf32>
    %145 = tpu.matmul %142, %144, %cst_100 {dimension_numbers = #tpu.dot_dimension_numbers<[1], [0], [0], [1], [0, 0, 1, 1], [], []>} : vector<256x128xbf16>, vector<128x128xbf16>, vector<256x128xf32> -> vector<256x128xf32>
    %146 = arith.addf %139, %145 : vector<256x128xf32>
    %c40_101 = arith.constant 40 : index
    %c0_102 = arith.constant 0 : index
    %147 = vector.load %arg9[%c40_101, %c0_102] : memref<304x128xbf16, #tpu.memory_space<vmem>>, vector<256x128xbf16>
    %c7_103 = arith.constant 7 : index
    %c0_104 = arith.constant 0 : index
    %c0_105 = arith.constant 0 : index
    %148 = vector.load %arg5[%c7_103, %c0_104, %c0_105] : memref<9x128x128xbf16, #tpu.memory_space<vmem>>, vector<1x128x128xbf16>
    %149 = vector.shape_cast %148 : vector<1x128x128xbf16> to vector<128x128xbf16>
    %cst_106 = arith.constant dense<0.000000e+00> : vector<256x128xf32>
    %150 = tpu.matmul %147, %149, %cst_106 {dimension_numbers = #tpu.dot_dimension_numbers<[1], [0], [0], [1], [0, 0, 1, 1], [], []>} : vector<256x128xbf16>, vector<128x128xbf16>, vector<256x128xf32> -> vector<256x128xf32>
    %151 = arith.addf %146, %150 : vector<256x128xf32>
    %c41_107 = arith.constant 41 : index
    %c0_108 = arith.constant 0 : index
    %152 = vector.load %arg9[%c41_107, %c0_108] : memref<304x128xbf16, #tpu.memory_space<vmem>>, vector<256x128xbf16>
    %153 = vector.broadcast %32 : vector<256x1xbf16> to vector<256x128xbf16>
    %154 = arith.mulf %152, %153 : vector<256x128xbf16>
    %c8_109 = arith.constant 8 : index
    %c0_110 = arith.constant 0 : index
    %c0_111 = arith.constant 0 : index
    %155 = vector.load %arg5[%c8_109, %c0_110, %c0_111] : memref<9x128x128xbf16, #tpu.memory_space<vmem>>, vector<1x128x128xbf16>
    %156 = vector.shape_cast %155 : vector<1x128x128xbf16> to vector<128x128xbf16>
    %cst_112 = arith.constant dense<0.000000e+00> : vector<256x128xf32>
    %157 = tpu.matmul %154, %156, %cst_112 {dimension_numbers = #tpu.dot_dimension_numbers<[1], [0], [0], [1], [0, 0, 1, 1], [], []>} : vector<256x128xbf16>, vector<128x128xbf16>, vector<256x128xf32> -> vector<256x128xf32>
    %158 = arith.addf %151, %157 : vector<256x128xf32>
    %c0_113 = arith.constant 0 : index
    %c0_114 = arith.constant 0 : index
    %159 = vector.load %arg6[%c0_113, %c0_114] : memref<1x128xf32, #tpu.memory_space<vmem>>, vector<1x128xf32>
    %160 = vector.broadcast %159 : vector<1x128xf32> to vector<256x128xf32>
    %161 = arith.mulf %158, %160 : vector<256x128xf32>
    %c0_115 = arith.constant 0 : index
    %c0_116 = arith.constant 0 : index
    %162 = vector.load %arg7[%c0_115, %c0_116] : memref<1x128xf32, #tpu.memory_space<vmem>>, vector<1x128xf32>
    %163 = vector.broadcast %162 : vector<1x128xf32> to vector<256x128xf32>
    %164 = arith.addf %161, %163 : vector<256x128xf32>
    %165 = arith.extf %4 : vector<256x128xbf16> to vector<256x128xf32>
    %166 = arith.addf %164, %165 : vector<256x128xf32>
    %cst_117 = arith.constant 0.000000e+00 : f32
    %167 = vector.broadcast %cst_117 : f32 to vector<256x128xf32>
    %168 = arith.maximumf %166, %167 : vector<256x128xf32>
    %169 = arith.truncf %168 : vector<256x128xf32> to vector<256x128xbf16>
    %c0_118 = arith.constant 0 : index
    %c0_119 = arith.constant 0 : index
    %c0_120 = arith.constant 0 : index
    %170 = vector.load %arg8[%c0_118, %c0_119, %c0_120] : memref<1x256x128xbf16, #tpu.memory_space<vmem>>, vector<1x256x128xbf16>
    %171 = vector.shape_cast %170 : vector<1x256x128xbf16> to vector<256x128xbf16>
    %172 = vector.shape_cast %169 : vector<256x128xbf16> to vector<1x256x128xbf16>
    tpu.vector_store %arg8[%c0_118, %c0_119, %c0_120], %172 {strides = array<i32>} : memref<1x256x128xbf16, #tpu.memory_space<vmem>>, vector<1x256x128xbf16>,
    return
  }
  func.func @transform_0(%arg0: i32) -> (i32, i32, i32) {
    %c0_i32 = arith.constant 0 : i32
    %c0_i32_0 = arith.constant 0 : i32
    %c0_i32_1 = arith.constant 0 : i32
    return %arg0, %c0_i32, %c0_i32_0 : i32, i32, i32
  }
  func.func @transform_1(%arg0: i32) -> (i32, i32, i32) {
    %c0_i32 = arith.constant 0 : i32
    %c0_i32_0 = arith.constant 0 : i32
    %c0_i32_1 = arith.constant 0 : i32
    %c0_i32_2 = arith.constant 0 : i32
    return %c0_i32, %c0_i32_0, %c0_i32_1 : i32, i32, i32
  }
  func.func @transform_2(%arg0: i32) -> (i32, i32) {
    %c0_i32 = arith.constant 0 : i32
    %c0_i32_0 = arith.constant 0 : i32
    %c0_i32_1 = arith.constant 0 : i32
    return %c0_i32, %c0_i32_0 : i32, i32
  }
  func.func @transform_3(%arg0: i32) -> (i32, i32) {
    %c0_i32 = arith.constant 0 : i32
    %c0_i32_0 = arith.constant 0 : i32
    %c0_i32_1 = arith.constant 0 : i32
    return %c0_i32, %c0_i32_0 : i32, i32
  }
  func.func @transform_4(%arg0: i32) -> (i32, i32, i32) {
    %c0_i32 = arith.constant 0 : i32
    %c0_i32_0 = arith.constant 0 : i32
    %c0_i32_1 = arith.constant 0 : i32
    %c0_i32_2 = arith.constant 0 : i32
    return %c0_i32, %c0_i32_0, %c0_i32_1 : i32, i32, i32
  }
  func.func @transform_5(%arg0: i32) -> (i32, i32) {
    %c0_i32 = arith.constant 0 : i32
    %c0_i32_0 = arith.constant 0 : i32
    %c0_i32_1 = arith.constant 0 : i32
    return %c0_i32, %c0_i32_0 : i32, i32
  }
  func.func @transform_6(%arg0: i32) -> (i32, i32) {
    %c0_i32 = arith.constant 0 : i32
    %c0_i32_0 = arith.constant 0 : i32
    %c0_i32_1 = arith.constant 0 : i32
    return %c0_i32, %c0_i32_0 : i32, i32
  }
  func.func @transform_7(%arg0: i32) -> (i32, i32, i32) {
    %c0_i32 = arith.constant 0 : i32
    %c0_i32_0 = arith.constant 0 : i32
    %c0_i32_1 = arith.constant 0 : i32
    return %arg0, %c0_i32, %c0_i32_0 : i32, i32, i32
  }
}

</mosaic_0001>

<bundles_post_ra>
// kernel: tpu_custom_call.1
= control target key start
LH: loop header
LB: loop body
LE: loop exit
PB: predicated region body
PF: predicated region fallthrough
CT: control target
= control target key end

     0   :  { %12 = vsyncpa [#allocation4], 0  ;;  %s14022_s0 = inlined_call_operand.hbm [shape: bf16[2,256,128], index: 0, kind: input, shape index: {}]   ;;  %s14023_s1 = inlined_call_operand.hbm [shape: bf16[9,128,128], index: 1, kind: input, shape index: {}]   ;;  %s14024_s2 = inlined_call_operand.vmem [shape: f32[1,128], index: 2, kind: input, shape index: {}]   ;;  %s14025_s3 = inlined_call_operand.vmem [shape: f32[1,128], index: 3, kind: input, shape index: {}]   ;;  %s14026_s4 = inlined_call_operand.hbm [shape: bf16[9,128,128], index: 4, kind: input, shape index: {}]   ;;  %s14027_s5 = inlined_call_operand.vmem [shape: f32[1,128], index: 5, kind: input, shape index: {}]   ;;  %s14028_s6 = inlined_call_operand.vmem [shape: f32[1,128], index: 6, kind: input, shape index: {}]   ;;  %s14029_s7 = inlined_call_operand.hbm [shape: bf16[2,256,128], index: 7, kind: output, shape index: {}]  }
   0x1   :  { %14 = vsyncpa [#allocation4 + $0x1], 0 }
   0x2   :  { %15 = vsyncpa [#allocation7], 0 }
   0x3   :  { %16 = vsyncpa [#allocation5], 0 }
   0x4   :  { %18 = vsyncpa [#allocation5 + $0x1], 0  ;;  %s12038_s24 = smov 0   ;;  %s12040_s25 = smov 0  }
   0x5   :  { %s12042_s26 = smov 0   ;;  %s12044_s27 = smov 0  }
   0x6 LB: > { %s12059_s28 = sadd.s32 4294967295, %s11985_s27   ;;  %s9333_s29 = sadd.s32 4294967294, %s11985_s27   ;;  %s11985_s27 = sphi %s12044_s27, %s14309_s27   ;;  %s11981_s26 = sphi %s12042_s26, %s14308_s26   ;;  %s11977_s25 = sphi %s12040_s25, %s14307_s25   ;;  %s11973_s24 = sphi %s12038_s24, %s14306_s24  }
   0x7   : > { %p44_p0 = scmp.ne.s32.totalorder %s11977_s25, %s11973_s24  ;;  %p14030_p1 = scmp.eq.s32.totalorder %s12059_s28, 0 }
   0x8   : > { %p200_p3 = scmp.eq.s32.totalorder %s9333_s29, 1  ;;  %p9334_p5 = scmp.ge.s32.totalorder %s11985_s27, 1 }
   0x9   : > { %p12068_p4 = por %p14030_p1, %p44_p0  ;;  %p207_p7 = scmp.lt.s32.totalorder %s11985_s27, 3 }
   0xa   : > { %p12073_p6 = por %p200_p3, %p44_p0  ;;  %s11987_s10 = smov [#allocation6]  }
   0xb   : > { %s14135_s30 = scalar_select %p12068_p4, 1, 0 }
   0xc   : > { %s14136_s8 = scalar_select %p12073_p6, 1, 0 }
   0xd   : > { %p12078_p8 = pnand %p9334_p5, %p207_p7  ;;  %s219_s11 = sshll.u32 %s11987_s10, 4  ;;  %s12082_s11 = int_to_ptr.vmem [resolvable:$true] %s219_s11 }
   0xe   : > { %s11988_s13 = smov [#allocation8]   ;;  %s11829_s17 = scalar_lea.hbm %s14023_s1, 9216 }
   0xf   : > { %p11529_p9 = pneg %p12078_p8  ;;  %s238_s14 = sshll.u32 %s11988_s13, 4  ;;  %s12093_s14 = int_to_ptr.vmem [resolvable:$true] %s238_s14 }
  0x10   : > { %p11830_p12 = scmp.ne.s32.totalorder %s14023_s1, %s11829_s17  ;;  %p11836_p5 = scmp.lt.u32.totalorder %s11829_s17, %s14023_s1 }
  0x11   : > { %p12089_p11 = pnand %p11529_p9, %p14030_p1 }
  0x13   : > { %p11831_p13 = pneg %p12089_p11 }
  0x15   : > { %p11832_p0 = pnand %p11831_p13, %p11830_p12 }
  0x17   : > { %p11833_p3 = pneg %p11832_p0 }
  0x19   : > { %p11838_p7 = pnand %p11836_p5, %p11833_p3 }
  0x1b   : > { %11841 = shalt.err (!%p11838_p7)
}
  0x1c   : > { %s11842_s22 = scalar_lea.vmem %s12082_s11, 9216  ;;  %p11850_p2 = scmp.lt.s32.totalorder %s12082_s11, %s12082_s11 }
  0x1d   : > { %p11843_p9 = scmp.ne.s32.totalorder %s12082_s11, %s11842_s22  ;;  %p11851_p12 = scmp.lt.s32.totalorder %s11842_s22, %s11842_s22 }
  0x1f   : > { %p11845_p10 = pnand %p11843_p9, %p11831_p13  ;;  %p11852_p0 = por %p11851_p12, %p11850_p2 }
  0x21   : > { %p11846_p1 = pneg %p11845_p10 }
  0x23   : > { %p11853_p6 = pnand %p11852_p0, %p11846_p1 }
  0x25   : > { %11856 = shalt.err (!%p11853_p6)
}
  0x26   : > { %s14031_s23 = smov 64   ;;  %s11990_s29 = smov 4  }
  0x27   : > { %11532 = dma.hbm_to_vmem [thread:$0]  (!%p12089_p11), %s14023_s1, 9216, %s12082_s11, [#allocation7], %s14031_s23, %s14031_s23, %s11990_s29  }
  0x28   : > { %s11857_s17 = scalar_lea.hbm %s14026_s4, 9216 }
  0x29   : > { %p11858_p1 = scmp.ne.s32.totalorder %s14026_s4, %s11857_s17  ;;  %p11864_p10 = scmp.lt.u32.totalorder %s11857_s17, %s14026_s4 }
  0x2b   : > { %p11860_p2 = pnand %p11858_p1, %p11831_p13 }
  0x2d   : > { %p11861_p6 = pneg %p11860_p2 }
  0x2f   : > { %p11866_p3 = pnand %p11864_p10, %p11861_p6 }
  0x31   : > { %11869 = shalt.err (!%p11866_p3)
}
  0x32   : > { %s11870_s11 = scalar_lea.vmem %s12093_s14, 9216  ;;  %p11878_p12 = scmp.lt.s32.totalorder %s12093_s14, %s12093_s14 }
  0x33   : > { %p11871_p5 = scmp.ne.s32.totalorder %s12093_s14, %s11870_s11  ;;  %p11879_p0 = scmp.lt.s32.totalorder %s11870_s11, %s11870_s11 }
  0x35   : > { %p11873_p7 = pnand %p11871_p5, %p11831_p13  ;;  %p11880_p1 = por %p11879_p0, %p11878_p12 }
  0x37   : > { %p11874_p9 = pneg %p11873_p7 }
  0x39   : > { %p11881_p2 = pnand %p11880_p1, %p11874_p9 }
  0x3b   : > { %11884 = shalt.err (!%p11881_p2)
}
  0x3c   : > { %11535 = dma.hbm_to_vmem [thread:$0]  (!%p12089_p11), %s14026_s4, 9216, %s12093_s14, [#allocation7], %s14031_s23, %s14031_s23, %s11990_s29  }
  0x3d   : > { %s12154_s12 = sadd.s32 1, %s11985_s27   ;;  %s31_s13 = sadd.s32 1, %s11981_s26 }
  0x3e   : > { %s28_s15 = ssub.s32 %s11985_s27, %s12154_s12  ;;  %p38_p13 = scmp.ne.s32.totalorder %s11981_s26, %s11977_s25 }
  0x3f   : > { %p29_p6 = scmp.eq.s32.totalorder %s28_s15, 0  ;;  %p39_p10 = scmp.eq.s32.totalorder %s11985_s27, 0 }
  0x40   : > { %p14139_p3 = scmp.eq.s32.totalorder %s12059_s28, 1  ;;  %p11546_p7 = scmp.lt.s32.totalorder %s11985_s27, 2 }
  0x41   : > { %s12170_s17 = scalar_select %p29_p6, %s11981_s26, %s31_s13  }
  0x42   : > { %p12164_p5 = por %p14139_p3, %p38_p13  ;;  %p40_p9 = por %p39_p10, %p38_p13 }
  0x43   : > { %s258_s18 = sand.u32 1, %s11981_s26   ;;  %s9580_s14 = sshll.u32 %s11985_s27, 11 }
  0x44   : > { %s14140_s16 = scalar_select %p12164_p5, 1, 0 }
  0x45   : > { %s9338_s19 = sshll.u32 %s258_s18, 7  ;;  %s12177_s11 = scalar_lea.hbm %s14022_s0, %s9580_s14 }
  0x46   : > { %s262_s22 = scalar_lea.vmem [#allocation3], %s9338_s19  ;;  %p12181_p11 = pnand %p11546_p7, %p40_p9 }
  0x47   : > { %s269_s10 = sshll.u32 %s262_s22, 4  ;;  %s12185_s15 = scalar_lea.sflag [#allocation4], %s258_s18  ;;  %s12179_s10 = int_to_ptr.vmem [resolvable:$true] %s269_s10 }
  0x48   : > { %s11885_s23 = scalar_lea.hbm %s12177_s11, 2048  ;;  %p11887_p0 = pneg %p12181_p11 }
  0x49   : > { %p11886_p12 = scmp.ne.s32.totalorder %s12177_s11, %s11885_s23  ;;  %s11890_s20 = scalar_lea.hbm %s14022_s0, 4096 }
  0x4a   : > { %p11891_p13 = scmp.lt.u32.totalorder %s12177_s11, %s14022_s0  ;;  %p11892_p6 = scmp.lt.u32.totalorder %s11890_s20, %s11885_s23 }
  0x4b   : > { %p11888_p1 = pnand %p11887_p0, %p11886_p12  ;;  %p11894_p3 = scmp.lt.u32.totalorder %s11885_s23, %s12177_s11 }
  0x4c   : > { %p11893_p10 = por %p11892_p6, %p11891_p13 }
  0x4d   : > { %p11889_p2 = pneg %p11888_p1 }
  0x4e   : > { %p11895_p7 = por %p11894_p3, %p11893_p10 }
  0x50   : > { %p11896_p9 = pnand %p11895_p7, %p11889_p2 }
  0x52   : > { %11899 = shalt.err (!%p11896_p9)
}
  0x53   : > { %s11900_s18 = scalar_lea.vmem %s12179_s10, 2048  ;;  %s11991_s19 = smov [#allocation3]  }
  0x54   : > { %p11901_p12 = scmp.ne.s32.totalorder %s12179_s10, %s11900_s18  ;;  %s11905_s14 = sshll.u32 %s11991_s19, 4  ;;  %s11906_s14 = int_to_ptr.vmem [resolvable:$false] %s11905_s14 }
  0x55   : > { %s11907_s21 = scalar_lea.vmem %s11906_s14, 4096  ;;  %p11908_p4 = scmp.lt.s32.totalorder %s12179_s10, %s11906_s14 }
  0x56   : > { %p11903_p1 = pnand %p11901_p12, %p11887_p0  ;;  %p11909_p13 = scmp.lt.s32.totalorder %s11907_s21, %s11900_s18 }
  0x58   : > { %p11904_p5 = pneg %p11903_p1  ;;  %p11910_p6 = por %p11909_p13, %p11908_p4 }
  0x5a   : > { %p11911_p10 = pnand %p11910_p6, %p11904_p5 }
  0x5c   : > { %11914 = shalt.err (!%p11911_p10)
}
  0x5d   : > { %s14142_s23 = smov 64   ;;  %281 = sbr.rel (%p12078_p8) target bundleno = 1699 (0x6a3), region = 48 }
  0x5e   : > { %11539 = dma.hbm_to_vmem [thread:$0]  (!%p12181_p11), %s12177_s11, 2048, %s12179_s10, %s12185_s15, %s14142_s23, %s14142_s23, %s11990_s29  }
  0x64   : > { %s12219_s20 = sand.u32 1, %s11977_s25   ;;  %p14143_p4 = scmp.ne.s32.totalorder %s14135_s30, 0 }
  0x65   : > { %s9342_s22 = sshll.u32 %s12219_s20, 7  ;;  %s284_s18 = scalar_lea.sflag [#allocation4], %s12219_s20 }
  0x66   : > { %s12225_s13 = scalar_lea.vmem [#allocation3], %s9342_s22 }
  0x67   : > { %11960 = dma.done.wait (%p14143_p4), %s284_s18, 2048  }
  0x68   : > { %11962 = vsyncadd (%p14143_p4), %s284_s18, 4294965248  ;;  %p14144_p5 = scmp.eq.s32.totalorder %s12059_s28, 0 }
  0x6a   : > { %11964 = dma.done.wait (%p14144_p5), [#allocation7], 18432   ;;  %p14145_p8 = pmov %p14144_p5 }
  0x6b   : > { %v11992_v0 = vmov 0   ;;  %v11591_v1 = vld [vmem:[#allocation6 + $0x40] sm:$0xff]   ;;  %v11592_v2 = vld [vmem:[#allocation6 + $0x48] sm:$0xff]   ;;  %v11593_v3 = vld [vmem:[#allocation6 + $0x50] sm:$0xff]   ;;  %v478_v4 = vlaneseq  ;;  %vm1365_vm0 = vcmask 1043456   ;;  %v14034_v33 = vmov 0.0  }
  0x6c   : > { %11966 = vsyncadd (%p14145_p8), [#allocation7], 4294948864  ;;  %327 = vst [vmem:[#allocation2] sm:$0xff] %v11992_v0  ;;  %10141 = vmatprep.subr.bf16.mxu0 %v11591_v1  ;;  %v11594_v5 = vld [vmem:[#allocation6 + $0x58] sm:$0xff]   ;;  %v331_v6 = vld [vmem:[%s12225_s13] sm:$0xf] }
  0x6d   : > { %328 = vst [vmem:[#allocation2 + $0x8] sm:$0xf] %v11992_v0  ;;  %329 = vst [vmem:[#allocation2 + $0x88] sm:$0xf0] %v11992_v0  ;;  %10142 = vmatpush3.bf16.msra.mxu0 %v11591_v1  ;;  %v12237_v7 = vld [vmem:[%s12225_s13 + $0x4] sm:$0xff]   ;;  %v9346_v8 = vcombine.low %v331_v6, %v331_v6  ;;  %v12239_v9 = vshrl.u32 %v478_v4, 7 }
  0x6e   : > { %330 = vst [vmem:[#allocation2 + $0x90] sm:$0xff] %v11992_v0  ;;  %10143 = vmatprep.subr.bf16.mxu0 %v11592_v2  ;;  %462 = vst [vmem:[#allocation2 + $0x10] sm:$0xff] %v12237_v7  ;;  %v11595_v11 = vld [vmem:[#allocation6 + $0x60] sm:$0xff]   ;;  %v12244_v12 = vld [vmem:[%s12225_s13 + $0xc] sm:$0xff]   ;;  %v14036_v39 = vmov 1.0   ;;  %v1369_v46 = vrot.slane %v12237_v7, 4 }
  0x6f   : > { %461 = vst [vmem:[#allocation2 + $0x8] sm:$0xf0] %v9346_v8  ;;  %v480_v10 = vadd.s32 8, %v12239_v9  ;;  %v12249_v14 = vld [vmem:[%s12225_s13 + $0x14] sm:$0xff]   ;;  %v12252_v16 = vld [vmem:[%s12225_s13 + $0x1c] sm:$0xff]   ;;  %v11596_v17 = vld [vmem:[#allocation6 + $0x68] sm:$0xff]  }
  0x70   : > { %v481_v19 = vadd.s32 16, %v12239_v9  ;;  %v12257_v20 = vld [vmem:[%s12225_s13 + $0x24] sm:$0xff]   ;;  %v11597_v21 = vld [vmem:[#allocation6 + $0x70] sm:$0xff]   ;;  %v483_v23 = vadd.s32 32, %v12239_v9  ;;  %463 = vst [vmem:[#allocation2 + $0x18] sm:$0xff] %v12244_v12  ;;  %464 = vst [vmem:[#allocation2 + $0x20] sm:$0xff] %v12249_v14 }
  0x71   : > { %10144 = vmatpush3.bf16.msra.mxu0 %v11592_v2  ;;  %v522_v15 = vand.u32 15, %v480_v10  ;;  %v12264_v24 = vld [vmem:[%s12225_s13 + $0x2c] sm:$0xff]   ;;  %v12269_v26 = vld [vmem:[%s12225_s13 + $0x34] sm:$0xff]   ;;  %v12272_v27 = vld [vmem:[%s12225_s13 + $0x3c] sm:$0xff]   ;;  %465 = vst [vmem:[#allocation2 + $0x28] sm:$0xff] %v12252_v16  ;;  %v482_v41 = vadd.s32 24, %v12239_v9 }
  0x72   : > { %10145 = vmatprep.subr.bf16.mxu0 %v11593_v3  ;;  %v12276_v28 = vld [vmem:[%s12225_s13 + $0x44] sm:$0xff]   ;;  %v529_v30 = vand.u32 15, %v481_v19  ;;  %v12280_v31 = vld [vmem:[%s12225_s13 + $0x4c] sm:$0xff]   ;;  %v12283_v32 = vld [vmem:[%s12225_s13 + $0x54] sm:$0xff]   ;;  %v543_v36 = vand.u32 15, %v483_v23  ;;  %466 = vst [vmem:[#allocation2 + $0x30] sm:$0xff] %v12257_v20 }
  0x73   : > { %v12246_v13 = vld [vmem:[#allocation2] sm:$0xf0]  ;;  %vm1008_vm1 = vcmp.lt.s32.totalorder %v522_v15, 15  ;;  %v12287_v35 = vld [vmem:[%s12225_s13 + $0x5c] sm:$0xff]   ;;  %467 = vst [vmem:[#allocation2 + $0x38] sm:$0xff] %v12264_v24  ;;  %468 = vst [vmem:[#allocation2 + $0x40] sm:$0xff] %v12269_v26 }
  0x74   : > { %v1366_v18 = vrot.slane %v12246_v13, 4  ;;  %v9379_v34 = vsel %vm1008_vm1, 1.0, %v14034_v33  ;;  %v11598_v37 = vld [vmem:[#allocation6 + $0x78] sm:$0xff]   ;;  %v12293_v38 = vld [vmem:[%s12225_s13 + $0x64] sm:$0xff]   ;;  %469 = vst [vmem:[#allocation2 + $0x48] sm:$0xff] %v12272_v27  ;;  %470 = vst [vmem:[#allocation2 + $0x50] sm:$0xff] %v12276_v28 }
  0x75   : > { %10146 = vmatpush3.bf16.msra.mxu0 %v11593_v3  ;;  %v1103_v40 = vpack.c.bf16 %v9379_v34, %v14036_v39  ;;  %v12300_v42 = vld [vmem:[%s12225_s13 + $0x6c] sm:$0xff]   ;;  %v360_v43 = vld [vmem:[%s12225_s13 + $0x74] sm:$0xff]   ;;  %v484_v44 = vadd.s32 40, %v12239_v9  ;;  %vm12304_vm2 = vcmp.gt.s32.totalorder %v529_v30, 0  ;;  %471 = vst [vmem:[#allocation2 + $0x58] sm:$0xff] %v12280_v31  ;;  %472 = vst [vmem:[#allocation2 + $0x60] sm:$0xff] %v12283_v32 }
  0x76   : > { %10147 = vmatprep.subr.bf16.mxu0 %v11594_v5  ;;  %v12259_v22 = vld [vmem:[#allocation2 + $0x8] sm:$0xff]  ;;  %vm899_vm3 = vcmp.gt.s32.totalorder %v543_v36, 0  ;;  %473 = vst [vmem:[#allocation2 + $0x68] sm:$0xff] %v12287_v35  ;;  %v11601_v47 = vld [vmem:[#allocation6] sm:$0xff]   ;;  %v1371_v48 = vrot.slane %v12244_v12, 4  ;;  %474 = vst [vmem:[#allocation2 + $0x70] sm:$0xff] %v12293_v38 }
  0x77   : > { %v1367_v25 = vrot.slane %v12259_v22, 4  ;;  %v2004_v49 = vshrl.u32 %v1103_v40, 16  ;;  %v2007_v50 = vshll.u32 %v1103_v40, 16  ;;  %475 = vst [vmem:[#allocation2 + $0x78] sm:$0xff] %v12300_v42  ;;  %476 = vst [vmem:[#allocation2 + $0x80] sm:$0xff] %v360_v43  ;;  %v536_v51 = vand.u32 15, %v482_v41 }
  0x78   : > { %v9364_v52 = vsel %vm12304_vm2, 1.0, %v14034_v33  ;;  %v9365_v53 = vsel %vm899_vm3, 1.0, %v14034_v33  ;;  %v550_v55 = vand.u32 15, %v484_v44  ;;  %v1372_v56 = vsel %vm1365_vm0, %v1369_v46, %v1371_v48  ;;  %v11604_v57 = vld [vmem:[#allocation6 + $0x8] sm:$0xff]   ;;  %v11607_v0 = vld [vmem:[#allocation6 + $0x10] sm:$0xff]   ;;  %s13891_s21 = scalar_lea.vmem [#allocation9], %s9342_s22 }
  0x79   : > { %10148 = vmatpush3.bf16.msra.mxu0 %v11594_v5  ;;  %v1368_v29 = vsel %vm1365_vm0, %v1366_v18, %v1367_v25  ;;  %v1370_v54 = vsel %vm1365_vm0, %v1367_v25, %v1369_v46  ;;  %v2006_v58 = vrot.slane %v2004_v49, 3  ;;  %v2009_v59 = vrot.slane %v2007_v50, 4  ;;  %v11610_v18 = vld [vmem:[#allocation6 + $0x18] sm:$0xff]   ;;  %s9613_s23 = sshll.u32 %s12059_s28, 11  ;;  %s9241_s22 = sshll.u32 %s13891_s21, 4  ;;  %s13976_s22 = int_to_ptr.vmem [resolvable:$true] %s9241_s22 }
  0x7a   : > { %10149 = vmatprep.subr.bf16.mxu0 %v11595_v11  ;;  %10157 = vmatprep.mubr.bf16.mxu0 %v1368_v29  ;;  %v992_v60 = vpack.c.bf16 %v14036_v39, %v9364_v52  ;;  %v993_v61 = vpack.c.bf16 %v14036_v39, %v9365_v53  ;;  %vm1010_vm4 = vcmp.lt.s32.totalorder %v536_v51, 15  ;;  %v1373_v62 = vrot.slane %v12249_v14, 4  ;;  %s13974_s30 = scalar_lea.hbm %s14029_s7, %s9613_s23  ;;  %s9228_s28 = scalar_lea.sflag [#allocation5], %s12219_s20 }
  0x7b   : > { %vm1012_vm5 = vcmp.lt.s32.totalorder %v550_v55, 15  ;;  %v1375_v63 = vrot.slane %v12252_v16, 4  ;;  %v485_v1 = vadd.s32 48, %v12239_v9  ;;  %v12326_v2 = vor.u32 %v2009_v59, %v2006_v58  ;;  %s11915_s9 = scalar_lea.vmem %s13976_s22, 2048  ;;  %p14303_p0 = scmp.ne.s32.totalorder %s14140_s16, 0 }
  0x7c   : > { %v515_v3 = vand.u32 15, %v12239_v9  ;;  %v9380_v4 = vsel %vm1010_vm4, 1.0, %v14034_v33  ;;  %v1146_v5 = vshrl.u32 %v992_v60, 16  ;;  %v1149_v6 = vshll.u32 %v992_v60, 16  ;;  %p11916_p11 = scmp.ne.s32.totalorder %s13976_s22, %s11915_s9  ;;  %s11995_s29 = smov [#allocation9]  }
  0x7d   : > { %10150 = vmatpush3.bf16.msra.mxu0 %v11595_v11  ;;  %14148 = vst [vmem:[#allocation13_spill] sm:$0xff] %v12326_v2  ;;  %v1155_v8 = vshrl.u32 %v993_v61, 16  ;;  %v9381_v10 = vsel %vm1012_vm5, 1.0, %v14034_v33  ;;  %v1158_v11 = vshll.u32 %v993_v61, 16  ;;  %v1374_v15 = vsel %vm1365_vm0, %v1371_v48, %v1373_v62  ;;  %s11919_s11 = sshll.u32 %s11995_s29, 4  ;;  %s11920_s11 = int_to_ptr.vmem [resolvable:$false] %s11919_s11 }
  0x7e   : > { %10151 = vmatprep.subr.bf16.mxu0 %v11596_v17  ;;  %vm1136_vm6 = vsmask.f32 3328  ;;  %v557_v19 = vand.u32 15, %v485_v1  ;;  %v1104_v23 = vpack.c.bf16 %v9380_v4, %v14036_v39  ;;  %vm895_vm7 = vcmp.gt.s32.totalorder %v515_v3, 0  ;;  %v11619_v4 = vld [vmem:[#allocation6 + $0x30] sm:$0xff]   ;;  %p11917_p2 = pnand %p11916_p11, %p14303_p0  ;;  %s11921_s10 = scalar_lea.vmem %s11920_s11, 4096 }
  0x7f   : > { %v487_v25 = vadd.s32 64, %v12239_v9  ;;  %v1105_v29 = vpack.c.bf16 %v9381_v10, %v14036_v39  ;;  %v1148_v30 = vrot.slane %v1146_v5, 4  ;;  %v1151_v34 = vrot.slane %v1149_v6, 5  ;;  %p11922_p7 = scmp.lt.s32.totalorder %s13976_s22, %s11920_s11  ;;  %p11923_p9 = scmp.lt.s32.totalorder %s11921_s10, %s11915_s9 }
  0x80   : > { %v1157_v36 = vrot.slane %v1155_v8, 4  ;;  %v1377_v40 = vrot.slane %v12257_v20, 4  ;;  %v1379_v41 = vrot.slane %v12264_v24, 4  ;;  %v9363_v43 = vsel %vm895_vm7, 1.0, %v14034_v33  ;;  %p11918_p3 = pneg %p11917_p2 }
  0x81   : > { %10152 = vmatpush3.bf16.msra.mxu0 %v11596_v17  ;;  %v1376_v17 = vsel %vm1365_vm0, %v1373_v62, %v1375_v63  ;;  %vm901_vm8 = vcmp.gt.s32.totalorder %v557_v19, 0  ;;  %v2012_v46 = vshrl.u32 %v1104_v23, 16  ;;  %v12345_v48 = vor.u32 %v1151_v34, %v1148_v30  ;;  %p11924_p12 = por %p11923_p9, %p11922_p7 }
  0x82   : > { %10153 = vmatprep.subr.bf16.mxu0 %v11597_v21  ;;  %v2015_v49 = vshll.u32 %v1104_v23, 16  ;;  %v2021_v50 = vshrl.u32 %v1105_v29, 16  ;;  %v1378_v52 = vsel %vm1365_vm0, %v1375_v63, %v1377_v40  ;;  %v991_v53 = vpack.c.bf16 %v14036_v39, %v9363_v43 }
  0x83   : > { %v2024_v55 = vshll.u32 %v1105_v29, 16  ;;  %v489_v58 = vadd.s32 80, %v12239_v9  ;;  %v12354_v59 = vrot.slane %v2012_v46, 3  ;;  %v1381_v60 = vrot.slane %v12269_v26, 4  ;;  %v12380_v46 = vld [vmem:[#allocation6 + $0x80] sm:$0xff]   ;;  %p11925_p1 = pnand %p11924_p12, %p11918_p3 }
  0x84   : > { %v1138_v63 = vshrl.u32 %v991_v53, 16  ;;  %v2017_v1 = vrot.slane %v2015_v49, 4  ;;  %v1383_v3 = vrot.slane %v12272_v27, 4  ;;  %v2023_v6 = vrot.slane %v2021_v50, 3 }
  0x85   : > { %10154 = vmatpush3.bf16.msra.mxu0 %v11597_v21  ;;  %v12335_v21 = vmul.bf16 %v12326_v2, %v12246_v13  ;;  %v11613_v13 = vld [vmem:[#allocation6 + $0x20] sm:$0xff]   ;;  %v2026_v8 = vrot.slane %v2024_v55, 4  ;;  %v585_v10 = vand.u32 15, %v489_v58  ;;  %v493_v19 = vadd.s32 112, %v12239_v9 }
  0x86   : > { %10155 = vmatprep.subr.bf16.mxu0 %v11598_v37  ;;  %v1382_v23 = vsel %vm1365_vm0, %v1379_v41, %v1381_v60  ;;  %v1384_v34 = vsel %vm1365_vm0, %v1381_v60, %v1383_v3  ;;  %v1391_v43 = vrot.slane %v12287_v35, 4  ;;  %vm1624_vm15 = vsmask.f32 4352 }
  0x87   : > { %v2198_v44 = vshrl.u32 %v12335_v21, 16  ;;  %v2201_v45 = vshll.u32 %v12335_v21, 16  ;;  %vm12375_vm10 = vcmp.gt.s32.totalorder %v585_v10, 0  ;;  %v613_v50 = vand.u32 15, %v493_v19  ;;  %v12599_v21 = vld [vmem:[#allocation6 + $0xc0] sm:$0xff]  }
  0x88   : > { %v9368_v58 = vsel %vm12375_vm10, 1.0, %v14034_v33  ;;  %v1395_v10 = vrot.slane %v12300_v42, 4 }
  0x89   : > { %10156 = vmatpush3.bf16.msra.mxu0 %v11598_v37  ;;  %v1160_v37 = vrot.slane %v1158_v11, 5  ;;  %v491_v11 = vadd.s32 96, %v12239_v9  ;;  %vm909_vm12 = vcmp.gt.s32.totalorder %v613_v50, 0  ;;  %v996_v19 = vpack.c.bf16 %v14036_v39, %v9368_v58 }
  0x8a   : > { %10189 = vmatprep.subr.bf16.mxu0 %v11601_v47 }
  0x8b   : > { %v12347_v51 = vor.u32 %v1160_v37, %v1157_v36  ;;  %v1385_v36 = vrot.slane %v12276_v28, 4  ;;  %v1387_v37 = vrot.slane %v12280_v31, 4 }
  0x8c   : > { %10158 = vmatmul.mubr.bf16.vlgmr.msra.gmra.mrb[0].mxu0 %v1370_v54  ;;  %v9366_v54 = vsel %vm901_vm8, 1.0, %v14034_v33 }
  0x8d   : > { %10190 = vmatpush3.bf16.msra.mxu0 %v11601_v47  ;;  %10161 = vmatprep.mubr.bf16.mxu0 %v1372_v56  ;;  %v571_v47 = vand.u32 15, %v487_v25  ;;  %v1380_v56 = vsel %vm1365_vm0, %v1377_v40, %v1379_v41  ;;  %v994_v61 = vpack.c.bf16 %v14036_v39, %v9366_v54  ;;  %v12361_v62 = vsel %vm1136_vm6, %v12345_v48, %v12347_v51 }
  0x8e   : > { %10191 = vmatprep.subr.bf16.mxu0 %v11604_v57  ;;  %14149 = vst [vmem:[#allocation14_spill] sm:$0xff] %v12361_v62  ;;  %v1140_v25 = vrot.slane %v1138_v63, 4  ;;  %v1389_v40 = vrot.slane %v12283_v32, 4  ;;  %v599_v41 = vand.u32 15, %v491_v11  ;;  %v1388_v60 = vsel %vm1365_vm0, %v1385_v36, %v1387_v37  ;;  %v12397_v11 = vld [vmem:[#allocation2 + $0x80] sm:$0xf] }
  0x8f   : > { %vm903_vm9 = vcmp.gt.s32.totalorder %v571_v47, 0  ;;  %v1397_v50 = vrot.slane %v12397_v11, 4 }
  0x90   : > { %v9367_v5 = vsel %vm903_vm9, 1.0, %v14034_v33  ;;  %vm12390_vm11 = vcmp.gt.s32.totalorder %v599_v41, 0 }
  0x91   : > { %10192 = vmatpush3.bf16.msra.mxu0 %v11604_v57  ;;  %v11616_v57 = vld [vmem:[#allocation6 + $0x28] sm:$0xff]   ;;  %v995_v30 = vpack.c.bf16 %v14036_v39, %v9367_v5 }
  0x92   : > { %10193 = vmatprep.subr.bf16.mxu0 %v11607_v0 }
  0x93   : > { %v1173_v55 = vshrl.u32 %v995_v30, 16 }
  0x94   : > { %10162 = vmatmul.mubr.bf16.gmra.mrb[4].mxu0 %v1374_v15  ;;  %v1299_v15 = vmul.bf16 %v12361_v62, %v12237_v7  ;;  %v11622_v7 = vld [vmem:[#allocation6 + $0x38] sm:$0xff]  }
  0x95   : > { %10165 = vmatprep.mubr.bf16.mxu0 %v1376_v17  ;;  %10194 = vmatpush3.bf16.msra.mxu0 %v11607_v0  ;;  %v1141_v0 = vshll.u32 %v991_v53, 16  ;;  %v1164_v17 = vshrl.u32 %v994_v61, 16 }
  0x96   : > { %10195 = vmatprep.subr.bf16.mxu0 %v11610_v18  ;;  %v1643_v54 = vshrl.u32 %v1299_v15, 16 }
  0x97   : > { %v1143_v29 = vrot.slane %v1141_v0, 5  ;;  %v1166_v47 = vrot.slane %v1164_v17, 4  ;;  %v495_v0 = vadd.s32 128, %v12239_v9 }
  0x99   : > { %10196 = vmatpush3.bf16.msra.mxu0 %v11610_v18  ;;  %v1167_v18 = vshll.u32 %v994_v61, 16  ;;  %v12382_v53 = vor.u32 %v1143_v29, %v1140_v25  ;;  %v1393_v61 = vrot.slane %v12293_v38, 4  ;;  %v9369_v29 = vsel %vm12390_vm11, 1.0, %v14034_v33 }
  0x9a   : > { %10197 = vmatprep.subr.bf16.mxu0 %v11613_v13 }
  0x9b   : > { %v1169_v49 = vrot.slane %v1167_v18, 5  ;;  %14152 = vst [vmem:[#allocation15_spill] sm:$0xff] %v12382_v53  ;;  %v12402_v17 = vsel %vm1136_vm6, %v12382_v53, %v12345_v48  ;;  %v1645_v18 = vrot.slane %v1643_v54, 3  ;;  %v9370_v48 = vsel %vm909_vm12, 1.0, %v14034_v33 }
  0x9c   : > { %10166 = vmatmul.mubr.bf16.gmra.mrb[8].mxu0 %v1378_v52  ;;  %v1119_v52 = vld [vmem:[#allocation2] sm:$0xf8]  ;;  %14155 = vst [vmem:[#allocation16_spill] sm:$0xff] %v12402_v17 }
  0x9d   : > { %10169 = vmatprep.mubr.bf16.mxu0 %v1380_v56  ;;  %10198 = vmatpush3.bf16.msra.mxu0 %v11613_v13  ;;  %v1386_v56 = vsel %vm1365_vm0, %v1383_v3, %v1385_v36  ;;  %v1170_v5 = vor.u32 %v1169_v49, %v1166_v47  ;;  %v497_v3 = vadd.s32 144, %v12239_v9  ;;  %v627_v36 = vand.u32 15, %v495_v0 }
  0x9e   : > { %10199 = vmatprep.subr.bf16.mxu0 %v11616_v57  ;;  %v1390_v49 = vsel %vm1365_vm0, %v1387_v37, %v1389_v40 }
  0x9f   : > { %v12420_v41 = vsel %vm1136_vm6, %v12347_v51, %v1170_v5  ;;  %v641_v47 = vand.u32 15, %v497_v3  ;;  %vm911_vm13 = vcmp.gt.s32.totalorder %v627_v36, 0 }
  0xa0   : > { %14156 = vst [vmem:[#allocation17_spill] sm:$0xff] %v12420_v41  ;;  %v1300_v51 = vmul.bf16 %v12420_v41, %v12244_v12  ;;  %v9371_v3 = vsel %vm911_vm13, 1.0, %v14034_v33 }
  0xa1   : > { %10200 = vmatpush3.bf16.msra.mxu0 %v11616_v57  ;;  %v1176_v57 = vshll.u32 %v995_v30, 16  ;;  %v12411_v30 = vor.u32 %v2017_v1, %v12354_v59  ;;  %v1182_v59 = vshrl.u32 %v996_v19, 16  ;;  %v1185_v1 = vshll.u32 %v996_v19, 16 }
  0xa2   : > { %10201 = vmatprep.subr.bf16.mxu0 %v11619_v4  ;;  %vm913_vm14 = vcmp.gt.s32.totalorder %v641_v47, 0  ;;  %v501_v19 = vadd.s32 176, %v12239_v9  ;;  %v1652_v12 = vshrl.u32 %v1300_v51, 16 }
  0xa3   : > { %v1178_v25 = vrot.slane %v1176_v57, 5  ;;  %v499_v57 = vadd.s32 160, %v12239_v9  ;;  %v1184_v58 = vrot.slane %v1182_v59, 4 }
  0xa4   : > { %10170 = vmatmul.mubr.bf16.gmra.mrb[12].mxu0 %v1382_v23  ;;  %v1297_v23 = vmul.bf16 %v12382_v53, %v1119_v52  ;;  %v998_v52 = vpack.c.bf16 %v14036_v39, %v9370_v48  ;;  %v1655_v48 = vshll.u32 %v1300_v51, 16  ;;  %v503_v51 = vadd.s32 192, %v12239_v9 }
  0xa5   : > { %10173 = vmatprep.mubr.bf16.mxu0 %v1384_v34  ;;  %10202 = vmatpush3.bf16.msra.mxu0 %v11619_v4  ;;  %v1646_v4 = vshll.u32 %v1299_v15, 16  ;;  %v1175_v15 = vrot.slane %v1173_v55, 4  ;;  %v12413_v34 = vor.u32 %v2026_v8, %v2023_v6  ;;  %v997_v6 = vpack.c.bf16 %v14036_v39, %v9369_v29 }
  0xa6   : > { %10203 = vmatprep.subr.bf16.mxu0 %v11622_v7  ;;  %v1392_v8 = vsel %vm1365_vm0, %v1389_v40, %v1391_v43  ;;  %v1629_v54 = vshll.u32 %v1297_v23, 16  ;;  %v1394_v29 = vsel %vm1365_vm0, %v1391_v43, %v1393_v61 }
  0xa7   : > { %v1648_v13 = vrot.slane %v1646_v4, 4  ;;  %v1179_v55 = vor.u32 %v1178_v25, %v1175_v15  ;;  %v1191_v63 = vshrl.u32 %v997_v6, 16  ;;  %v1194_v40 = vshll.u32 %v997_v6, 16 }
  0xa8   : > { %v1200_v4 = vshrl.u32 %v998_v52, 16  ;;  %v1203_v15 = vshll.u32 %v998_v52, 16  ;;  %v9372_v25 = vsel %vm913_vm14, 1.0, %v14034_v33  ;;  %v999_v6 = vpack.c.bf16 %v14036_v39, %v9371_v3 }
  0xa9   : > { %10204 = vmatpush3.bf16.msra.mxu0 %v11622_v7  ;;  %v1298_v7 = vmul.bf16 %v12402_v17, %v12259_v22  ;;  %v1626_v22 = vshrl.u32 %v1297_v23, 16  ;;  %v1631_v23 = vrot.slane %v1629_v54, 4  ;;  %v12443_v36 = vsel %vm1136_vm6, %v1170_v5, %v1179_v55 }
  0xaa   : > { %10237 = vmatprep.subr.bf16.mxu0 %v12380_v46  ;;  %14157 = vst [vmem:[#allocation18_spill] sm:$0xff] %v12443_v36  ;;  %v1193_v59 = vrot.slane %v1191_v63, 4  ;;  %v1000_v43 = vpack.c.bf16 %v14036_v39, %v9372_v25  ;;  %v669_v52 = vand.u32 15, %v501_v19  ;;  %v1398_v5 = vsel %vm1365_vm0, %v1395_v10, %v1397_v50 }
  0xab   : > { %v1634_v37 = vshrl.u32 %v1298_v7, 16  ;;  %v12432_v0 = vrot.slane %v1626_v22, 3  ;;  %v1202_v22 = vrot.slane %v1200_v4, 4  ;;  %v1205_v54 = vrot.slane %v1203_v15, 5 }
  0xac   : > { %10174 = vmatmul.mubr.bf16.gmra.mrb[16].mxu0 %v1386_v56  ;;  %v1637_v56 = vshll.u32 %v1298_v7, 16  ;;  %v655_v7 = vand.u32 15, %v499_v57  ;;  %v1212_v4 = vshll.u32 %v999_v6, 16  ;;  %vm917_vm2 = vcmp.gt.s32.totalorder %v669_v52, 0 }
  0xad   : > { %10177 = vmatprep.mubr.bf16.mxu0 %v1388_v60  ;;  %v1187_v60 = vrot.slane %v1185_v1, 5  ;;  %v1196_v1 = vrot.slane %v1194_v40, 5  ;;  %v1636_v57 = vrot.slane %v1634_v37, 3  ;;  %v1632_v38 = vor.u32 %v1631_v23, %v12432_v0 }
  0xae   : > { %vm915_vm1 = vcmp.gt.s32.totalorder %v655_v7, 0  ;;  %v1209_v40 = vshrl.u32 %v999_v6, 16  ;;  %v683_v37 = vand.u32 15, %v503_v51  ;;  %v1221_v3 = vshll.u32 %v1000_v43, 16 }
  0xaf   : > { %v1188_v47 = vor.u32 %v1187_v60, %v1184_v58  ;;  %v1639_v58 = vrot.slane %v1637_v56, 4  ;;  %v1301_v60 = vmul.bf16 %v12443_v36, %v12249_v14  ;;  %v1197_v42 = vor.u32 %v1196_v1, %v1193_v59 }
  0xb0   : > { %v9373_v50 = vsel %vm915_vm1, 1.0, %v14034_v33  ;;  %v505_v0 = vadd.s32 208, %v12239_v9  ;;  %v1211_v23 = vrot.slane %v1209_v40, 4  ;;  %v1214_v25 = vrot.slane %v1212_v4, 5 }
  0xb1   : > { %v12460_v63 = vsel %vm1136_vm6, %v1179_v55, %v1188_v47  ;;  %v1640_v56 = vor.u32 %v1639_v58, %v1636_v57  ;;  %v1661_v14 = vshrl.u32 %v1301_v60, 16  ;;  %v1664_v19 = vshll.u32 %v1301_v60, 16 }
  0xb2   : > { %14158 = vst [vmem:[#allocation19_spill] sm:$0xff] %v12460_v63  ;;  %v1302_v55 = vmul.bf16 %v12460_v63, %v12252_v16  ;;  %v12468_v15 = vsel %vm1136_vm6, %v1188_v47, %v1197_v42  ;;  %vm919_vm3 = vcmp.gt.s32.totalorder %v683_v37, 0  ;;  %v507_v1 = vadd.s32 224, %v12239_v9 }
  0xb3   : > { %14159 = vst [vmem:[#allocation20_spill] sm:$0xff] %v12468_v15  ;;  %v1641_v16 = vsel %vm1624_vm15, %v1632_v38, %v1640_v56  ;;  %v1223_v6 = vrot.slane %v1221_v3, 5  ;;  %v1663_v47 = vrot.slane %v1661_v14, 3  ;;  %v1215_v57 = vor.u32 %v1214_v25, %v1211_v23  ;;  %v11624_v23 = vld [vmem:[#allocation6 + $0x88] sm:$0xff]  }
  0xb4   : > { %10178 = vmatmul.mubr.bf16.gmra.mrb[20].mxu0 %v1390_v49  ;;  %v1396_v49 = vsel %vm1365_vm0, %v1393_v61, %v1395_v10  ;;  %v1654_v61 = vrot.slane %v1652_v12, 3  ;;  %v1218_v10 = vshrl.u32 %v1000_v43, 16  ;;  %v9374_v12 = vsel %vm917_vm2, 1.0, %v14034_v33 }
  0xb5   : > { %10181 = vmatprep.mubr.bf16.mxu0 %v1392_v8  ;;  %v1649_v8 = vor.u32 %v1648_v13, %v1645_v18  ;;  %v1657_v18 = vrot.slane %v1655_v48, 4  ;;  %v1206_v13 = vor.u32 %v1205_v54, %v1202_v22  ;;  %v697_v22 = vand.u32 15, %v505_v0 }
  0xb6   : > { %v1220_v48 = vrot.slane %v1218_v10, 4  ;;  %v1666_v43 = vrot.slane %v1664_v19, 4  ;;  %v1670_v52 = vshrl.u32 %v1302_v55, 16  ;;  %v1303_v54 = vmul.bf16 %v12468_v15, %v12257_v20 }
  0xb7   : > { %v12471_v7 = vor.u32 %v1657_v18, %v1654_v61  ;;  %v12474_v59 = vsel %vm1136_vm6, %v1197_v42, %v1206_v13  ;;  %v9375_v60 = vsel %vm919_vm3, 1.0, %v14034_v33  ;;  %v1650_v61 = vsel %vm1624_vm15, %v1640_v56, %v1649_v8 }
  0xb8   : > { %14160 = vst [vmem:[#allocation21_spill] sm:$0xff] %v12474_v59  ;;  %v1304_v51 = vmul.bf16 %v12474_v59, %v12264_v24  ;;  %v711_v42 = vand.u32 15, %v507_v1  ;;  %v1224_v4 = vor.u32 %v1223_v6, %v1220_v48  ;;  %vm921_vm4 = vcmp.gt.s32.totalorder %v697_v22, 0 }
  0xb9   : > { %v1659_v38 = vsel %vm1624_vm15, %v1649_v8, %v12471_v7  ;;  %v1672_v20 = vrot.slane %v1670_v52, 3  ;;  %v1679_v24 = vshrl.u32 %v1303_v54, 16  ;;  %v1003_v37 = vpack.c.bf16 %v14036_v39, %v9375_v60 }
  0xba   : > { %v1682_v14 = vshll.u32 %v1303_v54, 16  ;;  %v1688_v3 = vshrl.u32 %v1304_v51, 16  ;;  %v12489_v56 = vsel %vm1136_vm6, %v1206_v13, %v1215_v57  ;;  %v9376_v19 = vsel %vm921_vm4, 1.0, %v14034_v33 }
  0xbb   : > { %14161 = vst [vmem:[#allocation22_spill] sm:$0xff] %v12489_v56  ;;  %vm923_vm5 = vcmp.gt.s32.totalorder %v711_v42, 0  ;;  %v12494_v25 = vsel %vm1136_vm6, %v1215_v57, %v1224_v4  ;;  %v1681_v1 = vrot.slane %v1679_v24, 3  ;;  %v1248_v6 = vshll.u32 %v1003_v37, 16 }
  0xbc   : > { %10182 = vmatmul.mubr.bf16.gmra.mrb[24].mxu0 %v1394_v29  ;;  %v1001_v29 = vpack.c.bf16 %v14036_v39, %v9373_v50  ;;  %v1673_v50 = vshll.u32 %v1302_v55, 16  ;;  %14162 = vst [vmem:[#allocation23_spill] sm:$0xff] %v12494_v25  ;;  %v1684_v13 = vrot.slane %v1682_v14, 4  ;;  %v1004_v22 = vpack.c.bf16 %v14036_v39, %v9376_v19  ;;  %v11625_v14 = vld [vmem:[#allocation6 + $0x90] sm:$0xff]  }
  0xbd   : > { %10185 = vmatprep.mubr.bf16.mxu0 %v1396_v49  ;;  %v1002_v49 = vpack.c.bf16 %v14036_v39, %v9374_v12  ;;  %v1691_v12 = vshll.u32 %v1304_v51, 16  ;;  %v9377_v52 = vsel %vm923_vm5, 1.0, %v14034_v33  ;;  %v12503_v54 = vsel %vm1624_vm15, %v12411_v30, %v12413_v34 }
  0xbe   : > { %v1227_v58 = vshrl.u32 %v1001_v29, 16  ;;  %v1230_v40 = vshll.u32 %v1001_v29, 16  ;;  %v1675_v29 = vrot.slane %v1673_v50, 4  ;;  %14163 = vst [vmem:[#allocation24_spill] sm:$0xff] %v12503_v54  ;;  %v1306_v51 = vmul.bf16 %v12494_v25, %v12272_v27 }
  0xbf   : > { %v1236_v10 = vshrl.u32 %v1002_v49, 16  ;;  %v1239_v18 = vshll.u32 %v1002_v49, 16  ;;  %v1305_v49 = vmul.bf16 %v12489_v56, %v12269_v26  ;;  %v1667_v60 = vor.u32 %v1666_v43, %v1663_v47 }
  0xc0   : > { %v1229_v0 = vrot.slane %v1227_v58, 4  ;;  %v1232_v8 = vrot.slane %v1230_v40, 5  ;;  %v1690_v40 = vrot.slane %v1688_v3, 3  ;;  %v1693_v42 = vrot.slane %v1691_v12, 4 }
  0xc1   : > { %v1238_v55 = vrot.slane %v1236_v10, 4  ;;  %v1241_v48 = vrot.slane %v1239_v18, 5  ;;  %v1676_v26 = vor.u32 %v1675_v29, %v1672_v20  ;;  %v1250_v50 = vrot.slane %v1248_v6, 5 }
  0xc2   : > { %v1233_v57 = vor.u32 %v1232_v8, %v1229_v0  ;;  %v1005_v24 = vpack.c.bf16 %v14036_v39, %v9377_v52  ;;  %v1697_v19 = vshrl.u32 %v1305_v49, 16  ;;  %v1254_v27 = vshrl.u32 %v1004_v22, 16 }
  0xc3   : > { %v1242_v10 = vor.u32 %v1241_v48, %v1238_v55  ;;  %v1257_v0 = vshll.u32 %v1004_v22, 16  ;;  %v1700_v8 = vshll.u32 %v1305_v49, 16  ;;  %v1709_v43 = vshll.u32 %v1306_v51, 16  ;;  %v11626_v48 = vld [vmem:[#allocation6 + $0x98] sm:$0xff]  }
  0xc4   : > { %10186 = vmatmul.mubr.bf16.gmra.mrb[28].mxu0 %v1398_v5  ;;  %v509_v5 = vadd.s32 240, %v12239_v9  ;;  %v12510_v47 = vsel %vm1136_vm6, %v1224_v4, %v1233_v57  ;;  %v486_v20 = vadd.s32 56, %v12239_v9  ;;  %v1677_v3 = vsel %vm1624_vm15, %v1667_v60, %v1676_v26 }
  0xc5   : > { %10205 = vmatprep.mubr.bf16.mxu0 %v1641_v16  ;;  %v1245_v16 = vshrl.u32 %v1003_v37, 16  ;;  %v1685_v37 = vor.u32 %v1684_v13, %v1681_v1  ;;  %14164 = vst [vmem:[#allocation25_spill] sm:$0xff] %v12510_v47  ;;  %v1263_v12 = vshrl.u32 %v1005_v24, 16  ;;  %v1266_v55 = vshll.u32 %v1005_v24, 16 }
  0xc6   : > { %v725_v58 = vand.u32 15, %v509_v5  ;;  %v1307_v4 = vmul.bf16 %v12510_v47, %v12276_v28  ;;  %v1256_v29 = vrot.slane %v1254_v27, 4  ;;  %v1259_v1 = vrot.slane %v1257_v0, 5  ;;  %v11627_v28 = vld [vmem:[#allocation6 + $0xa0] sm:$0xff]  }
  0xc7   : > { %v1247_v18 = vrot.slane %v1245_v16, 4  ;;  %v1686_v16 = vsel %vm1624_vm15, %v1676_v26, %v1685_v37  ;;  %v12523_v6 = vor.u32 %v1693_v42, %v1690_v40  ;;  %v1699_v13 = vrot.slane %v1697_v19, 3 }
  0xc8   : > { %vm925_vm7 = vcmp.gt.s32.totalorder %v725_v58, 0  ;;  %v1702_v49 = vrot.slane %v1700_v8, 4  ;;  %v1711_v52 = vrot.slane %v1709_v43, 4  ;;  %v1265_v58 = vrot.slane %v1263_v12, 4 }
  0xc9   : > { %v1251_v5 = vor.u32 %v1250_v50, %v1247_v18  ;;  %v1715_v42 = vshrl.u32 %v1307_v4, 16  ;;  %v1260_v26 = vor.u32 %v1259_v1, %v1256_v29  ;;  %v488_v18 = vadd.s32 72, %v12239_v9 }
  0xca   : > { %v1695_v50 = vsel %vm1624_vm15, %v1685_v37, %v12523_v6  ;;  %v1718_v24 = vshll.u32 %v1307_v4, 16  ;;  %v1703_v19 = vor.u32 %v1702_v49, %v1699_v13 }
  0xcb   : > { %v1717_v37 = vrot.slane %v1715_v42, 3 }
  0xcc   : > { %10206 = vmatmul.mubr.bf16.vlgmr.msra.gmra.mrb[0].mxu0 %v1650_v61  ;;  %v1706_v61 = vshrl.u32 %v1306_v51, 16  ;;  %v564_v51 = vand.u32 15, %v486_v20  ;;  %v11628_v20 = vld [vmem:[#allocation6 + $0xa8] sm:$0xff]   ;;  %v1720_v4 = vrot.slane %v1718_v24, 4 }
  0xcd   : > { %10238 = vmatpush3.bf16.msra.mxu0 %v12380_v46  ;;  %10209 = vmatprep.mubr.bf16.mxu0 %v1659_v38  ;;  %v1668_v46 = vsel %vm1624_vm15, %v12471_v7, %v1667_v60  ;;  %v12515_v38 = vsel %vm1136_vm6, %v1233_v57, %v1242_v10  ;;  %v9378_v7 = vsel %vm925_vm7, 1.0, %v14034_v33  ;;  %v12528_v57 = vsel %vm1136_vm6, %v1242_v10, %v1251_v5 }
  0xce   : > { %10239 = vmatprep.subr.bf16.mxu0 %v11624_v23  ;;  %14165 = vst [vmem:[#allocation26_spill] sm:$0xff] %v12515_v38  ;;  %v1708_v22 = vrot.slane %v1706_v61, 3  ;;  %14166 = vst [vmem:[#allocation27_spill] sm:$0xff] %v12528_v57  ;;  %v1268_v60 = vrot.slane %v1266_v55, 5  ;;  %v1006_v40 = vpack.c.bf16 %v14036_v39, %v9378_v7  ;;  %v1309_v0 = vmul.bf16 %v12528_v57, %v12283_v32 }
  0xcf   : > { %vm1014_vm8 = vcmp.lt.s32.totalorder %v564_v51, 15  ;;  %v578_v55 = vand.u32 15, %v488_v18 }
  0xd0   : > { %v1712_v8 = vor.u32 %v1711_v52, %v1708_v22  ;;  %v12542_v61 = vor.u32 %v1268_v60, %v1265_v58  ;;  %v1275_v12 = vshll.u32 %v1006_v40, 16  ;;  %v1733_v7 = vshrl.u32 %v1309_v0, 16 }
  0xd1   : > { %10240 = vmatpush3.bf16.msra.mxu0 %v11624_v23  ;;  %v1308_v23 = vmul.bf16 %v12515_v38, %v12280_v31  ;;  %v12534_v31 = vsel %vm1624_vm15, %v12326_v2, %v12411_v30  ;;  %v1272_v30 = vshrl.u32 %v1006_v40, 16  ;;  %v1736_v13 = vshll.u32 %v1309_v0, 16  ;;  %v11768_v40 = vld [vmem:[#allocation2 + $0x10] sm:$0xff] }
  0xd2   : > { %10241 = vmatprep.subr.bf16.mxu0 %v11625_v14  ;;  %14167 = vst [vmem:[#allocation28_spill] sm:$0xff] %v12534_v31  ;;  %v12559_v49 = vsel %vm1136_vm6, %v1260_v26, %v12542_v61  ;;  %v1277_v51 = vrot.slane %v1275_v12, 5  ;;  %vm1016_vm9 = vcmp.lt.s32.totalorder %v578_v55, 15  ;;  %v1721_v60 = vor.u32 %v1720_v4, %v1717_v37 }
  0xd3   : > { %v1724_v10 = vshrl.u32 %v1308_v23, 16  ;;  %v1727_v27 = vshll.u32 %v1308_v23, 16  ;;  %v12553_v23 = vrot.slane %v2198_v44, 4  ;;  %14169 = vst [vmem:[#allocation30_spill] sm:$0xff] %v12559_v49  ;;  %v1274_v22 = vrot.slane %v1272_v30, 4  ;;  %v11630_v30 = vld [vmem:[#allocation6 + $0xb8] sm:$0xff]  }
  0xd4   : > { %10210 = vmatmul.mubr.bf16.gmra.mrb[4].mxu0 %v1668_v46  ;;  %v11767_v46 = vld [vmem:[#allocation2 + $0x8] sm:$0xff]  ;;  %v492_v44 = vadd.s32 104, %v12239_v9  ;;  %v12570_v42 = vmul.bf16 %v11768_v40, %v12503_v54  ;;  %v1713_v18 = vsel %vm1624_vm15, %v1703_v19, %v1712_v8  ;;  %v1722_v37 = vsel %vm1624_vm15, %v1712_v8, %v1721_v60 }
  0xd5   : > { %10213 = vmatprep.mubr.bf16.mxu0 %v1677_v3  ;;  %10242 = vmatpush3.bf16.msra.mxu0 %v11625_v14  ;;  %v490_v14 = vadd.s32 88, %v12239_v9  ;;  %v12545_v43 = vmul.bf16 %v11767_v46, %v12534_v31  ;;  %v12548_v3 = vsel %vm1136_vm6, %v1251_v5, %v1260_v26  ;;  %v1726_v32 = vrot.slane %v1724_v10, 3  ;;  %v12575_v10 = vld [vmem:[#allocation2 + $0x70] sm:$0xff] }
  0xd6   : > { %10243 = vmatprep.subr.bf16.mxu0 %v11626_v48  ;;  %14168 = vst [vmem:[#allocation29_spill] sm:$0xff] %v12548_v3  ;;  %v1729_v1 = vrot.slane %v1727_v27, 4  ;;  %v1310_v5 = vmul.bf16 %v12548_v3, %v12287_v35  ;;  %v494_v35 = vadd.s32 120, %v12239_v9  ;;  %v1704_v26 = vsel %vm1624_vm15, %v12523_v6, %v1703_v19 }
  0xd7   : > { %v592_v29 = vand.u32 15, %v490_v14  ;;  %v2206_v52 = vshrl.u32 %v12545_v43, 16  ;;  %v1311_v14 = vmul.bf16 %v12575_v10, %v12559_v49  ;;  %v9383_v27 = vsel %vm1016_vm9, 1.0, %v14034_v33 }
  0xd8   : > { %v1745_v24 = vshll.u32 %v1310_v5, 16  ;;  %v12580_v0 = vor.u32 %v1277_v51, %v1274_v22  ;;  %v606_v19 = vand.u32 15, %v492_v44  ;;  %v620_v55 = vand.u32 15, %v494_v35 }
  0xd9   : > { %10244 = vmatpush3.bf16.msra.mxu0 %v11626_v48  ;;  %v9382_v48 = vsel %vm1014_vm8, 1.0, %v14034_v33  ;;  %vm12564_vm10 = vcmp.lt.s32.totalorder %v592_v29, 15  ;;  %v1735_v4 = vrot.slane %v1733_v7, 3  ;;  %v12588_v29 = vrot.slane %v2201_v45, 5 }
  0xda   : > { %10245 = vmatprep.subr.bf16.mxu0 %v11627_v28  ;;  %v1106_v58 = vpack.c.bf16 %v9382_v48, %v14036_v39  ;;  %14172 = vst [vmem:[#allocation31_spill] sm:$0xff] %v12580_v0  ;;  %v9384_v6 = vsel %vm12564_vm10, 1.0, %v14034_v33  ;;  %v1738_v48 = vrot.slane %v1736_v13, 4  ;;  %v1751_v22 = vshrl.u32 %v1311_v14, 16 }
  0xdb   : > { %v1754_v51 = vshll.u32 %v1311_v14, 16  ;;  %v1108_v8 = vpack.c.bf16 %v9384_v6, %v14036_v39  ;;  %v12597_v7 = vsel %vm1136_vm6, %v12542_v61, %v12580_v0  ;;  %vm1020_vm11 = vcmp.lt.s32.totalorder %v606_v19, 15  ;;  %v12609_v14 = vld [vmem:[#allocation2 + $0x78] sm:$0xff] }
  0xdc   : > { %10214 = vmatmul.mubr.bf16.gmra.mrb[8].mxu0 %v1686_v16  ;;  %v11629_v16 = vld [vmem:[#allocation6 + $0xb0] sm:$0xff]   ;;  %v2030_v46 = vshrl.u32 %v1106_v58, 16  ;;  %v2033_v12 = vshll.u32 %v1106_v58, 16  ;;  %14173 = vst [vmem:[#allocation32_spill] sm:$0xff] %v12597_v7  ;;  %vm12601_vm12 = vcmp.lt.s32.totalorder %v620_v55, 15  ;;  %v1739_v44 = vor.u32 %v1738_v48, %v1735_v4 }
  0xdd   : > { %10217 = vmatprep.mubr.bf16.mxu0 %v1695_v50  ;;  %10246 = vmatpush3.bf16.msra.mxu0 %v11627_v28  ;;  %v1742_v50 = vshrl.u32 %v1310_v5, 16  ;;  %v1107_v5 = vpack.c.bf16 %v9383_v27, %v14036_v39  ;;  %v12591_v28 = vrot.slane %v2206_v52, 4  ;;  %v496_v52 = vadd.s32 136, %v12239_v9 }
  0xde   : > { %10247 = vmatprep.subr.bf16.mxu0 %v11628_v20  ;;  %v2032_v45 = vrot.slane %v2030_v46, 3  ;;  %v2035_v13 = vrot.slane %v2033_v12, 4  ;;  %v2209_v61 = vshll.u32 %v12545_v43, 16  ;;  %v1312_v27 = vmul.bf16 %v12609_v14, %v12597_v7 }
  0xdf   : > { %v2039_v35 = vshrl.u32 %v1107_v5, 16  ;;  %v2042_v40 = vshll.u32 %v1107_v5, 16  ;;  %v1313_v46 = vmul.bf16 %v12580_v0, %v12397_v11  ;;  %v2215_v6 = vshrl.u32 %v12570_v42, 16 }
  0xe0   : > { %v2036_v19 = vor.u32 %v2035_v13, %v2032_v45  ;;  %v634_v48 = vand.u32 15, %v496_v52  ;;  %v2211_v11 = vrot.slane %v2209_v61, 5  ;;  %v1760_v58 = vshrl.u32 %v1312_v27, 16 }
  0xe1   : > { %10248 = vmatpush3.bf16.msra.mxu0 %v11628_v20  ;;  %v1730_v20 = vor.u32 %v1729_v1, %v1726_v32  ;;  %v1744_v32 = vrot.slane %v1742_v50, 3  ;;  %v1747_v1 = vrot.slane %v1745_v24, 4  ;;  %v9385_v50 = vsel %vm1020_vm11, 1.0, %v14034_v33 }
  0xe2   : > { %10249 = vmatprep.subr.bf16.mxu0 %v11629_v16  ;;  %v1753_v24 = vrot.slane %v1751_v22, 3  ;;  %v2041_v12 = vrot.slane %v2039_v35, 3  ;;  %v2044_v55 = vrot.slane %v2042_v40, 4  ;;  %v1109_v4 = vpack.c.bf16 %v9385_v50, %v14036_v39 }
  0xe3   : > { %v12619_v43 = vor.u32 %v1747_v1, %v1744_v32  ;;  %v1769_v32 = vshrl.u32 %v1313_v46, 16  ;;  %v1740_v1 = vsel %vm1624_vm15, %v1730_v20, %v1739_v44  ;;  %v1772_v45 = vshll.u32 %v1313_v46, 16 }
  0xe4   : > { %10218 = vmatmul.mubr.bf16.gmra.mrb[12].mxu0 %v1704_v26  ;;  %v2048_v26 = vshrl.u32 %v1108_v8, 16  ;;  %v498_v13 = vadd.s32 152, %v12239_v9  ;;  %v2057_v35 = vshrl.u32 %v1109_v4, 16  ;;  %vm12631_vm13 = vcmp.lt.s32.totalorder %v634_v48, 15 }
  0xe5   : > { %10221 = vmatprep.mubr.bf16.mxu0 %v1713_v18  ;;  %10250 = vmatpush3.bf16.msra.mxu0 %v11629_v16  ;;  %v1731_v16 = vsel %vm1624_vm15, %v1721_v60, %v1730_v20  ;;  %v2051_v18 = vshll.u32 %v1108_v8, 16  ;;  %v9386_v60 = vsel %vm12601_vm12, 1.0, %v14034_v33  ;;  %v1763_v33 = vshll.u32 %v1312_v27, 16 }
  0xe6   : > { %10251 = vmatprep.subr.bf16.mxu0 %v11630_v30  ;;  %v2050_v5 = vrot.slane %v2048_v26, 3  ;;  %v1110_v8 = vpack.c.bf16 %v9386_v60, %v14036_v39  ;;  %v2060_v26 = vshll.u32 %v1109_v4, 16  ;;  %v1749_v20 = vsel %vm1624_vm15, %v1739_v44, %v12619_v43 }
  0xe7   : > { %v2053_v22 = vrot.slane %v2051_v18, 4  ;;  %v1762_v50 = vrot.slane %v1760_v58, 3  ;;  %v1765_v27 = vrot.slane %v1763_v33, 4  ;;  %v12638_v60 = vrot.slane %v1769_v32, 3 }
  0xe8   : > { %v2066_v18 = vshrl.u32 %v1110_v8, 16  ;;  %v2059_v4 = vrot.slane %v2057_v35, 3  ;;  %v14180_v48 = vmov 0.0   ;;  %v500_v44 = vadd.s32 168, %v12239_v9 }
  0xe9   : > { %10252 = vmatpush3.bf16.msra.mxu0 %v11630_v30  ;;  %v1756_v30 = vrot.slane %v1754_v51, 4  ;;  %v2218_v51 = vshll.u32 %v12570_v42, 16  ;;  %v2054_v61 = vor.u32 %v2053_v22, %v2050_v5  ;;  %v2069_v42 = vshll.u32 %v1110_v8, 16 }
  0xea   : > { %10285 = vmatprep.subr.bf16.mxu0 %v12599_v21  ;;  %v9387_v5 = vsel %vm12631_vm13, 1.0, %v14180_v48  ;;  %v2062_v22 = vrot.slane %v2060_v26, 4  ;;  %v2068_v8 = vrot.slane %v2066_v18, 3  ;;  %v12655_v40 = vor.u32 %v2211_v11, %v12591_v28 }
  0xeb   : > { %v1757_v52 = vor.u32 %v1756_v30, %v1753_v24  ;;  %v1774_v24 = vrot.slane %v1772_v45, 4  ;;  %v2217_v30 = vrot.slane %v2215_v6, 4  ;;  %v2071_v58 = vrot.slane %v2069_v42, 4 }
  0xec   : > { %10222 = vmatmul.mubr.bf16.gmra.mrb[16].mxu0 %v1722_v37  ;;  %v12628_v37 = vsel %vm1624_vm15, %v12413_v34, %v2036_v19  ;;  %v11771_v34 = vld [vmem:[#allocation2 + $0x18] sm:$0xff]  ;;  %v1766_v6 = vor.u32 %v1765_v27, %v1762_v50  ;;  %v1111_v18 = vpack.c.bf16 %v9387_v5, %v14036_v39  ;;  %v662_v42 = vand.u32 15, %v500_v44 }
  0xed   : > { %10225 = vmatprep.mubr.bf16.mxu0 %v1731_v16  ;;  %14176 = vst [vmem:[#allocation33_spill] sm:$0xff] %v12628_v37  ;;  %v2045_v16 = vor.u32 %v2044_v55, %v2041_v12  ;;  %v2166_v46 = vmul.bf16 %v11771_v34, %v12628_v37  ;;  %v648_v12 = vand.u32 15, %v498_v13  ;;  %v11772_v13 = vld [vmem:[#allocation2 + $0x20] sm:$0xff]  ;;  %v2220_v50 = vrot.slane %v2218_v51, 5 }
  0xee   : > { %v2063_v27 = vor.u32 %v2062_v22, %v2059_v4  ;;  %v1775_v34 = vor.u32 %v1774_v24, %v12638_v60  ;;  %v2075_v44 = vshrl.u32 %v1111_v18, 16  ;;  %v2078_v39 = vshll.u32 %v1111_v18, 16 }
  0xef   : > { %v12641_v55 = vsel %vm1624_vm15, %v2036_v19, %v2045_v16  ;;  %v12648_v33 = vsel %vm1624_vm15, %v2045_v16, %v2054_v61  ;;  %v2224_v32 = vshrl.u32 %v2166_v46, 16  ;;  %v2204_v19 = vor.u32 %v12588_v29, %v12553_v23  ;;  %v11773_v16 = vld [vmem:[#allocation2 + $0x28] sm:$0xff] }
  0xf0   : > { %14179 = vst [vmem:[#allocation34_spill] sm:$0xff] %v12641_v55  ;;  %14181 = vst [vmem:[#allocation35_spill] sm:$0xff] %v12648_v33  ;;  %v2227_v45 = vshll.u32 %v2166_v46, 16  ;;  %v2167_v35 = vmul.bf16 %v11772_v13, %v12641_v55  ;;  %vm1026_vm14 = vcmp.lt.s32.totalorder %v648_v12, 15  ;;  %v2168_v26 = vmul.bf16 %v11773_v16, %v12648_v33 }
  0xf1   : > { %v2072_v23 = vor.u32 %v2071_v58, %v2068_v8  ;;  %v1767_v29 = vsel %vm1624_vm15, %v1757_v52, %v1766_v6  ;;  %v9388_v46 = vsel %vm1026_vm14, 1.0, %v14180_v48  ;;  %v2226_v11 = vrot.slane %v2224_v32, 4 }
  0xf2   : > { %v2229_v12 = vrot.slane %v2227_v45, 5  ;;  %v2233_v13 = vshrl.u32 %v2167_v35, 16  ;;  %v2236_v16 = vshll.u32 %v2167_v35, 16  ;;  %v2242_v5 = vshrl.u32 %v2168_v26, 16  ;;  %v11775_v35 = vld [vmem:[#allocation2 + $0x38] sm:$0xff] }
  0xf3   : > { %vm1028_vm1 = vcmp.lt.s32.totalorder %v662_v42, 15  ;;  %v12665_v51 = vsel %vm1624_vm15, %v2054_v61, %v2063_v27  ;;  %v14184_v60 = vmov 1.0   ;;  %v504_v22 = vadd.s32 200, %v12239_v9 }
  0xf4   : > { %10226 = vmatmul.mubr.bf16.gmra.mrb[20].mxu0 %v1740_v1  ;;  %v502_v1 = vadd.s32 184, %v12239_v9  ;;  %14182 = vst [vmem:[#allocation36_spill] sm:$0xff] %v12665_v51  ;;  %v1112_v24 = vpack.c.bf16 %v9388_v46, %v14184_v60  ;;  %v2213_v8 = vsel %vm1136_vm6, %v2204_v19, %v12655_v40  ;;  %v2221_v58 = vor.u32 %v2220_v50, %v2217_v30 }
  0xf5   : > { %10229 = vmatprep.mubr.bf16.mxu0 %v1749_v20  ;;  %v1758_v20 = vsel %vm1624_vm15, %v12619_v43, %v1757_v52  ;;  %v2245_v43 = vshll.u32 %v2168_v26, 16  ;;  %v12668_v52 = vsel %vm1624_vm15, %v2063_v27, %v2072_v23  ;;  %v9389_v32 = vsel %vm1028_vm1, 1.0, %v14180_v48 }
  0xf6   : > { %v676_v28 = vand.u32 15, %v502_v1  ;;  %14183 = vst [vmem:[#allocation37_spill] sm:$0xff] %v12668_v52  ;;  %v506_v61 = vadd.s32 216, %v12239_v9  ;;  %v11774_v1 = vld [vmem:[#allocation2 + $0x30] sm:$0xff]  ;;  %v2170_v26 = vmul.bf16 %v11775_v35, %v12668_v52  ;;  %v2077_v18 = vrot.slane %v2075_v44, 3 }
  0xf7   : > { %v2169_v45 = vmul.bf16 %v11774_v1, %v12665_v51  ;;  %v2080_v42 = vrot.slane %v2078_v39, 4  ;;  %v12683_v27 = vor.u32 %v2229_v12, %v2226_v11  ;;  %v2087_v46 = vshll.u32 %v1112_v24, 16 }
  0xf8   : > { %vm12671_vm2 = vcmp.lt.s32.totalorder %v676_v28, 15  ;;  %v2235_v19 = vrot.slane %v2233_v13, 4  ;;  %v1113_v30 = vpack.c.bf16 %v9389_v32, %v14184_v60  ;;  %v690_v28 = vand.u32 15, %v504_v22 }
  0xf9   : > { %v9390_v50 = vsel %vm12671_vm2, 1.0, %v14180_v48  ;;  %v2238_v1 = vrot.slane %v2236_v16, 5  ;;  %v2244_v51 = vrot.slane %v2242_v5, 4  ;;  %v2247_v33 = vrot.slane %v2245_v43, 5  ;;  %v11632_v5 = vld [vmem:[#allocation6 + $0xc8] sm:$0xff]  }
  0xfa   : > { %v704_v35 = vand.u32 15, %v506_v61  ;;  %v2251_v39 = vshrl.u32 %v2169_v45, 16  ;;  %v2254_v44 = vshll.u32 %v2169_v45, 16  ;;  %v2263_v11 = vshll.u32 %v2170_v26, 16 }
  0xfb   : > { %v2089_v13 = vrot.slane %v2087_v46, 4  ;;  %v2093_v32 = vshrl.u32 %v1113_v30, 16  ;;  %v2096_v52 = vshll.u32 %v1113_v30, 16  ;;  %vm1032_vm3 = vcmp.lt.s32.totalorder %v690_v28, 15 }
  0xfc   : > { %10230 = vmatmul.mubr.bf16.gmra.mrb[24].mxu0 %v1758_v20  ;;  %v1776_v20 = vsel %vm1624_vm15, %v1766_v6, %v1775_v34  ;;  %v2260_v6 = vshrl.u32 %v2170_v26, 16  ;;  %v2081_v34 = vor.u32 %v2080_v42, %v2077_v18  ;;  %v508_v4 = vadd.s32 232, %v12239_v9 }
  0xfd   : > { %10233 = vmatprep.mubr.bf16.mxu0 %v1767_v29  ;;  %v2084_v29 = vshrl.u32 %v1112_v24, 16  ;;  %v1114_v24 = vpack.c.bf16 %v9390_v50, %v14184_v60  ;;  %vm1034_vm4 = vcmp.lt.s32.totalorder %v704_v35, 15  ;;  %v510_v16 = vadd.s32 248, %v12239_v9 }
  0xfe   : > { %v12693_v43 = vsel %vm1624_vm15, %v2072_v23, %v2081_v34  ;;  %v2222_v22 = vsel %vm1136_vm6, %v12655_v40, %v2221_v58  ;;  %v9391_v45 = vsel %vm1032_vm3, 1.0, %v14180_v48  ;;  %v2231_v26 = vsel %vm1136_vm6, %v2221_v58, %v12683_v27 }
  0xff   : > { %v2086_v12 = vrot.slane %v2084_v29, 3  ;;  %v2102_v61 = vshrl.u32 %v1114_v24, 16  ;;  %v2105_v18 = vshll.u32 %v1114_v24, 16  ;;  %v718_v42 = vand.u32 15, %v508_v4  ;;  %v11776_v29 = vld [vmem:[#allocation2 + $0x40] sm:$0xff] }
 0x100   : > { %v2171_v9 = vmul.bf16 %v11776_v29, %v12693_v43  ;;  %v9392_v46 = vsel %vm1034_vm4, 1.0, %v14180_v48  ;;  %v732_v23 = vand.u32 15, %v510_v16  ;;  %v2248_v30 = vor.u32 %v2247_v33, %v2244_v51 }
 0x101   : > { %v2253_v50 = vrot.slane %v2251_v39, 4  ;;  %v2095_v40 = vrot.slane %v2093_v32, 3  ;;  %v2098_v28 = vrot.slane %v2096_v52, 4  ;;  %v2256_v35 = vrot.slane %v2254_v44, 5 }
 0x102   : > { %v2107_v24 = vrot.slane %v2105_v18, 4  ;;  %v1116_v4 = vpack.c.bf16 %v9392_v46, %v14184_v60  ;;  %vm1036_vm5 = vcmp.lt.s32.totalorder %v718_v42, 15  ;;  %v2265_v33 = vrot.slane %v2263_v11, 5 }
 0x103   : > { %v2269_v51 = vshrl.u32 %v2171_v9, 16  ;;  %v2272_v52 = vshll.u32 %v2171_v9, 16  ;;  %vm1038_vm7 = vcmp.lt.s32.totalorder %v732_v23, 15  ;;  %v2099_v39 = vor.u32 %v2098_v28, %v2095_v40 }
 0x104   : > { %10234 = vmatmul.mubr.bf16.gmra.mrb[28].mxu0 %v1776_v20  ;;  %v2239_v20 = vor.u32 %v2238_v1, %v2235_v19  ;;  %v1115_v19 = vpack.c.bf16 %v9391_v45, %v14184_v60  ;;  %v11633_v1 = vld [vmem:[#allocation6 + $0xd0] sm:$0xff]   ;;  %v9393_v16 = vsel %vm1036_vm5, 1.0, %v14180_v48  ;;  %v2120_v45 = vshrl.u32 %v1116_v4, 16 }
 0x105   : > { %10253 = vmatprep.mubr.bf16.mxu0 %v2213_v8  ;;  %v2090_v8 = vor.u32 %v2089_v13, %v2086_v12  ;;  %v2262_v12 = vrot.slane %v2260_v6, 4  ;;  %v2104_v13 = vrot.slane %v2102_v61, 3  ;;  %v11777_v6 = vld [vmem:[#allocation2 + $0x48] sm:$0xff]  ;;  %v9394_v18 = vsel %vm1038_vm7, 1.0, %v14180_v48 }
 0x106   : > { %v2240_v44 = vsel %vm1136_vm6, %v12683_v27, %v2239_v20  ;;  %v2111_v32 = vshrl.u32 %v1115_v19, 16  ;;  %v2114_v11 = vshll.u32 %v1115_v19, 16  ;;  %v2271_v42 = vrot.slane %v2269_v51, 4 }
 0x107   : > { %v12704_v58 = vsel %vm1624_vm15, %v2081_v34, %v2090_v8  ;;  %v2108_v61 = vor.u32 %v2107_v24, %v2104_v13  ;;  %v12715_v27 = vsel %vm1624_vm15, %v2090_v8, %v2099_v39  ;;  %v1117_v29 = vpack.c.bf16 %v9393_v16, %v14184_v60  ;;  %v11778_v8 = vld [vmem:[#allocation2 + $0x50] sm:$0xff] }
 0x108   : > { %14187 = vst [vmem:[#allocation38_spill] sm:$0xff] %v12704_v58  ;;  %v2172_v34 = vmul.bf16 %v11777_v6, %v12704_v58  ;;  %14188 = vst [vmem:[#allocation39_spill] sm:$0xff] %v12715_v27  ;;  %v2257_v9 = vor.u32 %v2256_v35, %v2253_v50  ;;  %v2266_v46 = vor.u32 %v2265_v33, %v2262_v12  ;;  %v2113_v28 = vrot.slane %v2111_v32, 3  ;;  %v11779_v33 = vld [vmem:[#allocation2 + $0x58] sm:$0xff] }
 0x109   : > { %v12719_v40 = vsel %vm1624_vm15, %v2099_v39, %v2108_v61  ;;  %v2116_v48 = vrot.slane %v2114_v11, 4  ;;  %v1118_v19 = vpack.c.bf16 %v9394_v18, %v14184_v60  ;;  %v2274_v13 = vrot.slane %v2272_v52, 5  ;;  %v11636_v52 = vld [vmem:[#allocation6 + $0xe8] sm:$0xff]  }
 0x10a   : > { %v2281_v23 = vshll.u32 %v2172_v34, 16  ;;  %14189 = vst [vmem:[#allocation40_spill] sm:$0xff] %v12719_v40  ;;  %v2173_v24 = vmul.bf16 %v11778_v8, %v12715_v27  ;;  %v2132_v50 = vshll.u32 %v1117_v29, 16  ;;  %v2258_v35 = vsel %vm1136_vm6, %v2248_v30, %v2257_v9 }
 0x10b   : > { %v2174_v39 = vmul.bf16 %v11779_v33, %v12719_v40  ;;  %v2267_v6 = vsel %vm1136_vm6, %v2257_v9, %v2266_v46  ;;  %v2117_v60 = vor.u32 %v2116_v48, %v2113_v28  ;;  %v2141_v32 = vshll.u32 %v1118_v19, 16 }
 0x10c   : > { %10254 = vmatmul.mubr.bf16.vlgmr.msra.gmra.mrb[0].mxu0 %v2222_v22  ;;  %v2249_v22 = vsel %vm1136_vm6, %v2239_v20, %v2248_v30  ;;  %v2278_v20 = vshrl.u32 %v2172_v34, 16  ;;  %v2138_v34 = vshrl.u32 %v1118_v19, 16  ;;  %v2287_v16 = vshrl.u32 %v2173_v24, 16 }
 0x10d   : > { %10286 = vmatpush3.bf16.msra.mxu0 %v12599_v21  ;;  %10257 = vmatprep.mubr.bf16.mxu0 %v2231_v26  ;;  %v11634_v21 = vld [vmem:[#allocation6 + $0xd8] sm:$0xff]   ;;  %v2123_v26 = vshll.u32 %v1116_v4, 16  ;;  %v2122_v4 = vrot.slane %v2120_v45, 3  ;;  %v2275_v45 = vor.u32 %v2274_v13, %v2271_v42  ;;  %v12727_v9 = vsel %vm1624_vm15, %v2108_v61, %v2117_v60 }
 0x10e   : > { %10287 = vmatprep.subr.bf16.mxu0 %v11632_v5  ;;  %v2280_v12 = vrot.slane %v2278_v20, 4  ;;  %v2299_v20 = vshll.u32 %v2174_v39, 16  ;;  %14190 = vst [vmem:[#allocation41_spill] sm:$0xff] %v12727_v9  ;;  %v2143_v28 = vrot.slane %v2141_v32, 4  ;;  %v362_v13 = vld [vmem:[%s12225_s13 + $0x7c] sm:$0xf] }
 0x10f   : > { %v2125_v51 = vrot.slane %v2123_v26, 4  ;;  %v11637_v26 = vld [vmem:[#allocation6 + $0xf0] sm:$0xff]   ;;  %v2276_v42 = vsel %vm1136_vm6, %v2266_v46, %v2275_v45  ;;  %v11638_v61 = vld [vmem:[#allocation6 + $0xf8] sm:$0xff]   ;;  %v9362_v46 = vcombine.low %v362_v13, %v362_v13 }
 0x110   : > { %v2606_v13 = vld [vmem:[#allocation2 + $0x8] sm:$0xf8] }
 0x111   : > { %10288 = vmatpush3.bf16.msra.mxu0 %v11632_v5  ;;  %v11635_v5 = vld [vmem:[#allocation6 + $0xe0] sm:$0xff]   ;;  %v2126_v11 = vor.u32 %v2125_v51, %v2122_v4  ;;  %477 = vst [vmem:[#allocation2 + $0x88] sm:$0xf] %v9362_v46 }
 0x112   : > { %10289 = vmatprep.subr.bf16.mxu0 %v11633_v1 }
 0x113   : > { %v12730_v48 = vsel %vm1624_vm15, %v2117_v60, %v2126_v11 }
 0x114   : > { %10258 = vmatmul.mubr.bf16.gmra.mrb[4].mxu0 %v2240_v44  ;;  %v2129_v44 = vshrl.u32 %v1117_v29, 16  ;;  %v2296_v29 = vshrl.u32 %v2174_v39, 16  ;;  %14191 = vst [vmem:[#allocation42_spill] sm:$0xff] %v12730_v48 }
 0x115   : > { %10261 = vmatprep.mubr.bf16.mxu0 %v2249_v22  ;;  %10290 = vmatpush3.bf16.msra.mxu0 %v11633_v1  ;;  %v2283_v1 = vrot.slane %v2281_v23, 5  ;;  %v2290_v22 = vshll.u32 %v2173_v24, 16  ;;  %v2140_v23 = vrot.slane %v2138_v34, 3  ;;  %v2289_v24 = vrot.slane %v2287_v16, 4 }
 0x116   : > { %10291 = vmatprep.subr.bf16.mxu0 %v11634_v21  ;;  %v2131_v30 = vrot.slane %v2129_v44, 3  ;;  %v2298_v44 = vrot.slane %v2296_v29, 4 }
 0x117   : > { %v2284_v18 = vor.u32 %v2283_v1, %v2280_v12  ;;  %v2292_v4 = vrot.slane %v2290_v22, 5  ;;  %v12737_v1 = vor.u32 %v2143_v28, %v2140_v23  ;;  %v12746_v22 = vld [vmem:[#allocation6 + $0x100] sm:$0xff]  }
 0x119   : > { %10292 = vmatpush3.bf16.msra.mxu0 %v11634_v21  ;;  %v2134_v21 = vrot.slane %v2132_v50, 4  ;;  %v2285_v8 = vsel %vm1136_vm6, %v2275_v45, %v2284_v18  ;;  %v2301_v50 = vrot.slane %v2299_v20, 5  ;;  %14192 = vst [vmem:[#allocation43_spill] sm:$0xff] %v12737_v1  ;;  %v2293_v39 = vor.u32 %v2292_v4, %v2289_v24  ;;  %v12755_v24 = vld [vmem:[#allocation2 + $0x10] sm:$0xff] }
 0x11a   : > { %10293 = vmatprep.subr.bf16.mxu0 %v11635_v5  ;;  %v2624_v46 = vmul.bf16 %v12755_v24, %v12402_v17 }
 0x11b   : > { %v2135_v19 = vor.u32 %v2134_v21, %v2131_v30  ;;  %v2294_v45 = vsel %vm1136_vm6, %v2284_v18, %v2293_v39 }
 0x11c   : > { %10262 = vmatmul.mubr.bf16.gmra.mrb[8].mxu0 %v2258_v35  ;;  %v11781_v35 = vld [vmem:[#allocation2 + $0x68] sm:$0xff] }
 0x11d   : > { %10265 = vmatprep.mubr.bf16.mxu0 %v2267_v6  ;;  %10294 = vmatpush3.bf16.msra.mxu0 %v11635_v5  ;;  %v11780_v5 = vld [vmem:[#allocation2 + $0x60] sm:$0xff]  ;;  %v2176_v12 = vmul.bf16 %v11781_v35, %v12730_v48  ;;  %v12740_v33 = vsel %vm1624_vm15, %v2126_v11, %v2135_v19  ;;  %v12744_v16 = vsel %vm1624_vm15, %v2135_v19, %v12737_v1 }
 0x11e   : > { %10295 = vmatprep.subr.bf16.mxu0 %v11636_v52  ;;  %v2175_v51 = vmul.bf16 %v11780_v5, %v12727_v9  ;;  %14193 = vst [vmem:[#allocation44_spill] sm:$0xff] %v12740_v33  ;;  %14194 = vst [vmem:[#allocation45_spill] sm:$0xff] %v12744_v16  ;;  %v2177_v11 = vmul.bf16 %v12575_v10, %v12740_v33  ;;  %v2002_v19 = vld [vmem:[#allocation2 + $0x80] sm:$0x1f] }
 0x11f   : > { %v2314_v34 = vshrl.u32 %v2176_v12, 16  ;;  %v2317_v32 = vshll.u32 %v2176_v12, 16  ;;  %v2179_v35 = vmul.bf16 %v12737_v1, %v2002_v19 }
 0x120   : > { %v2305_v6 = vshrl.u32 %v2175_v51, 16  ;;  %v2308_v60 = vshll.u32 %v2175_v51, 16  ;;  %v2323_v28 = vshrl.u32 %v2177_v11, 16  ;;  %v2623_v51 = vmul.bf16 %v2606_v13, %v12382_v53 }
 0x121   : > { %10296 = vmatpush3.bf16.msra.mxu0 %v11636_v52  ;;  %v2302_v52 = vor.u32 %v2301_v50, %v2298_v44  ;;  %v2316_v20 = vrot.slane %v2314_v34, 4  ;;  %v2319_v23 = vrot.slane %v2317_v32, 5  ;;  %v2341_v32 = vshrl.u32 %v2179_v35, 16 }
 0x122   : > { %10297 = vmatprep.subr.bf16.mxu0 %v11637_v26  ;;  %v2307_v30 = vrot.slane %v2305_v6, 4  ;;  %v2310_v21 = vrot.slane %v2308_v60, 5  ;;  %v2661_v6 = vshll.u32 %v2623_v51, 16  ;;  %v12763_v60 = vld [vmem:[#allocation2 + $0x18] sm:$0xff] }
 0x123   : > { %v2303_v29 = vsel %vm1136_vm6, %v2293_v39, %v2302_v52  ;;  %v2320_v4 = vor.u32 %v2319_v23, %v2316_v20  ;;  %v2658_v39 = vshrl.u32 %v2623_v51, 16  ;;  %v2343_v23 = vrot.slane %v2341_v32, 4 }
 0x124   : > { %10266 = vmatmul.mubr.bf16.gmra.mrb[12].mxu0 %v2276_v42  ;;  %v2326_v42 = vshll.u32 %v2177_v11, 16  ;;  %v2311_v10 = vor.u32 %v2310_v21, %v2307_v30  ;;  %v2344_v11 = vshll.u32 %v2179_v35, 16  ;;  %v2669_v30 = vshll.u32 %v2624_v46, 16  ;;  %v12765_v21 = vld [vmem:[#allocation2 + $0x20] sm:$0xff]  ;;  %v12775_v35 = vld [vmem:[#allocation2 + $0x30] sm:$0xff] }
 0x125   : > { %10269 = vmatprep.mubr.bf16.mxu0 %v2285_v8  ;;  %10298 = vmatpush3.bf16.msra.mxu0 %v11637_v26  ;;  %v2178_v26 = vmul.bf16 %v12609_v14, %v12744_v16  ;;  %v2325_v14 = vrot.slane %v2323_v28, 4 }
 0x126   : > { %10299 = vmatprep.subr.bf16.mxu0 %v11638_v61  ;;  %v2328_v5 = vrot.slane %v2326_v42, 5  ;;  %v2321_v12 = vsel %vm1136_vm6, %v2311_v10, %v2320_v4  ;;  %v2346_v28 = vrot.slane %v2344_v11, 5  ;;  %v2625_v42 = vmul.bf16 %v12763_v60, %v12361_v62 }
 0x127   : > { %v2332_v18 = vshrl.u32 %v2178_v26, 16  ;;  %v2335_v8 = vshll.u32 %v2178_v26, 16  ;;  %v2660_v26 = vrot.slane %v2658_v39, 3 }
 0x128   : > { %v2329_v34 = vor.u32 %v2328_v5, %v2325_v14  ;;  %v2675_v14 = vshrl.u32 %v2625_v42, 16  ;;  %v2678_v5 = vshll.u32 %v2625_v42, 16  ;;  %v12785_v42 = vld [vmem:[#allocation2 + $0x40] sm:$0xff] }
 0x129   : > { %10300 = vmatpush3.bf16.msra.mxu0 %v11638_v61  ;;  %v2312_v61 = vsel %vm1136_vm6, %v2302_v52, %v2311_v10  ;;  %v2334_v44 = vrot.slane %v2332_v18, 4  ;;  %v2337_v50 = vrot.slane %v2335_v8, 5  ;;  %v2666_v52 = vshrl.u32 %v2624_v46, 16 }
 0x12a   : > { %10333 = vmatprep.subr.bf16.mxu0 %v12746_v22  ;;  %v2330_v20 = vsel %vm1136_vm6, %v2320_v4, %v2329_v34  ;;  %v2671_v10 = vrot.slane %v2669_v30, 4  ;;  %v2626_v18 = vmul.bf16 %v12765_v21, %v12420_v41  ;;  %v2347_v8 = vor.u32 %v2346_v28, %v2343_v23  ;;  %v12783_v28 = vld [vmem:[#allocation2 + $0x38] sm:$0xff] }
 0x12b   : > { %v2668_v13 = vrot.slane %v2666_v52, 3  ;;  %v2677_v46 = vrot.slane %v2675_v14, 3  ;;  %v2680_v39 = vrot.slane %v2678_v5, 4  ;;  %v2628_v52 = vmul.bf16 %v12775_v35, %v12460_v63  ;;  %v11640_v14 = vld [vmem:[#allocation6 + $0x108] sm:$0xff]  }
 0x12c   : > { %10270 = vmatmul.mubr.bf16.gmra.mrb[16].mxu0 %v2294_v45  ;;  %v2338_v45 = vor.u32 %v2337_v50, %v2334_v44  ;;  %v2684_v4 = vshrl.u32 %v2626_v18, 16  ;;  %v2687_v44 = vshll.u32 %v2626_v18, 16  ;;  %v12773_v50 = vld [vmem:[#allocation2 + $0x28] sm:$0xff]  ;;  %v2629_v18 = vmul.bf16 %v12783_v28, %v12468_v15 }
 0x12d   : > { %10273 = vmatprep.mubr.bf16.mxu0 %v2303_v29  ;;  %v2663_v29 = vrot.slane %v2661_v6, 4  ;;  %v2627_v6 = vmul.bf16 %v12773_v50, %v12443_v36  ;;  %v2681_v30 = vor.u32 %v2680_v39, %v2677_v46  ;;  %v2702_v23 = vshrl.u32 %v2628_v52, 16  ;;  %v11641_v39 = vld [vmem:[#allocation6 + $0x110] sm:$0xff]  }
 0x12e   : > { %v2339_v19 = vsel %vm1136_vm6, %v2329_v34, %v2338_v45  ;;  %v2686_v32 = vrot.slane %v2684_v4, 3  ;;  %v2689_v11 = vrot.slane %v2687_v44, 4  ;;  %v2630_v4 = vmul.bf16 %v12785_v42, %v12474_v59 }
 0x12f   : > { %v2664_v51 = vor.u32 %v2663_v29, %v2660_v26  ;;  %v2693_v26 = vshrl.u32 %v2627_v6, 16  ;;  %v2696_v29 = vshll.u32 %v2627_v6, 16  ;;  %v2704_v5 = vrot.slane %v2702_v23, 3 }
 0x130   : > { %v2720_v6 = vshrl.u32 %v2630_v4, 16 }
 0x132   : > { %v2722_v23 = vrot.slane %v2720_v6, 3 }
 0x134   : > { %10274 = vmatmul.mubr.bf16.gmra.mrb[20].mxu0 %v2312_v61  ;;  %v2672_v61 = vor.u32 %v2671_v10, %v2668_v13  ;;  %v2695_v13 = vrot.slane %v2693_v26, 3  ;;  %v2698_v10 = vrot.slane %v2696_v29, 4 }
 0x135   : > { %10277 = vmatprep.mubr.bf16.mxu0 %v2321_v12  ;;  %v2348_v12 = vsel %vm1136_vm6, %v2338_v45, %v2347_v8  ;;  %v2705_v45 = vshll.u32 %v2628_v52, 16 }
 0x136   : > { %v2673_v34 = vsel %vm1624_vm15, %v2664_v51, %v2672_v61  ;;  %v2699_v44 = vor.u32 %v2698_v10, %v2695_v13 }
 0x137   : > { %v2707_v51 = vrot.slane %v2705_v45, 4 }
 0x139   : > { %v2708_v46 = vor.u32 %v2707_v51, %v2704_v5  ;;  %v12804_v51 = vld [vmem:[#allocation2 + $0x58] sm:$0xff] }
 0x13b   : > { %v2709_v29 = vsel %vm1624_vm15, %v2699_v44, %v2708_v46 }
 0x13c   : > { %10278 = vmatmul.mubr.bf16.gmra.mrb[24].mxu0 %v2330_v20  ;;  %v2690_v20 = vor.u32 %v2689_v11, %v2686_v32  ;;  %v12794_v32 = vld [vmem:[#allocation2 + $0x48] sm:$0xff]  ;;  %v12796_v11 = vld [vmem:[#allocation2 + $0x50] sm:$0xff] }
 0x13d   : > { %10281 = vmatprep.mubr.bf16.mxu0 %v2339_v19  ;;  %v2682_v19 = vsel %vm1624_vm15, %v2672_v61, %v2681_v30  ;;  %v2714_v61 = vshll.u32 %v2629_v18, 16  ;;  %v2632_v13 = vmul.bf16 %v12796_v11, %v12494_v25 }
 0x13e   : > { %v2691_v8 = vsel %vm1624_vm15, %v2681_v30, %v2690_v20  ;;  %v2700_v52 = vsel %vm1624_vm15, %v2690_v20, %v2699_v44  ;;  %v12806_v44 = vld [vmem:[#allocation2 + $0x60] sm:$0xff] }
 0x13f   : > { %v2716_v26 = vrot.slane %v2714_v61, 4  ;;  %v2741_v5 = vshll.u32 %v2632_v13, 16 }
 0x144   : > { %10282 = vmatmul.mubr.bf16.gmra.mrb[28].mxu0 %v2348_v12  ;;  %v2711_v12 = vshrl.u32 %v2629_v18, 16 }
 0x145   : > { %10301 = vmatprep.mubr.bf16.mxu0 %v2673_v34  ;;  %v2723_v34 = vshll.u32 %v2630_v4, 16  ;;  %v11643_v4 = vld [vmem:[#allocation6 + $0x120] sm:$0xff]  }
 0x146   : > { %v2713_v30 = vrot.slane %v2711_v12, 3 }
 0x147   : > { %v2725_v45 = vrot.slane %v2723_v34, 4  ;;  %v2633_v34 = vmul.bf16 %v12804_v51, %v12510_v47 }
 0x148   : > { %v2717_v10 = vor.u32 %v2716_v26, %v2713_v30  ;;  %v2743_v30 = vrot.slane %v2741_v5, 4  ;;  %v2634_v26 = vmul.bf16 %v12806_v44, %v12515_v38 }
 0x14a   : > { %v2718_v12 = vsel %vm1624_vm15, %v2708_v46, %v2717_v10  ;;  %v2750_v46 = vshll.u32 %v2633_v34, 16 }
 0x14c   : > { %10302 = vmatmul.mubr.bf16.vlgmr.msra.gmra.mrb[0].mxu0 %v2682_v19  ;;  %v11642_v19 = vld [vmem:[#allocation6 + $0x118] sm:$0xff]   ;;  %v2752_v38 = vrot.slane %v2750_v46, 4 }
 0x14d   : > { %10334 = vmatpush3.bf16.msra.mxu0 %v12746_v22  ;;  %10305 = vmatprep.mubr.bf16.mxu0 %v2691_v8  ;;  %v2631_v22 = vmul.bf16 %v12794_v32, %v12489_v56  ;;  %v2726_v8 = vor.u32 %v2725_v45, %v2722_v23  ;;  %v2747_v23 = vshrl.u32 %v2633_v34, 16 }
 0x14e   : > { %10335 = vmatprep.subr.bf16.mxu0 %v11640_v14 }
 0x14f   : > { %v2729_v20 = vshrl.u32 %v2631_v22, 16  ;;  %v2732_v18 = vshll.u32 %v2631_v22, 16  ;;  %v11644_v22 = vld [vmem:[#allocation6 + $0x128] sm:$0xff]   ;;  %v2749_v5 = vrot.slane %v2747_v23, 3 }
 0x151   : > { %10336 = vmatpush3.bf16.msra.mxu0 %v11640_v14  ;;  %v2738_v14 = vshrl.u32 %v2632_v13, 16  ;;  %v2731_v61 = vrot.slane %v2729_v20, 3  ;;  %v2734_v6 = vrot.slane %v2732_v18, 4  ;;  %v2759_v13 = vshll.u32 %v2634_v26, 16  ;;  %v12814_v20 = vld [vmem:[#allocation2 + $0x68] sm:$0xff]  ;;  %v12816_v18 = vld [vmem:[#allocation2 + $0x70] sm:$0xff] }
 0x152   : > { %10337 = vmatprep.subr.bf16.mxu0 %v11641_v39  ;;  %v2636_v34 = vmul.bf16 %v12816_v18, %v12548_v3 }
 0x154   : > { %10306 = vmatmul.mubr.bf16.gmra.mrb[4].mxu0 %v2700_v52  ;;  %v2740_v52 = vrot.slane %v2738_v14, 3  ;;  %v2774_v23 = vshrl.u32 %v2636_v34, 16  ;;  %v2777_v46 = vshll.u32 %v2636_v34, 16 }
 0x155   : > { %10309 = vmatprep.mubr.bf16.mxu0 %v2709_v29  ;;  %10338 = vmatpush3.bf16.msra.mxu0 %v11641_v39  ;;  %v2727_v39 = vsel %vm1624_vm15, %v2717_v10, %v2726_v8  ;;  %v2735_v29 = vor.u32 %v2734_v6, %v2731_v61  ;;  %v11645_v10 = vld [vmem:[#allocation6 + $0x130] sm:$0xff]   ;;  %v2761_v6 = vrot.slane %v2759_v13, 4 }
 0x156   : > { %10339 = vmatprep.subr.bf16.mxu0 %v11642_v19  ;;  %v2744_v45 = vor.u32 %v2743_v30, %v2740_v52  ;;  %v2753_v52 = vor.u32 %v2752_v38, %v2749_v5  ;;  %v2779_v5 = vrot.slane %v2777_v46, 4 }
 0x157   : > { %v2736_v14 = vsel %vm1624_vm15, %v2726_v8, %v2735_v29 }
 0x158   : > { %v2745_v61 = vsel %vm1624_vm15, %v2735_v29, %v2744_v45  ;;  %v12826_v29 = vld [vmem:[#allocation2 + $0x80] sm:$0xff] }
 0x159   : > { %10340 = vmatpush3.bf16.msra.mxu0 %v11642_v19  ;;  %v2756_v19 = vshrl.u32 %v2634_v26, 16 }
 0x15a   : > { %10341 = vmatprep.subr.bf16.mxu0 %v11643_v4 }
 0x15c   : > { %10310 = vmatmul.mubr.bf16.gmra.mrb[8].mxu0 %v2718_v12  ;;  %v2635_v12 = vmul.bf16 %v12814_v20, %v12528_v57  ;;  %v12824_v57 = vld [vmem:[#allocation2 + $0x78] sm:$0xff] }
 0x15d   : > { %10313 = vmatprep.mubr.bf16.mxu0 %v2727_v39  ;;  %10342 = vmatpush3.bf16.msra.mxu0 %v11643_v4  ;;  %v2758_v4 = vrot.slane %v2756_v19, 3  ;;  %v11647_v39 = vld [vmem:[#allocation6 + $0x138] sm:$0xff]   ;;  %v2754_v19 = vsel %vm1624_vm15, %v2744_v45, %v2753_v52 }
 0x15e   : > { %10343 = vmatprep.subr.bf16.mxu0 %v11644_v22  ;;  %v2765_v30 = vshrl.u32 %v2635_v12, 16  ;;  %v2768_v8 = vshll.u32 %v2635_v12, 16  ;;  %v2638_v12 = vmul.bf16 %v12826_v29, %v12597_v7 }
 0x15f   : > { %v2762_v26 = vor.u32 %v2761_v6, %v2758_v4 }
 0x160   : > { %v2767_v13 = vrot.slane %v2765_v30, 3  ;;  %v2770_v3 = vrot.slane %v2768_v8, 4  ;;  %v2792_v34 = vshrl.u32 %v2638_v12, 16  ;;  %v2795_v30 = vshll.u32 %v2638_v12, 16  ;;  %v12834_v8 = vld [vmem:[#allocation2 + $0x88] sm:$0xf] }
 0x161   : > { %10344 = vmatpush3.bf16.msra.mxu0 %v11644_v22  ;;  %v11648_v22 = vld [vmem:[#allocation6 + $0x140] sm:$0xff]   ;;  %v2763_v38 = vsel %vm1624_vm15, %v2753_v52, %v2762_v26 }
 0x162   : > { %10345 = vmatprep.subr.bf16.mxu0 %v11645_v10  ;;  %v2794_v7 = vrot.slane %v2792_v34, 3  ;;  %v3102_v34 = vrot.slane %v12755_v24, 4 }
 0x164   : > { %10314 = vmatmul.mubr.bf16.gmra.mrb[12].mxu0 %v2736_v14  ;;  %v2637_v14 = vmul.bf16 %v12824_v57, %v12559_v49 }
 0x165   : > { %10317 = vmatprep.mubr.bf16.mxu0 %v2745_v61  ;;  %10346 = vmatpush3.bf16.msra.mxu0 %v11645_v10  ;;  %v2776_v10 = vrot.slane %v2774_v23, 3  ;;  %v2771_v61 = vor.u32 %v2770_v3, %v2767_v13  ;;  %v2639_v23 = vmul.bf16 %v12834_v8, %v12580_v0 }
 0x166   : > { %10347 = vmatprep.subr.bf16.mxu0 %v11647_v39  ;;  %v2783_v4 = vshrl.u32 %v2637_v14, 16  ;;  %v2786_v6 = vshll.u32 %v2637_v14, 16 }
 0x167   : > { %v2780_v45 = vor.u32 %v2779_v5, %v2776_v10  ;;  %v2801_v13 = vshrl.u32 %v2639_v23, 16  ;;  %v2804_v14 = vshll.u32 %v2639_v23, 16  ;;  %v11649_v23 = vld [vmem:[#allocation6 + $0x148] sm:$0xff]  }
 0x168   : > { %v2785_v49 = vrot.slane %v2783_v4, 3  ;;  %v2788_v52 = vrot.slane %v2786_v6, 4  ;;  %v12842_v4 = vld [vmem:[#allocation2 + $0x8] sm:$0xf0] }
 0x169   : > { %10348 = vmatpush3.bf16.msra.mxu0 %v11647_v39  ;;  %v2772_v39 = vsel %vm1624_vm15, %v2762_v26, %v2771_v61  ;;  %v2781_v46 = vsel %vm1624_vm15, %v2771_v61, %v2780_v45  ;;  %v2803_v5 = vrot.slane %v2801_v13, 3  ;;  %v2806_v12 = vrot.slane %v2804_v14, 4 }
 0x16a   : > { %10381 = vmatprep.subr.bf16.mxu0 %v11648_v22  ;;  %v2789_v3 = vor.u32 %v2788_v52, %v2785_v49  ;;  %v3101_v61 = vrot.slane %v12842_v4, 4 }
 0x16b   : > { %v2807_v6 = vor.u32 %v2806_v12, %v2803_v5  ;;  %v11652_v5 = vld [vmem:[#allocation6 + $0x160] sm:$0xff]  }
 0x16c   : > { %10318 = vmatmul.mubr.bf16.gmra.mrb[16].mxu0 %v2754_v19  ;;  %v2797_v19 = vrot.slane %v2795_v30, 4  ;;  %v2790_v10 = vsel %vm1624_vm15, %v2780_v45, %v2789_v3  ;;  %v3103_v30 = vsel %vm1365_vm0, %v3101_v61, %v3102_v34  ;;  %v3106_v45 = vrot.slane %v12765_v21, 4 }
 0x16d   : > { %10321 = vmatprep.mubr.bf16.mxu0 %v2763_v38  ;;  %v3116_v61 = vrot.slane %v12794_v32, 4 }
 0x16e   : > { %v2798_v38 = vor.u32 %v2797_v19, %v2794_v7  ;;  %v12849_v7 = vrot.slane %v12763_v60, 4  ;;  %v3110_v19 = vrot.slane %v12775_v35, 4 }
 0x170   : > { %v2799_v26 = vsel %vm1624_vm15, %v2789_v3, %v2798_v38  ;;  %v2808_v49 = vsel %vm1624_vm15, %v2798_v38, %v2807_v6  ;;  %v12856_v52 = vsel %vm1365_vm0, %v12849_v7, %v3106_v45  ;;  %v11650_v3 = vld [vmem:[#allocation6 + $0x150] sm:$0xff]   ;;  %v11651_v38 = vld [vmem:[#allocation6 + $0x158] sm:$0xff]   ;;  %v11653_v6 = vld [vmem:[#allocation6 + $0x168] sm:$0xff]  }
 0x174   : > { %10322 = vmatmul.mubr.bf16.gmra.mrb[20].mxu0 %v2772_v39  ;;  %v3105_v39 = vsel %vm1365_vm0, %v3102_v34, %v12849_v7  ;;  %v3118_v34 = vrot.slane %v12796_v11, 4 }
 0x175   : > { %10325 = vmatprep.mubr.bf16.mxu0 %v2781_v46  ;;  %v3108_v46 = vrot.slane %v12773_v50, 4 }
 0x177   : > { %v12862_v13 = vsel %vm1365_vm0, %v3106_v45, %v3108_v46  ;;  %v12865_v14 = vsel %vm1365_vm0, %v3108_v46, %v3110_v19  ;;  %v12885_v45 = vsel %vm1365_vm0, %v3116_v61, %v3118_v34  ;;  %v3122_v46 = vrot.slane %v12806_v44, 4 }
 0x178   : > { %14198 = vst [vmem:[#allocation49_spill] sm:$0xff] %v12885_v45 }
 0x17c   : > { %10326 = vmatmul.mubr.bf16.gmra.mrb[24].mxu0 %v2790_v10  ;;  %v3114_v10 = vrot.slane %v12785_v42, 4 }
 0x17d   : > { %10329 = vmatprep.mubr.bf16.mxu0 %v2799_v26 }
 0x184   : > { %10330 = vmatmul.mubr.bf16.gmra.mrb[28].mxu0 %v2808_v49  ;;  %v11654_v49 = vld [vmem:[#allocation6 + $0x170] sm:$0xff]  }
 0x185   : > { %10349 = vmatprep.mubr.bf16.mxu0 %v3103_v30  ;;  %v12882_v30 = vsel %vm1365_vm0, %v3114_v10, %v3116_v61 }
 0x186   : > { %14197 = vst [vmem:[#allocation48_spill] sm:$0xff] %v12882_v30 }
 0x18c   : > { %10350 = vmatmul.mubr.bf16.vlgmr.msra.gmra.mrb[0].mxu0 %v3105_v39  ;;  %v11655_v39 = vld [vmem:[#allocation6 + $0x178] sm:$0xff]  }
 0x18d   : > { %10382 = vmatpush3.bf16.msra.mxu0 %v11648_v22  ;;  %10353 = vmatprep.mubr.bf16.mxu0 %v12856_v52  ;;  %v3112_v22 = vrot.slane %v12783_v28, 4 }
 0x18e   : > { %10383 = vmatprep.subr.bf16.mxu0 %v11649_v23 }
 0x18f   : > { %v12872_v12 = vsel %vm1365_vm0, %v3110_v19, %v3112_v22  ;;  %v12875_v26 = vsel %vm1365_vm0, %v3112_v22, %v3114_v10  ;;  %v12891_v19 = vld [vmem:[#allocation6 + $0x180] sm:$0xff]   ;;  %v3124_v22 = vrot.slane %v12814_v20, 4  ;;  %v3126_v10 = vrot.slane %v12816_v18, 4 }
 0x190   : > { %14195 = vst [vmem:[#allocation46_spill] sm:$0xff] %v12872_v12  ;;  %14196 = vst [vmem:[#allocation47_spill] sm:$0xff] %v12875_v26 }
 0x191   : > { %10384 = vmatpush3.bf16.msra.mxu0 %v11649_v23  ;;  %v3120_v23 = vrot.slane %v12804_v51, 4  ;;  %v12910_v61 = vsel %vm1365_vm0, %v3124_v22, %v3126_v10 }
 0x192   : > { %10385 = vmatprep.subr.bf16.mxu0 %v11650_v3  ;;  %14202 = vst [vmem:[#allocation53_spill] sm:$0xff] %v12910_v61 }
 0x194   : > { %10354 = vmatmul.mubr.bf16.gmra.mrb[4].mxu0 %v12862_v13 }
 0x195   : > { %10357 = vmatprep.mubr.bf16.mxu0 %v12865_v14  ;;  %10386 = vmatpush3.bf16.msra.mxu0 %v11650_v3  ;;  %v12894_v3 = vsel %vm1365_vm0, %v3118_v34, %v3120_v23  ;;  %v3393_v34 = vmul.bf16 %v12755_v24, %v12534_v31 }
 0x196   : > { %10387 = vmatprep.subr.bf16.mxu0 %v11651_v38  ;;  %14199 = vst [vmem:[#allocation50_spill] sm:$0xff] %v12894_v3 }
 0x199   : > { %10388 = vmatpush3.bf16.msra.mxu0 %v11651_v38  ;;  %v12897_v38 = vsel %vm1365_vm0, %v3120_v23, %v3122_v46 }
 0x19a   : > { %10389 = vmatprep.subr.bf16.mxu0 %v11652_v5  ;;  %14200 = vst [vmem:[#allocation51_spill] sm:$0xff] %v12897_v38 }
 0x19c   : > { %10358 = vmatmul.mubr.bf16.gmra.mrb[8].mxu0 %v12872_v12  ;;  %v14206_v12 = vld [vmem:[#allocation35_spill] sm:$0xff] }
 0x19d   : > { %10361 = vmatprep.mubr.bf16.mxu0 %v12875_v26  ;;  %10390 = vmatpush3.bf16.msra.mxu0 %v11652_v5  ;;  %v12905_v5 = vsel %vm1365_vm0, %v3122_v46, %v3124_v22 }
 0x19e   : > { %10391 = vmatprep.subr.bf16.mxu0 %v11653_v6  ;;  %14201 = vst [vmem:[#allocation52_spill] sm:$0xff] %v12905_v5 }
 0x1a1   : > { %10392 = vmatpush3.bf16.msra.mxu0 %v11653_v6  ;;  %v3392_v6 = vmul.bf16 %v12842_v4, %v12326_v2 }
 0x1a2   : > { %10393 = vmatprep.subr.bf16.mxu0 %v11654_v49 }
 0x1a3   : > { %v3427_v23 = vshrl.u32 %v3392_v6, 16  ;;  %v3430_v46 = vshll.u32 %v3392_v6, 16 }
 0x1a4   : > { %10362 = vmatmul.mubr.bf16.gmra.mrb[12].mxu0 %v12882_v30 }
 0x1a5   : > { %10365 = vmatprep.mubr.bf16.mxu0 %v12885_v45  ;;  %10394 = vmatpush3.bf16.msra.mxu0 %v11654_v49  ;;  %v3128_v49 = vrot.slane %v12824_v57, 4  ;;  %v3429_v24 = vrot.slane %v3427_v23, 4  ;;  %v3432_v31 = vrot.slane %v3430_v46, 5  ;;  %v3395_v45 = vmul.bf16 %v12765_v21, %v12628_v37 }
 0x1a6   : > { %10395 = vmatprep.subr.bf16.mxu0 %v11655_v39  ;;  %v3396_v37 = vmul.bf16 %v12773_v50, %v12641_v55  ;;  %v14207_v55 = vld [vmem:[#allocation36_spill] sm:$0xff] }
 0x1a7   : > { %v12921_v4 = vsel %vm1365_vm0, %v3126_v10, %v3128_v49  ;;  %v3132_v10 = vrot.slane %v12834_v8, 4  ;;  %v3453_v23 = vshrl.u32 %v3395_v45, 16  ;;  %v3456_v26 = vshll.u32 %v3395_v45, 16 }
 0x1a8   : > { %14204 = vst [vmem:[#allocation55_spill] sm:$0xff] %v12921_v4  ;;  %v3397_v8 = vmul.bf16 %v12775_v35, %v14206_v12  ;;  %v3465_v45 = vshll.u32 %v3396_v37, 16 }
 0x1a9   : > { %10396 = vmatpush3.bf16.msra.mxu0 %v11655_v39  ;;  %v12918_v39 = vrot.slane %v12826_v29, 4 }
 0x1aa   : > { %10429 = vmatprep.subr.bf16.mxu0 %v12891_v19 }
 0x1ab   : > { %14203 = vst [vmem:[#allocation54_spill] sm:$0xff] %v12918_v39  ;;  %v12925_v22 = vsel %vm1365_vm0, %v3128_v49, %v12918_v39  ;;  %v3433_v49 = vor.u32 %v3432_v31, %v3429_v24  ;;  %v3133_v46 = vsel %vm1365_vm0, %v12918_v39, %v3132_v10  ;;  %v3462_v31 = vshrl.u32 %v3396_v37, 16 }
 0x1ac   : > { %10366 = vmatmul.mubr.bf16.gmra.mrb[16].mxu0 %v12894_v3  ;;  %v3438_v3 = vshll.u32 %v3393_v34, 16  ;;  %14205 = vst [vmem:[#allocation56_spill] sm:$0xff] %v12925_v22  ;;  %v3474_v24 = vshll.u32 %v3397_v8, 16 }
 0x1ad   : > { %10369 = vmatprep.mubr.bf16.mxu0 %v12897_v38  ;;  %v3435_v38 = vshrl.u32 %v3393_v34, 16 }
 0x1ae   : > { %v3476_v12 = vrot.slane %v3474_v24, 5 }
 0x1af   : > { %v3437_v2 = vrot.slane %v3435_v38, 4 }
 0x1b4   : > { %10370 = vmatmul.mubr.bf16.gmra.mrb[20].mxu0 %v12905_v5  ;;  %v3440_v5 = vrot.slane %v3438_v3, 5 }
 0x1b5   : > { %10373 = vmatprep.mubr.bf16.mxu0 %v12910_v61  ;;  %v3394_v61 = vmul.bf16 %v12763_v60, %v12503_v54 }
 0x1b6   : > { %v3441_v30 = vor.u32 %v3440_v5, %v3437_v2 }
 0x1b7   : > { %v3444_v6 = vshrl.u32 %v3394_v61, 16  ;;  %v3447_v34 = vshll.u32 %v3394_v61, 16  ;;  %v3471_v61 = vshrl.u32 %v3397_v8, 16 }
 0x1b8   : > { %v3442_v54 = vsel %vm1136_vm6, %v3433_v49, %v3441_v30  ;;  %v3398_v49 = vmul.bf16 %v12783_v28, %v14207_v55 }
 0x1b9   : > { %v3446_v38 = vrot.slane %v3444_v6, 4  ;;  %v3449_v3 = vrot.slane %v3447_v34, 5  ;;  %v3464_v6 = vrot.slane %v3462_v31, 4  ;;  %v3467_v34 = vrot.slane %v3465_v45, 5 }
 0x1ba   : > { %v3473_v39 = vrot.slane %v3471_v61, 4  ;;  %v3400_v61 = vmul.bf16 %v12794_v32, %v12693_v43 }
 0x1bb   : > { %v3450_v2 = vor.u32 %v3449_v3, %v3446_v38  ;;  %v3468_v37 = vor.u32 %v3467_v34, %v3464_v6  ;;  %v11658_v38 = vld [vmem:[#allocation6 + $0x190] sm:$0xff]   ;;  %v11659_v6 = vld [vmem:[#allocation6 + $0x198] sm:$0xff]  }
 0x1bc   : > { %10374 = vmatmul.mubr.bf16.gmra.mrb[24].mxu0 %v12921_v4  ;;  %v3455_v4 = vrot.slane %v3453_v23, 4  ;;  %v11657_v23 = vld [vmem:[#allocation6 + $0x188] sm:$0xff]   ;;  %v3501_v34 = vshll.u32 %v3400_v61, 16 }
 0x1bd   : > { %10377 = vmatprep.mubr.bf16.mxu0 %v12925_v22  ;;  %v3458_v22 = vrot.slane %v3456_v26, 5  ;;  %v3451_v10 = vsel %vm1136_vm6, %v3441_v30, %v3450_v2  ;;  %v3483_v30 = vshll.u32 %v3398_v49, 16 }
 0x1bf   : > { %v3459_v5 = vor.u32 %v3458_v22, %v3455_v4  ;;  %v3480_v4 = vshrl.u32 %v3398_v49, 16  ;;  %v3477_v22 = vor.u32 %v3476_v12, %v3473_v39  ;;  %v3485_v45 = vrot.slane %v3483_v30, 5 }
 0x1c0   : > { %v3401_v12 = vmul.bf16 %v12796_v11, %v12704_v58  ;;  %v3503_v30 = vrot.slane %v3501_v34, 5 }
 0x1c1   : > { %v3460_v26 = vsel %vm1136_vm6, %v3450_v2, %v3459_v5  ;;  %v3469_v2 = vsel %vm1136_vm6, %v3459_v5, %v3468_v37  ;;  %v3482_v31 = vrot.slane %v3480_v4, 4  ;;  %v3478_v24 = vsel %vm1136_vm6, %v3468_v37, %v3477_v22 }
 0x1c2   : > { %v3498_v5 = vshrl.u32 %v3400_v61, 16 }
 0x1c3   : > { %v3486_v39 = vor.u32 %v3485_v45, %v3482_v31  ;;  %v11661_v45 = vld [vmem:[#allocation6 + $0x1a8] sm:$0xff]  }
 0x1c4   : > { %10378 = vmatmul.mubr.bf16.gmra.mrb[28].mxu0 %v3133_v46  ;;  %v14208_v46 = vld [vmem:[#allocation37_spill] sm:$0xff]  ;;  %v3500_v4 = vrot.slane %v3498_v5, 4 }
 0x1c5   : > { %10397 = vmatprep.mubr.bf16.mxu0 %v3442_v54  ;;  %v3399_v54 = vmul.bf16 %v12785_v42, %v14208_v46  ;;  %v3487_v37 = vsel %vm1136_vm6, %v3477_v22, %v3486_v39 }
 0x1c6   : > { %v3504_v61 = vor.u32 %v3503_v30, %v3500_v4  ;;  %v11663_v30 = vld [vmem:[#allocation6 + $0x1b8] sm:$0xff]  }
 0x1c7   : > { %v3489_v3 = vshrl.u32 %v3399_v54, 16  ;;  %v3492_v8 = vshll.u32 %v3399_v54, 16  ;;  %v11660_v54 = vld [vmem:[#allocation6 + $0x1a0] sm:$0xff]  }
 0x1cc   : > { %10398 = vmatmul.mubr.bf16.vlgmr.msra.gmra.mrb[0].mxu0 %v3451_v10  ;;  %v3494_v10 = vrot.slane %v3492_v8, 5 }
 0x1cd   : > { %10430 = vmatpush3.bf16.msra.mxu0 %v12891_v19  ;;  %10401 = vmatprep.mubr.bf16.mxu0 %v3460_v26  ;;  %v3491_v19 = vrot.slane %v3489_v3, 4  ;;  %v3507_v26 = vshrl.u32 %v3401_v12, 16  ;;  %v3402_v3 = vmul.bf16 %v12804_v51, %v12715_v27 }
 0x1ce   : > { %10431 = vmatprep.subr.bf16.mxu0 %v11657_v23 }
 0x1cf   : > { %v3495_v49 = vor.u32 %v3494_v10, %v3491_v19  ;;  %v3519_v22 = vshll.u32 %v3402_v3, 16 }
 0x1d1   : > { %10432 = vmatpush3.bf16.msra.mxu0 %v11657_v23  ;;  %v3510_v23 = vshll.u32 %v3401_v12, 16  ;;  %v3496_v8 = vsel %vm1136_vm6, %v3486_v39, %v3495_v49  ;;  %v11662_v12 = vld [vmem:[#allocation6 + $0x1b0] sm:$0xff]   ;;  %v3505_v39 = vsel %vm1136_vm6, %v3495_v49, %v3504_v61  ;;  %v3521_v34 = vrot.slane %v3519_v22, 5 }
 0x1d2   : > { %10433 = vmatprep.subr.bf16.mxu0 %v11658_v38 }
 0x1d3   : > { %v3512_v31 = vrot.slane %v3510_v23, 5 }
 0x1d4   : > { %10402 = vmatmul.mubr.bf16.gmra.mrb[4].mxu0 %v3469_v2  ;;  %v3509_v2 = vrot.slane %v3507_v26, 4  ;;  %v3404_v26 = vmul.bf16 %v12814_v20, %v12727_v9 }
 0x1d5   : > { %10405 = vmatprep.mubr.bf16.mxu0 %v3478_v24  ;;  %10434 = vmatpush3.bf16.msra.mxu0 %v11658_v38  ;;  %v3403_v38 = vmul.bf16 %v12806_v44, %v12719_v40  ;;  %v3516_v24 = vshrl.u32 %v3402_v3, 16 }
 0x1d6   : > { %10435 = vmatprep.subr.bf16.mxu0 %v11659_v6  ;;  %v3513_v19 = vor.u32 %v3512_v31, %v3509_v2  ;;  %v3537_v49 = vshll.u32 %v3404_v26, 16 }
 0x1d7   : > { %v3525_v10 = vshrl.u32 %v3403_v38, 16  ;;  %v3518_v5 = vrot.slane %v3516_v24, 4 }
 0x1d8   : > { %v3514_v23 = vsel %vm1136_vm6, %v3504_v61, %v3513_v19  ;;  %v3406_v61 = vmul.bf16 %v12824_v57, %v12740_v33 }
 0x1d9   : > { %10436 = vmatpush3.bf16.msra.mxu0 %v11659_v6  ;;  %v3528_v6 = vshll.u32 %v3403_v38, 16  ;;  %v3522_v3 = vor.u32 %v3521_v34, %v3518_v5 }
 0x1da   : > { %10437 = vmatprep.subr.bf16.mxu0 %v11660_v54  ;;  %v3552_v34 = vshrl.u32 %v3406_v61, 16 }
 0x1db   : > { %v3530_v4 = vrot.slane %v3528_v6, 5  ;;  %v3523_v24 = vsel %vm1136_vm6, %v3513_v19, %v3522_v3  ;;  %v3407_v6 = vmul.bf16 %v12826_v29, %v12744_v16  ;;  %v3391_v19 = vld [vmem:[#allocation2 + $0x88] sm:$0x1f] }
 0x1dc   : > { %10406 = vmatmul.mubr.bf16.gmra.mrb[8].mxu0 %v3487_v37  ;;  %v3527_v37 = vrot.slane %v3525_v10, 4  ;;  %v3539_v10 = vrot.slane %v3537_v49, 5  ;;  %v3554_v49 = vrot.slane %v3552_v34, 4 }
 0x1dd   : > { %10409 = vmatprep.mubr.bf16.mxu0 %v3496_v8  ;;  %10438 = vmatpush3.bf16.msra.mxu0 %v11660_v54  ;;  %v3405_v54 = vmul.bf16 %v12816_v18, %v12730_v48  ;;  %v3534_v8 = vshrl.u32 %v3404_v26, 16  ;;  %v3555_v26 = vshll.u32 %v3406_v61, 16  ;;  %v3853_v61 = vmul.bf16 %v12763_v60, %v12402_v17 }
 0x1de   : > { %10439 = vmatprep.subr.bf16.mxu0 %v11661_v45  ;;  %v3531_v2 = vor.u32 %v3530_v4, %v3527_v37  ;;  %v3561_v37 = vshrl.u32 %v3407_v6, 16  ;;  %v3564_v4 = vshll.u32 %v3407_v6, 16  ;;  %v3854_v60 = vmul.bf16 %v12765_v21, %v12361_v62 }
 0x1df   : > { %v3543_v31 = vshrl.u32 %v3405_v54, 16  ;;  %v3546_v38 = vshll.u32 %v3405_v54, 16  ;;  %v3536_v22 = vrot.slane %v3534_v8, 4  ;;  %v3835_v8 = vld [vmem:[#allocation2 + $0x10] sm:$0xf8]  ;;  %v3557_v33 = vrot.slane %v3555_v26, 5 }
 0x1e0   : > { %v3852_v16 = vmul.bf16 %v3835_v8, %v12382_v53  ;;  %v3895_v34 = vshrl.u32 %v3853_v61, 16  ;;  %v3898_v26 = vshll.u32 %v3853_v61, 16  ;;  %v3856_v21 = vmul.bf16 %v12775_v35, %v12443_v36 }
 0x1e1   : > { %10440 = vmatpush3.bf16.msra.mxu0 %v11661_v45  ;;  %v12966_v45 = vld [vmem:[#allocation6 + $0x1c0] sm:$0xff]   ;;  %v3548_v5 = vrot.slane %v3546_v38, 5  ;;  %v3566_v38 = vrot.slane %v3564_v4, 5  ;;  %v3858_v35 = vmul.bf16 %v12785_v42, %v12468_v15 }
 0x1e2   : > { %10441 = vmatprep.subr.bf16.mxu0 %v11662_v12 }
 0x1e4   : > { %10410 = vmatmul.mubr.bf16.gmra.mrb[12].mxu0 %v3505_v39  ;;  %v3532_v39 = vsel %vm1136_vm6, %v3522_v3, %v3531_v2 }
 0x1e5   : > { %10413 = vmatprep.mubr.bf16.mxu0 %v3514_v23  ;;  %10442 = vmatpush3.bf16.msra.mxu0 %v11662_v12  ;;  %v3545_v12 = vrot.slane %v3543_v31, 4  ;;  %v3540_v23 = vor.u32 %v3539_v10, %v3536_v22  ;;  %v3563_v31 = vrot.slane %v3561_v37, 4  ;;  %v3558_v22 = vor.u32 %v3557_v33, %v3554_v49 }
 0x1e6   : > { %10443 = vmatprep.subr.bf16.mxu0 %v11663_v30  ;;  %v3897_v33 = vrot.slane %v3895_v34, 3  ;;  %v3900_v49 = vrot.slane %v3898_v26, 4  ;;  %v3857_v34 = vmul.bf16 %v12783_v28, %v12460_v63 }
 0x1e7   : > { %v3549_v54 = vor.u32 %v3548_v5, %v3545_v12  ;;  %v3541_v3 = vsel %vm1136_vm6, %v3531_v2, %v3540_v23  ;;  %v3567_v6 = vor.u32 %v3566_v38, %v3563_v31  ;;  %v3887_v12 = vshrl.u32 %v3852_v16, 16 }
 0x1e8   : > { %v3890_v5 = vshll.u32 %v3852_v16, 16  ;;  %v3907_v31 = vshll.u32 %v3854_v60, 16  ;;  %v3901_v38 = vor.u32 %v3900_v49, %v3897_v33  ;;  %v11665_v49 = vld [vmem:[#allocation6 + $0x1c8] sm:$0xff]  }
 0x1e9   : > { %10444 = vmatpush3.bf16.msra.mxu0 %v11663_v30  ;;  %v3408_v30 = vmul.bf16 %v3391_v19, %v12737_v1  ;;  %v3559_v2 = vsel %vm1136_vm6, %v3549_v54, %v3558_v22  ;;  %v3568_v4 = vsel %vm1136_vm6, %v3558_v22, %v3567_v6 }
 0x1ea   : > { %10477 = vmatprep.subr.bf16.mxu0 %v12966_v45  ;;  %v3892_v8 = vrot.slane %v3890_v5, 4 }
 0x1eb   : > { %v3570_v10 = vshrl.u32 %v3408_v30, 16 }
 0x1ec   : > { %10414 = vmatmul.mubr.bf16.gmra.mrb[16].mxu0 %v3523_v24  ;;  %v3550_v24 = vsel %vm1136_vm6, %v3540_v23, %v3549_v54  ;;  %v3889_v23 = vrot.slane %v3887_v12, 3 }
 0x1ed   : > { %10417 = vmatprep.mubr.bf16.mxu0 %v3532_v39  ;;  %v3573_v39 = vshll.u32 %v3408_v30, 16  ;;  %v3572_v37 = vrot.slane %v3570_v10, 4  ;;  %v3855_v30 = vmul.bf16 %v12773_v50, %v12420_v41 }
 0x1ee   : > { %v3893_v54 = vor.u32 %v3892_v8, %v3889_v23 }
 0x1ef   : > { %v3575_v19 = vrot.slane %v3573_v39, 5  ;;  %v3916_v61 = vshll.u32 %v3855_v30, 16  ;;  %v3909_v39 = vrot.slane %v3907_v31, 4  ;;  %v3940_v31 = vshrl.u32 %v3858_v35, 16 }
 0x1f0   : > { %v3902_v12 = vsel %vm1624_vm15, %v3893_v54, %v3901_v38  ;;  %v3943_v54 = vshll.u32 %v3858_v35, 16 }
 0x1f1   : > { %v3576_v16 = vor.u32 %v3575_v19, %v3572_v37  ;;  %v3918_v50 = vrot.slane %v3916_v61, 4  ;;  %v3925_v37 = vshll.u32 %v3856_v21, 16  ;;  %v3931_v19 = vshrl.u32 %v3857_v34, 16 }
 0x1f3   : > { %v3577_v22 = vsel %vm1136_vm6, %v3567_v6, %v3576_v16  ;;  %v3934_v6 = vshll.u32 %v3857_v34, 16  ;;  %v3927_v8 = vrot.slane %v3925_v37, 4  ;;  %v3859_v16 = vmul.bf16 %v12794_v32, %v12474_v59 }
 0x1f4   : > { %10418 = vmatmul.mubr.bf16.gmra.mrb[20].mxu0 %v3541_v3  ;;  %v3904_v3 = vshrl.u32 %v3854_v60, 16  ;;  %v3860_v32 = vmul.bf16 %v12796_v11, %v12489_v56  ;;  %v11668_v11 = vld [vmem:[#allocation6 + $0x1e0] sm:$0xff]  }
 0x1f5   : > { %10421 = vmatprep.mubr.bf16.mxu0 %v3550_v24  ;;  %v3913_v24 = vshrl.u32 %v3855_v30, 16  ;;  %v3933_v30 = vrot.slane %v3931_v19, 3  ;;  %v3936_v28 = vrot.slane %v3934_v6, 4  ;;  %v3949_v61 = vshrl.u32 %v3859_v16, 16 }
 0x1f6   : > { %v3906_v10 = vrot.slane %v3904_v3, 3  ;;  %v3952_v42 = vshll.u32 %v3859_v16, 16 }
 0x1f7   : > { %v3915_v5 = vrot.slane %v3913_v24, 3  ;;  %v11666_v24 = vld [vmem:[#allocation6 + $0x1d0] sm:$0xff]  }
 0x1f8   : > { %v3910_v26 = vor.u32 %v3909_v39, %v3906_v10  ;;  %v3942_v10 = vrot.slane %v3940_v31, 3  ;;  %v3945_v39 = vrot.slane %v3943_v54, 4 }
 0x1fa   : > { %v3911_v23 = vsel %vm1624_vm15, %v3901_v38, %v3910_v26  ;;  %v3937_v38 = vor.u32 %v3936_v28, %v3933_v30  ;;  %v3946_v34 = vor.u32 %v3945_v39, %v3942_v10  ;;  %v11669_v28 = vld [vmem:[#allocation6 + $0x1e8] sm:$0xff]   ;;  %v14210_v10 = vld [vmem:[#allocation27_spill] sm:$0xff] }
 0x1fb   : > { %v3864_v39 = vmul.bf16 %v12816_v18, %v14210_v10  ;;  %v11672_v18 = vld [vmem:[#allocation6 + $0x200] sm:$0xff]  }
 0x1fc   : > { %10422 = vmatmul.mubr.bf16.gmra.mrb[24].mxu0 %v3559_v2  ;;  %v3922_v2 = vshrl.u32 %v3856_v21, 16  ;;  %v3947_v6 = vsel %vm1624_vm15, %v3937_v38, %v3946_v34 }
 0x1fd   : > { %10425 = vmatprep.mubr.bf16.mxu0 %v3568_v4  ;;  %v3919_v4 = vor.u32 %v3918_v50, %v3915_v5  ;;  %v11667_v5 = vld [vmem:[#allocation6 + $0x1d8] sm:$0xff]   ;;  %v3861_v50 = vmul.bf16 %v12804_v51, %v12494_v25 }
 0x1fe   : > { %v3924_v60 = vrot.slane %v3922_v2, 3  ;;  %v3961_v2 = vshll.u32 %v3860_v32, 16 }
 0x1ff   : > { %v3920_v33 = vsel %vm1624_vm15, %v3910_v26, %v3919_v4  ;;  %v3958_v26 = vshrl.u32 %v3860_v32, 16  ;;  %v3970_v19 = vshll.u32 %v3861_v50, 16 }
 0x200   : > { %v3928_v3 = vor.u32 %v3927_v8, %v3924_v60  ;;  %v3963_v60 = vrot.slane %v3961_v2, 4  ;;  %v3862_v8 = vmul.bf16 %v12806_v44, %v12510_v47  ;;  %v11670_v44 = vld [vmem:[#allocation6 + $0x1f0] sm:$0xff]  }
 0x202   : > { %v3938_v21 = vsel %vm1624_vm15, %v3928_v3, %v3937_v38  ;;  %v3979_v31 = vshll.u32 %v3862_v8, 16 }
 0x204   : > { %10426 = vmatmul.mubr.bf16.gmra.mrb[28].mxu0 %v3577_v22  ;;  %v3929_v22 = vsel %vm1624_vm15, %v3919_v4, %v3928_v3  ;;  %v3967_v4 = vshrl.u32 %v3861_v50, 16  ;;  %v3976_v3 = vshrl.u32 %v3862_v8, 16 }
 0x205   : > { %10445 = vmatprep.mubr.bf16.mxu0 %v3902_v12  ;;  %v3954_v12 = vrot.slane %v3952_v42, 4 }
 0x206   : > { %v3969_v35 = vrot.slane %v3967_v4, 3  ;;  %v3978_v42 = vrot.slane %v3976_v3, 3 }
 0x20c   : > { %10446 = vmatmul.mubr.bf16.vlgmr.msra.gmra.mrb[0].mxu0 %v3911_v23  ;;  %v3960_v23 = vrot.slane %v3958_v26, 3  ;;  %v3997_v26 = vshll.u32 %v3864_v39, 16 }
 0x20d   : > { %10478 = vmatpush3.bf16.msra.mxu0 %v12966_v45  ;;  %10449 = vmatprep.mubr.bf16.mxu0 %v3920_v33  ;;  %v3951_v45 = vrot.slane %v3949_v61, 3  ;;  %v3972_v33 = vrot.slane %v3970_v19, 4  ;;  %v13018_v19 = vld [vmem:[#allocation2 + $0x88] sm:$0xff] }
 0x20e   : > { %10479 = vmatprep.subr.bf16.mxu0 %v11665_v49  ;;  %v3964_v16 = vor.u32 %v3963_v60, %v3960_v23  ;;  %v3999_v23 = vrot.slane %v3997_v26, 4 }
 0x20f   : > { %v3955_v37 = vor.u32 %v3954_v12, %v3951_v45  ;;  %v3973_v54 = vor.u32 %v3972_v33, %v3969_v35  ;;  %v14211_v45 = vld [vmem:[#allocation29_spill] sm:$0xff]  ;;  %v14213_v33 = vld [vmem:[#allocation32_spill] sm:$0xff] }
 0x210   : > { %v3865_v12 = vmul.bf16 %v12824_v57, %v14211_v45  ;;  %v14212_v57 = vld [vmem:[#allocation30_spill] sm:$0xff] }
 0x211   : > { %10480 = vmatpush3.bf16.msra.mxu0 %v11665_v49  ;;  %v3956_v51 = vsel %vm1624_vm15, %v3946_v34, %v3955_v37  ;;  %v14209_v49 = vld [vmem:[#allocation26_spill] sm:$0xff]  ;;  %v3965_v61 = vsel %vm1624_vm15, %v3955_v37, %v3964_v16  ;;  %v3994_v34 = vshrl.u32 %v3864_v39, 16  ;;  %v3866_v60 = vmul.bf16 %v12826_v29, %v14212_v57 }
 0x212   : > { %10481 = vmatprep.subr.bf16.mxu0 %v11666_v24  ;;  %v3863_v30 = vmul.bf16 %v12814_v20, %v14209_v49  ;;  %v3974_v20 = vsel %vm1624_vm15, %v3964_v16, %v3973_v54  ;;  %v4003_v37 = vshrl.u32 %v3865_v12, 16  ;;  %v4006_v4 = vshll.u32 %v3865_v12, 16 }
 0x213   : > { %v4012_v16 = vshrl.u32 %v3866_v60, 16  ;;  %v4015_v3 = vshll.u32 %v3866_v60, 16  ;;  %v11680_v60 = vld [vmem:[#allocation8 + $0x40] sm:$0xff]  }
 0x214   : > { %10450 = vmatmul.mubr.bf16.gmra.mrb[4].mxu0 %v3929_v22  ;;  %v3985_v38 = vshrl.u32 %v3863_v30, 16  ;;  %v3981_v22 = vrot.slane %v3979_v31, 4  ;;  %v4008_v35 = vrot.slane %v4006_v4, 4  ;;  %10573 = vmatprep.subr.bf16.mxu1 %v11680_v60 }
 0x215   : > { %10453 = vmatprep.mubr.bf16.mxu0 %v3938_v21  ;;  %10482 = vmatpush3.bf16.msra.mxu0 %v11666_v24  ;;  %v3988_v24 = vshll.u32 %v3863_v30, 16  ;;  %v3867_v30 = vmul.bf16 %v13018_v19, %v14213_v33 }
 0x216   : > { %10483 = vmatprep.subr.bf16.mxu0 %v11667_v5  ;;  %v3987_v32 = vrot.slane %v3985_v38, 3  ;;  %v3982_v50 = vor.u32 %v3981_v22, %v3978_v42  ;;  %10574 = vmatpush3.bf16.msra.mxu1 %v11680_v60 }
 0x217   : > { %v3990_v21 = vrot.slane %v3988_v24, 4  ;;  %v4024_v38 = vshll.u32 %v3867_v30, 16  ;;  %v13026_v24 = vld [vmem:[#allocation2 + $0x90] sm:$0xf] }
 0x218   : > { %v3868_v42 = vmul.bf16 %v13026_v24, %v12580_v0 }
 0x219   : > { %10484 = vmatpush3.bf16.msra.mxu0 %v11667_v5  ;;  %v11671_v5 = vld [vmem:[#allocation6 + $0x1f8] sm:$0xff]   ;;  %v3991_v2 = vor.u32 %v3990_v21, %v3987_v32 }
 0x21a   : > { %10485 = vmatprep.subr.bf16.mxu0 %v11668_v11  ;;  %v4030_v21 = vshrl.u32 %v3868_v42, 16  ;;  %v4033_v12 = vshll.u32 %v3868_v42, 16  ;;  %v14222_v42 = vld [vmem:[#allocation28_spill] sm:$0xff] }
 0x21b   : > { %v3992_v8 = vsel %vm1624_vm15, %v3982_v50, %v3991_v2 }
 0x21c   : > { %10454 = vmatmul.mubr.bf16.gmra.mrb[8].mxu0 %v3947_v6  ;;  %v3996_v6 = vrot.slane %v3994_v34, 3  ;;  %v4032_v34 = vrot.slane %v4030_v21, 3  ;;  %v4035_v26 = vrot.slane %v4033_v12, 4 }
 0x21d   : > { %10457 = vmatprep.mubr.bf16.mxu0 %v3956_v51  ;;  %10486 = vmatpush3.bf16.msra.mxu0 %v11668_v11  ;;  %v3983_v11 = vsel %vm1624_vm15, %v3973_v54, %v3982_v50  ;;  %v4005_v51 = vrot.slane %v4003_v37, 3  ;;  %v4021_v54 = vshrl.u32 %v3867_v30, 16  ;;  %v4295_v37 = vld [vmem:[#allocation2 + $0x10] sm:$0xf0] }
 0x21e   : > { %10487 = vmatprep.subr.bf16.mxu0 %v11669_v28  ;;  %v4036_v4 = vor.u32 %v4035_v26, %v4032_v34  ;;  %v11675_v30 = vld [vmem:[#allocation6 + $0x218] sm:$0xff]   ;;  %v14225_v34 = vld [vmem:[#allocation54_spill] sm:$0xff] }
 0x21f   : > { %v4009_v31 = vor.u32 %v4008_v35, %v4005_v51  ;;  %v4023_v39 = vrot.slane %v4021_v54, 3  ;;  %v11673_v51 = vld [vmem:[#allocation6 + $0x208] sm:$0xff]   ;;  %v11674_v35 = vld [vmem:[#allocation6 + $0x210] sm:$0xff]  }
 0x220   : > { %v14219_v54 = vld [vmem:[#allocation51_spill] sm:$0xff] }
 0x221   : > { %10488 = vmatpush3.bf16.msra.mxu0 %v11669_v28  ;;  %v4000_v28 = vor.u32 %v3999_v23, %v3996_v6 }
 0x222   : > { %10489 = vmatprep.subr.bf16.mxu0 %v11670_v44 }
 0x223   : > { %v4001_v29 = vsel %vm1624_vm15, %v3991_v2, %v4000_v28  ;;  %v4010_v22 = vsel %vm1624_vm15, %v4000_v28, %v4009_v31  ;;  %v11676_v28 = vld [vmem:[#allocation6 + $0x220] sm:$0xff]  }
 0x224   : > { %10458 = vmatmul.mubr.bf16.gmra.mrb[12].mxu0 %v3965_v61  ;;  %v4017_v61 = vrot.slane %v4015_v3, 4  ;;  %v14215_v3 = vld [vmem:[#allocation47_spill] sm:$0xff] }
 0x225   : > { %10461 = vmatprep.mubr.bf16.mxu0 %v3974_v20  ;;  %10490 = vmatpush3.bf16.msra.mxu0 %v11670_v44  ;;  %v4014_v44 = vrot.slane %v4012_v16, 3  ;;  %v4026_v20 = vrot.slane %v4024_v38, 4  ;;  %v11677_v16 = vld [vmem:[#allocation6 + $0x228] sm:$0xff]   ;;  %v14220_v38 = vld [vmem:[#allocation52_spill] sm:$0xff] }
 0x226   : > { %10491 = vmatprep.subr.bf16.mxu0 %v11671_v5 }
 0x227   : > { %v4018_v32 = vor.u32 %v4017_v61, %v4014_v44  ;;  %v11782_v61 = vld [vmem:[#allocation2 + $0x18] sm:$0xff] }
 0x229   : > { %10492 = vmatpush3.bf16.msra.mxu0 %v11671_v5  ;;  %v4027_v5 = vor.u32 %v4026_v20, %v4023_v39  ;;  %v4019_v50 = vsel %vm1624_vm15, %v4009_v31, %v4018_v32  ;;  %v14217_v31 = vld [vmem:[#allocation49_spill] sm:$0xff]  ;;  %v14224_v20 = vld [vmem:[#allocation55_spill] sm:$0xff] }
 0x22a   : > { %10525 = vmatprep.subr.bf16.mxu0 %v11672_v18  ;;  %v14223_v39 = vld [vmem:[#allocation53_spill] sm:$0xff] }
 0x22b   : > { %v4028_v2 = vsel %vm1624_vm15, %v4018_v32, %v4027_v5  ;;  %v4037_v6 = vsel %vm1624_vm15, %v4027_v5, %v4036_v4  ;;  %v4359_v32 = vrot.slane %v13018_v19, 4  ;;  %v11783_v4 = vld [vmem:[#allocation2 + $0x20] sm:$0xff] }
 0x22c   : > { %10462 = vmatmul.mubr.bf16.gmra.mrb[16].mxu0 %v3983_v11  ;;  %v4330_v11 = vrot.slane %v4295_v37, 4 }
 0x22d   : > { %10465 = vmatprep.mubr.bf16.mxu0 %v3992_v8  ;;  %v11681_v8 = vld [vmem:[#allocation8 + $0x48] sm:$0xff]   ;;  %v4360_v26 = vsel %vm1365_vm0, %v14225_v34, %v4359_v32 }
 0x22e   : > { %v4332_v23 = vsel %vm1365_vm0, %v4330_v11, %v12849_v7  ;;  %10575 = vmatprep.subr.bf16.mxu1 %v11681_v8  ;;  %v14214_v7 = vld [vmem:[#allocation46_spill] sm:$0xff]  ;;  %v14226_v11 = vld [vmem:[#allocation24_spill] sm:$0xff] }
 0x22f   : > { %10576 = vmatpush3.bf16.msra.mxu1 %v11681_v8  ;;  %v11784_v8 = vld [vmem:[#allocation2 + $0x28] sm:$0xff] }
 0x234   : > { %10466 = vmatmul.mubr.bf16.gmra.mrb[20].mxu0 %v4001_v29  ;;  %v14221_v29 = vld [vmem:[#allocation13_spill] sm:$0xff] }
 0x235   : > { %10469 = vmatprep.mubr.bf16.mxu0 %v4010_v22  ;;  %v4621_v44 = vmul.bf16 %v4295_v37, %v14221_v29  ;;  %v4622_v22 = vmul.bf16 %v11782_v61, %v14222_v42  ;;  %v4623_v37 = vmul.bf16 %v11783_v4, %v14226_v11 }
 0x237   : > { %v4656_v21 = vshrl.u32 %v4621_v44, 16  ;;  %v4659_v12 = vshll.u32 %v4621_v44, 16  ;;  %v4664_v5 = vshrl.u32 %v4622_v22, 16  ;;  %v14229_v44 = vld [vmem:[#allocation34_spill] sm:$0xff] }
 0x23c   : > { %10470 = vmatmul.mubr.bf16.gmra.mrb[24].mxu0 %v4019_v50  ;;  %v4667_v50 = vshll.u32 %v4622_v22, 16 }
 0x23d   : > { %10473 = vmatprep.mubr.bf16.mxu0 %v4028_v2  ;;  %v4658_v2 = vrot.slane %v4656_v21, 4  ;;  %v11786_v21 = vld [vmem:[#allocation2 + $0x38] sm:$0xff] }
 0x23e   : > { %v4669_v60 = vrot.slane %v4667_v50, 5 }
 0x244   : > { %10474 = vmatmul.mubr.bf16.gmra.mrb[28].mxu0 %v4037_v6  ;;  %v4661_v6 = vrot.slane %v4659_v12, 5  ;;  %v14230_v12 = vld [vmem:[#allocation35_spill] sm:$0xff] }
 0x245   : > { %10493 = vmatprep.mubr.bf16.mxu0 %v4332_v23  ;;  %v4666_v23 = vrot.slane %v4664_v5, 4 }
 0x24c   : > { %10494 = vmatmul.mubr.bf16.vlgmr.msra.gmra.mrb[0].mxu0 %v12856_v52  ;;  %v14216_v52 = vld [vmem:[#allocation48_spill] sm:$0xff] }
 0x24d   : > { %10526 = vmatpush3.bf16.msra.mxu0 %v11672_v18  ;;  %10497 = vmatprep.mubr.bf16.mxu0 %v12862_v13  ;;  %v11678_v13 = vld [vmem:[#allocation6 + $0x230] sm:$0xff]   ;;  %v11679_v18 = vld [vmem:[#allocation6 + $0x238] sm:$0xff]  }
 0x24e   : > { %10527 = vmatprep.subr.bf16.mxu0 %v11673_v51 }
 0x251   : > { %10528 = vmatpush3.bf16.msra.mxu0 %v11673_v51  ;;  %v14227_v51 = vld [vmem:[#allocation33_spill] sm:$0xff] }
 0x252   : > { %10529 = vmatprep.subr.bf16.mxu0 %v11674_v35 }
 0x254   : > { %10498 = vmatmul.mubr.bf16.gmra.mrb[4].mxu0 %v12865_v14  ;;  %v14218_v14 = vld [vmem:[#allocation50_spill] sm:$0xff] }
 0x255   : > { %10501 = vmatprep.mubr.bf16.mxu0 %v14214_v7  ;;  %10530 = vmatpush3.bf16.msra.mxu0 %v11674_v35  ;;  %v4624_v35 = vmul.bf16 %v11784_v8, %v14227_v51  ;;  %v4361_v7 = vrot.slane %v13026_v24, 4  ;;  %v4626_v24 = vmul.bf16 %v11786_v21, %v14230_v12 }
 0x256   : > { %10531 = vmatprep.subr.bf16.mxu0 %v11675_v30 }
 0x259   : > { %10532 = vmatpush3.bf16.msra.mxu0 %v11675_v30  ;;  %v14228_v30 = vld [vmem:[#allocation56_spill] sm:$0xff] }
 0x25a   : > { %10533 = vmatprep.subr.bf16.mxu0 %v11676_v28 }
 0x25c   : > { %10502 = vmatmul.mubr.bf16.gmra.mrb[8].mxu0 %v14215_v3  ;;  %v4662_v3 = vor.u32 %v4661_v6, %v4658_v2  ;;  %v4700_v2 = vshrl.u32 %v4626_v24, 16 }
 0x25d   : > { %10505 = vmatprep.mubr.bf16.mxu0 %v14216_v52  ;;  %10534 = vmatpush3.bf16.msra.mxu0 %v11676_v28  ;;  %v4673_v28 = vshrl.u32 %v4623_v37, 16  ;;  %v4670_v52 = vor.u32 %v4669_v60, %v4666_v23  ;;  %v11787_v23 = vld [vmem:[#allocation2 + $0x40] sm:$0xff] }
 0x25e   : > { %10535 = vmatprep.subr.bf16.mxu0 %v11677_v16  ;;  %v4627_v60 = vmul.bf16 %v11787_v23, %v14207_v55 }
 0x25f   : > { %v4671_v22 = vsel %vm1136_vm6, %v4662_v3, %v4670_v52 }
 0x260   : > { %v4709_v3 = vshrl.u32 %v4627_v60, 16 }
 0x261   : > { %10536 = vmatpush3.bf16.msra.mxu0 %v11677_v16  ;;  %v4676_v16 = vshll.u32 %v4623_v37, 16 }
 0x262   : > { %10537 = vmatprep.subr.bf16.mxu0 %v11678_v13 }
 0x264   : > { %10506 = vmatmul.mubr.bf16.gmra.mrb[12].mxu0 %v14217_v31  ;;  %v4362_v31 = vsel %vm1365_vm0, %v4359_v32, %v4361_v7  ;;  %v4703_v32 = vshll.u32 %v4626_v24, 16  ;;  %v11788_v7 = vld [vmem:[#allocation2 + $0x48] sm:$0xff]  ;;  %v11790_v24 = vld [vmem:[#allocation2 + $0x58] sm:$0xff] }
 0x265   : > { %10509 = vmatprep.mubr.bf16.mxu0 %v14218_v14  ;;  %10538 = vmatpush3.bf16.msra.mxu0 %v11678_v13  ;;  %v4682_v13 = vshrl.u32 %v4624_v35, 16  ;;  %v4675_v14 = vrot.slane %v4673_v28, 4  ;;  %v4628_v28 = vmul.bf16 %v11788_v7, %v14208_v46 }
 0x266   : > { %10539 = vmatprep.subr.bf16.mxu0 %v11679_v18 }
 0x269   : > { %10540 = vmatpush3.bf16.msra.mxu0 %v11679_v18  ;;  %v4685_v18 = vshll.u32 %v4624_v35, 16  ;;  %v4702_v35 = vrot.slane %v4700_v2, 4 }
 0x26c   : > { %10510 = vmatmul.mubr.bf16.gmra.mrb[16].mxu0 %v14219_v54  ;;  %v4678_v54 = vrot.slane %v4676_v16, 5 }
 0x26d   : > { %10513 = vmatprep.mubr.bf16.mxu0 %v14220_v38  ;;  %v11785_v38 = vld [vmem:[#allocation2 + $0x30] sm:$0xff] }
 0x26e   : > { %v4625_v61 = vmul.bf16 %v11785_v38, %v14229_v44  ;;  %v4679_v5 = vor.u32 %v4678_v54, %v4675_v14  ;;  %v4711_v54 = vrot.slane %v4709_v3, 4 }
 0x270   : > { %v4691_v50 = vshrl.u32 %v4625_v61, 16  ;;  %v4694_v34 = vshll.u32 %v4625_v61, 16  ;;  %v4680_v4 = vsel %vm1136_vm6, %v4670_v52, %v4679_v5  ;;  %v4721_v52 = vshll.u32 %v4628_v28, 16  ;;  %v11789_v61 = vld [vmem:[#allocation2 + $0x50] sm:$0xff] }
 0x272   : > { %v4693_v37 = vrot.slane %v4691_v50, 4  ;;  %v4696_v6 = vrot.slane %v4694_v34, 5  ;;  %v4723_v21 = vrot.slane %v4721_v52, 5 }
 0x274   : > { %10514 = vmatmul.mubr.bf16.gmra.mrb[20].mxu0 %v14223_v39  ;;  %v4684_v39 = vrot.slane %v4682_v13, 4  ;;  %v4697_v16 = vor.u32 %v4696_v6, %v4693_v37  ;;  %v4712_v13 = vshll.u32 %v4627_v60, 16  ;;  %v11791_v60 = vld [vmem:[#allocation2 + $0x60] sm:$0xff] }
 0x275   : > { %10517 = vmatprep.mubr.bf16.mxu0 %v14224_v20  ;;  %v4687_v20 = vrot.slane %v4685_v18, 5 }
 0x276   : > { %v4714_v38 = vrot.slane %v4712_v13, 5 }
 0x278   : > { %v4715_v50 = vor.u32 %v4714_v38, %v4711_v54 }
 0x27c   : > { %10518 = vmatmul.mubr.bf16.gmra.mrb[24].mxu0 %v14228_v30  ;;  %v4705_v30 = vrot.slane %v4703_v32, 5 }
 0x27d   : > { %10521 = vmatprep.mubr.bf16.mxu0 %v4360_v26  ;;  %v4688_v26 = vor.u32 %v4687_v20, %v4684_v39 }
 0x27e   : > { %v4706_v18 = vor.u32 %v4705_v30, %v4702_v35 }
 0x27f   : > { %v4689_v8 = vsel %vm1136_vm6, %v4679_v5, %v4688_v26  ;;  %v4698_v14 = vsel %vm1136_vm6, %v4688_v26, %v4697_v16  ;;  %v4630_v5 = vmul.bf16 %v11790_v24, %v12704_v58 }
 0x280   : > { %v4707_v39 = vsel %vm1136_vm6, %v4697_v16, %v4706_v18  ;;  %v4716_v37 = vsel %vm1136_vm6, %v4706_v18, %v4715_v50 }
 0x281   : > { %v4739_v26 = vshll.u32 %v4630_v5, 16 }
 0x283   : > { %v4741_v7 = vrot.slane %v4739_v26, 5 }
 0x284   : > { %10522 = vmatmul.mubr.bf16.gmra.mrb[28].mxu0 %v4362_v31  ;;  %v4718_v31 = vshrl.u32 %v4628_v28, 16  ;;  %v11792_v28 = vld [vmem:[#allocation2 + $0x68] sm:$0xff] }
 0x285   : > { %10541 = vmatprep.mubr.bf16.mxu0 %v4671_v22  ;;  %v4629_v22 = vmul.bf16 %v11789_v61, %v12693_v43  ;;  %v4632_v16 = vmul.bf16 %v11792_v28, %v12719_v40 }
 0x286   : > { %v4720_v20 = vrot.slane %v4718_v31, 4 }
 0x287   : > { %v4727_v34 = vshrl.u32 %v4629_v22, 16  ;;  %v4730_v2 = vshll.u32 %v4629_v22, 16  ;;  %v4757_v18 = vshll.u32 %v4632_v16, 16  ;;  %v11793_v22 = vld [vmem:[#allocation2 + $0x70] sm:$0xff] }
 0x288   : > { %v4724_v32 = vor.u32 %v4723_v21, %v4720_v20 }
 0x289   : > { %v4729_v6 = vrot.slane %v4727_v34, 4  ;;  %v4732_v23 = vrot.slane %v4730_v2, 5  ;;  %v4759_v24 = vrot.slane %v4757_v18, 5 }
 0x28a   : > { %v4725_v35 = vsel %vm1136_vm6, %v4715_v50, %v4724_v32 }
 0x28b   : > { %v4733_v3 = vor.u32 %v4732_v23, %v4729_v6 }
 0x28c   : > { %10542 = vmatmul.mubr.bf16.vlgmr.msra.gmra.mrb[0].mxu0 %v4680_v4  ;;  %v4736_v4 = vshrl.u32 %v4630_v5, 16  ;;  %v11794_v5 = vld [vmem:[#allocation2 + $0x78] sm:$0xff] }
 0x28d   : > { %10545 = vmatprep.mubr.bf16.mxu0 %v4689_v8  ;;  %v4631_v8 = vmul.bf16 %v11791_v60, %v12715_v27  ;;  %v4734_v54 = vsel %vm1136_vm6, %v4724_v32, %v4733_v3  ;;  %v4634_v50 = vmul.bf16 %v11794_v5, %v12730_v48 }
 0x28e   : > { %v4738_v30 = vrot.slane %v4736_v4, 4 }
 0x28f   : > { %v4745_v13 = vshrl.u32 %v4631_v8, 16  ;;  %v4748_v31 = vshll.u32 %v4631_v8, 16  ;;  %v4775_v32 = vshll.u32 %v4634_v50, 16  ;;  %v11795_v8 = vld [vmem:[#allocation2 + $0x80] sm:$0xff] }
 0x290   : > { %v4742_v52 = vor.u32 %v4741_v7, %v4738_v30 }
 0x291   : > { %v4747_v38 = vrot.slane %v4745_v13, 4  ;;  %v4750_v61 = vrot.slane %v4748_v31, 5 }
 0x292   : > { %v4743_v20 = vsel %vm1136_vm6, %v4733_v3, %v4742_v52  ;;  %v14232_v3 = vld [vmem:[#allocation45_spill] sm:$0xff] }
 0x293   : > { %v4751_v34 = vor.u32 %v4750_v61, %v4747_v38  ;;  %v4636_v13 = vmul.bf16 %v13018_v19, %v14232_v3  ;;  %v4620_v61 = vld [vmem:[#allocation2 + $0x90] sm:$0x1f] }
 0x294   : > { %10546 = vmatmul.mubr.bf16.gmra.mrb[4].mxu0 %v4698_v14  ;;  %v4754_v14 = vshrl.u32 %v4632_v16, 16  ;;  %v4777_v16 = vrot.slane %v4775_v32, 5 }
 0x295   : > { %10549 = vmatprep.mubr.bf16.mxu0 %v4707_v39  ;;  %v4633_v39 = vmul.bf16 %v11793_v22, %v12727_v9  ;;  %v4752_v6 = vsel %vm1136_vm6, %v4742_v52, %v4751_v34  ;;  %v4790_v38 = vshrl.u32 %v4636_v13, 16  ;;  %v4793_v52 = vshll.u32 %v4636_v13, 16  ;;  %v11687_v13 = vld [vmem:[#allocation8 + $0x78] sm:$0xff]  }
 0x296   : > { %v4756_v21 = vrot.slane %v4754_v14, 4 }
 0x297   : > { %v4763_v2 = vshrl.u32 %v4633_v39, 16  ;;  %v4766_v4 = vshll.u32 %v4633_v39, 16  ;;  %v4792_v5 = vrot.slane %v4790_v38, 4  ;;  %v5271_v38 = vld [vmem:[#allocation2] sm:$0xf8] }
 0x298   : > { %v4760_v26 = vor.u32 %v4759_v24, %v4756_v21  ;;  %v4637_v21 = vmul.bf16 %v4620_v61, %v12737_v1 }
 0x299   : > { %v4765_v23 = vrot.slane %v4763_v2, 4  ;;  %v4768_v60 = vrot.slane %v4766_v4, 5 }
 0x29a   : > { %v4761_v7 = vsel %vm1136_vm6, %v4751_v34, %v4760_v26  ;;  %v4799_v34 = vshrl.u32 %v4637_v21, 16  ;;  %v4802_v2 = vshll.u32 %v4637_v21, 16 }
 0x29b   : > { %v4769_v31 = vor.u32 %v4768_v60, %v4765_v23 }
 0x29c   : > { %10550 = vmatmul.mubr.bf16.gmra.mrb[8].mxu0 %v4716_v37  ;;  %v4772_v37 = vshrl.u32 %v4634_v50, 16  ;;  %v4795_v50 = vrot.slane %v4793_v52, 5  ;;  %v4801_v32 = vrot.slane %v4799_v34, 4 }
 0x29d   : > { %10553 = vmatprep.mubr.bf16.mxu0 %v4725_v35  ;;  %v14231_v35 = vld [vmem:[#allocation44_spill] sm:$0xff]  ;;  %v4770_v22 = vsel %vm1136_vm6, %v4760_v26, %v4769_v31 }
 0x29e   : > { %v4635_v30 = vmul.bf16 %v11795_v8, %v14231_v35  ;;  %v4774_v28 = vrot.slane %v4772_v37, 4  ;;  %v4796_v4 = vor.u32 %v4795_v50, %v4792_v5  ;;  %v11682_v8 = vld [vmem:[#allocation8 + $0x50] sm:$0xff]   ;;  %v5288_v5 = vmul.bf16 %v5271_v38, %v12382_v53 }
 0x29f   : > { %10577 = vmatprep.subr.bf16.mxu1 %v11682_v8 }
 0x2a0   : > { %v4781_v14 = vshrl.u32 %v4635_v30, 16  ;;  %v4784_v18 = vshll.u32 %v4635_v30, 16  ;;  %10578 = vmatpush3.bf16.msra.mxu1 %v11682_v8  ;;  %v11683_v30 = vld [vmem:[#allocation8 + $0x58] sm:$0xff]   ;;  %v5618_v8 = vshll.u32 %v5288_v5, 16 }
 0x2a1   : > { %10579 = vmatprep.subr.bf16.mxu1 %v11683_v30 }
 0x2a2   : > { %v4783_v39 = vrot.slane %v4781_v14, 4  ;;  %v13095_v14 = vld [vmem:[%s14024_s2] ss:$0 sm:$0xff] }
 0x2a4   : > { %10554 = vmatmul.mubr.bf16.gmra.mrb[12].mxu0 %v4734_v54  ;;  %v4778_v54 = vor.u32 %v4777_v16, %v4774_v28  ;;  %10580 = vmatpush3.bf16.msra.mxu1 %v11683_v30  ;;  %v11685_v28 = vld [vmem:[#allocation8 + $0x68] sm:$0xff]   ;;  %v11686_v16 = vld [vmem:[#allocation8 + $0x70] sm:$0xff]  }
 0x2a5   : > { %10557 = vmatprep.mubr.bf16.mxu0 %v4743_v20  ;;  %v4786_v20 = vrot.slane %v4784_v18, 5 }
 0x2a6   : > { %v4779_v24 = vsel %vm1136_vm6, %v4769_v31, %v4778_v54  ;;  %v13089_v31 = vld [vmem:[#allocation8] sm:$0xff]  }
 0x2a7   : > { %v4787_v19 = vor.u32 %v4786_v20, %v4783_v39 }
 0x2a9   : > { %v4788_v37 = vsel %vm1136_vm6, %v4778_v54, %v4787_v19  ;;  %v4797_v26 = vsel %vm1136_vm6, %v4787_v19, %v4796_v4  ;;  %v13100_v54 = vld [vmem:[%s14025_s3] ss:$0 sm:$0xff] }
 0x2ac   : > { %10558 = vmatmul.mubr.bf16.gmra.mrb[16].mxu0 %v4752_v6  ;;  %v4804_v6 = vrot.slane %v4802_v2, 5 }
 0x2ad   : > { %10561 = vmatprep.mubr.bf16.mxu0 %v4761_v7  ;;  %v11684_v7 = vld [vmem:[#allocation8 + $0x60] sm:$0xff]  }
 0x2ae   : > { %v4805_v23 = vor.u32 %v4804_v6, %v4801_v32  ;;  %10581 = vmatprep.subr.bf16.mxu1 %v11684_v7  ;;  %v13111_v32 = vld [vmem:[#allocation2] sm:$0xf0]  ;;  %v5615_v6 = vshrl.u32 %v5288_v5, 16 }
 0x2af   : > { %10582 = vmatpush3.bf16.msra.mxu1 %v11684_v7  ;;  %v5992_v38 = vmul.bf16 %v13111_v32, %v14221_v29 }
 0x2b0   : > { %v4806_v60 = vsel %vm1136_vm6, %v4796_v4, %v4805_v23  ;;  %10583 = vmatprep.subr.bf16.mxu1 %v11685_v28 }
 0x2b3   : > { %10584 = vmatpush3.bf16.msra.mxu1 %v11685_v28 }
 0x2b4   : > { %10562 = vmatmul.mubr.bf16.gmra.mrb[20].mxu0 %v4770_v22  ;;  %10585 = vmatprep.subr.bf16.mxu1 %v11686_v16 }
 0x2b5   : > { %10565 = vmatprep.mubr.bf16.mxu0 %v4779_v24 }
 0x2b7   : > { %10586 = vmatpush3.bf16.msra.mxu1 %v11686_v16 }
 0x2b8   : > { %10587 = vmatprep.subr.bf16.mxu1 %v11687_v13 }
 0x2bb   : > { %10588 = vmatpush3.bf16.msra.mxu1 %v11687_v13 }
 0x2bc   : > { %10566 = vmatmul.mubr.bf16.gmra.mrb[24].mxu0 %v4788_v37  ;;  %10621 = vmatprep.subr.bf16.mxu1 %v13089_v31 }
 0x2bd   : > { %10569 = vmatprep.mubr.bf16.mxu0 %v4797_v26 }
 0x2c4   : > { %10570 = vmatmul.mubr.bf16.gmra.mrb[28].mxu0 %v4806_v60 }
 0x35f   : > { %v10543_v18 = vpop.f32.mrb[0].mxu0 }
 0x360   : > { %v5073_v52 = vmul.f32 %v10543_v18, %v13095_v14  ;;  %v4905_v61 = vpop.f32.mrb[1].mxu0 }
 0x361   : > { %v5071_v22 = vmul.f32 %v13095_v14, %v4905_v61  ;;  %v10544_v39 = vpop.f32.mrb[2].mxu0 }
 0x362   : > { %v5112_v20 = vadd.f32 %v13100_v54, %v5073_v52  ;;  %v5074_v21 = vmul.f32 %v10544_v39, %v13095_v14  ;;  %v4908_v24 = vpop.f32.mrb[3].mxu0 }
 0x363   : > { %v5110_v50 = vadd.f32 %v13100_v54, %v5071_v22  ;;  %v5072_v19 = vmul.f32 %v13095_v14, %v4908_v24 }
 0x364   : > { %v5113_v34 = vadd.f32 %v13100_v54, %v5074_v21  ;;  %v5144_v4 = vmax.f32 %v5112_v20, 0.0  ;;  %v13119_v20 = vrot.slane %v5615_v6, 3 }
 0x365   : > { %v5111_v2 = vadd.f32 %v13100_v54, %v5072_v19  ;;  %v5142_v26 = vmax.f32 %v5110_v50, 0.0  ;;  %v13123_v50 = vrot.slane %v5618_v8, 4 }
 0x366   : > { %v5145_v37 = vmax.f32 %v5113_v34, 0.0 }
 0x367   : > { %v5143_v23 = vmax.f32 %v5111_v2, 0.0  ;;  %v10547_v60 = vpop.f32.mrb[4].mxu0 }
 0x368   : > { %v5175_v30 = vpack.c.bf16 %v5145_v37, %v5144_v4  ;;  %v5077_v7 = vmul.f32 %v10547_v60, %v13095_v14  ;;  %v4921_v28 = vpop.f32.mrb[5].mxu0  ;;  %v6027_v4 = vshrl.u32 %v5992_v38, 16  ;;  %v6030_v37 = vshll.u32 %v5992_v38, 16 }
 0x369   : > { %v5174_v16 = vpack.c.bf16 %v5143_v23, %v5142_v26  ;;  %v5075_v13 = vmul.f32 %v13095_v14, %v4921_v28  ;;  %v10548_v18 = vpop.f32.mrb[6].mxu0  ;;  %v5356_v28 = vrot.slane %v13111_v32, 4 }
 0x36a   : > { %v5207_v52 = vrot.slane %v5175_v30, 4  ;;  %v5116_v61 = vadd.f32 %v13100_v54, %v5077_v7  ;;  %v5078_v22 = vmul.f32 %v10548_v18, %v13095_v14  ;;  %v4924_v39 = vpop.f32.mrb[7].mxu0 }
 0x36b   : > { %v5206_v21 = vrot.slane %v5174_v16, 4  ;;  %v5114_v24 = vadd.f32 %v13100_v54, %v5075_v13  ;;  %v5076_v5 = vmul.f32 %v13095_v14, %v4924_v39 }
 0x36c   : > { %v5117_v19 = vadd.f32 %v13100_v54, %v5078_v22  ;;  %v5148_v6 = vmax.f32 %v5116_v61, 0.0 }
 0x36d   : > { %v13127_v34 = vsel %vm1365_vm0, %v5206_v21, %v5207_v52  ;;  %5254 = vst [vmem:[#allocation2 + $0x8] sm:$0xf0] %v5206_v21  ;;  %v5115_v2 = vadd.f32 %v13100_v54, %v5076_v5  ;;  %v5146_v8 = vmax.f32 %v5114_v24, 0.0  ;;  %v13144_v24 = vrot.slane %v6030_v37, 5 }
 0x36e   : > { %5255 = vst [vmem:[#allocation2 + $0x10] sm:$0xff] %v13127_v34  ;;  %v5149_v26 = vmax.f32 %v5117_v19, 0.0  ;;  %v5290_v23 = vmul.bf16 %v13127_v34, %v12361_v62  ;;  %v5994_v60 = vmul.bf16 %v13127_v34, %v14226_v11  ;;  %v13142_v19 = vrot.slane %v6027_v4, 4 }
 0x36f   : > { %v5147_v30 = vmax.f32 %v5115_v2, 0.0  ;;  %v10551_v7 = vpop.f32.mrb[8].mxu0 }
 0x370   : > { %v13138_v13 = vpack.c.bf16 %v5149_v26, %v5148_v6  ;;  %v5081_v18 = vmul.f32 %v10551_v7, %v13095_v14  ;;  %v4937_v38 = vpop.f32.mrb[9].mxu0  ;;  %v5632_v61 = vshrl.u32 %v5290_v23, 16  ;;  %v5635_v22 = vshll.u32 %v5290_v23, 16 }
 0x371   : > { %v5176_v39 = vpack.c.bf16 %v5147_v30, %v5146_v8  ;;  %v5079_v21 = vmul.f32 %v13095_v14, %v4937_v38  ;;  %v10552_v5 = vpop.f32.mrb[10].mxu0  ;;  %v6044_v16 = vshrl.u32 %v5994_v60, 16  ;;  %v5359_v8 = vrot.slane %v13127_v34, 4 }
 0x372   : > { %v5211_v32 = vrot.slane %v13138_v13, 4  ;;  %v5120_v2 = vadd.f32 %v13100_v54, %v5081_v18  ;;  %v5082_v6 = vmul.f32 %v10552_v5, %v13095_v14  ;;  %v4940_v26 = vpop.f32.mrb[11].mxu0  ;;  %v5634_v37 = vrot.slane %v5632_v61, 3 }
 0x373   : > { %v5209_v7 = vrot.slane %v5176_v39, 4  ;;  %v5118_v11 = vadd.f32 %v13100_v54, %v5079_v21  ;;  %v5080_v23 = vmul.f32 %v13095_v14, %v4940_v26  ;;  %v5637_v38 = vrot.slane %v5635_v22, 4 }
 0x374   : > { %v5121_v4 = vadd.f32 %v13100_v54, %v5082_v6  ;;  %v5272_v30 = vld [vmem:[#allocation2 + $0x8] sm:$0xff]  ;;  %v6047_v29 = vshll.u32 %v5994_v60, 16  ;;  %v5152_v5 = vmax.f32 %v5120_v2, 0.0  ;;  %v13162_v26 = vrot.slane %v6044_v16, 4  ;;  %v11689_v16 = vld [vmem:[#allocation8 + $0x8] sm:$0xff]  }
 0x375   : > { %v13154_v13 = vsel %vm1365_vm0, %v5207_v52, %v5209_v7  ;;  %v13157_v18 = vsel %vm1365_vm0, %v5209_v7, %v5211_v32  ;;  %v5119_v39 = vadd.f32 %v13100_v54, %v5080_v23  ;;  %v5150_v34 = vmax.f32 %v5118_v11, 0.0 }
 0x376   : > { %5256 = vst [vmem:[#allocation2 + $0x18] sm:$0xff] %v13154_v13  ;;  %5257 = vst [vmem:[#allocation2 + $0x20] sm:$0xff] %v13157_v18  ;;  %v5153_v21 = vmax.f32 %v5121_v4, 0.0  ;;  %v5357_v6 = vrot.slane %v5272_v30, 4  ;;  %v13165_v52 = vmul.bf16 %v5272_v30, %v12402_v17  ;;  %v5361_v22 = vrot.slane %v13154_v13, 4 }
 0x377   : > { %v5151_v61 = vmax.f32 %v5119_v39, 0.0  ;;  %v10555_v60 = vpop.f32.mrb[12].mxu0  ;;  %v5363_v2 = vrot.slane %v13157_v18, 4  ;;  %v13180_v3 = vrot.slane %v6047_v29, 5 }
 0x378   : > { %v13169_v7 = vpack.c.bf16 %v5153_v21, %v5152_v5  ;;  %v5085_v23 = vmul.f32 %v10555_v60, %v13095_v14  ;;  %v4953_v62 = vpop.f32.mrb[13].mxu0  ;;  %v5358_v11 = vsel %vm1365_vm0, %v5356_v28, %v5357_v6  ;;  %v5360_v4 = vsel %vm1365_vm0, %v5357_v6, %v5359_v8 }
 0x379   : > { %v5178_v53 = vpack.c.bf16 %v5151_v61, %v5150_v34  ;;  %v5083_v39 = vmul.f32 %v13095_v14, %v4953_v62  ;;  %10589 = vmatprep.mubr.bf16.mxu1 %v5358_v11  ;;  %v10556_v17 = vpop.f32.mrb[14].mxu0  ;;  %v5362_v1 = vsel %vm1365_vm0, %v5359_v8, %v5361_v22  ;;  %v5364_v0 = vsel %vm1365_vm0, %v5361_v22, %v5363_v2  ;;  %v11690_v22 = vld [vmem:[#allocation8 + $0x10] sm:$0xff]  }
 0x37a   : > { %v14091_v5 = vrot.slane %v13169_v7, 4  ;;  %v5124_v21 = vadd.f32 %v13100_v54, %v5085_v23  ;;  %v5086_v60 = vmul.f32 %v10556_v17, %v13095_v14  ;;  %10590 = vmatmul.mubr.bf16.vlgmr.msra.gmra.mrb[0].mxu1 %v5360_v4  ;;  %v4956_v28 = vpop.f32.mrb[15].mxu0  ;;  %v13184_v62 = vmul.bf16 %v5272_v30, %v14222_v42 }
 0x37b   : > { %v5213_v6 = vrot.slane %v5178_v53, 4  ;;  %v5122_v34 = vadd.f32 %v13100_v54, %v5083_v39  ;;  %v5084_v8 = vmul.f32 %v13095_v14, %v4956_v28  ;;  %10622 = vmatpush3.bf16.msra.mxu1 %v13089_v31  ;;  %10593 = vmatprep.mubr.bf16.mxu1 %v5362_v1  ;;  %v5623_v17 = vshrl.u32 %v13165_v52, 16 }
 0x37c   : > { %v5125_v61 = vadd.f32 %v13100_v54, %v5086_v60  ;;  %10623 = vmatprep.subr.bf16.mxu1 %v11689_v16  ;;  %v13190_v23 = vor.u32 %v5637_v38, %v5634_v37  ;;  %v5291_v53 = vmul.bf16 %v13154_v13, %v12420_v41  ;;  %v5626_v31 = vshll.u32 %v13165_v52, 16 }
 0x37d   : > { %v13195_v29 = vsel %vm1365_vm0, %v5211_v32, %v5213_v6  ;;  %v13200_v30 = vsel %vm1365_vm0, %v5213_v6, %v14091_v5  ;;  %v5123_v1 = vadd.f32 %v13100_v54, %v5084_v8  ;;  %v5156_v37 = vmax.f32 %v5124_v21, 0.0 }
 0x37e   : > { %5258 = vst [vmem:[#allocation2 + $0x28] sm:$0xff] %v13195_v29  ;;  %5259 = vst [vmem:[#allocation2 + $0x30] sm:$0xff] %v13200_v30  ;;  %v5157_v38 = vmax.f32 %v5125_v61, 0.0  ;;  %v5365_v11 = vrot.slane %v13195_v29, 4  ;;  %v5367_v32 = vrot.slane %v13200_v30, 4  ;;  %v5154_v4 = vmax.f32 %v5122_v34, 0.0 }
 0x37f   : > { %v5155_v39 = vmax.f32 %v5123_v1, 0.0  ;;  %v10559_v60 = vpop.f32.mrb[16].mxu0  ;;  %10624 = vmatpush3.bf16.msra.mxu1 %v11689_v16  ;;  %v5641_v28 = vshrl.u32 %v5291_v53, 16  ;;  %v5644_v6 = vshll.u32 %v5291_v53, 16  ;;  %v11691_v61 = vld [vmem:[#allocation8 + $0x18] sm:$0xff]   ;;  %v13214_v1 = vrot.slane %v5623_v17, 3 }
 0x380   : > { %v13208_v5 = vpack.c.bf16 %v5157_v38, %v5156_v37  ;;  %v5089_v52 = vmul.f32 %v10559_v60, %v13095_v14  ;;  %v4969_v8 = vpop.f32.mrb[17].mxu0  ;;  %v5366_v42 = vsel %vm1365_vm0, %v5363_v2, %v5365_v11  ;;  %v5368_v21 = vsel %vm1365_vm0, %v5365_v11, %v5367_v32  ;;  %10625 = vmatprep.subr.bf16.mxu1 %v11690_v22 }
 0x381   : > { %v5180_v41 = vpack.c.bf16 %v5155_v39, %v5154_v4  ;;  %v5087_v35 = vmul.f32 %v13095_v14, %v4969_v8  ;;  %v10560_v34 = vpop.f32.mrb[18].mxu0  ;;  %v5643_v16 = vrot.slane %v5641_v28, 3  ;;  %v5646_v2 = vrot.slane %v5644_v6, 4 }
 0x382   : > { %v14097_v53 = vrot.slane %v13208_v5, 4  ;;  %v5128_v37 = vadd.f32 %v13100_v54, %v5089_v52  ;;  %v5090_v38 = vmul.f32 %v10560_v34, %v13095_v14  ;;  %v4972_v60 = vpop.f32.mrb[19].mxu0  ;;  %10594 = vmatmul.mubr.bf16.gmra.mrb[4].mxu1 %v5364_v0  ;;  %v5292_v17 = vmul.bf16 %v13157_v18, %v12443_v36  ;;  %v11692_v52 = vld [vmem:[#allocation8 + $0x20] sm:$0xff]   ;;  %v11693_v36 = vld [vmem:[#allocation8 + $0x28] sm:$0xff]  }
 0x383   : > { %v5217_v48 = vrot.slane %v5180_v41, 4  ;;  %v5126_v11 = vadd.f32 %v13100_v54, %v5087_v35  ;;  %v5088_v4 = vmul.f32 %v13095_v14, %v4972_v60  ;;  %10597 = vmatprep.mubr.bf16.mxu1 %v5366_v42  ;;  %10626 = vmatpush3.bf16.msra.mxu1 %v11690_v22  ;;  %v13224_v8 = vrot.slane %v5626_v31, 4 }
 0x384   : > { %v5160_v39 = vmax.f32 %v5128_v37, 0.0  ;;  %v5129_v28 = vadd.f32 %v13100_v54, %v5090_v38  ;;  %10627 = vmatprep.subr.bf16.mxu1 %v11691_v61  ;;  %v5647_v34 = vor.u32 %v5646_v2, %v5643_v16  ;;  %v14233_v0 = vrot.slane %v13169_v7, 4 }
 0x385   : > { %v13234_v42 = vsel %vm1365_vm0, %v5217_v48, %v14097_v53  ;;  %v5158_v35 = vmax.f32 %v5126_v11, 0.0  ;;  %v5127_v22 = vadd.f32 %v13100_v54, %v5088_v4  ;;  %v5653_v60 = vshll.u32 %v5292_v17, 16 }
 0x386   : > { %v13229_v41 = vsel %vm1365_vm0, %v14233_v0, %v5217_v48  ;;  %5261 = vst [vmem:[#allocation2 + $0x40] sm:$0xff] %v13234_v42  ;;  %v5161_v31 = vmax.f32 %v5129_v28, 0.0  ;;  %v5371_v7 = vrot.slane %v13234_v42, 4  ;;  %v13243_v16 = vsel %vm1624_vm15, %v13190_v23, %v5647_v34 }
 0x387   : > { %5260 = vst [vmem:[#allocation2 + $0x38] sm:$0xff] %v13229_v41  ;;  %v5369_v6 = vrot.slane %v13229_v41, 4  ;;  %14234 = vst [vmem:[#allocation36_spill] sm:$0xff] %v13243_v16  ;;  %v5159_v37 = vmax.f32 %v5127_v22, 0.0  ;;  %v10563_v38 = vpop.f32.mrb[20].mxu0  ;;  %10628 = vmatpush3.bf16.msra.mxu1 %v11691_v61  ;;  %v5650_v48 = vshrl.u32 %v5292_v17, 16  ;;  %v5293_v2 = vmul.bf16 %v13195_v29, %v12460_v63 }
 0x388   : > { %v13247_v11 = vpack.c.bf16 %v5161_v31, %v5160_v39  ;;  %v5093_v4 = vmul.f32 %v10563_v38, %v13095_v14  ;;  %v4985_v28 = vpop.f32.mrb[21].mxu0  ;;  %10629 = vmatprep.subr.bf16.mxu1 %v11692_v52  ;;  %v5655_v17 = vrot.slane %v5653_v60, 4  ;;  %v11694_v60 = vld [vmem:[#allocation8 + $0x30] sm:$0xff]  }
 0x389   : > { %v5370_v0 = vsel %vm1365_vm0, %v5367_v32, %v5369_v6  ;;  %v5372_v53 = vsel %vm1365_vm0, %v5369_v6, %v5371_v7  ;;  %v5182_v9 = vpack.c.bf16 %v5159_v37, %v5158_v35  ;;  %v5091_v22 = vmul.f32 %v13095_v14, %v4985_v28  ;;  %v10564_v61 = vpop.f32.mrb[22].mxu0 }
 0x38a   : > { %v5652_v40 = vrot.slane %v5650_v48, 3  ;;  %v14108_v16 = vrot.slane %v13247_v11, 4  ;;  %v5132_v39 = vadd.f32 %v13100_v54, %v5093_v4  ;;  %v5094_v31 = vmul.f32 %v10564_v61, %v13095_v14  ;;  %v4988_v38 = vpop.f32.mrb[23].mxu0  ;;  %10598 = vmatmul.mubr.bf16.gmra.mrb[8].mxu1 %v5368_v21 }
 0x38b   : > { %v5659_v63 = vshrl.u32 %v5293_v2, 16  ;;  %v5221_v32 = vrot.slane %v5182_v9, 4  ;;  %v5130_v6 = vadd.f32 %v13100_v54, %v5091_v22  ;;  %v5092_v27 = vmul.f32 %v13095_v14, %v4988_v38  ;;  %10601 = vmatprep.mubr.bf16.mxu1 %v5370_v0  ;;  %10630 = vmatpush3.bf16.msra.mxu1 %v11692_v52 }
 0x38c   : > { %v5656_v35 = vor.u32 %v5655_v17, %v5652_v40  ;;  %v5164_v37 = vmax.f32 %v5132_v39, 0.0  ;;  %v5133_v48 = vadd.f32 %v13100_v54, %v5094_v31  ;;  %10631 = vmatprep.subr.bf16.mxu1 %v11693_v36  ;;  %v5662_v4 = vshll.u32 %v5293_v2, 16 }
 0x38d   : > { %v5661_v28 = vrot.slane %v5659_v63, 3  ;;  %v14235_v61 = vrot.slane %v13208_v5, 4  ;;  %v13267_v9 = vsel %vm1365_vm0, %v5221_v32, %v14108_v16  ;;  %v5162_v0 = vmax.f32 %v5130_v6, 0.0 }
 0x38e   : > { %v5131_v40 = vadd.f32 %v13100_v54, %v5092_v27  ;;  %5263 = vst [vmem:[#allocation2 + $0x50] sm:$0xff] %v13267_v9  ;;  %v5165_v52 = vmax.f32 %v5133_v48, 0.0  ;;  %v5375_v5 = vrot.slane %v13267_v9, 4  ;;  %v13275_v2 = vsel %vm1624_vm15, %v5647_v34, %v5656_v35 }
 0x38f   : > { %v13262_v21 = vsel %vm1365_vm0, %v14235_v61, %v5221_v32  ;;  %14236 = vst [vmem:[#allocation37_spill] sm:$0xff] %v13275_v2  ;;  %v10567_v17 = vpop.f32.mrb[24].mxu0  ;;  %10632 = vmatpush3.bf16.msra.mxu1 %v11693_v36  ;;  %v5664_v39 = vrot.slane %v5662_v4, 4  ;;  %v5294_v31 = vmul.bf16 %v13200_v30, %v12468_v15  ;;  %v13281_v27 = vmul.bf16 %v13229_v41, %v12474_v59  ;;  %v11695_v61 = vld [vmem:[#allocation8 + $0x38] sm:$0xff]  }
 0x390   : > { %5262 = vst [vmem:[#allocation2 + $0x48] sm:$0xff] %v13262_v21  ;;  %v5373_v63 = vrot.slane %v13262_v21, 4  ;;  %v5163_v22 = vmax.f32 %v5131_v40, 0.0  ;;  %v13283_v38 = vpack.c.bf16 %v5165_v52, %v5164_v37  ;;  %v5097_v32 = vmul.f32 %v10567_v17, %v13095_v14  ;;  %v5001_v6 = vpop.f32.mrb[25].mxu0  ;;  %10633 = vmatprep.subr.bf16.mxu1 %v11694_v60 }
 0x391   : > { %v5095_v4 = vmul.f32 %v13095_v14, %v5001_v6  ;;  %v10568_v40 = vpop.f32.mrb[26].mxu0  ;;  %v5665_v16 = vor.u32 %v5664_v39, %v5661_v28  ;;  %v5668_v15 = vshrl.u32 %v5294_v31, 16  ;;  %v5671_v2 = vshll.u32 %v5294_v31, 16  ;;  %v13298_v39 = vld [vmem:[#allocation8 + $0x80] sm:$0xff]  }
 0x392   : > { %v5374_v48 = vsel %vm1365_vm0, %v5371_v7, %v5373_v63  ;;  %v5376_v34 = vsel %vm1365_vm0, %v5373_v63, %v5375_v5  ;;  %v5184_v36 = vpack.c.bf16 %v5163_v22, %v5162_v0  ;;  %v5227_v59 = vrot.slane %v13283_v38, 4  ;;  %v5004_v17 = vpop.f32.mrb[27].mxu0  ;;  %10602 = vmatmul.mubr.bf16.gmra.mrb[12].mxu1 %v5372_v53 }
 0x393   : > { %v5136_v37 = vadd.f32 %v13100_v54, %v5097_v32  ;;  %v5098_v52 = vmul.f32 %v10568_v40, %v13095_v14  ;;  %v5134_v63 = vadd.f32 %v13100_v54, %v5095_v4  ;;  %v5096_v58 = vmul.f32 %v13095_v14, %v5004_v17  ;;  %10605 = vmatprep.mubr.bf16.mxu1 %v5374_v48 }
 0x394   : > { %v5225_v7 = vrot.slane %v5184_v36, 4  ;;  %10634 = vmatpush3.bf16.msra.mxu1 %v11694_v60  ;;  %v13295_v0 = vsel %vm1624_vm15, %v5656_v35, %v5665_v16  ;;  %v5670_v38 = vrot.slane %v5668_v15, 3  ;;  %v5673_v32 = vrot.slane %v5671_v2, 4 }
 0x395   : > { %v5168_v28 = vmax.f32 %v5136_v37, 0.0  ;;  %v5137_v22 = vadd.f32 %v13100_v54, %v5098_v52  ;;  %10635 = vmatprep.subr.bf16.mxu1 %v11695_v61  ;;  %v14237_v53 = vrot.slane %v13247_v11, 4  ;;  %v5166_v60 = vmax.f32 %v5134_v63, 0.0 }
 0x396   : > { %v13306_v6 = vsel %vm1365_vm0, %v5225_v7, %v5227_v59  ;;  %v5135_v35 = vadd.f32 %v13100_v54, %v5096_v58  ;;  %v5674_v2 = vor.u32 %v5673_v32, %v5670_v38  ;;  %v5677_v40 = vshrl.u32 %v13281_v27, 16 }
 0x397   : > { %v13303_v31 = vsel %vm1365_vm0, %v14237_v53, %v5225_v7  ;;  %5265 = vst [vmem:[#allocation2 + $0x60] sm:$0xff] %v13306_v6  ;;  %v5169_v48 = vmax.f32 %v5137_v22, 0.0  ;;  %v5379_v15 = vrot.slane %v13306_v6, 4  ;;  %v10571_v4 = vpop.f32.mrb[28].mxu0  ;;  %v5680_v37 = vshll.u32 %v13281_v27, 16 }
 0x398   : > { %5264 = vst [vmem:[#allocation2 + $0x58] sm:$0xff] %v13303_v31  ;;  %v5377_v36 = vrot.slane %v13303_v31, 4  ;;  %v5167_v11 = vmax.f32 %v5135_v35, 0.0  ;;  %10636 = vmatpush3.bf16.msra.mxu1 %v11695_v61  ;;  %v5296_v58 = vmul.bf16 %v13234_v42, %v12489_v56  ;;  %v5101_v17 = vmul.f32 %v10571_v4, %v13095_v14  ;;  %v5017_v7 = vpop.f32.mrb[29].mxu0 }
 0x399   : > { %v13317_v52 = vpack.c.bf16 %v5169_v48, %v5168_v28  ;;  %10669 = vmatprep.subr.bf16.mxu1 %v13298_v39  ;;  %v5099_v61 = vmul.f32 %v13095_v14, %v5017_v7  ;;  %v10572_v32 = vpop.f32.mrb[30].mxu0  ;;  %v13325_v27 = vsel %vm1624_vm15, %v5665_v16, %v5674_v2  ;;  %v5679_v53 = vrot.slane %v5677_v40, 3 }
 0x39a   : > { %v5378_v63 = vsel %vm1365_vm0, %v5375_v5, %v5377_v36  ;;  %v5380_v22 = vsel %vm1365_vm0, %v5377_v36, %v5379_v15  ;;  %v5186_v38 = vpack.c.bf16 %v5167_v11, %v5166_v60  ;;  %14238 = vst [vmem:[#allocation27_spill] sm:$0xff] %v13325_v27  ;;  %v5140_v35 = vadd.f32 %v13100_v54, %v5101_v17  ;;  %v5020_v4 = vpop.f32.mrb[31].mxu0 }
 0x39b   : > { %v5231_v28 = vrot.slane %v13317_v52, 4  ;;  %v5102_v48 = vmul.f32 %v10572_v32, %v13095_v14  ;;  %10606 = vmatmul.mubr.bf16.gmra.mrb[16].mxu1 %v5376_v34  ;;  %v5682_v5 = vrot.slane %v5680_v37, 4  ;;  %v5138_v56 = vadd.f32 %v13100_v54, %v5099_v61 }
 0x39c   : > { %v5229_v36 = vrot.slane %v5186_v38, 4  ;;  %v5100_v60 = vmul.f32 %v13095_v14, %v5020_v4  ;;  %10609 = vmatprep.mubr.bf16.mxu1 %v5378_v63  ;;  %v5686_v11 = vshrl.u32 %v5296_v58, 16  ;;  %v5172_v7 = vmax.f32 %v5140_v35, 0.0 }
 0x39d   : > { %v5141_v16 = vadd.f32 %v13100_v54, %v5102_v48  ;;  %v5683_v40 = vor.u32 %v5682_v5, %v5679_v53  ;;  %v5689_v27 = vshll.u32 %v5296_v58, 16  ;;  %v5170_v34 = vmax.f32 %v5138_v56, 0.0 }
 0x39e   : > { %v13334_v52 = vsel %vm1365_vm0, %v5227_v59, %v5229_v36  ;;  %v13337_v17 = vsel %vm1365_vm0, %v5229_v36, %v5231_v28  ;;  %v5139_v37 = vadd.f32 %v13100_v54, %v5100_v60  ;;  %v5688_v61 = vrot.slane %v5686_v11, 3 }
 0x39f   : > { %5266 = vst [vmem:[#allocation2 + $0x68] sm:$0xff] %v13334_v52  ;;  %5267 = vst [vmem:[#allocation2 + $0x70] sm:$0xff] %v13337_v17  ;;  %v5173_v14 = vmax.f32 %v5141_v16, 0.0  ;;  %v5381_v63 = vrot.slane %v13334_v52, 4  ;;  %v5383_v38 = vrot.slane %v13337_v17, 4  ;;  %v13345_v58 = vsel %vm1624_vm15, %v5674_v2, %v5683_v40 }
 0x3a0   : > { %v5171_v59 = vmax.f32 %v5139_v37, 0.0  ;;  %v5691_v32 = vrot.slane %v5689_v27, 4  ;;  %v5297_v56 = vmul.bf16 %v13262_v21, %v12494_v25  ;;  %v5298_v48 = vmul.bf16 %v13267_v9, %v12510_v47 }
 0x3a1   : > { %v5189_v53 = vpack.c.bf16 %v5173_v14, %v5172_v7  ;;  %v5382_v54 = vsel %vm1365_vm0, %v5379_v15, %v5381_v63  ;;  %v5384_v35 = vsel %vm1365_vm0, %v5381_v63, %v5383_v38  ;;  %v5299_v27 = vmul.bf16 %v13303_v31, %v14209_v49 }
 0x3a2   : > { %v5188_v4 = vpack.c.bf16 %v5171_v59, %v5170_v34  ;;  %v5692_v5 = vor.u32 %v5691_v32, %v5688_v61  ;;  %v5695_v36 = vshrl.u32 %v5297_v56, 16  ;;  %v5698_v60 = vshll.u32 %v5297_v56, 16 }
 0x3a3   : > { %v5235_v2 = vrot.slane %v5189_v53, 4  ;;  %10610 = vmatmul.mubr.bf16.gmra.mrb[20].mxu1 %v5380_v22  ;;  %v5704_v16 = vshrl.u32 %v5298_v48, 16  ;;  %v5707_v11 = vshll.u32 %v5298_v48, 16  ;;  %v5713_v59 = vshrl.u32 %v5299_v27, 16 }
 0x3a4   : > { %v5233_v37 = vrot.slane %v5188_v4, 4  ;;  %10613 = vmatprep.mubr.bf16.mxu1 %v5382_v54  ;;  %v13356_v15 = vsel %vm1624_vm15, %v5683_v40, %v5692_v5  ;;  %v5697_v7 = vrot.slane %v5695_v36, 3  ;;  %v5700_v14 = vrot.slane %v5698_v60, 4 }
 0x3a5   : > { %5270 = vst [vmem:[#allocation2 + $0x88] sm:$0xf] %v5235_v2  ;;  %v5706_v63 = vrot.slane %v5704_v16, 3  ;;  %v5709_v34 = vrot.slane %v5707_v11, 4  ;;  %v5716_v61 = vshll.u32 %v5299_v27, 16  ;;  %v5300_v53 = vmul.bf16 %v13306_v6, %v14210_v10 }
 0x3a6   : > { %v13359_v32 = vsel %vm1365_vm0, %v5231_v28, %v5233_v37  ;;  %v5236_v22 = vsel %vm1365_vm0, %v5233_v37, %v5235_v2  ;;  %v5701_v56 = vor.u32 %v5700_v14, %v5697_v7  ;;  %v5715_v48 = vrot.slane %v5713_v59, 3 }
 0x3a7   : > { %5268 = vst [vmem:[#allocation2 + $0x78] sm:$0xff] %v13359_v32  ;;  %5269 = vst [vmem:[#allocation2 + $0x80] sm:$0xff] %v5236_v22  ;;  %v5385_v40 = vrot.slane %v13359_v32, 4  ;;  %v5710_v54 = vor.u32 %v5709_v34, %v5706_v63  ;;  %v5718_v4 = vrot.slane %v5716_v61, 4  ;;  %v5722_v60 = vshrl.u32 %v5300_v53, 16 }
 0x3a8   : > { %v13367_v36 = vsel %vm1624_vm15, %v5692_v5, %v5701_v56  ;;  %v5725_v28 = vshll.u32 %v5300_v53, 16  ;;  %v5301_v2 = vmul.bf16 %v13334_v52, %v14211_v45  ;;  %v5302_v37 = vmul.bf16 %v13337_v17, %v14212_v57 }
 0x3a9   : > { %v5386_v16 = vsel %vm1365_vm0, %v5383_v38, %v5385_v40  ;;  %v13373_v11 = vsel %vm1624_vm15, %v5701_v56, %v5710_v54  ;;  %v5719_v27 = vor.u32 %v5718_v4, %v5715_v48  ;;  %v5724_v7 = vrot.slane %v5722_v60, 3 }
 0x3aa   : > { %v5727_v14 = vrot.slane %v5725_v28, 4  ;;  %v5731_v63 = vshrl.u32 %v5301_v2, 16  ;;  %v5734_v34 = vshll.u32 %v5301_v2, 16  ;;  %v5740_v59 = vshrl.u32 %v5302_v37, 16 }
 0x3ab   : > { %10614 = vmatmul.mubr.bf16.gmra.mrb[24].mxu1 %v5384_v35  ;;  %v13378_v5 = vsel %vm1624_vm15, %v5710_v54, %v5719_v27  ;;  %v5743_v61 = vshll.u32 %v5302_v37, 16  ;;  %v5303_v38 = vmul.bf16 %v13359_v32, %v14213_v33  ;;  %v6035_v48 = vshrl.u32 %v13184_v62, 16 }
 0x3ac   : > { %10617 = vmatprep.mubr.bf16.mxu1 %v5386_v16  ;;  %v5728_v22 = vor.u32 %v5727_v14, %v5724_v7  ;;  %v5733_v56 = vrot.slane %v5731_v63, 3  ;;  %v5736_v53 = vrot.slane %v5734_v34, 4  ;;  %v5742_v4 = vrot.slane %v5740_v59, 3 }
 0x3ad   : > { %v5745_v60 = vrot.slane %v5743_v61, 4  ;;  %v5749_v28 = vshrl.u32 %v5303_v38, 16  ;;  %v5752_v57 = vshll.u32 %v5303_v38, 16  ;;  %v6037_v37 = vrot.slane %v6035_v48, 4 }
 0x3ae   : > { %v13383_v2 = vld [vmem:[#allocation2 + $0x80] sm:$0xf]  ;;  %v13386_v35 = vsel %vm1624_vm15, %v5719_v27, %v5728_v22  ;;  %v5737_v54 = vor.u32 %v5736_v53, %v5733_v56  ;;  %v6038_v45 = vshll.u32 %v13184_v62, 16  ;;  %v5629_v7 = vor.u32 %v13224_v8, %v13214_v1 }
 0x3af   : > { %v5387_v16 = vrot.slane %v13383_v2, 4  ;;  %v5746_v14 = vor.u32 %v5745_v60, %v5742_v4  ;;  %v5751_v63 = vrot.slane %v5749_v28, 3  ;;  %v5754_v59 = vrot.slane %v5752_v57, 4 }
 0x3b0   : > { %v13393_v34 = vsel %vm1624_vm15, %v5728_v22, %v5737_v54  ;;  %v6033_v61 = vor.u32 %v13144_v24, %v13142_v19  ;;  %v6040_v27 = vrot.slane %v6038_v45, 5  ;;  %v6050_v62 = vor.u32 %v13180_v3, %v13162_v26 }
 0x3b1   : > { %v5388_v38 = vsel %vm1365_vm0, %v5385_v40, %v5387_v16  ;;  %v13399_v56 = vsel %vm1624_vm15, %v5737_v54, %v5746_v14  ;;  %v13403_v53 = vor.u32 %v5754_v59, %v5751_v63  ;;  %v5995_v8 = vmul.bf16 %v13154_v13, %v14227_v51 }
 0x3b2   : > { %v6041_v1 = vor.u32 %v6040_v27, %v6037_v37  ;;  %v5996_v57 = vmul.bf16 %v13157_v18, %v14229_v44  ;;  %v14239_v45 = vor.u32 %v13123_v50, %v13119_v20  ;;  %v5997_v24 = vmul.bf16 %v13195_v29, %v14230_v12 }
 0x3b3   : > { %10618 = vmatmul.mubr.bf16.gmra.mrb[28].mxu1 %v5388_v38  ;;  %v5998_v3 = vmul.bf16 %v13200_v30, %v14207_v55  ;;  %v13419_v26 = vsel %vm1624_vm15, %v5746_v14, %v13403_v53  ;;  %v6053_v20 = vshrl.u32 %v5995_v8, 16  ;;  %v6056_v50 = vshll.u32 %v5995_v8, 16 }
 0x3b4   : > { %v5630_v19 = vsel %vm1624_vm15, %v14239_v45, %v5629_v7  ;;  %v13422_v13 = vsel %vm1136_vm6, %v6033_v61, %v6041_v1  ;;  %v13425_v18 = vsel %vm1136_vm6, %v6041_v1, %v6050_v62  ;;  %v6062_v40 = vshrl.u32 %v5996_v57, 16  ;;  %v11697_v61 = vld [vmem:[#allocation8 + $0x88] sm:$0xff]  }
 0x3b5   : > { %10637 = vmatprep.mubr.bf16.mxu1 %v5630_v19  ;;  %v6065_v22 = vshll.u32 %v5996_v57, 16  ;;  %v6055_v48 = vrot.slane %v6053_v20, 4  ;;  %v6071_v29 = vshrl.u32 %v5997_v24, 16  ;;  %v6074_v4 = vshll.u32 %v5997_v24, 16  ;;  %v14240_v19 = vld [vmem:[#allocation38_spill] sm:$0xff] }
 0x3b6   : > { %v6080_v60 = vshrl.u32 %v5998_v3, 16  ;;  %v5639_v30 = vsel %vm1624_vm15, %v5629_v7, %v13190_v23  ;;  %v6058_v28 = vrot.slane %v6056_v50, 5  ;;  %v6064_v54 = vrot.slane %v6062_v40, 4  ;;  %v14241_v7 = vld [vmem:[#allocation39_spill] sm:$0xff]  ;;  %v14242_v40 = vld [vmem:[#allocation36_spill] sm:$0xff] }
 0x3b7   : > { %v6067_v37 = vrot.slane %v6065_v22, 5  ;;  %v6073_v16 = vrot.slane %v6071_v29, 4  ;;  %v6076_v14 = vrot.slane %v6074_v4, 5  ;;  %v6083_v59 = vshll.u32 %v5998_v3, 16 }
 0x3b8   : > { %v6082_v63 = vrot.slane %v6080_v60, 4  ;;  %v6059_v27 = vor.u32 %v6058_v28, %v6055_v48  ;;  %v5999_v1 = vmul.bf16 %v13229_v41, %v14208_v46  ;;  %v6000_v8 = vmul.bf16 %v13234_v42, %v12693_v43 }
 0x3b9   : > { %v6068_v38 = vor.u32 %v6067_v37, %v6064_v54  ;;  %v6077_v57 = vor.u32 %v6076_v14, %v6073_v16  ;;  %v6085_v45 = vrot.slane %v6083_v59, 5  ;;  %v6001_v23 = vmul.bf16 %v13262_v21, %v14240_v19 }
 0x3ba   : > { %v6002_v24 = vmul.bf16 %v13267_v9, %v14241_v7  ;;  %v13438_v3 = vsel %vm1136_vm6, %v6050_v62, %v6059_v27  ;;  %v6089_v50 = vshrl.u32 %v5999_v1, 16  ;;  %v6092_v41 = vshll.u32 %v5999_v1, 16  ;;  %v11698_v9 = vld [vmem:[#allocation8 + $0x90] sm:$0xff]  }
 0x3bb   : > { %10638 = vmatmul.mubr.bf16.vlgmr.msra.gmra.mrb[0].mxu1 %v5639_v30  ;;  %v13441_v20 = vsel %vm1136_vm6, %v6059_v27, %v6068_v38  ;;  %v13446_v42 = vsel %vm1136_vm6, %v6068_v38, %v6077_v57  ;;  %v6086_v21 = vor.u32 %v6085_v45, %v6082_v63  ;;  %v6098_v22 = vshrl.u32 %v6000_v8, 16  ;;  %v14243_v38 = vld [vmem:[#allocation40_spill] sm:$0xff] }
 0x3bc   : > { %10641 = vmatprep.mubr.bf16.mxu1 %v14242_v40  ;;  %10670 = vmatpush3.bf16.msra.mxu1 %v13298_v39  ;;  %v6101_v48 = vshll.u32 %v6000_v8, 16  ;;  %v6091_v29 = vrot.slane %v6089_v50, 4  ;;  %v6094_v62 = vrot.slane %v6092_v41, 5  ;;  %v6107_v4 = vshrl.u32 %v6001_v23, 16  ;;  %v14244_v8 = vld [vmem:[#allocation41_spill] sm:$0xff]  ;;  %v14245_v40 = vld [vmem:[#allocation42_spill] sm:$0xff] }
 0x3bd   : > { %10671 = vmatprep.subr.bf16.mxu1 %v11697_v61  ;;  %v6110_v60 = vshll.u32 %v6001_v23, 16  ;;  %v13449_v30 = vsel %vm1136_vm6, %v6077_v57, %v6086_v21  ;;  %v6100_v28 = vrot.slane %v6098_v22, 4  ;;  %v6116_v37 = vshrl.u32 %v6002_v24, 16  ;;  %v11699_v23 = vld [vmem:[#allocation8 + $0x98] sm:$0xff]  }
 0x3be   : > { %v6103_v54 = vrot.slane %v6101_v48, 5  ;;  %v6095_v16 = vor.u32 %v6094_v62, %v6091_v29  ;;  %v6109_v39 = vrot.slane %v6107_v4, 4  ;;  %v6119_v59 = vshll.u32 %v6002_v24, 16 }
 0x3bf   : > { %v6112_v14 = vrot.slane %v6110_v60, 5  ;;  %v6118_v27 = vrot.slane %v6116_v37, 4  ;;  %v6003_v1 = vmul.bf16 %v13303_v31, %v14243_v38  ;;  %v6004_v45 = vmul.bf16 %v13306_v6, %v14244_v8  ;;  %v14246_v31 = vld [vmem:[#allocation37_spill] sm:$0xff] }
 0x3c0   : > { %10672 = vmatpush3.bf16.msra.mxu1 %v11697_v61  ;;  %v6104_v63 = vor.u32 %v6103_v54, %v6100_v28  ;;  %v13456_v57 = vsel %vm1136_vm6, %v6086_v21, %v6095_v16  ;;  %v6121_v41 = vrot.slane %v6119_v59, 5  ;;  %v6005_v22 = vmul.bf16 %v13334_v52, %v14245_v40  ;;  %v11700_v37 = vld [vmem:[#allocation8 + $0xa0] sm:$0xff]   ;;  %v14247_v59 = vld [vmem:[#allocation44_spill] sm:$0xff] }
 0x3c1   : > { %10673 = vmatprep.subr.bf16.mxu1 %v11698_v9  ;;  %v6113_v50 = vor.u32 %v6112_v14, %v6109_v39  ;;  %v6125_v24 = vshrl.u32 %v6003_v1, 16  ;;  %v6128_v48 = vshll.u32 %v6003_v1, 16  ;;  %v6134_v29 = vshrl.u32 %v6004_v45, 16 }
 0x3c2   : > { %v13461_v61 = vsel %vm1136_vm6, %v6095_v16, %v6104_v63  ;;  %v6122_v62 = vor.u32 %v6121_v41, %v6118_v27  ;;  %v6137_v4 = vshll.u32 %v6004_v45, 16  ;;  %v6143_v21 = vshrl.u32 %v6005_v22, 16  ;;  %v14248_v45 = vld [vmem:[#allocation45_spill] sm:$0xff] }
 0x3c3   : > { %10642 = vmatmul.mubr.bf16.gmra.mrb[4].mxu1 %v14246_v31  ;;  %v13465_v6 = vsel %vm1136_vm6, %v6104_v63, %v6113_v50  ;;  %v6127_v60 = vrot.slane %v6125_v24, 4  ;;  %v6130_v28 = vrot.slane %v6128_v48, 5  ;;  %v6136_v52 = vrot.slane %v6134_v29, 4  ;;  %v11701_v31 = vld [vmem:[#allocation8 + $0xa8] sm:$0xff]  }
 0x3c4   : > { %10645 = vmatprep.mubr.bf16.mxu1 %v13295_v0  ;;  %10674 = vmatpush3.bf16.msra.mxu1 %v11698_v9  ;;  %v6146_v54 = vshll.u32 %v6005_v22, 16  ;;  %v13469_v16 = vsel %vm1136_vm6, %v6113_v50, %v6122_v62  ;;  %v6139_v39 = vrot.slane %v6137_v4, 5  ;;  %v6145_v14 = vrot.slane %v6143_v21, 4 }
 0x3c5   : > { %10675 = vmatprep.subr.bf16.mxu1 %v11699_v23  ;;  %v6006_v63 = vmul.bf16 %v13337_v17, %v14247_v59  ;;  %v6131_v27 = vor.u32 %v6130_v28, %v6127_v60  ;;  %v6007_v0 = vmul.bf16 %v13359_v32, %v14248_v45 }
 0x3c6   : > { %v6148_v1 = vrot.slane %v6146_v54, 5  ;;  %v6140_v9 = vor.u32 %v6139_v39, %v6136_v52  ;;  %v14249_v52 = vld [vmem:[#allocation27_spill] sm:$0xff] }
 0x3c7   : > { %v6152_v41 = vshrl.u32 %v6006_v63, 16  ;;  %v6155_v24 = vshll.u32 %v6006_v63, 16  ;;  %v13476_v22 = vsel %vm1136_vm6, %v6122_v62, %v6131_v27  ;;  %v6161_v50 = vshrl.u32 %v6007_v0, 16  ;;  %v11702_v54 = vld [vmem:[#allocation8 + $0xb0] sm:$0xff]   ;;  %v11703_v63 = vld [vmem:[#allocation8 + $0xb8] sm:$0xff]  }
 0x3c8   : > { %10676 = vmatpush3.bf16.msra.mxu1 %v11699_v23  ;;  %v6149_v48 = vor.u32 %v6148_v1, %v6145_v14  ;;  %v6164_v29 = vshll.u32 %v6007_v0, 16  ;;  %v13479_v4 = vsel %vm1136_vm6, %v6131_v27, %v6140_v9 }
 0x3c9   : > { %10677 = vmatprep.subr.bf16.mxu1 %v11700_v37  ;;  %v6154_v17 = vrot.slane %v6152_v41, 4  ;;  %v6157_v21 = vrot.slane %v6155_v24, 5  ;;  %v6163_v32 = vrot.slane %v6161_v50, 4 }
 0x3ca   : > { %v13482_v60 = vsel %vm1136_vm6, %v6140_v9, %v6149_v48  ;;  %v6166_v28 = vrot.slane %v6164_v29, 5  ;;  %v13529_v29 = vld [vmem:[#allocation2 + $0x80] sm:$0xff] }
 0x3cb   : > { %10646 = vmatmul.mubr.bf16.gmra.mrb[8].mxu1 %v14249_v52  ;;  %v6158_v23 = vor.u32 %v6157_v21, %v6154_v17  ;;  %v13531_v17 = vld [vmem:[#allocation2 + $0x18] sm:$0xff]  ;;  %v13533_v21 = vld [vmem:[#allocation2 + $0x20] sm:$0xff] }
 0x3cc   : > { %10649 = vmatprep.mubr.bf16.mxu1 %v13345_v58  ;;  %10678 = vmatpush3.bf16.msra.mxu1 %v11700_v37  ;;  %v13486_v62 = vor.u32 %v6166_v28, %v6163_v32  ;;  %v11704_v58 = vld [vmem:[#allocation8 + $0xc0] sm:$0xff]   ;;  %v14250_v37 = vld [vmem:[#allocation31_spill] sm:$0xff]  ;;  %v7680_v28 = vld [vmem:[#allocation2 + $0x90] sm:$0xf] }
 0x3cd   : > { %10679 = vmatprep.subr.bf16.mxu1 %v11701_v31  ;;  %v13489_v39 = vsel %vm1136_vm6, %v6149_v48, %v6158_v23  ;;  %v5304_v27 = vmul.bf16 %v13383_v2, %v14250_v37  ;;  %v11706_v2 = vld [vmem:[#allocation8 + $0xd0] sm:$0xff]  }
 0x3ce   : > { %v13493_v14 = vsel %vm1136_vm6, %v6158_v23, %v13486_v62  ;;  %v7679_v32 = vld [vmem:[#allocation2 + $0x88] sm:$0xff] }
 0x3cf   : > { %v5758_v1 = vshrl.u32 %v5304_v27, 16 }
 0x3d0   : > { %10680 = vmatpush3.bf16.msra.mxu1 %v11701_v31 }
 0x3d1   : > { %10681 = vmatprep.subr.bf16.mxu1 %v11702_v54  ;;  %v5760_v0 = vrot.slane %v5758_v1, 3 }
 0x3d3   : > { %10650 = vmatmul.mubr.bf16.gmra.mrb[12].mxu1 %v13356_v15  ;;  %v5761_v15 = vshll.u32 %v5304_v27, 16 }
 0x3d4   : > { %10653 = vmatprep.mubr.bf16.mxu1 %v13367_v36  ;;  %10682 = vmatpush3.bf16.msra.mxu1 %v11702_v54 }
 0x3d5   : > { %10683 = vmatprep.subr.bf16.mxu1 %v11703_v63  ;;  %v5763_v36 = vrot.slane %v5761_v15, 4  ;;  %v14255_v15 = vld [vmem:[#allocation17_spill] sm:$0xff] }
 0x3d7   : > { %v5764_v9 = vor.u32 %v5763_v36, %v5760_v0  ;;  %v6455_v0 = vmul.bf16 %v13533_v21, %v14255_v15  ;;  %v8188_v36 = vrot.slane %v7679_v32, 4 }
 0x3d8   : > { %10684 = vmatpush3.bf16.msra.mxu1 %v11703_v63 }
 0x3d9   : > { %10717 = vmatprep.subr.bf16.mxu1 %v11704_v58 }
 0x3db   : > { %10654 = vmatmul.mubr.bf16.gmra.mrb[16].mxu1 %v13373_v11  ;;  %v5765_v11 = vsel %vm1624_vm15, %v13403_v53, %v5764_v9  ;;  %v11710_v53 = vld [vmem:[#allocation8 + $0xf0] sm:$0xff]   ;;  %v8190_v9 = vrot.slane %v7680_v28, 4 }
 0x3dc   : > { %10657 = vmatprep.mubr.bf16.mxu1 %v13378_v5  ;;  %v11705_v5 = vld [vmem:[#allocation8 + $0xc8] sm:$0xff]  }
 0x3e3   : > { %10658 = vmatmul.mubr.bf16.gmra.mrb[20].mxu1 %v13386_v35  ;;  %v11707_v35 = vld [vmem:[#allocation8 + $0xd8] sm:$0xff]  }
 0x3e4   : > { %10661 = vmatprep.mubr.bf16.mxu1 %v13393_v34  ;;  %v11708_v34 = vld [vmem:[#allocation8 + $0xe0] sm:$0xff]  }
 0x3eb   : > { %10662 = vmatmul.mubr.bf16.gmra.mrb[24].mxu1 %v13399_v56  ;;  %v11709_v56 = vld [vmem:[#allocation8 + $0xe8] sm:$0xff]  }
 0x3ec   : > { %10665 = vmatprep.mubr.bf16.mxu1 %v13419_v26  ;;  %v11711_v26 = vld [vmem:[#allocation8 + $0xf8] sm:$0xff]  }
 0x3f3   : > { %10666 = vmatmul.mubr.bf16.gmra.mrb[28].mxu1 %v5765_v11 }
 0x3f4   : > { %10685 = vmatprep.mubr.bf16.mxu1 %v13422_v13  ;;  %v13516_v13 = vld [vmem:[#allocation8 + $0x100] sm:$0xff]  }
 0x3fb   : > { %10686 = vmatmul.mubr.bf16.vlgmr.msra.gmra.mrb[0].mxu1 %v13425_v18  ;;  %v5991_v18 = vld [vmem:[#allocation2 + $0x80] sm:$0x1f] }
 0x3fc   : > { %10689 = vmatprep.mubr.bf16.mxu1 %v13438_v3  ;;  %10718 = vmatpush3.bf16.msra.mxu1 %v11704_v58  ;;  %v6435_v3 = vld [vmem:[#allocation2 + $0x8] sm:$0xf8]  ;;  %v14254_v58 = vld [vmem:[#allocation14_spill] sm:$0xff] }
 0x3fd   : > { %10719 = vmatprep.subr.bf16.mxu1 %v11705_v5  ;;  %v6454_v27 = vmul.bf16 %v13531_v17, %v14254_v58 }
 0x400   : > { %10720 = vmatpush3.bf16.msra.mxu1 %v11705_v5  ;;  %v13549_v5 = vsel %vm1365_vm0, %v8188_v36, %v8190_v9  ;;  %v14260_v9 = vld [vmem:[#allocation20_spill] sm:$0xff] }
 0x401   : > { %10721 = vmatprep.subr.bf16.mxu1 %v11706_v2  ;;  %14257 = vst [vmem:[#allocation46_spill] sm:$0xff] %v13549_v5 }
 0x403   : > { %10690 = vmatmul.mubr.bf16.gmra.mrb[4].mxu1 %v13441_v20  ;;  %v13521_v20 = vld [vmem:[#allocation2 + $0x10] sm:$0xff] }
 0x404   : > { %10693 = vmatprep.mubr.bf16.mxu1 %v13446_v42  ;;  %10722 = vmatpush3.bf16.msra.mxu1 %v11706_v2  ;;  %v14251_v42 = vld [vmem:[#allocation43_spill] sm:$0xff] }
 0x405   : > { %10723 = vmatprep.subr.bf16.mxu1 %v11707_v35 }
 0x408   : > { %10724 = vmatpush3.bf16.msra.mxu1 %v11707_v35  ;;  %v6504_v35 = vshrl.u32 %v6454_v27, 16 }
 0x409   : > { %10725 = vmatprep.subr.bf16.mxu1 %v11708_v34 }
 0x40b   : > { %10694 = vmatmul.mubr.bf16.gmra.mrb[8].mxu1 %v13449_v30  ;;  %v6008_v30 = vmul.bf16 %v5991_v18, %v14251_v42  ;;  %v13551_v18 = vld [vmem:[#allocation2 + $0x28] sm:$0xff] }
 0x40c   : > { %10697 = vmatprep.mubr.bf16.mxu1 %v13456_v57  ;;  %10726 = vmatpush3.bf16.msra.mxu1 %v11708_v34  ;;  %v14252_v57 = vld [vmem:[#allocation15_spill] sm:$0xff]  ;;  %v6507_v34 = vshll.u32 %v6454_v27, 16  ;;  %v11713_v27 = vld [vmem:[#allocation8 + $0x108] sm:$0xff]  }
 0x40d   : > { %10727 = vmatprep.subr.bf16.mxu1 %v11709_v56  ;;  %v6170_v24 = vshrl.u32 %v6008_v30, 16  ;;  %v6173_v48 = vshll.u32 %v6008_v30, 16  ;;  %v6506_v30 = vrot.slane %v6504_v35, 3 }
 0x40f   : > { %v6172_v52 = vrot.slane %v6170_v24, 4  ;;  %v6175_v23 = vrot.slane %v6173_v48, 5 }
 0x410   : > { %10728 = vmatpush3.bf16.msra.mxu1 %v11709_v56 }
 0x411   : > { %10729 = vmatprep.subr.bf16.mxu1 %v11710_v53  ;;  %v6176_v2 = vor.u32 %v6175_v23, %v6172_v52 }
 0x413   : > { %10698 = vmatmul.mubr.bf16.gmra.mrb[12].mxu1 %v13461_v61  ;;  %v6452_v61 = vmul.bf16 %v6435_v3, %v14252_v57  ;;  %v13553_v3 = vld [vmem:[#allocation2 + $0x30] sm:$0xff] }
 0x414   : > { %10701 = vmatprep.mubr.bf16.mxu1 %v13465_v6  ;;  %10730 = vmatpush3.bf16.msra.mxu1 %v11710_v53  ;;  %v14253_v6 = vld [vmem:[#allocation16_spill] sm:$0xff]  ;;  %v6513_v53 = vshrl.u32 %v6455_v0, 16 }
 0x415   : > { %10731 = vmatprep.subr.bf16.mxu1 %v11711_v26  ;;  %v6453_v41 = vmul.bf16 %v13521_v20, %v14253_v6  ;;  %v6490_v50 = vshll.u32 %v6452_v61, 16 }
 0x417   : > { %v6498_v31 = vshll.u32 %v6453_v41, 16  ;;  %v6492_v54 = vrot.slane %v6490_v50, 4 }
 0x418   : > { %10732 = vmatpush3.bf16.msra.mxu1 %v11711_v26  ;;  %v6516_v26 = vshll.u32 %v6455_v0, 16 }
 0x419   : > { %10765 = vmatprep.subr.bf16.mxu1 %v13516_v13  ;;  %v6500_v1 = vrot.slane %v6498_v31, 4 }
 0x41a   : > { %v6518_v50 = vrot.slane %v6516_v26, 4 }
 0x41b   : > { %10702 = vmatmul.mubr.bf16.gmra.mrb[16].mxu1 %v13469_v16  ;;  %v6487_v16 = vshrl.u32 %v6452_v61, 16  ;;  %v6509_v61 = vrot.slane %v6507_v34, 4 }
 0x41c   : > { %10705 = vmatprep.mubr.bf16.mxu1 %v13476_v22  ;;  %v6495_v22 = vshrl.u32 %v6453_v41, 16  ;;  %v14258_v41 = vld [vmem:[#allocation18_spill] sm:$0xff] }
 0x41d   : > { %v6456_v24 = vmul.bf16 %v13551_v18, %v14258_v41  ;;  %v6510_v32 = vor.u32 %v6509_v61, %v6506_v30 }
 0x41e   : > { %v6497_v63 = vrot.slane %v6495_v22, 3  ;;  %v14259_v22 = vld [vmem:[#allocation19_spill] sm:$0xff] }
 0x41f   : > { %v6457_v31 = vmul.bf16 %v13553_v3, %v14259_v22  ;;  %v6522_v28 = vshrl.u32 %v6456_v24, 16  ;;  %v6525_v52 = vshll.u32 %v6456_v24, 16 }
 0x421   : > { %v6524_v0 = vrot.slane %v6522_v28, 3 }
 0x423   : > { %10706 = vmatmul.mubr.bf16.gmra.mrb[20].mxu1 %v13479_v4  ;;  %v13536_v4 = vrot.slane %v13529_v29, 4 }
 0x424   : > { %10709 = vmatprep.mubr.bf16.mxu1 %v13482_v60  ;;  %v6489_v60 = vrot.slane %v6487_v16, 3  ;;  %v6515_v16 = vrot.slane %v6513_v53, 3  ;;  %v14261_v53 = vld [vmem:[#allocation21_spill] sm:$0xff] }
 0x425   : > { %v13546_v11 = vsel %vm1365_vm0, %v13536_v4, %v8188_v36  ;;  %v6527_v36 = vrot.slane %v6525_v52, 4 }
 0x426   : > { %14256 = vst [vmem:[#allocation32_spill] sm:$0xff] %v13546_v11  ;;  %v6493_v56 = vor.u32 %v6492_v54, %v6489_v60  ;;  %v6519_v23 = vor.u32 %v6518_v50, %v6515_v16  ;;  %v6531_v60 = vshrl.u32 %v6457_v31, 16  ;;  %v13562_v54 = vld [vmem:[#allocation2 + $0x38] sm:$0xff]  ;;  %v13573_v50 = vld [vmem:[#allocation2 + $0x48] sm:$0xff] }
 0x427   : > { %v6528_v30 = vor.u32 %v6527_v36, %v6524_v0  ;;  %v13593_v11 = vld [vmem:[#allocation2 + $0x68] sm:$0xff] }
 0x428   : > { %v6520_v35 = vsel %vm1624_vm15, %v6510_v32, %v6519_v23  ;;  %v6533_v34 = vrot.slane %v6531_v60, 3 }
 0x429   : > { %v6529_v28 = vsel %vm1624_vm15, %v6519_v23, %v6528_v30 }
 0x42b   : > { %10710 = vmatmul.mubr.bf16.gmra.mrb[24].mxu1 %v13489_v39  ;;  %v6501_v39 = vor.u32 %v6500_v1, %v6497_v63  ;;  %v13564_v63 = vld [vmem:[#allocation2 + $0x40] sm:$0xff] }
 0x42c   : > { %10713 = vmatprep.mubr.bf16.mxu1 %v13493_v14  ;;  %v6177_v14 = vsel %vm1136_vm6, %v13486_v62, %v6176_v2  ;;  %v6534_v62 = vshll.u32 %v6457_v31, 16  ;;  %v6458_v2 = vmul.bf16 %v13562_v54, %v14260_v9  ;;  %v6459_v26 = vmul.bf16 %v13564_v63, %v14261_v53  ;;  %v13575_v31 = vld [vmem:[#allocation2 + $0x50] sm:$0xff] }
 0x42d   : > { %v6502_v48 = vsel %vm1624_vm15, %v6493_v56, %v6501_v39  ;;  %v6511_v1 = vsel %vm1624_vm15, %v6501_v39, %v6510_v32  ;;  %v11715_v32 = vld [vmem:[#allocation8 + $0x118] sm:$0xff]  }
 0x42e   : > { %v6536_v56 = vrot.slane %v6534_v62, 4  ;;  %v6540_v39 = vshrl.u32 %v6458_v2, 16  ;;  %v6543_v61 = vshll.u32 %v6458_v2, 16  ;;  %v6552_v16 = vshll.u32 %v6459_v26, 16 }
 0x42f   : > { %v6461_v2 = vmul.bf16 %v13575_v31, %v12494_v25  ;;  %v13603_v25 = vld [vmem:[#allocation2 + $0x78] sm:$0xff] }
 0x430   : > { %v6537_v24 = vor.u32 %v6536_v56, %v6533_v34  ;;  %v6542_v52 = vrot.slane %v6540_v39, 3  ;;  %v6545_v60 = vrot.slane %v6543_v61, 4  ;;  %v6554_v36 = vrot.slane %v6552_v16, 4  ;;  %v13583_v61 = vld [vmem:[#allocation2 + $0x58] sm:$0xff] }
 0x431   : > { %v6570_v39 = vshll.u32 %v6461_v2, 16 }
 0x433   : > { %10714 = vmatmul.mubr.bf16.gmra.mrb[28].mxu1 %v6177_v14  ;;  %v11714_v14 = vld [vmem:[#allocation8 + $0x110] sm:$0xff]  }
 0x434   : > { %10733 = vmatprep.mubr.bf16.mxu1 %v6502_v48  ;;  %v6549_v48 = vshrl.u32 %v6459_v26, 16  ;;  %v6567_v26 = vshrl.u32 %v6461_v2, 16 }
 0x436   : > { %v6551_v0 = vrot.slane %v6549_v48, 3 }
 0x438   : > { %v6555_v56 = vor.u32 %v6554_v36, %v6551_v0 }
 0x43b   : > { %10734 = vmatmul.mubr.bf16.vlgmr.msra.gmra.mrb[0].mxu1 %v6511_v1  ;;  %v6538_v1 = vsel %vm1624_vm15, %v6528_v30, %v6537_v24  ;;  %v11717_v30 = vld [vmem:[#allocation8 + $0x128] sm:$0xff]  }
 0x43c   : > { %10737 = vmatprep.mubr.bf16.mxu1 %v6520_v35  ;;  %10766 = vmatpush3.bf16.msra.mxu1 %v13516_v13  ;;  %v14262_v13 = vld [vmem:[#allocation22_spill] sm:$0xff]  ;;  %v6546_v35 = vor.u32 %v6545_v60, %v6542_v52  ;;  %v6569_v60 = vrot.slane %v6567_v26, 3 }
 0x43d   : > { %10767 = vmatprep.subr.bf16.mxu1 %v11713_v27  ;;  %v6460_v62 = vmul.bf16 %v13573_v50, %v14262_v13 }
 0x43e   : > { %v6547_v48 = vsel %vm1624_vm15, %v6537_v24, %v6546_v35  ;;  %v6556_v52 = vsel %vm1624_vm15, %v6546_v35, %v6555_v56  ;;  %v11719_v35 = vld [vmem:[#allocation8 + $0x138] sm:$0xff]  }
 0x43f   : > { %v6558_v34 = vshrl.u32 %v6460_v62, 16  ;;  %v6561_v23 = vshll.u32 %v6460_v62, 16  ;;  %v6572_v62 = vrot.slane %v6570_v39, 4 }
 0x440   : > { %10768 = vmatpush3.bf16.msra.mxu1 %v11713_v27  ;;  %v11716_v27 = vld [vmem:[#allocation8 + $0x120] sm:$0xff]  }
 0x441   : > { %10769 = vmatprep.subr.bf16.mxu1 %v11714_v14  ;;  %v6560_v16 = vrot.slane %v6558_v34, 3  ;;  %v6573_v34 = vor.u32 %v6572_v62, %v6569_v60  ;;  %v14263_v60 = vld [vmem:[#allocation29_spill] sm:$0xff] }
 0x443   : > { %10738 = vmatmul.mubr.bf16.gmra.mrb[4].mxu1 %v6529_v28  ;;  %v13585_v28 = vld [vmem:[#allocation2 + $0x60] sm:$0xff] }
 0x444   : > { %10741 = vmatprep.mubr.bf16.mxu1 %v6538_v1  ;;  %10770 = vmatpush3.bf16.msra.mxu1 %v11714_v14  ;;  %v6563_v1 = vrot.slane %v6561_v23, 4  ;;  %v6462_v14 = vmul.bf16 %v13583_v61, %v12510_v47  ;;  %v6463_v0 = vmul.bf16 %v13585_v28, %v14209_v49 }
 0x445   : > { %10771 = vmatprep.subr.bf16.mxu1 %v11715_v32 }
 0x446   : > { %v6564_v36 = vor.u32 %v6563_v1, %v6560_v16  ;;  %v6576_v2 = vshrl.u32 %v6462_v14, 16  ;;  %v6579_v24 = vshll.u32 %v6462_v14, 16  ;;  %v6585_v23 = vshrl.u32 %v6463_v0, 16 }
 0x447   : > { %v6588_v5 = vshll.u32 %v6463_v0, 16 }
 0x448   : > { %10772 = vmatpush3.bf16.msra.mxu1 %v11715_v32  ;;  %v11718_v32 = vld [vmem:[#allocation8 + $0x130] sm:$0xff]   ;;  %v6565_v26 = vsel %vm1624_vm15, %v6555_v56, %v6564_v36  ;;  %v6578_v39 = vrot.slane %v6576_v2, 3  ;;  %v6574_v16 = vsel %vm1624_vm15, %v6564_v36, %v6573_v34  ;;  %v6587_v1 = vrot.slane %v6585_v23, 3 }
 0x449   : > { %10773 = vmatprep.subr.bf16.mxu1 %v11716_v27  ;;  %v6590_v14 = vrot.slane %v6588_v5, 4 }
 0x44b   : > { %10742 = vmatmul.mubr.bf16.gmra.mrb[8].mxu1 %v6547_v48  ;;  %v13595_v48 = vld [vmem:[#allocation2 + $0x70] sm:$0xff]  ;;  %v6591_v2 = vor.u32 %v6590_v14, %v6587_v1 }
 0x44c   : > { %10745 = vmatprep.mubr.bf16.mxu1 %v6556_v52  ;;  %10774 = vmatpush3.bf16.msra.mxu1 %v11716_v27  ;;  %v6581_v52 = vrot.slane %v6579_v24, 4  ;;  %v6464_v27 = vmul.bf16 %v13593_v11, %v14210_v10  ;;  %v6465_v62 = vmul.bf16 %v13595_v48, %v14263_v60 }
 0x44d   : > { %10775 = vmatprep.subr.bf16.mxu1 %v11717_v30 }
 0x44e   : > { %v6582_v0 = vor.u32 %v6581_v52, %v6578_v39  ;;  %v6594_v49 = vshrl.u32 %v6464_v27, 16  ;;  %v6597_v56 = vshll.u32 %v6464_v27, 16  ;;  %v6603_v24 = vshrl.u32 %v6465_v62, 16 }
 0x44f   : > { %v6606_v47 = vshll.u32 %v6465_v62, 16  ;;  %v6467_v27 = vmul.bf16 %v13529_v29, %v14213_v33 }
 0x450   : > { %10776 = vmatpush3.bf16.msra.mxu1 %v11717_v30  ;;  %v11720_v30 = vld [vmem:[#allocation8 + $0x140] sm:$0xff]   ;;  %v6583_v36 = vsel %vm1624_vm15, %v6573_v34, %v6582_v0  ;;  %v6596_v5 = vrot.slane %v6594_v49, 3  ;;  %v6599_v23 = vrot.slane %v6597_v56, 4  ;;  %v6605_v39 = vrot.slane %v6603_v24, 3  ;;  %v13611_v49 = vld [vmem:[#allocation2 + $0x88] sm:$0xf] }
 0x451   : > { %10777 = vmatprep.subr.bf16.mxu1 %v11718_v32  ;;  %v6608_v52 = vrot.slane %v6606_v47, 4  ;;  %v6621_v60 = vshrl.u32 %v6467_v27, 16  ;;  %v6624_v34 = vshll.u32 %v6467_v27, 16 }
 0x452   : > { %v6600_v1 = vor.u32 %v6599_v23, %v6596_v5  ;;  %v6468_v5 = vmul.bf16 %v13611_v49, %v14250_v37 }
 0x453   : > { %10746 = vmatmul.mubr.bf16.gmra.mrb[12].mxu1 %v6565_v26  ;;  %v14264_v26 = vld [vmem:[#allocation30_spill] sm:$0xff]  ;;  %v6609_v62 = vor.u32 %v6608_v52, %v6605_v39  ;;  %v6623_v47 = vrot.slane %v6621_v60, 3  ;;  %v6626_v24 = vrot.slane %v6624_v34, 4 }
 0x454   : > { %10749 = vmatprep.mubr.bf16.mxu1 %v6574_v16  ;;  %10778 = vmatpush3.bf16.msra.mxu1 %v11718_v32  ;;  %v6466_v16 = vmul.bf16 %v13603_v25, %v14264_v26  ;;  %v6592_v32 = vsel %vm1624_vm15, %v6582_v0, %v6591_v2  ;;  %v6601_v56 = vsel %vm1624_vm15, %v6591_v2, %v6600_v1  ;;  %v6633_v39 = vshll.u32 %v6468_v5, 16 }
 0x455   : > { %10779 = vmatprep.subr.bf16.mxu1 %v11719_v35  ;;  %v6610_v0 = vsel %vm1624_vm15, %v6600_v1, %v6609_v62  ;;  %v6931_v1 = vrot.slane %v13521_v20, 4 }
 0x456   : > { %v6612_v14 = vshrl.u32 %v6466_v16, 16 }
 0x458   : > { %10780 = vmatpush3.bf16.msra.mxu1 %v11719_v35  ;;  %v6615_v35 = vshll.u32 %v6466_v16, 16  ;;  %v6614_v26 = vrot.slane %v6612_v14, 3  ;;  %v6627_v16 = vor.u32 %v6626_v24, %v6623_v47  ;;  %v6635_v14 = vrot.slane %v6633_v39, 4 }
 0x459   : > { %10813 = vmatprep.subr.bf16.mxu1 %v11720_v30 }
 0x45b   : > { %10750 = vmatmul.mubr.bf16.gmra.mrb[16].mxu1 %v6583_v36  ;;  %v6617_v36 = vrot.slane %v6615_v35, 4  ;;  %v13619_v35 = vld [vmem:[#allocation2 + $0x8] sm:$0xf0] }
 0x45c   : > { %10753 = vmatprep.mubr.bf16.mxu1 %v6592_v32  ;;  %v6630_v32 = vshrl.u32 %v6468_v5, 16  ;;  %v6930_v60 = vrot.slane %v13619_v35, 4  ;;  %v11722_v5 = vld [vmem:[#allocation8 + $0x150] sm:$0xff]  }
 0x45d   : > { %v6618_v23 = vor.u32 %v6617_v36, %v6614_v26  ;;  %v6935_v36 = vrot.slane %v13533_v21, 4 }
 0x45e   : > { %v6632_v27 = vrot.slane %v6630_v32, 3  ;;  %v11723_v32 = vld [vmem:[#allocation8 + $0x158] sm:$0xff]  }
 0x45f   : > { %v6619_v52 = vsel %vm1624_vm15, %v6609_v62, %v6618_v23  ;;  %v6628_v2 = vsel %vm1624_vm15, %v6618_v23, %v6627_v16  ;;  %v13626_v62 = vrot.slane %v13531_v17, 4  ;;  %v6937_v23 = vrot.slane %v13551_v18, 4 }
 0x460   : > { %v6636_v34 = vor.u32 %v6635_v14, %v6632_v27  ;;  %v6943_v27 = vrot.slane %v13564_v63, 4  ;;  %v11725_v14 = vld [vmem:[#allocation8 + $0x168] sm:$0xff]  }
 0x461   : > { %14265 = vst [vmem:[#allocation47_spill] sm:$0xff] %v13626_v62  ;;  %v6934_v47 = vsel %vm1365_vm0, %v6931_v1, %v13626_v62  ;;  %v13633_v24 = vsel %vm1365_vm0, %v13626_v62, %v6935_v36  ;;  %v13639_v39 = vsel %vm1365_vm0, %v6935_v36, %v6937_v23  ;;  %v11727_v36 = vld [vmem:[#allocation8 + $0x178] sm:$0xff]  }
 0x462   : > { %v6637_v26 = vsel %vm1624_vm15, %v6627_v16, %v6636_v34  ;;  %14266 = vst [vmem:[#allocation48_spill] sm:$0xff] %v13633_v24  ;;  %v6939_v16 = vrot.slane %v13553_v3, 4  ;;  %14267 = vst [vmem:[#allocation49_spill] sm:$0xff] %v13639_v39  ;;  %v11726_v34 = vld [vmem:[#allocation8 + $0x170] sm:$0xff]  }
 0x463   : > { %10754 = vmatmul.mubr.bf16.gmra.mrb[20].mxu1 %v6601_v56  ;;  %v6932_v56 = vsel %vm1365_vm0, %v6930_v60, %v6931_v1 }
 0x464   : > { %10757 = vmatprep.mubr.bf16.mxu1 %v6610_v0  ;;  %v11721_v0 = vld [vmem:[#allocation8 + $0x148] sm:$0xff]  }
 0x46b   : > { %10758 = vmatmul.mubr.bf16.gmra.mrb[24].mxu1 %v6619_v52  ;;  %v13643_v52 = vsel %vm1365_vm0, %v6937_v23, %v6939_v16  ;;  %v6949_v23 = vrot.slane %v13583_v61, 4 }
 0x46c   : > { %10761 = vmatprep.mubr.bf16.mxu1 %v6628_v2  ;;  %14268 = vst [vmem:[#allocation50_spill] sm:$0xff] %v13643_v52  ;;  %v6941_v2 = vrot.slane %v13562_v54, 4 }
 0x46e   : > { %v13649_v60 = vsel %vm1365_vm0, %v6939_v16, %v6941_v2  ;;  %v13653_v1 = vsel %vm1365_vm0, %v6941_v2, %v6943_v27  ;;  %v6951_v16 = vrot.slane %v13585_v28, 4  ;;  %v6953_v2 = vrot.slane %v13593_v11, 4 }
 0x46f   : > { %14269 = vst [vmem:[#allocation51_spill] sm:$0xff] %v13649_v60  ;;  %14270 = vst [vmem:[#allocation52_spill] sm:$0xff] %v13653_v1 }
 0x473   : > { %10762 = vmatmul.mubr.bf16.gmra.mrb[28].mxu1 %v6637_v26  ;;  %v6945_v26 = vrot.slane %v13573_v50, 4 }
 0x474   : > { %10781 = vmatprep.mubr.bf16.mxu1 %v6932_v56  ;;  %v6947_v56 = vrot.slane %v13575_v31, 4 }
 0x47b   : > { %10782 = vmatmul.mubr.bf16.vlgmr.msra.gmra.mrb[0].mxu1 %v6934_v47  ;;  %v13663_v47 = vsel %vm1365_vm0, %v6945_v26, %v6947_v56 }
 0x47c   : > { %10785 = vmatprep.mubr.bf16.mxu1 %v13633_v24  ;;  %10814 = vmatpush3.bf16.msra.mxu1 %v11720_v30  ;;  %v11724_v30 = vld [vmem:[#allocation8 + $0x160] sm:$0xff]   ;;  %14272 = vst [vmem:[#allocation55_spill] sm:$0xff] %v13663_v47  ;;  %v6961_v24 = vrot.slane %v13611_v49, 4 }
 0x47d   : > { %10815 = vmatprep.subr.bf16.mxu1 %v11721_v0 }
 0x480   : > { %10816 = vmatpush3.bf16.msra.mxu1 %v11721_v0  ;;  %v13659_v0 = vsel %vm1365_vm0, %v6943_v27, %v6945_v26  ;;  %v6955_v27 = vrot.slane %v13595_v48, 4 }
 0x481   : > { %10817 = vmatprep.subr.bf16.mxu1 %v11722_v5  ;;  %14271 = vst [vmem:[#allocation53_spill] sm:$0xff] %v13659_v0 }
 0x483   : > { %10786 = vmatmul.mubr.bf16.gmra.mrb[4].mxu1 %v13639_v39 }
 0x484   : > { %10789 = vmatprep.mubr.bf16.mxu1 %v13643_v52  ;;  %10818 = vmatpush3.bf16.msra.mxu1 %v11722_v5  ;;  %v13666_v5 = vld [vmem:[#allocation8 + $0x180] sm:$0xff]  }
 0x485   : > { %10819 = vmatprep.subr.bf16.mxu1 %v11723_v32 }
 0x488   : > { %10820 = vmatpush3.bf16.msra.mxu1 %v11723_v32  ;;  %v13672_v32 = vsel %vm1365_vm0, %v6947_v56, %v6949_v23  ;;  %v13688_v56 = vsel %vm1365_vm0, %v6953_v2, %v6955_v27 }
 0x489   : > { %10821 = vmatprep.subr.bf16.mxu1 %v11724_v30  ;;  %14273 = vst [vmem:[#allocation54_spill] sm:$0xff] %v13672_v32  ;;  %14277 = vst [vmem:[#allocation35_spill] sm:$0xff] %v13688_v56 }
 0x48b   : > { %10790 = vmatmul.mubr.bf16.gmra.mrb[8].mxu1 %v13649_v60 }
 0x48c   : > { %10793 = vmatprep.mubr.bf16.mxu1 %v13653_v1  ;;  %10822 = vmatpush3.bf16.msra.mxu1 %v11724_v30  ;;  %v13676_v30 = vsel %vm1365_vm0, %v6949_v23, %v6951_v16 }
 0x48d   : > { %10823 = vmatprep.subr.bf16.mxu1 %v11725_v14  ;;  %14274 = vst [vmem:[#allocation56_spill] sm:$0xff] %v13676_v30 }
 0x490   : > { %10824 = vmatpush3.bf16.msra.mxu1 %v11725_v14  ;;  %v13682_v14 = vsel %vm1365_vm0, %v6951_v16, %v6953_v2  ;;  %v14279_v2 = vld [vmem:[#allocation24_spill] sm:$0xff] }
 0x491   : > { %10825 = vmatprep.subr.bf16.mxu1 %v11726_v34  ;;  %14275 = vst [vmem:[#allocation34_spill] sm:$0xff] %v13682_v14 }
 0x493   : > { %10794 = vmatmul.mubr.bf16.gmra.mrb[12].mxu1 %v13659_v0 }
 0x494   : > { %10797 = vmatprep.mubr.bf16.mxu1 %v13663_v47  ;;  %10826 = vmatpush3.bf16.msra.mxu1 %v11726_v34  ;;  %v14276_v34 = vld [vmem:[#allocation13_spill] sm:$0xff] }
 0x495   : > { %10827 = vmatprep.subr.bf16.mxu1 %v11727_v36  ;;  %v7221_v26 = vmul.bf16 %v13619_v35, %v14276_v34  ;;  %v7223_v34 = vmul.bf16 %v13531_v17, %v14279_v2  ;;  %v6962_v2 = vsel %vm1365_vm0, %v13536_v4, %v6961_v24  ;;  %v11729_v24 = vld [vmem:[#allocation8 + $0x188] sm:$0xff]  }
 0x497   : > { %v7259_v47 = vshll.u32 %v7221_v26, 16 }
 0x498   : > { %10828 = vmatpush3.bf16.msra.mxu1 %v11727_v36  ;;  %v14278_v36 = vld [vmem:[#allocation28_spill] sm:$0xff] }
 0x499   : > { %10861 = vmatprep.subr.bf16.mxu1 %v13666_v5  ;;  %v7222_v23 = vmul.bf16 %v13521_v20, %v14278_v36  ;;  %v7224_v20 = vmul.bf16 %v13533_v21, %v14227_v51 }
 0x49b   : > { %10798 = vmatmul.mubr.bf16.gmra.mrb[16].mxu1 %v13672_v32  ;;  %v7256_v32 = vshrl.u32 %v7221_v26, 16  ;;  %v7264_v0 = vshrl.u32 %v7222_v23, 16  ;;  %v7267_v16 = vshll.u32 %v7222_v23, 16  ;;  %v7276_v23 = vshll.u32 %v7223_v34, 16 }
 0x49c   : > { %10801 = vmatprep.mubr.bf16.mxu1 %v13676_v30  ;;  %v6957_v30 = vrot.slane %v13603_v25, 4  ;;  %v7285_v39 = vshll.u32 %v7224_v20, 16 }
 0x49d   : > { %v7258_v36 = vrot.slane %v7256_v32, 4  ;;  %v7266_v26 = vrot.slane %v7264_v0, 4  ;;  %v7278_v62 = vrot.slane %v7276_v23, 5 }
 0x49e   : > { %v13695_v1 = vsel %vm1365_vm0, %v6955_v27, %v6957_v30  ;;  %v13699_v35 = vsel %vm1365_vm0, %v6957_v30, %v13536_v4  ;;  %v7273_v27 = vshrl.u32 %v7223_v34, 16  ;;  %v7282_v30 = vshrl.u32 %v7224_v20, 16 }
 0x4a0   : > { %v7275_v51 = vrot.slane %v7273_v27, 4  ;;  %v7284_v32 = vrot.slane %v7282_v30, 4 }
 0x4a2   : > { %v7279_v34 = vor.u32 %v7278_v62, %v7275_v51  ;;  %v7228_v51 = vmul.bf16 %v13564_v63, %v14208_v46  ;;  %v11730_v62 = vld [vmem:[#allocation8 + $0x190] sm:$0xff]  }
 0x4a3   : > { %10802 = vmatmul.mubr.bf16.gmra.mrb[20].mxu1 %v13682_v14  ;;  %v7269_v14 = vrot.slane %v7267_v16, 5  ;;  %v7287_v16 = vrot.slane %v7285_v39, 5 }
 0x4a4   : > { %10805 = vmatprep.mubr.bf16.mxu1 %v13688_v56  ;;  %v7261_v56 = vrot.slane %v7259_v47, 5  ;;  %v7225_v47 = vmul.bf16 %v13551_v18, %v14229_v44 }
 0x4a5   : > { %v7270_v52 = vor.u32 %v7269_v14, %v7266_v26  ;;  %v7226_v14 = vmul.bf16 %v13553_v3, %v14230_v12 }
 0x4a6   : > { %v7262_v60 = vor.u32 %v7261_v56, %v7258_v36  ;;  %v7291_v56 = vshrl.u32 %v7225_v47, 16  ;;  %v7294_v49 = vshll.u32 %v7225_v47, 16  ;;  %v7288_v36 = vor.u32 %v7287_v16, %v7284_v32 }
 0x4a7   : > { %v7300_v20 = vshrl.u32 %v7226_v14, 16  ;;  %v7303_v4 = vshll.u32 %v7226_v14, 16  ;;  %v7280_v26 = vsel %vm1136_vm6, %v7270_v52, %v7279_v34  ;;  %v7318_v16 = vshrl.u32 %v7228_v51, 16 }
 0x4a8   : > { %v7271_v0 = vsel %vm1136_vm6, %v7262_v60, %v7270_v52  ;;  %v7293_v27 = vrot.slane %v7291_v56, 4  ;;  %v7296_v23 = vrot.slane %v7294_v49, 5  ;;  %v7227_v60 = vmul.bf16 %v13562_v54, %v14207_v55  ;;  %v11731_v56 = vld [vmem:[#allocation8 + $0x198] sm:$0xff]  }
 0x4a9   : > { %v7289_v39 = vsel %vm1136_vm6, %v7279_v34, %v7288_v36  ;;  %v7305_v30 = vrot.slane %v7303_v4, 5  ;;  %v7321_v14 = vshll.u32 %v7228_v51, 16  ;;  %v7229_v4 = vmul.bf16 %v13573_v50, %v12693_v43 }
 0x4aa   : > { %v7297_v47 = vor.u32 %v7296_v23, %v7293_v27  ;;  %v7309_v52 = vshrl.u32 %v7227_v60, 16  ;;  %v7230_v23 = vmul.bf16 %v13575_v31, %v14240_v19 }
 0x4ab   : > { %10806 = vmatmul.mubr.bf16.gmra.mrb[24].mxu1 %v13695_v1  ;;  %v7323_v27 = vrot.slane %v7321_v14, 5  ;;  %v7231_v14 = vmul.bf16 %v13583_v61, %v14241_v7 }
 0x4ac   : > { %10809 = vmatprep.mubr.bf16.mxu1 %v13699_v35  ;;  %v7298_v34 = vsel %vm1136_vm6, %v7288_v36, %v7297_v47  ;;  %v7311_v49 = vrot.slane %v7309_v52, 4  ;;  %v7330_v36 = vshll.u32 %v7229_v4, 16  ;;  %v7339_v51 = vshll.u32 %v7230_v23, 16  ;;  %v11733_v52 = vld [vmem:[#allocation8 + $0x1a8] sm:$0xff]  }
 0x4b3   : > { %10810 = vmatmul.mubr.bf16.gmra.mrb[28].mxu1 %v6962_v2  ;;  %v7302_v2 = vrot.slane %v7300_v20, 4 }
 0x4b4   : > { %10829 = vmatprep.mubr.bf16.mxu1 %v7271_v0  ;;  %v7312_v0 = vshll.u32 %v7227_v60, 16 }
 0x4b5   : > { %v7306_v32 = vor.u32 %v7305_v30, %v7302_v2  ;;  %v7336_v30 = vshrl.u32 %v7230_v23, 16 }
 0x4b6   : > { %v7314_v20 = vrot.slane %v7312_v0, 5 }
 0x4b8   : > { %v7315_v60 = vor.u32 %v7314_v20, %v7311_v49  ;;  %v7341_v49 = vrot.slane %v7339_v51, 5  ;;  %v7232_v20 = vmul.bf16 %v13585_v28, %v14243_v38  ;;  %v7233_v51 = vmul.bf16 %v13593_v11, %v14244_v8 }
 0x4ba   : > { %v7357_v23 = vshll.u32 %v7232_v20, 16 }
 0x4bb   : > { %10830 = vmatmul.mubr.bf16.vlgmr.msra.gmra.mrb[0].mxu1 %v7280_v26  ;;  %v7320_v26 = vrot.slane %v7318_v16, 4  ;;  %v7332_v16 = vrot.slane %v7330_v36, 5 }
 0x4bc   : > { %10833 = vmatprep.mubr.bf16.mxu1 %v7289_v39  ;;  %10862 = vmatpush3.bf16.msra.mxu1 %v13666_v5  ;;  %v7307_v5 = vsel %vm1136_vm6, %v7297_v47, %v7306_v32  ;;  %v7327_v39 = vshrl.u32 %v7229_v4, 16  ;;  %v7316_v47 = vsel %vm1136_vm6, %v7306_v32, %v7315_v60  ;;  %v7348_v32 = vshll.u32 %v7231_v14, 16 }
 0x4bd   : > { %10863 = vmatprep.subr.bf16.mxu1 %v11729_v24  ;;  %v7324_v2 = vor.u32 %v7323_v27, %v7320_v26  ;;  %v7354_v27 = vshrl.u32 %v7232_v20, 16 }
 0x4be   : > { %v7329_v0 = vrot.slane %v7327_v39, 4  ;;  %v11735_v39 = vld [vmem:[#allocation8 + $0x1b8] sm:$0xff]  }
 0x4c0   : > { %10864 = vmatpush3.bf16.msra.mxu1 %v11729_v24  ;;  %v11732_v24 = vld [vmem:[#allocation8 + $0x1a0] sm:$0xff]   ;;  %v7333_v4 = vor.u32 %v7332_v16, %v7329_v0  ;;  %v7359_v0 = vrot.slane %v7357_v23, 5  ;;  %v7234_v16 = vmul.bf16 %v13595_v48, %v14245_v40 }
 0x4c1   : > { %10865 = vmatprep.subr.bf16.mxu1 %v11730_v62 }
 0x4c2   : > { %v7375_v20 = vshll.u32 %v7234_v16, 16 }
 0x4c3   : > { %10834 = vmatmul.mubr.bf16.gmra.mrb[4].mxu1 %v7298_v34  ;;  %v7338_v34 = vrot.slane %v7336_v30, 4  ;;  %v7350_v30 = vrot.slane %v7348_v32, 5 }
 0x4c4   : > { %10837 = vmatprep.mubr.bf16.mxu1 %v7307_v5  ;;  %10866 = vmatpush3.bf16.msra.mxu1 %v11730_v62  ;;  %v7325_v62 = vsel %vm1136_vm6, %v7315_v60, %v7324_v2  ;;  %v7345_v5 = vshrl.u32 %v7231_v14, 16  ;;  %v7334_v60 = vsel %vm1136_vm6, %v7324_v2, %v7333_v4  ;;  %v7363_v2 = vshrl.u32 %v7233_v51, 16 }
 0x4c5   : > { %10867 = vmatprep.subr.bf16.mxu1 %v11731_v56  ;;  %v7342_v26 = vor.u32 %v7341_v49, %v7338_v34  ;;  %v7372_v49 = vshrl.u32 %v7234_v16, 16 }
 0x4c6   : > { %v7347_v36 = vrot.slane %v7345_v5, 4  ;;  %v7365_v5 = vrot.slane %v7363_v2, 4 }
 0x4c7   : > { %v7374_v23 = vrot.slane %v7372_v49, 4 }
 0x4c8   : > { %10868 = vmatpush3.bf16.msra.mxu1 %v11731_v56  ;;  %v11734_v56 = vld [vmem:[#allocation8 + $0x1b0] sm:$0xff]   ;;  %v7351_v14 = vor.u32 %v7350_v30, %v7347_v36  ;;  %v7236_v36 = vmul.bf16 %v13529_v29, %v14248_v45  ;;  %v7682_v29 = vmul.bf16 %v13531_v17, %v14253_v6 }
 0x4c9   : > { %10869 = vmatprep.subr.bf16.mxu1 %v11732_v24 }
 0x4cb   : > { %10838 = vmatmul.mubr.bf16.gmra.mrb[8].mxu1 %v7316_v47  ;;  %v7356_v47 = vrot.slane %v7354_v27, 4  ;;  %v7235_v27 = vmul.bf16 %v13603_v25, %v14247_v59 }
 0x4cc   : > { %10841 = vmatprep.mubr.bf16.mxu1 %v7325_v62  ;;  %10870 = vmatpush3.bf16.msra.mxu1 %v11732_v24  ;;  %v7343_v24 = vsel %vm1136_vm6, %v7333_v4, %v7342_v26  ;;  %v7366_v62 = vshll.u32 %v7233_v51, 16  ;;  %v7352_v4 = vsel %vm1136_vm6, %v7342_v26, %v7351_v14  ;;  %v7393_v26 = vshll.u32 %v7236_v36, 16 }
 0x4cd   : > { %10871 = vmatprep.subr.bf16.mxu1 %v11733_v52  ;;  %v7360_v34 = vor.u32 %v7359_v0, %v7356_v47  ;;  %v7384_v51 = vshll.u32 %v7235_v27, 16  ;;  %v7390_v47 = vshrl.u32 %v7236_v36, 16  ;;  %v7220_v0 = vld [vmem:[#allocation2 + $0x88] sm:$0x1f] }
 0x4ce   : > { %v7368_v32 = vrot.slane %v7366_v62, 5 }
 0x4cf   : > { %v7386_v62 = vrot.slane %v7384_v51, 5  ;;  %v7392_v49 = vrot.slane %v7390_v47, 4  ;;  %v7683_v47 = vmul.bf16 %v13533_v21, %v14254_v58 }
 0x4d0   : > { %10872 = vmatpush3.bf16.msra.mxu1 %v11733_v52  ;;  %v13740_v52 = vld [vmem:[#allocation8 + $0x1c0] sm:$0xff]   ;;  %v7369_v30 = vor.u32 %v7368_v32, %v7365_v5  ;;  %v7237_v5 = vmul.bf16 %v7220_v0, %v14251_v42 }
 0x4d1   : > { %10873 = vmatprep.subr.bf16.mxu1 %v11734_v56 }
 0x4d2   : > { %v7370_v16 = vsel %vm1136_vm6, %v7360_v34, %v7369_v30  ;;  %v7402_v36 = vshll.u32 %v7237_v5, 16 }
 0x4d3   : > { %10842 = vmatmul.mubr.bf16.gmra.mrb[12].mxu1 %v7334_v60  ;;  %v7377_v60 = vrot.slane %v7375_v20, 5  ;;  %v7395_v20 = vrot.slane %v7393_v26, 5 }
 0x4d4   : > { %10845 = vmatprep.mubr.bf16.mxu1 %v7343_v24  ;;  %10874 = vmatpush3.bf16.msra.mxu1 %v11734_v56  ;;  %v7361_v56 = vsel %vm1136_vm6, %v7351_v14, %v7360_v34  ;;  %v7727_v34 = vshll.u32 %v7682_v29, 16 }
 0x4d5   : > { %10875 = vmatprep.subr.bf16.mxu1 %v11735_v39  ;;  %v7378_v24 = vor.u32 %v7377_v60, %v7374_v23  ;;  %v7724_v23 = vshrl.u32 %v7682_v29, 16  ;;  %v7399_v60 = vshrl.u32 %v7237_v5, 16 }
 0x4d6   : > { %v7729_v26 = vrot.slane %v7727_v34, 4  ;;  %v7686_v34 = vmul.bf16 %v13562_v54, %v14259_v22  ;;  %v7688_v54 = vmul.bf16 %v13573_v50, %v14261_v53  ;;  %v7689_v53 = vmul.bf16 %v13575_v31, %v14262_v13  ;;  %v11741_v31 = vld [vmem:[#allocation8 + $0x1e8] sm:$0xff]  }
 0x4d7   : > { %v7379_v14 = vsel %vm1136_vm6, %v7369_v30, %v7378_v24  ;;  %v7726_v17 = vrot.slane %v7724_v23, 3  ;;  %v7401_v0 = vrot.slane %v7399_v60, 4 }
 0x4d8   : > { %10876 = vmatpush3.bf16.msra.mxu1 %v11735_v39  ;;  %v7381_v39 = vshrl.u32 %v7235_v27, 16 }
 0x4d9   : > { %10909 = vmatprep.subr.bf16.mxu1 %v13740_v52 }
 0x4da   : > { %v7383_v2 = vrot.slane %v7381_v39, 4 }
 0x4db   : > { %10846 = vmatmul.mubr.bf16.gmra.mrb[16].mxu1 %v7352_v4  ;;  %v7664_v4 = vld [vmem:[#allocation2 + $0x10] sm:$0xf8] }
 0x4dc   : > { %10849 = vmatprep.mubr.bf16.mxu1 %v7361_v56  ;;  %v7681_v32 = vmul.bf16 %v7664_v4, %v14252_v57  ;;  %v7387_v27 = vor.u32 %v7386_v62, %v7383_v2  ;;  %v7396_v56 = vor.u32 %v7395_v20, %v7392_v49  ;;  %v7684_v57 = vmul.bf16 %v13551_v18, %v14255_v15 }
 0x4dd   : > { %v7733_v4 = vshrl.u32 %v7683_v47, 16  ;;  %v7730_v49 = vor.u32 %v7729_v26, %v7726_v17 }
 0x4de   : > { %v7716_v39 = vshrl.u32 %v7681_v32, 16  ;;  %v7719_v51 = vshll.u32 %v7681_v32, 16  ;;  %v7388_v30 = vsel %vm1136_vm6, %v7378_v24, %v7387_v27  ;;  %v7397_v6 = vsel %vm1136_vm6, %v7387_v27, %v7396_v56 }
 0x4df   : > { %v7742_v24 = vshrl.u32 %v7684_v57, 16  ;;  %v7745_v20 = vshll.u32 %v7684_v57, 16  ;;  %v7735_v5 = vrot.slane %v7733_v4, 3  ;;  %v7685_v27 = vmul.bf16 %v13553_v3, %v14258_v41 }
 0x4e0   : > { %v7718_v2 = vrot.slane %v7716_v39, 3  ;;  %v7721_v62 = vrot.slane %v7719_v51, 4  ;;  %v7687_v41 = vmul.bf16 %v13564_v63, %v14260_v9  ;;  %v11739_v63 = vld [vmem:[#allocation8 + $0x1d8] sm:$0xff]  }
 0x4e1   : > { %v7744_v18 = vrot.slane %v7742_v24, 3  ;;  %v7747_v23 = vrot.slane %v7745_v20, 4  ;;  %v7754_v39 = vshll.u32 %v7685_v27, 16 }
 0x4e2   : > { %v7722_v21 = vor.u32 %v7721_v62, %v7718_v2  ;;  %v7769_v2 = vshrl.u32 %v7687_v41, 16  ;;  %v7772_v62 = vshll.u32 %v7687_v41, 16 }
 0x4e3   : > { %10850 = vmatmul.mubr.bf16.gmra.mrb[20].mxu1 %v7370_v16  ;;  %v7404_v16 = vrot.slane %v7402_v36, 5  ;;  %v7751_v36 = vshrl.u32 %v7685_v27, 16  ;;  %v7748_v51 = vor.u32 %v7747_v23, %v7744_v18  ;;  %v7756_v3 = vrot.slane %v7754_v39, 4  ;;  %v14281_v39 = vld [vmem:[#allocation25_spill] sm:$0xff] }
 0x4e4   : > { %10853 = vmatprep.mubr.bf16.mxu1 %v7379_v14  ;;  %v7736_v14 = vshll.u32 %v7683_v47, 16  ;;  %v7731_v15 = vsel %vm1624_vm15, %v7722_v21, %v7730_v49  ;;  %v11737_v47 = vld [vmem:[#allocation8 + $0x1c8] sm:$0xff]   ;;  %v7771_v24 = vrot.slane %v7769_v2, 3  ;;  %v7774_v20 = vrot.slane %v7772_v62, 4  ;;  %v14280_v21 = vld [vmem:[#allocation23_spill] sm:$0xff] }
 0x4e5   : > { %v7405_v29 = vor.u32 %v7404_v16, %v7401_v0  ;;  %v7753_v17 = vrot.slane %v7751_v36, 3  ;;  %v11738_v0 = vld [vmem:[#allocation8 + $0x1d0] sm:$0xff]   ;;  %v7787_v27 = vshrl.u32 %v7689_v53, 16 }
 0x4e6   : > { %v7738_v32 = vrot.slane %v7736_v14, 4  ;;  %v7778_v14 = vshrl.u32 %v7688_v54, 16 }
 0x4e7   : > { %v7406_v58 = vsel %vm1136_vm6, %v7396_v56, %v7405_v29  ;;  %v7763_v56 = vshll.u32 %v7686_v34, 16  ;;  %v7757_v16 = vor.u32 %v7756_v3, %v7753_v17  ;;  %v11742_v17 = vld [vmem:[#allocation8 + $0x1f0] sm:$0xff]  }
 0x4e8   : > { %v7739_v60 = vor.u32 %v7738_v32, %v7735_v5  ;;  %v11740_v5 = vld [vmem:[#allocation8 + $0x1e0] sm:$0xff]   ;;  %v7775_v32 = vor.u32 %v7774_v20, %v7771_v24 }
 0x4e9   : > { %v7765_v22 = vrot.slane %v7763_v56, 4  ;;  %v7758_v9 = vsel %vm1624_vm15, %v7748_v51, %v7757_v16 }
 0x4ea   : > { %v7749_v26 = vsel %vm1624_vm15, %v7739_v60, %v7748_v51 }
 0x4eb   : > { %10854 = vmatmul.mubr.bf16.gmra.mrb[24].mxu1 %v7388_v30  ;;  %v7760_v30 = vshrl.u32 %v7686_v34, 16 }
 0x4ec   : > { %10857 = vmatprep.mubr.bf16.mxu1 %v7397_v6  ;;  %v7740_v6 = vsel %vm1624_vm15, %v7730_v49, %v7739_v60  ;;  %v7781_v49 = vshll.u32 %v7688_v54, 16  ;;  %v7789_v60 = vrot.slane %v7787_v27, 3 }
 0x4ed   : > { %v7762_v57 = vrot.slane %v7760_v30, 3 }
 0x4ee   : > { %v7783_v29 = vrot.slane %v7781_v49, 4  ;;  %v14283_v49 = vld [vmem:[#allocation29_spill] sm:$0xff] }
 0x4ef   : > { %v7766_v4 = vor.u32 %v7765_v22, %v7762_v57 }
 0x4f1   : > { %v7767_v50 = vsel %vm1624_vm15, %v7757_v16, %v7766_v4  ;;  %v7776_v13 = vsel %vm1624_vm15, %v7766_v4, %v7775_v32 }
 0x4f3   : > { %10858 = vmatmul.mubr.bf16.gmra.mrb[28].mxu1 %v7406_v58  ;;  %v7690_v58 = vmul.bf16 %v13583_v61, %v14280_v21  ;;  %v7691_v61 = vmul.bf16 %v13585_v28, %v14281_v39  ;;  %v11743_v28 = vld [vmem:[#allocation8 + $0x1f8] sm:$0xff]  }
 0x4f4   : > { %10877 = vmatprep.mubr.bf16.mxu1 %v7731_v15  ;;  %v7790_v15 = vshll.u32 %v7689_v53, 16 }
 0x4f5   : > { %v7796_v23 = vshrl.u32 %v7690_v58, 16  ;;  %v7799_v34 = vshll.u32 %v7690_v58, 16  ;;  %v7805_v41 = vshrl.u32 %v7691_v61, 16  ;;  %v13793_v58 = vld [vmem:[#allocation2 + $0x80] sm:$0xff] }
 0x4f6   : > { %v7792_v36 = vrot.slane %v7790_v15, 4 }
 0x4f7   : > { %v7798_v30 = vrot.slane %v7796_v23, 3  ;;  %v7801_v56 = vrot.slane %v7799_v34, 4  ;;  %v7807_v16 = vrot.slane %v7805_v41, 3 }
 0x4f8   : > { %v7793_v3 = vor.u32 %v7792_v36, %v7789_v60 }
 0x4f9   : > { %v7802_v57 = vor.u32 %v7801_v56, %v7798_v30  ;;  %v11798_v56 = vld [vmem:[#allocation2 + $0x90] sm:$0xf] }
 0x4fb   : > { %10878 = vmatmul.mubr.bf16.vlgmr.msra.gmra.mrb[0].mxu1 %v7740_v6  ;;  %v7803_v62 = vsel %vm1624_vm15, %v7793_v3, %v7802_v57 }
 0x4fc   : > { %10881 = vmatprep.mubr.bf16.mxu1 %v7749_v26  ;;  %10910 = vmatpush3.bf16.msra.mxu1 %v13740_v52  ;;  %v7780_v52 = vrot.slane %v7778_v14, 3  ;;  %v7808_v26 = vshll.u32 %v7691_v61, 16 }
 0x4fd   : > { %10911 = vmatprep.subr.bf16.mxu1 %v11737_v47 }
 0x4fe   : > { %v7784_v18 = vor.u32 %v7783_v29, %v7780_v52  ;;  %v7810_v2 = vrot.slane %v7808_v26, 4 }
 0x500   : > { %10912 = vmatpush3.bf16.msra.mxu1 %v11737_v47  ;;  %v7785_v51 = vsel %vm1624_vm15, %v7775_v32, %v7784_v18  ;;  %v14282_v47 = vld [vmem:[#allocation26_spill] sm:$0xff]  ;;  %v7811_v24 = vor.u32 %v7810_v2, %v7807_v16 }
 0x501   : > { %10913 = vmatprep.subr.bf16.mxu1 %v11738_v0  ;;  %v7692_v6 = vmul.bf16 %v13593_v11, %v14282_v47  ;;  %v7693_v11 = vmul.bf16 %v13595_v48, %v14210_v10  ;;  %v7697_v47 = vmul.bf16 %v11798_v56, %v14250_v37  ;;  %v8124_v37 = vld [vmem:[#allocation2 + $0x10] sm:$0xf0] }
 0x502   : > { %v7812_v10 = vsel %vm1624_vm15, %v7802_v57, %v7811_v24  ;;  %v8159_v2 = vrot.slane %v8124_v37, 4  ;;  %v14299_v56 = vld [vmem:[#allocation24_spill] sm:$0xff] }
 0x503   : > { %10882 = vmatmul.mubr.bf16.gmra.mrb[4].mxu1 %v7758_v9  ;;  %v7814_v22 = vshrl.u32 %v7692_v6, 16  ;;  %v7817_v54 = vshll.u32 %v7692_v6, 16  ;;  %v11744_v9 = vld [vmem:[#allocation8 + $0x200] sm:$0xff]   ;;  %v7823_v20 = vshrl.u32 %v7693_v11, 16  ;;  %v7826_v53 = vshll.u32 %v7693_v11, 16 }
 0x504   : > { %10885 = vmatprep.mubr.bf16.mxu1 %v7767_v50  ;;  %10914 = vmatpush3.bf16.msra.mxu1 %v11738_v0  ;;  %v7794_v0 = vsel %vm1624_vm15, %v7784_v18, %v7793_v3  ;;  %v13798_v18 = vld [vmem:[#allocation2 + $0x88] sm:$0xff]  ;;  %v7859_v41 = vshrl.u32 %v7697_v47, 16  ;;  %v7862_v26 = vshll.u32 %v7697_v47, 16 }
 0x505   : > { %10915 = vmatprep.subr.bf16.mxu1 %v11739_v63  ;;  %v7816_v4 = vrot.slane %v7814_v22, 3  ;;  %v7819_v14 = vrot.slane %v7817_v54, 4  ;;  %v7825_v48 = vrot.slane %v7823_v20, 3  ;;  %v7828_v21 = vrot.slane %v7826_v53, 4  ;;  %v11747_v20 = vld [vmem:[#allocation8 + $0x218] sm:$0xff]   ;;  %v14288_v53 = vld [vmem:[#allocation50_spill] sm:$0xff] }
 0x506   : > { %v7696_v23 = vmul.bf16 %v13798_v18, %v14213_v33  ;;  %v7861_v54 = vrot.slane %v7859_v41, 3 }
 0x507   : > { %v7820_v50 = vor.u32 %v7819_v14, %v7816_v4  ;;  %v7829_v34 = vor.u32 %v7828_v21, %v7825_v48  ;;  %v11745_v14 = vld [vmem:[#allocation8 + $0x208] sm:$0xff]   ;;  %v14291_v48 = vld [vmem:[#allocation53_spill] sm:$0xff]  ;;  %v11751_v21 = vld [vmem:[#allocation8 + $0x238] sm:$0xff]  }
 0x508   : > { %10916 = vmatpush3.bf16.msra.mxu1 %v11739_v63  ;;  %v7694_v63 = vmul.bf16 %v13603_v25, %v14283_v49  ;;  %v7850_v36 = vshrl.u32 %v7696_v23, 16  ;;  %v7853_v39 = vshll.u32 %v7696_v23, 16  ;;  %v14286_v49 = vld [vmem:[#allocation48_spill] sm:$0xff]  ;;  %v11799_v23 = vld [vmem:[#allocation2 + $0x18] sm:$0xff] }
 0x509   : > { %10917 = vmatprep.subr.bf16.mxu1 %v11740_v5  ;;  %v7821_v32 = vsel %vm1624_vm15, %v7811_v24, %v7820_v50  ;;  %v7830_v61 = vsel %vm1624_vm15, %v7820_v50, %v7829_v34  ;;  %v11746_v24 = vld [vmem:[#allocation8 + $0x210] sm:$0xff]  }
 0x50a   : > { %v7832_v52 = vshrl.u32 %v7694_v63, 16  ;;  %v7835_v29 = vshll.u32 %v7694_v63, 16  ;;  %v7855_v3 = vrot.slane %v7853_v39, 4  ;;  %v14287_v63 = vld [vmem:[#allocation49_spill] sm:$0xff]  ;;  %v14289_v50 = vld [vmem:[#allocation51_spill] sm:$0xff] }
 0x50b   : > { %10886 = vmatmul.mubr.bf16.gmra.mrb[8].mxu1 %v7776_v13 }
 0x50c   : > { %10889 = vmatprep.mubr.bf16.mxu1 %v7785_v51  ;;  %10918 = vmatpush3.bf16.msra.mxu1 %v11740_v5  ;;  %v14284_v5 = vld [vmem:[#allocation30_spill] sm:$0xff]  ;;  %v7834_v27 = vrot.slane %v7832_v52, 3  ;;  %v7837_v15 = vrot.slane %v7835_v29, 4  ;;  %v11748_v52 = vld [vmem:[#allocation8 + $0x220] sm:$0xff]  }
 0x50d   : > { %10919 = vmatprep.subr.bf16.mxu1 %v11741_v31  ;;  %v7695_v25 = vmul.bf16 %v13793_v58, %v14284_v5  ;;  %v11749_v29 = vld [vmem:[#allocation8 + $0x228] sm:$0xff]   ;;  %v14292_v5 = vld [vmem:[#allocation55_spill] sm:$0xff] }
 0x50e   : > { %v7838_v60 = vor.u32 %v7837_v15, %v7834_v27  ;;  %v14295_v27 = vld [vmem:[#allocation34_spill] sm:$0xff]  ;;  %v14296_v15 = vld [vmem:[#allocation35_spill] sm:$0xff] }
 0x50f   : > { %v7844_v13 = vshll.u32 %v7695_v25, 16 }
 0x510   : > { %10920 = vmatpush3.bf16.msra.mxu1 %v11741_v31  ;;  %v7841_v31 = vshrl.u32 %v7695_v25, 16  ;;  %v7839_v6 = vsel %vm1624_vm15, %v7829_v34, %v7838_v60  ;;  %v14293_v25 = vld [vmem:[#allocation54_spill] sm:$0xff]  ;;  %v14297_v34 = vld [vmem:[#allocation28_spill] sm:$0xff] }
 0x511   : > { %10921 = vmatprep.subr.bf16.mxu1 %v11742_v17  ;;  %v7846_v30 = vrot.slane %v7844_v13, 4  ;;  %v14298_v13 = vld [vmem:[#allocation13_spill] sm:$0xff] }
 0x512   : > { %v7843_v51 = vrot.slane %v7841_v31, 3  ;;  %v8451_v31 = vmul.bf16 %v11799_v23, %v14297_v34 }
 0x513   : > { %10890 = vmatmul.mubr.bf16.gmra.mrb[12].mxu1 %v7794_v0 }
 0x514   : > { %10893 = vmatprep.mubr.bf16.mxu1 %v7803_v62  ;;  %10922 = vmatpush3.bf16.msra.mxu1 %v11742_v17  ;;  %v7852_v17 = vrot.slane %v7850_v36, 3  ;;  %v7847_v33 = vor.u32 %v7846_v30, %v7843_v51  ;;  %v14285_v62 = vld [vmem:[#allocation47_spill] sm:$0xff]  ;;  %v8493_v36 = vshrl.u32 %v8451_v31, 16  ;;  %v8496_v39 = vshll.u32 %v8451_v31, 16  ;;  %v11800_v30 = vld [vmem:[#allocation2 + $0x20] sm:$0xff] }
 0x515   : > { %10923 = vmatprep.subr.bf16.mxu1 %v11743_v28  ;;  %v8161_v4 = vsel %vm1365_vm0, %v8159_v2, %v14285_v62  ;;  %v8452_v47 = vmul.bf16 %v11800_v30, %v14299_v56  ;;  %v11802_v62 = vld [vmem:[#allocation2 + $0x30] sm:$0xff] }
 0x516   : > { %v7856_v57 = vor.u32 %v7855_v3, %v7852_v17  ;;  %v7848_v22 = vsel %vm1624_vm15, %v7838_v60, %v7847_v33  ;;  %v8450_v60 = vmul.bf16 %v8124_v37, %v14298_v13  ;;  %v8498_v17 = vrot.slane %v8496_v39, 5  ;;  %v11801_v3 = vld [vmem:[#allocation2 + $0x28] sm:$0xff] }
 0x518   : > { %10924 = vmatpush3.bf16.msra.mxu1 %v11743_v28  ;;  %v7864_v28 = vrot.slane %v7862_v26, 4  ;;  %v7857_v0 = vsel %vm1624_vm15, %v7847_v33, %v7856_v57  ;;  %v8488_v51 = vshll.u32 %v8450_v60, 16  ;;  %v14300_v33 = vld [vmem:[#allocation33_spill] sm:$0xff]  ;;  %v14301_v26 = vld [vmem:[#allocation32_spill] sm:$0xff] }
 0x519   : > { %10957 = vmatprep.subr.bf16.mxu1 %v11744_v9  ;;  %v8453_v41 = vmul.bf16 %v11801_v3, %v14300_v33 }
 0x51a   : > { %v7865_v16 = vor.u32 %v7864_v28, %v7861_v54  ;;  %v8505_v54 = vshll.u32 %v8452_v47, 16 }
 0x51b   : > { %10894 = vmatmul.mubr.bf16.gmra.mrb[16].mxu1 %v7812_v10  ;;  %v14290_v10 = vld [vmem:[#allocation52_spill] sm:$0xff] }
 0x51c   : > { %10897 = vmatprep.mubr.bf16.mxu1 %v7821_v32  ;;  %v7866_v11 = vsel %vm1624_vm15, %v7856_v57, %v7865_v16  ;;  %v14294_v32 = vld [vmem:[#allocation56_spill] sm:$0xff]  ;;  %v8514_v16 = vshll.u32 %v8453_v41, 16 }
 0x523   : > { %10898 = vmatmul.mubr.bf16.gmra.mrb[20].mxu1 %v7830_v61  ;;  %v8485_v61 = vshrl.u32 %v8450_v60, 16 }
 0x524   : > { %10901 = vmatprep.mubr.bf16.mxu1 %v7839_v6  ;;  %v8495_v6 = vrot.slane %v8493_v36, 4 }
 0x525   : > { %v8487_v57 = vrot.slane %v8485_v61, 4 }
 0x526   : > { %v8499_v28 = vor.u32 %v8498_v17, %v8495_v6 }
 0x52b   : > { %10902 = vmatmul.mubr.bf16.gmra.mrb[24].mxu1 %v7848_v22  ;;  %v8502_v22 = vshrl.u32 %v8452_v47, 16 }
 0x52c   : > { %10905 = vmatprep.mubr.bf16.mxu1 %v7857_v0  ;;  %v8511_v0 = vshrl.u32 %v8453_v41, 16 }
 0x52d   : > { %v8504_v2 = vrot.slane %v8502_v22, 4 }
 0x533   : > { %10906 = vmatmul.mubr.bf16.gmra.mrb[28].mxu1 %v7866_v11  ;;  %v8507_v11 = vrot.slane %v8505_v54, 5 }
 0x534   : > { %10925 = vmatprep.mubr.bf16.mxu1 %v8161_v4  ;;  %v14302_v4 = vld [vmem:[#allocation46_spill] sm:$0xff] }
 0x53b   : > { %10926 = vmatmul.mubr.bf16.vlgmr.msra.gmra.mrb[0].mxu1 %v14286_v49  ;;  %v8513_v49 = vrot.slane %v8511_v0, 4 }
 0x53c   : > { %10929 = vmatprep.mubr.bf16.mxu1 %v14287_v63  ;;  %10958 = vmatpush3.bf16.msra.mxu1 %v11744_v9  ;;  %v11750_v9 = vld [vmem:[#allocation8 + $0x230] sm:$0xff]   ;;  %v8516_v63 = vrot.slane %v8514_v16, 5 }
 0x53d   : > { %10959 = vmatprep.subr.bf16.mxu1 %v11745_v14 }
 0x540   : > { %10960 = vmatpush3.bf16.msra.mxu1 %v11745_v14 }
 0x541   : > { %10961 = vmatprep.subr.bf16.mxu1 %v11746_v24 }
 0x543   : > { %10930 = vmatmul.mubr.bf16.gmra.mrb[4].mxu1 %v14288_v53  ;;  %v8508_v53 = vor.u32 %v8507_v11, %v8504_v2 }
 0x544   : > { %10933 = vmatprep.mubr.bf16.mxu1 %v14289_v50  ;;  %10962 = vmatpush3.bf16.msra.mxu1 %v11746_v24  ;;  %v11803_v24 = vld [vmem:[#allocation2 + $0x38] sm:$0xff] }
 0x545   : > { %10963 = vmatprep.subr.bf16.mxu1 %v11747_v20 }
 0x548   : > { %10964 = vmatpush3.bf16.msra.mxu1 %v11747_v20  ;;  %v8455_v20 = vmul.bf16 %v11803_v24, %v14230_v12  ;;  %v11805_v12 = vld [vmem:[#allocation2 + $0x48] sm:$0xff] }
 0x549   : > { %10965 = vmatprep.subr.bf16.mxu1 %v11748_v52  ;;  %v8457_v23 = vmul.bf16 %v11805_v12, %v14208_v46  ;;  %v11807_v46 = vld [vmem:[#allocation2 + $0x58] sm:$0xff] }
 0x54a   : > { %v8459_v3 = vmul.bf16 %v11807_v46, %v14240_v19  ;;  %v11809_v19 = vld [vmem:[#allocation2 + $0x68] sm:$0xff] }
 0x54b   : > { %10934 = vmatmul.mubr.bf16.gmra.mrb[8].mxu1 %v14290_v10  ;;  %v8529_v10 = vshrl.u32 %v8455_v20, 16  ;;  %v8547_v36 = vshrl.u32 %v8457_v23, 16  ;;  %v8550_v39 = vshll.u32 %v8457_v23, 16 }
 0x54c   : > { %10937 = vmatprep.mubr.bf16.mxu1 %v14291_v48  ;;  %10966 = vmatpush3.bf16.msra.mxu1 %v11748_v52  ;;  %v8532_v48 = vshll.u32 %v8455_v20, 16  ;;  %v8568_v22 = vshll.u32 %v8459_v3, 16 }
 0x54d   : > { %10967 = vmatprep.subr.bf16.mxu1 %v11749_v29  ;;  %v8549_v6 = vrot.slane %v8547_v36, 4  ;;  %v8552_v17 = vrot.slane %v8550_v39, 5 }
 0x54e   : > { %v8570_v11 = vrot.slane %v8568_v22, 5 }
 0x550   : > { %10968 = vmatpush3.bf16.msra.mxu1 %v11749_v29  ;;  %v8517_v29 = vor.u32 %v8516_v63, %v8513_v49 }
 0x551   : > { %10969 = vmatprep.subr.bf16.mxu1 %v11750_v9 }
 0x553   : > { %10938 = vmatmul.mubr.bf16.gmra.mrb[12].mxu1 %v14292_v5  ;;  %v11804_v5 = vld [vmem:[#allocation2 + $0x40] sm:$0xff] }
 0x554   : > { %10941 = vmatprep.mubr.bf16.mxu1 %v14293_v25  ;;  %10970 = vmatpush3.bf16.msra.mxu1 %v11750_v9  ;;  %v8509_v9 = vsel %vm1136_vm6, %v8499_v28, %v8508_v53  ;;  %v8456_v25 = vmul.bf16 %v11804_v5, %v14207_v55  ;;  %v11806_v55 = vld [vmem:[#allocation2 + $0x50] sm:$0xff] }
 0x555   : > { %10971 = vmatprep.subr.bf16.mxu1 %v11751_v21  ;;  %v8458_v56 = vmul.bf16 %v11806_v55, %v12693_v43  ;;  %v11808_v43 = vld [vmem:[#allocation2 + $0x60] sm:$0xff] }
 0x556   : > { %v8538_v31 = vshrl.u32 %v8456_v25, 16  ;;  %v8541_v13 = vshll.u32 %v8456_v25, 16  ;;  %v8460_v16 = vmul.bf16 %v11808_v43, %v14241_v7  ;;  %v11810_v7 = vld [vmem:[#allocation2 + $0x70] sm:$0xff] }
 0x557   : > { %v8556_v41 = vshrl.u32 %v8458_v56, 16 }
 0x558   : > { %10972 = vmatpush3.bf16.msra.mxu1 %v11751_v21  ;;  %v8543_v30 = vrot.slane %v8541_v13, 5 }
 0x55b   : > { %10942 = vmatmul.mubr.bf16.gmra.mrb[16].mxu1 %v14294_v32  ;;  %v8518_v32 = vsel %vm1136_vm6, %v8508_v53, %v8517_v29 }
 0x55c   : > { %10945 = vmatprep.mubr.bf16.mxu1 %v14295_v27  ;;  %v8531_v27 = vrot.slane %v8529_v10, 4 }
 0x563   : > { %10946 = vmatmul.mubr.bf16.gmra.mrb[20].mxu1 %v14296_v15  ;;  %v8534_v15 = vrot.slane %v8532_v48, 5 }
 0x564   : > { %10949 = vmatprep.mubr.bf16.mxu1 %v13695_v1  ;;  %v8490_v1 = vrot.slane %v8488_v51, 5  ;;  %v8540_v51 = vrot.slane %v8538_v31, 4 }
 0x565   : > { %v8535_v60 = vor.u32 %v8534_v15, %v8531_v27 }
 0x566   : > { %v8491_v37 = vor.u32 %v8490_v1, %v8487_v57  ;;  %v8544_v33 = vor.u32 %v8543_v30, %v8540_v51  ;;  %v8553_v57 = vor.u32 %v8552_v17, %v8549_v6  ;;  %v8565_v1 = vshrl.u32 %v8459_v3, 16  ;;  %v8449_v51 = vld [vmem:[#allocation2 + $0x90] sm:$0x1f] }
 0x568   : > { %v8500_v14 = vsel %vm1136_vm6, %v8491_v37, %v8499_v28  ;;  %v8545_v54 = vsel %vm1136_vm6, %v8535_v60, %v8544_v33  ;;  %v8558_v28 = vrot.slane %v8556_v41, 4  ;;  %v8554_v37 = vsel %vm1136_vm6, %v8544_v33, %v8553_v57 }
 0x569   : > { %v8567_v2 = vrot.slane %v8565_v1, 4 }
 0x56b   : > { %10950 = vmatmul.mubr.bf16.gmra.mrb[24].mxu1 %v13699_v35  ;;  %v8454_v35 = vmul.bf16 %v11802_v62, %v14229_v44  ;;  %v8461_v62 = vmul.bf16 %v11809_v19, %v14243_v38  ;;  %v8571_v49 = vor.u32 %v8570_v11, %v8567_v2  ;;  %v11811_v38 = vld [vmem:[#allocation2 + $0x78] sm:$0xff] }
 0x56c   : > { %10953 = vmatprep.mubr.bf16.mxu1 %v14301_v26  ;;  %v8559_v26 = vshll.u32 %v8458_v56, 16  ;;  %v11813_v19 = vld [vmem:[%s12225_s13] sm:$0xf] }
 0x56d   : > { %v8520_v50 = vshrl.u32 %v8454_v35, 16  ;;  %v8523_v52 = vshll.u32 %v8454_v35, 16  ;;  %v8583_v63 = vshrl.u32 %v8461_v62, 16  ;;  %v8586_v24 = vshll.u32 %v8461_v62, 16 }
 0x56e   : > { %v8561_v0 = vrot.slane %v8559_v26, 5  ;;  %v8971_v62 = vunpack.c.l.bf16 %v11813_v19 }
 0x56f   : > { %v8522_v21 = vrot.slane %v8520_v50, 4  ;;  %v8525_v44 = vrot.slane %v8523_v52, 5  ;;  %v8462_v52 = vmul.bf16 %v11810_v7, %v14244_v8  ;;  %v8585_v10 = vrot.slane %v8583_v63, 4 }
 0x570   : > { %v8562_v35 = vor.u32 %v8561_v0, %v8558_v28  ;;  %v8588_v48 = vrot.slane %v8586_v24, 5  ;;  %v8464_v8 = vmul.bf16 %v13793_v58, %v14247_v59  ;;  %v8466_v58 = vmul.bf16 %v8449_v51, %v14251_v42  ;;  %v13868_v0 = vld [vmem:[%s14028_s6] ss:$0 sm:$0xff] }
 0x571   : > { %v8526_v34 = vor.u32 %v8525_v44, %v8522_v21  ;;  %v8592_v44 = vshrl.u32 %v8462_v52, 16  ;;  %v8595_v5 = vshll.u32 %v8462_v52, 16 }
 0x572   : > { %v8563_v20 = vsel %vm1136_vm6, %v8553_v57, %v8562_v35  ;;  %v8589_v25 = vor.u32 %v8588_v48, %v8585_v10  ;;  %v8610_v36 = vshrl.u32 %v8464_v8, 16  ;;  %v8613_v39 = vshll.u32 %v8464_v8, 16 }
 0x573   : > { %10954 = vmatmul.mubr.bf16.gmra.mrb[28].mxu1 %v14302_v4  ;;  %v8527_v61 = vsel %vm1136_vm6, %v8517_v29, %v8526_v34  ;;  %v8536_v47 = vsel %vm1136_vm6, %v8526_v34, %v8535_v60  ;;  %v8574_v4 = vshrl.u32 %v8460_v16, 16  ;;  %v8572_v29 = vsel %vm1136_vm6, %v8562_v35, %v8571_v49 }
 0x574   : > { %10973 = vmatprep.mubr.bf16.mxu1 %v8500_v14  ;;  %v8577_v14 = vshll.u32 %v8460_v16, 16  ;;  %v8594_v12 = vrot.slane %v8592_v44, 4  ;;  %v8597_v23 = vrot.slane %v8595_v5, 5  ;;  %v8615_v59 = vrot.slane %v8613_v39, 5  ;;  %v11812_v16 = vld [vmem:[%s12225_s13 + $0x4] sm:$0xff]  }
 0x575   : > { %v8576_v53 = vrot.slane %v8574_v4, 4  ;;  %v8631_v3 = vshll.u32 %v8466_v58, 16 }
 0x576   : > { %v8579_v50 = vrot.slane %v8577_v14, 5  ;;  %v8598_v60 = vor.u32 %v8597_v23, %v8594_v12 }
 0x577   : > { %v8633_v57 = vrot.slane %v8631_v3, 5 }
 0x578   : > { %v8580_v21 = vor.u32 %v8579_v50, %v8576_v53  ;;  %v8599_v56 = vsel %vm1136_vm6, %v8589_v25, %v8598_v60  ;;  %v8972_v50 = vunpack.c.l.bf16 %v11812_v16 }
 0x57a   : > { %v8581_v15 = vsel %vm1136_vm6, %v8571_v49, %v8580_v21  ;;  %v8590_v34 = vsel %vm1136_vm6, %v8580_v21, %v8589_v25  ;;  %v11814_v49 = vld [vmem:[%s12225_s13 + $0xc] sm:$0xff]   ;;  %v11815_v25 = vld [vmem:[%s12225_s13 + $0x14] sm:$0xff]  }
 0x57b   : > { %10974 = vmatmul.mubr.bf16.vlgmr.msra.gmra.mrb[0].mxu1 %v8509_v9  ;;  %v8463_v9 = vmul.bf16 %v11811_v38, %v14245_v40  ;;  %v8465_v40 = vmul.bf16 %v13798_v18, %v14248_v45  ;;  %v8628_v18 = vshrl.u32 %v8466_v58, 16  ;;  %v8974_v63 = vunpack.c.l.bf16 %v11814_v49 }
 0x57c   : > { %10977 = vmatprep.mubr.bf16.mxu1 %v8518_v32  ;;  %v8975_v8 = vunpack.c.h.bf16 %v11814_v49 }
 0x57d   : > { %v8601_v32 = vshrl.u32 %v8463_v9, 16  ;;  %v8604_v27 = vshll.u32 %v8463_v9, 16  ;;  %v8619_v30 = vshrl.u32 %v8465_v40, 16  ;;  %v8622_v55 = vshll.u32 %v8465_v40, 16 }
 0x57e   : > { %v8630_v26 = vrot.slane %v8628_v18, 4 }
 0x57f   : > { %v8603_v31 = vrot.slane %v8601_v32, 4  ;;  %v8606_v13 = vrot.slane %v8604_v27, 5  ;;  %v8621_v17 = vrot.slane %v8619_v30, 4  ;;  %v8624_v46 = vrot.slane %v8622_v55, 5 }
 0x580   : > { %v8634_v42 = vor.u32 %v8633_v57, %v8630_v26  ;;  %v8977_v32 = vunpack.c.h.bf16 %v11815_v25  ;;  %v8976_v55 = vunpack.c.l.bf16 %v11815_v25 }
 0x581   : > { %v8625_v33 = vor.u32 %v8624_v46, %v8621_v17 }
 0x583   : > { %10978 = vmatmul.mubr.bf16.gmra.mrb[4].mxu1 %v8527_v61  ;;  %v8607_v61 = vor.u32 %v8606_v13, %v8603_v31  ;;  %v8635_v22 = vsel %vm1136_vm6, %v8625_v33, %v8634_v42 }
 0x584   : > { %10981 = vmatprep.mubr.bf16.mxu1 %v8536_v47  ;;  %v8612_v47 = vrot.slane %v8610_v36, 4 }
 0x585   : > { %v8608_v6 = vsel %vm1136_vm6, %v8598_v60, %v8607_v61  ;;  %v11816_v60 = vld [vmem:[%s12225_s13 + $0x1c] sm:$0xff]  }
 0x586   : > { %v8616_v45 = vor.u32 %v8615_v59, %v8612_v47  ;;  %v8978_v36 = vunpack.c.l.bf16 %v11816_v60 }
 0x588   : > { %v8617_v41 = vsel %vm1136_vm6, %v8607_v61, %v8616_v45  ;;  %v8626_v1 = vsel %vm1136_vm6, %v8616_v45, %v8625_v33  ;;  %v11817_v33 = vld [vmem:[%s12225_s13 + $0x24] sm:$0xff]  }
 0x58b   : > { %10982 = vmatmul.mubr.bf16.gmra.mrb[8].mxu1 %v8545_v54  ;;  %v13863_v54 = vld [vmem:[%s14027_s5] ss:$0 sm:$0xff] }
 0x58c   : > { %10985 = vmatprep.mubr.bf16.mxu1 %v8554_v37  ;;  %v8973_v37 = vunpack.c.h.bf16 %v11812_v16 }
 0x593   : > { %10986 = vmatmul.mubr.bf16.gmra.mrb[12].mxu1 %v8563_v20 }
 0x594   : > { %10989 = vmatprep.mubr.bf16.mxu1 %v8572_v29 }
 0x59b   : > { %10990 = vmatmul.mubr.bf16.gmra.mrb[16].mxu1 %v8581_v15 }
 0x59c   : > { %10993 = vmatprep.mubr.bf16.mxu1 %v8590_v34 }
 0x5a3   : > { %10994 = vmatmul.mubr.bf16.gmra.mrb[20].mxu1 %v8599_v56 }
 0x5a4   : > { %10997 = vmatprep.mubr.bf16.mxu1 %v8608_v6 }
 0x5ab   : > { %10998 = vmatmul.mubr.bf16.gmra.mrb[24].mxu1 %v8617_v41  ;;  %v8981_v41 = vunpack.c.h.bf16 %v11817_v33 }
 0x5ac   : > { %11001 = vmatprep.mubr.bf16.mxu1 %v8626_v1 }
 0x5b3   : > { %11002 = vmatmul.mubr.bf16.gmra.mrb[28].mxu1 %v8635_v22  ;;  %v8979_v22 = vunpack.c.h.bf16 %v11816_v60 }
 0x64e   : > { %v10975_v28 = vpop.f32.mrb[0].mxu1 }
 0x64f   : > { %v8902_v43 = vmul.f32 %v10975_v28, %v13863_v54  ;;  %v8734_v2 = vpop.f32.mrb[1].mxu1 }
 0x650   : > { %v8900_v11 = vmul.f32 %v13863_v54, %v8734_v2  ;;  %v10976_v35 = vpop.f32.mrb[2].mxu1  ;;  %v11818_v2 = vld [vmem:[%s12225_s13 + $0x2c] sm:$0xff]  }
 0x651   : > { %v8941_v4 = vadd.f32 %v13868_v0, %v8902_v43  ;;  %v8903_v14 = vmul.f32 %v10976_v35, %v13863_v54  ;;  %v8737_v24 = vpop.f32.mrb[3].mxu1  ;;  %v8983_v25 = vunpack.c.h.bf16 %v11818_v2 }
 0x652   : > { %v8939_v20 = vadd.f32 %v13868_v0, %v8900_v11  ;;  %v8901_v53 = vmul.f32 %v13863_v54, %v8737_v24  ;;  %v8982_v11 = vunpack.c.l.bf16 %v11818_v2 }
 0x653   : > { %v9005_v7 = vadd.f32 %v8973_v37, %v8941_v4  ;;  %v8942_v52 = vadd.f32 %v13868_v0, %v8903_v14  ;;  %v8980_v14 = vunpack.c.l.bf16 %v11817_v33 }
 0x654   : > { %v9003_v29 = vadd.f32 %v8971_v62, %v8939_v20  ;;  %v8940_v10 = vadd.f32 %v13868_v0, %v8901_v53 }
 0x655   : > { %v9006_v48 = vadd.f32 %v8974_v63, %v8942_v52  ;;  %v9037_v21 = vmax.f32 %v9005_v7, 0.0 }
 0x656   : > { %v9004_v38 = vadd.f32 %v8972_v50, %v8940_v10  ;;  %v10979_v9 = vpop.f32.mrb[4].mxu1  ;;  %v9035_v15 = vmax.f32 %v9003_v29, 0.0 }
 0x657   : > { %v9038_v44 = vmax.f32 %v9006_v48, 0.0  ;;  %v8906_v5 = vmul.f32 %v10979_v9, %v13863_v54  ;;  %v8750_v27 = vpop.f32.mrb[5].mxu1  ;;  %v11819_v48 = vld [vmem:[%s12225_s13 + $0x34] sm:$0xff]  }
 0x658   : > { %v9036_v12 = vmax.f32 %v9004_v38, 0.0  ;;  %v8904_v23 = vmul.f32 %v13863_v54, %v8750_v27  ;;  %v10980_v34 = vpop.f32.mrb[6].mxu1  ;;  %v8985_v38 = vunpack.c.h.bf16 %v11819_v48  ;;  %v8984_v60 = vunpack.c.l.bf16 %v11819_v48 }
 0x659   : > { %v9622_v31 = vpack.c.bf16 %v9038_v44, %v9037_v21  ;;  %v8945_v13 = vadd.f32 %v13868_v0, %v8906_v5  ;;  %v8907_v40 = vmul.f32 %v10980_v34, %v13863_v54  ;;  %v8753_v39 = vpop.f32.mrb[7].mxu1 }
 0x65a   : > { %v9617_v61 = vpack.c.bf16 %v9036_v12, %v9035_v15  ;;  %v8943_v51 = vadd.f32 %v13868_v0, %v8904_v23  ;;  %v8905_v30 = vmul.f32 %v13863_v54, %v8753_v39  ;;  %v11820_v23 = vld [vmem:[%s12225_s13 + $0x3c] sm:$0xff]  }
 0x65b   : > { %9694 = vst [vmem:[%s13891_s21 + $0x8] sm:$0xff] %v9622_v31   ;;  %v9009_v56 = vadd.f32 %v8977_v32, %v8945_v13  ;;  %v8946_v47 = vadd.f32 %v13868_v0, %v8907_v40  ;;  %v8987_v33 = vunpack.c.h.bf16 %v11820_v23 }
 0x65c   : > { %9618 = vst [vmem:[%s13891_s21] sm:$0xff] %v9617_v61   ;;  %v9007_v59 = vadd.f32 %v8975_v8, %v8943_v51  ;;  %v8944_v58 = vadd.f32 %v13868_v0, %v8905_v30  ;;  %v8986_v8 = vunpack.c.l.bf16 %v11820_v23 }
 0x65d   : > { %v9010_v6 = vadd.f32 %v8978_v36, %v8946_v47  ;;  %v9041_v45 = vmax.f32 %v9009_v56, 0.0 }
 0x65e   : > { %v9008_v17 = vadd.f32 %v8976_v55, %v8944_v58  ;;  %v10983_v46 = vpop.f32.mrb[8].mxu1  ;;  %v9039_v57 = vmax.f32 %v9007_v59, 0.0 }
 0x65f   : > { %v9042_v18 = vmax.f32 %v9010_v6, 0.0  ;;  %v8910_v3 = vmul.f32 %v10983_v46, %v13863_v54  ;;  %v8766_v26 = vpop.f32.mrb[9].mxu1  ;;  %v11821_v6 = vld [vmem:[%s12225_s13 + $0x44] sm:$0xff]  }
 0x660   : > { %v9040_v1 = vmax.f32 %v9008_v17, 0.0  ;;  %v8908_v42 = vmul.f32 %v13863_v54, %v8766_v26  ;;  %v10984_v28 = vpop.f32.mrb[10].mxu1  ;;  %v8989_v17 = vunpack.c.h.bf16 %v11821_v6  ;;  %v8988_v2 = vunpack.c.l.bf16 %v11821_v6 }
 0x661   : > { %v9632_v43 = vpack.c.bf16 %v9042_v18, %v9041_v45  ;;  %v8949_v16 = vadd.f32 %v13868_v0, %v8910_v3  ;;  %v8911_v37 = vmul.f32 %v10984_v28, %v13863_v54  ;;  %v8769_v19 = vpop.f32.mrb[11].mxu1 }
 0x662   : > { %v9627_v62 = vpack.c.bf16 %v9040_v1, %v9039_v57  ;;  %v8947_v35 = vadd.f32 %v13868_v0, %v8908_v42  ;;  %v8909_v4 = vmul.f32 %v13863_v54, %v8769_v19  ;;  %v11822_v42 = vld [vmem:[%s12225_s13 + $0x4c] sm:$0xff]  }
 0x663   : > { %9696 = vst [vmem:[%s13891_s21 + $0x18] sm:$0xff] %v9632_v43   ;;  %v9013_v49 = vadd.f32 %v8981_v41, %v8949_v16  ;;  %v8950_v63 = vadd.f32 %v13868_v0, %v8911_v37  ;;  %v8991_v48 = vunpack.c.h.bf16 %v11822_v42 }
 0x664   : > { %9695 = vst [vmem:[%s13891_s21 + $0x10] sm:$0xff] %v9627_v62   ;;  %v9011_v24 = vadd.f32 %v8979_v22, %v8947_v35  ;;  %v8948_v20 = vadd.f32 %v13868_v0, %v8909_v4  ;;  %v8990_v22 = vunpack.c.l.bf16 %v11822_v42 }
 0x665   : > { %v9014_v53 = vadd.f32 %v8982_v11, %v8950_v63  ;;  %v9045_v52 = vmax.f32 %v9013_v49, 0.0 }
 0x666   : > { %v9012_v50 = vadd.f32 %v8980_v14, %v8948_v20  ;;  %v10987_v7 = vpop.f32.mrb[12].mxu1  ;;  %v9043_v21 = vmax.f32 %v9011_v24, 0.0 }
 0x667   : > { %v9046_v29 = vmax.f32 %v9014_v53, 0.0  ;;  %v8914_v10 = vmul.f32 %v10987_v7, %v13863_v54  ;;  %v8782_v9 = vpop.f32.mrb[13].mxu1  ;;  %v11823_v53 = vld [vmem:[%s12225_s13 + $0x54] sm:$0xff]  }
 0x668   : > { %v9044_v44 = vmax.f32 %v9012_v50, 0.0  ;;  %v8912_v5 = vmul.f32 %v13863_v54, %v8782_v9  ;;  %v10988_v32 = vpop.f32.mrb[14].mxu1  ;;  %v8993_v50 = vunpack.c.h.bf16 %v11823_v53  ;;  %v8992_v23 = vunpack.c.l.bf16 %v11823_v53 }
 0x669   : > { %v9642_v27 = vpack.c.bf16 %v9046_v29, %v9045_v52  ;;  %v8953_v15 = vadd.f32 %v13868_v0, %v8914_v10  ;;  %v8915_v12 = vmul.f32 %v10988_v32, %v13863_v54  ;;  %v8785_v34 = vpop.f32.mrb[15].mxu1 }
 0x66a   : > { %v9637_v31 = vpack.c.bf16 %v9044_v44, %v9043_v21  ;;  %v8951_v13 = vadd.f32 %v13868_v0, %v8912_v5  ;;  %v8913_v40 = vmul.f32 %v13863_v54, %v8785_v34  ;;  %v11824_v5 = vld [vmem:[%s12225_s13 + $0x5c] sm:$0xff]  }
 0x66b   : > { %9698 = vst [vmem:[%s13891_s21 + $0x28] sm:$0xff] %v9642_v27   ;;  %v9017_v36 = vadd.f32 %v8985_v38, %v8953_v15  ;;  %v8954_v39 = vadd.f32 %v13868_v0, %v8915_v12  ;;  %v8995_v6 = vunpack.c.h.bf16 %v11824_v5 }
 0x66c   : > { %9697 = vst [vmem:[%s13891_s21 + $0x20] sm:$0xff] %v9637_v31   ;;  %v9015_v61 = vadd.f32 %v8983_v25, %v8951_v13  ;;  %v8952_v51 = vadd.f32 %v13868_v0, %v8913_v40  ;;  %v8994_v25 = vunpack.c.l.bf16 %v11824_v5 }
 0x66d   : > { %v9018_v30 = vadd.f32 %v8986_v8, %v8954_v39  ;;  %v9049_v47 = vmax.f32 %v9017_v36, 0.0 }
 0x66e   : > { %v9016_v55 = vadd.f32 %v8984_v60, %v8952_v51  ;;  %v10991_v56 = vpop.f32.mrb[16].mxu1  ;;  %v9047_v45 = vmax.f32 %v9015_v61, 0.0 }
 0x66f   : > { %v9050_v59 = vmax.f32 %v9018_v30, 0.0  ;;  %v8918_v58 = vmul.f32 %v10991_v56, %v13863_v54  ;;  %v8798_v46 = vpop.f32.mrb[17].mxu1  ;;  %v11825_v30 = vld [vmem:[%s12225_s13 + $0x64] sm:$0xff]  }
 0x670   : > { %v9048_v18 = vmax.f32 %v9016_v55, 0.0  ;;  %v8916_v3 = vmul.f32 %v13863_v54, %v8798_v46  ;;  %v10992_v41 = vpop.f32.mrb[18].mxu1  ;;  %v8997_v55 = vunpack.c.h.bf16 %v11825_v30  ;;  %v8996_v42 = vunpack.c.l.bf16 %v11825_v30 }
 0x671   : > { %v9652_v26 = vpack.c.bf16 %v9050_v59, %v9049_v47  ;;  %v8957_v57 = vadd.f32 %v13868_v0, %v8918_v58  ;;  %v8919_v1 = vmul.f32 %v10992_v41, %v13863_v54  ;;  %v8801_v28 = vpop.f32.mrb[19].mxu1 }
 0x672   : > { %v9647_v43 = vpack.c.bf16 %v9048_v18, %v9047_v45  ;;  %v8955_v16 = vadd.f32 %v13868_v0, %v8916_v3  ;;  %v8917_v37 = vmul.f32 %v13863_v54, %v8801_v28  ;;  %v11826_v3 = vld [vmem:[%s12225_s13 + $0x6c] sm:$0xff]  }
 0x673   : > { %9700 = vst [vmem:[%s13891_s21 + $0x38] sm:$0xff] %v9652_v26   ;;  %v9021_v11 = vadd.f32 %v8989_v17, %v8957_v57  ;;  %v8958_v19 = vadd.f32 %v13868_v0, %v8919_v1  ;;  %v8999_v53 = vunpack.c.h.bf16 %v11826_v3 }
 0x674   : > { %9699 = vst [vmem:[%s13891_s21 + $0x30] sm:$0xff] %v9647_v43   ;;  %v9019_v62 = vadd.f32 %v8987_v33, %v8955_v16  ;;  %v8956_v35 = vadd.f32 %v13868_v0, %v8917_v37  ;;  %v8998_v33 = vunpack.c.l.bf16 %v11826_v3 }
 0x675   : > { %v9022_v4 = vadd.f32 %v8990_v22, %v8958_v19  ;;  %v9053_v63 = vmax.f32 %v9021_v11, 0.0 }
 0x676   : > { %v9020_v14 = vadd.f32 %v8988_v2, %v8956_v35  ;;  %v10995_v49 = vpop.f32.mrb[20].mxu1  ;;  %v9051_v52 = vmax.f32 %v9019_v62, 0.0 }
 0x677   : > { %v9054_v24 = vmax.f32 %v9022_v4, 0.0  ;;  %v8922_v20 = vmul.f32 %v10995_v49, %v13863_v54  ;;  %v8814_v7 = vpop.f32.mrb[21].mxu1  ;;  %v11827_v4 = vld [vmem:[%s12225_s13 + $0x74] sm:$0xff]  }
 0x678   : > { %v9052_v29 = vmax.f32 %v9020_v14, 0.0  ;;  %v8920_v10 = vmul.f32 %v13863_v54, %v8814_v7  ;;  %v10996_v38 = vpop.f32.mrb[22].mxu1  ;;  %v9001_v14 = vunpack.c.h.bf16 %v11827_v4  ;;  %v9000_v5 = vunpack.c.l.bf16 %v11827_v4 }
 0x679   : > { %v9662_v9 = vpack.c.bf16 %v9054_v24, %v9053_v63  ;;  %v8961_v21 = vadd.f32 %v13868_v0, %v8922_v20  ;;  %v8923_v44 = vmul.f32 %v10996_v38, %v13863_v54  ;;  %v8817_v32 = vpop.f32.mrb[23].mxu1 }
 0x67a   : > { %v9657_v27 = vpack.c.bf16 %v9052_v29, %v9051_v52  ;;  %v8959_v15 = vadd.f32 %v13868_v0, %v8920_v10  ;;  %v8921_v12 = vmul.f32 %v13863_v54, %v8817_v32  ;;  %v11828_v10 = vld [vmem:[%s12225_s13 + $0x7c] sm:$0xf] }
 0x67b   : > { %9702 = vst [vmem:[%s13891_s21 + $0x48] sm:$0xff] %v9662_v9   ;;  %v9025_v8 = vadd.f32 %v8993_v50, %v8961_v21  ;;  %v8962_v34 = vadd.f32 %v13868_v0, %v8923_v44 }
 0x67c   : > { %9701 = vst [vmem:[%s13891_s21 + $0x40] sm:$0xff] %v9657_v27   ;;  %v9023_v31 = vadd.f32 %v8991_v48, %v8959_v15  ;;  %v8960_v13 = vadd.f32 %v13868_v0, %v8921_v12  ;;  %v9002_v48 = vunpack.c.l.bf16 %v11828_v10 }
 0x67d   : > { %v9026_v40 = vadd.f32 %v8994_v25, %v8962_v34  ;;  %v9057_v39 = vmax.f32 %v9025_v8, 0.0 }
 0x67e   : > { %v9024_v60 = vadd.f32 %v8992_v23, %v8960_v13  ;;  %v10999_v36 = vpop.f32.mrb[24].mxu1  ;;  %v9055_v47 = vmax.f32 %v9023_v31, 0.0 }
 0x67f   : > { %v9058_v61 = vmax.f32 %v9026_v40, 0.0  ;;  %v8926_v51 = vmul.f32 %v10999_v36, %v13863_v54  ;;  %v8830_v56 = vpop.f32.mrb[25].mxu1 }
 0x680   : > { %v9056_v59 = vmax.f32 %v9024_v60, 0.0  ;;  %v8924_v58 = vmul.f32 %v13863_v54, %v8830_v56  ;;  %v11000_v17 = vpop.f32.mrb[26].mxu1 }
 0x681   : > { %v9672_v46 = vpack.c.bf16 %v9058_v61, %v9057_v39  ;;  %v8965_v45 = vadd.f32 %v13868_v0, %v8926_v51  ;;  %v8927_v18 = vmul.f32 %v11000_v17, %v13863_v54  ;;  %v8833_v41 = vpop.f32.mrb[27].mxu1 }
 0x682   : > { %v9667_v26 = vpack.c.bf16 %v9056_v59, %v9055_v47  ;;  %v8963_v57 = vadd.f32 %v13868_v0, %v8924_v58  ;;  %v8925_v1 = vmul.f32 %v13863_v54, %v8833_v41 }
 0x683   : > { %9704 = vst [vmem:[%s13891_s21 + $0x58] sm:$0xff] %v9672_v46   ;;  %v9029_v22 = vadd.f32 %v8997_v55, %v8965_v45  ;;  %v8966_v28 = vadd.f32 %v13868_v0, %v8927_v18 }
 0x684   : > { %9703 = vst [vmem:[%s13891_s21 + $0x50] sm:$0xff] %v9667_v26   ;;  %v9027_v43 = vadd.f32 %v8995_v6, %v8963_v57  ;;  %v8964_v16 = vadd.f32 %v13868_v0, %v8925_v1 }
 0x685   : > { %v9030_v37 = vadd.f32 %v8998_v33, %v8966_v28  ;;  %v9061_v19 = vmax.f32 %v9029_v22, 0.0 }
 0x686   : > { %v9028_v2 = vadd.f32 %v8996_v42, %v8964_v16  ;;  %v11003_v11 = vpop.f32.mrb[28].mxu1  ;;  %v9059_v63 = vmax.f32 %v9027_v43, 0.0 }
 0x687   : > { %v9062_v62 = vmax.f32 %v9030_v37, 0.0  ;;  %v8930_v35 = vmul.f32 %v11003_v11, %v13863_v54  ;;  %v8846_v49 = vpop.f32.mrb[29].mxu1 }
 0x688   : > { %v9060_v24 = vmax.f32 %v9028_v2, 0.0  ;;  %v8928_v20 = vmul.f32 %v13863_v54, %v8846_v49  ;;  %v11004_v50 = vpop.f32.mrb[30].mxu1 }
 0x689   : > { %v9682_v7 = vpack.c.bf16 %v9062_v62, %v9061_v19  ;;  %v8969_v52 = vadd.f32 %v13868_v0, %v8930_v35  ;;  %v8931_v29 = vmul.f32 %v11004_v50, %v13863_v54  ;;  %v8849_v38 = vpop.f32.mrb[31].mxu1 }
 0x68a   : > { %v9677_v9 = vpack.c.bf16 %v9060_v24, %v9059_v63  ;;  %v8967_v21 = vadd.f32 %v13868_v0, %v8928_v20  ;;  %v8929_v44 = vmul.f32 %v13863_v54, %v8849_v38 }
 0x68b   : > { %9706 = vst [vmem:[%s13891_s21 + $0x68] sm:$0xff] %v9682_v7   ;;  %v9033_v25 = vadd.f32 %v9001_v14, %v8969_v52  ;;  %v8970_v32 = vadd.f32 %v13868_v0, %v8931_v29 }
 0x68c   : > { %9705 = vst [vmem:[%s13891_s21 + $0x60] sm:$0xff] %v9677_v9   ;;  %v9031_v27 = vadd.f32 %v8999_v53, %v8967_v21  ;;  %v8968_v15 = vadd.f32 %v13868_v0, %v8929_v44 }
 0x68d   : > { %v9034_v12 = vadd.f32 %v9002_v48, %v8970_v32  ;;  %v9065_v8 = vmax.f32 %v9033_v25, 0.0 }
 0x68e   : > { %v9032_v23 = vadd.f32 %v9000_v5, %v8968_v15  ;;  %v9063_v54 = vmax.f32 %v9031_v27, 0.0 }
 0x68f   : > { %v9066_v34 = vmax.f32 %v9034_v12, 0.0 }
 0x690   : > { %v9064_v31 = vmax.f32 %v9032_v23, 0.0 }
 0x691   : > { %v9692_v13 = vpack.c.bf16 %v9066_v34, %v9065_v8 }
 0x692   : > { %v9687_v0 = vpack.c.bf16 %v9064_v31, %v9063_v54 }
 0x693   : > { %9708 = vst [vmem:[%s13891_s21 + $0x78] sm:$0xff] %v9692_v13  }
 0x694   : > { %9707 = vst [vmem:[%s13891_s21 + $0x70] sm:$0xff] %v9687_v0  }
 0x695   : > { %11928 = shalt.err (!%p11925_p1)
}
 0x696   : > { %s11929_s15 = scalar_lea.hbm %s13974_s30, 2048  ;;  %s11933_s21 = scalar_lea.hbm %s14029_s7, 4096 }
 0x697   : > { %p11930_p13 = scmp.ne.s32.totalorder %s13974_s30, %s11929_s15  ;;  %p11934_p4 = scmp.lt.u32.totalorder %s13974_s30, %s14029_s7 }
 0x698   : > { %p11935_p5 = scmp.lt.u32.totalorder %s11933_s21, %s11929_s15  ;;  %p11937_p11 = scmp.lt.u32.totalorder %s11929_s15, %s13974_s30 }
 0x699   : > { %p11931_p6 = pnand %p11930_p13, %p14303_p0 }
 0x69a   : > { %p11936_p8 = por %p11935_p5, %p11934_p4 }
 0x69b   : > { %p11932_p10 = pneg %p11931_p6 }
 0x69c   : > { %p11938_p2 = por %p11937_p11, %p11936_p8 }
 0x69e   : > { %p11939_p3 = pnand %p11938_p2, %p11932_p10 }
 0x6a0   : > { %11942 = shalt.err (!%p11939_p3)
}
 0x6a1   : > { %s11996_s13 = smov 64   ;;  %s11997_s9 = smov 4  }
 0x6a2   : > { %11527 = dma.vmem_to_hbm [thread:$0]  (%p14303_p0), %s13976_s22, 2048, %s13974_s30, %s9228_s28, %s11996_s13, %s11996_s13, %s11997_s9  }
 0x6a3 PF: > { %s9256_s29 = sand.u32 1, %s11973_s24   ;;  %p14304_p7 = scmp.ne.s32.totalorder %s14136_s8, 0 }
 0x6a4   : > { %p14305_p9 = scmp.ge.s32.totalorder %s11985_s27, 2  ;;  %s9257_s11 = scalar_lea.sflag [#allocation5], %s9256_s29 }
 0x6a6   : > { %p11541_p12 = pnand %p14305_p9, %p14304_p7 }
 0x6a8   : > { %11968 = dma.done.wait (!%p11541_p12), %s9257_s11, 2048  }
 0x6a9   : > { %11970 = vsyncadd (!%p11541_p12), %s9257_s11, 4294965248  ;;  %p21_p1 = scmp.ge.s32.totalorder %s12154_s12, 4   ;;  %s14306_s24 = smov %s11977_s25 }
 0x6aa   : > { %s14307_s25 = smov %s11981_s26  ;;  %s14308_s26 = smov %s12170_s17 }
 0x6ab   : > { %s14309_s27 = smov %s12154_s12  ;;  %23 = sbr.rel (!%p21_p1) target bundleno = 6 (0x6), region = 117 }
 0x6b2   :  { %9262 = vsyncpa [#allocation4], 1 }
 0x6b3   :  { %9264 = vsyncpa [#allocation4 + $0x1], 1 }
 0x6b4   :  { %9265 = vsyncpa [#allocation7], 1 }
 0x6b5   :  { %9266 = vsyncpa [#allocation5], 1 }
 0x6b6   :  { %9268 = vsyncpa [#allocation5 + $0x1], 1 }

// kernel: tpu_custom_call.1
= control target key start
LH: loop header
LB: loop body
LE: loop exit
PB: predicated region body
PF: predicated region fallthrough
CT: control target
= control target key end

     0   :  { %12 = vsyncpa [#allocation4], 0  ;;  %s14022_s0 = inlined_call_operand.hbm [shape: bf16[2,256,128], index: 0, kind: input, shape index: {}]   ;;  %s14023_s1 = inlined_call_operand.hbm [shape: bf16[9,128,128], index: 1, kind: input, shape index: {}]   ;;  %s14024_s2 = inlined_call_operand.vmem [shape: f32[1,128], index: 2, kind: input, shape index: {}]   ;;  %s14025_s3 = inlined_call_operand.vmem [shape: f32[1,128], index: 3, kind: input, shape index: {}]   ;;  %s14026_s4 = inlined_call_operand.hbm [shape: bf16[9,128,128], index: 4, kind: input, shape index: {}]   ;;  %s14027_s5 = inlined_call_operand.vmem [shape: f32[1,128], index: 5, kind: input, shape index: {}]   ;;  %s14028_s6 = inlined_call_operand.vmem [shape: f32[1,128], index: 6, kind: input, shape index: {}]   ;;  %s14029_s7 = inlined_call_operand.hbm [shape: bf16[2,256,128], index: 7, kind: output, shape index: {}]  }
   0x1   :  { %14 = vsyncpa [#allocation4 + $0x1], 0 }
   0x2   :  { %15 = vsyncpa [#allocation7], 0 }
   0x3   :  { %16 = vsyncpa [#allocation5], 0 }
   0x4   :  { %18 = vsyncpa [#allocation5 + $0x1], 0  ;;  %s12038_s24 = smov 0   ;;  %s12040_s25 = smov 0  }
   0x5   :  { %s12042_s26 = smov 0   ;;  %s12044_s27 = smov 0  }
   0x6 LB: > { %s12059_s28 = sadd.s32 4294967295, %s11985_s27   ;;  %s9333_s29 = sadd.s32 4294967294, %s11985_s27   ;;  %s11985_s27 = sphi %s12044_s27, %s14309_s27   ;;  %s11981_s26 = sphi %s12042_s26, %s14308_s26   ;;  %s11977_s25 = sphi %s12040_s25, %s14307_s25   ;;  %s11973_s24 = sphi %s12038_s24, %s14306_s24  }
   0x7   : > { %p44_p0 = scmp.ne.s32.totalorder %s11977_s25, %s11973_s24  ;;  %p14030_p1 = scmp.eq.s32.totalorder %s12059_s28, 0 }
   0x8   : > { %p200_p3 = scmp.eq.s32.totalorder %s9333_s29, 1  ;;  %p9334_p5 = scmp.ge.s32.totalorder %s11985_s27, 1 }
   0x9   : > { %p12068_p4 = por %p14030_p1, %p44_p0  ;;  %p207_p7 = scmp.lt.s32.totalorder %s11985_s27, 3 }
   0xa   : > { %p12073_p6 = por %p200_p3, %p44_p0  ;;  %s11987_s10 = smov [#allocation6]  }
   0xb   : > { %s14135_s30 = scalar_select %p12068_p4, 1, 0 }
   0xc   : > { %s14136_s8 = scalar_select %p12073_p6, 1, 0 }
   0xd   : > { %p12078_p8 = pnand %p9334_p5, %p207_p7  ;;  %s219_s11 = sshll.u32 %s11987_s10, 4  ;;  %s12082_s11 = int_to_ptr.vmem [resolvable:$true] %s219_s11 }
   0xe   : > { %s11988_s13 = smov [#allocation8]   ;;  %s11829_s17 = scalar_lea.hbm %s14023_s1, 9216 }
   0xf   : > { %p11529_p9 = pneg %p12078_p8  ;;  %s238_s14 = sshll.u32 %s11988_s13, 4  ;;  %s12093_s14 = int_to_ptr.vmem [resolvable:$true] %s238_s14 }
  0x10   : > { %p11830_p12 = scmp.ne.s32.totalorder %s14023_s1, %s11829_s17  ;;  %p11836_p5 = scmp.lt.u32.totalorder %s11829_s17, %s14023_s1 }
  0x11   : > { %p12089_p11 = pnand %p11529_p9, %p14030_p1 }
  0x13   : > { %p11831_p13 = pneg %p12089_p11 }
  0x15   : > { %p11832_p0 = pnand %p11831_p13, %p11830_p12 }
  0x17   : > { %p11833_p3 = pneg %p11832_p0 }
  0x19   : > { %p11838_p7 = pnand %p11836_p5, %p11833_p3 }
  0x1b   : > { %11841 = shalt.err (!%p11838_p7)
}
  0x1c   : > { %s11842_s22 = scalar_lea.vmem %s12082_s11, 9216  ;;  %p11850_p2 = scmp.lt.s32.totalorder %s12082_s11, %s12082_s11 }
  0x1d   : > { %p11843_p9 = scmp.ne.s32.totalorder %s12082_s11, %s11842_s22  ;;  %p11851_p12 = scmp.lt.s32.totalorder %s11842_s22, %s11842_s22 }
  0x1f   : > { %p11845_p10 = pnand %p11843_p9, %p11831_p13  ;;  %p11852_p0 = por %p11851_p12, %p11850_p2 }
  0x21   : > { %p11846_p1 = pneg %p11845_p10 }
  0x23   : > { %p11853_p6 = pnand %p11852_p0, %p11846_p1 }
  0x25   : > { %11856 = shalt.err (!%p11853_p6)
}
  0x26   : > { %s14031_s23 = smov 64   ;;  %s11990_s29 = smov 4  }
  0x27   : > { %11532 = dma.hbm_to_vmem [thread:$0]  (!%p12089_p11), %s14023_s1, 9216, %s12082_s11, [#allocation7], %s14031_s23, %s14031_s23, %s11990_s29  }
  0x28   : > { %s11857_s17 = scalar_lea.hbm %s14026_s4, 9216 }
  0x29   : > { %p11858_p1 = scmp.ne.s32.totalorder %s14026_s4, %s11857_s17  ;;  %p11864_p10 = scmp.lt.u32.totalorder %s11857_s17, %s14026_s4 }
  0x2b   : > { %p11860_p2 = pnand %p11858_p1, %p11831_p13 }
  0x2d   : > { %p11861_p6 = pneg %p11860_p2 }
  0x2f   : > { %p11866_p3 = pnand %p11864_p10, %p11861_p6 }
  0x31   : > { %11869 = shalt.err (!%p11866_p3)
}
  0x32   : > { %s11870_s11 = scalar_lea.vmem %s12093_s14, 9216  ;;  %p11878_p12 = scmp.lt.s32.totalorder %s12093_s14, %s12093_s14 }
  0x33   : > { %p11871_p5 = scmp.ne.s32.totalorder %s12093_s14, %s11870_s11  ;;  %p11879_p0 = scmp.lt.s32.totalorder %s11870_s11, %s11870_s11 }
  0x35   : > { %p11873_p7 = pnand %p11871_p5, %p11831_p13  ;;  %p11880_p1 = por %p11879_p0, %p11878_p12 }
  0x37   : > { %p11874_p9 = pneg %p11873_p7 }
  0x39   : > { %p11881_p2 = pnand %p11880_p1, %p11874_p9 }
  0x3b   : > { %11884 = shalt.err (!%p11881_p2)
}
  0x3c   : > { %11535 = dma.hbm_to_vmem [thread:$0]  (!%p12089_p11), %s14026_s4, 9216, %s12093_s14, [#allocation7], %s14031_s23, %s14031_s23, %s11990_s29  }
  0x3d   : > { %s12154_s12 = sadd.s32 1, %s11985_s27   ;;  %s31_s13 = sadd.s32 1, %s11981_s26 }
  0x3e   : > { %s28_s15 = ssub.s32 %s11985_s27, %s12154_s12  ;;  %p38_p13 = scmp.ne.s32.totalorder %s11981_s26, %s11977_s25 }
  0x3f   : > { %p29_p6 = scmp.eq.s32.totalorder %s28_s15, 0  ;;  %p39_p10 = scmp.eq.s32.totalorder %s11985_s27, 0 }
  0x40   : > { %p14139_p3 = scmp.eq.s32.totalorder %s12059_s28, 1  ;;  %p11546_p7 = scmp.lt.s32.totalorder %s11985_s27, 2 }
  0x41   : > { %s12170_s17 = scalar_select %p29_p6, %s11981_s26, %s31_s13  }
  0x42   : > { %p12164_p5 = por %p14139_p3, %p38_p13  ;;  %p40_p9 = por %p39_p10, %p38_p13 }
  0x43   : > { %s258_s18 = sand.u32 1, %s11981_s26   ;;  %s9580_s14 = sshll.u32 %s11985_s27, 11 }
  0x44   : > { %s14140_s16 = scalar_select %p12164_p5, 1, 0 }
  0x45   : > { %s9338_s19 = sshll.u32 %s258_s18, 7  ;;  %s12177_s11 = scalar_lea.hbm %s14022_s0, %s9580_s14 }
  0x46   : > { %s262_s22 = scalar_lea.vmem [#allocation3], %s9338_s19  ;;  %p12181_p11 = pnand %p11546_p7, %p40_p9 }
  0x47   : > { %s269_s10 = sshll.u32 %s262_s22, 4  ;;  %s12185_s15 = scalar_lea.sflag [#allocation4], %s258_s18  ;;  %s12179_s10 = int_to_ptr.vmem [resolvable:$true] %s269_s10 }
  0x48   : > { %s11885_s23 = scalar_lea.hbm %s12177_s11, 2048  ;;  %p11887_p0 = pneg %p12181_p11 }
  0x49   : > { %p11886_p12 = scmp.ne.s32.totalorder %s12177_s11, %s11885_s23  ;;  %s11890_s20 = scalar_lea.hbm %s14022_s0, 4096 }
  0x4a   : > { %p11891_p13 = scmp.lt.u32.totalorder %s12177_s11, %s14022_s0  ;;  %p11892_p6 = scmp.lt.u32.totalorder %s11890_s20, %s11885_s23 }
  0x4b   : > { %p11888_p1 = pnand %p11887_p0, %p11886_p12  ;;  %p11894_p3 = scmp.lt.u32.totalorder %s11885_s23, %s12177_s11 }
  0x4c   : > { %p11893_p10 = por %p11892_p6, %p11891_p13 }
  0x4d   : > { %p11889_p2 = pneg %p11888_p1 }
  0x4e   : > { %p11895_p7 = por %p11894_p3, %p11893_p10 }
  0x50   : > { %p11896_p9 = pnand %p11895_p7, %p11889_p2 }
  0x52   : > { %11899 = shalt.err (!%p11896_p9)
}
  0x53   : > { %s11900_s18 = scalar_lea.vmem %s12179_s10, 2048  ;;  %s11991_s19 = smov [#allocation3]  }
  0x54   : > { %p11901_p12 = scmp.ne.s32.totalorder %s12179_s10, %s11900_s18  ;;  %s11905_s14 = sshll.u32 %s11991_s19, 4  ;;  %s11906_s14 = int_to_ptr.vmem [resolvable:$false] %s11905_s14 }
  0x55   : > { %s11907_s21 = scalar_lea.vmem %s11906_s14, 4096  ;;  %p11908_p4 = scmp.lt.s32.totalorder %s12179_s10, %s11906_s14 }
  0x56   : > { %p11903_p1 = pnand %p11901_p12, %p11887_p0  ;;  %p11909_p13 = scmp.lt.s32.totalorder %s11907_s21, %s11900_s18 }
  0x58   : > { %p11904_p5 = pneg %p11903_p1  ;;  %p11910_p6 = por %p11909_p13, %p11908_p4 }
  0x5a   : > { %p11911_p10 = pnand %p11910_p6, %p11904_p5 }
  0x5c   : > { %11914 = shalt.err (!%p11911_p10)
}
  0x5d   : > { %s14142_s23 = smov 64   ;;  %281 = sbr.rel (%p12078_p8) target bundleno = 1699 (0x6a3), region = 48 }
  0x5e   : > { %11539 = dma.hbm_to_vmem [thread:$0]  (!%p12181_p11), %s12177_s11, 2048, %s12179_s10, %s12185_s15, %s14142_s23, %s14142_s23, %s11990_s29  }
  0x64   : > { %s12219_s20 = sand.u32 1, %s11977_s25   ;;  %p14143_p4 = scmp.ne.s32.totalorder %s14135_s30, 0 }
  0x65   : > { %s9342_s22 = sshll.u32 %s12219_s20, 7  ;;  %s284_s18 = scalar_lea.sflag [#allocation4], %s12219_s20 }
  0x66   : > { %s12225_s13 = scalar_lea.vmem [#allocation3], %s9342_s22 }
  0x67   : > { %11960 = dma.done.wait (%p14143_p4), %s284_s18, 2048  }
  0x68   : > { %11962 = vsyncadd (%p14143_p4), %s284_s18, 4294965248  ;;  %p14144_p5 = scmp.eq.s32.totalorder %s12059_s28, 0 }
  0x6a   : > { %11964 = dma.done.wait (%p14144_p5), [#allocation7], 18432   ;;  %p14145_p8 = pmov %p14144_p5 }
  0x6b   : > { %v11992_v0 = vmov 0   ;;  %v11591_v1 = vld [vmem:[#allocation6 + $0x40] sm:$0xff]   ;;  %v11592_v2 = vld [vmem:[#allocation6 + $0x48] sm:$0xff]   ;;  %v11593_v3 = vld [vmem:[#allocation6 + $0x50] sm:$0xff]   ;;  %v478_v4 = vlaneseq  ;;  %vm1365_vm0 = vcmask 1043456   ;;  %v14034_v33 = vmov 0.0  }
  0x6c   : > { %11966 = vsyncadd (%p14145_p8), [#allocation7], 4294948864  ;;  %327 = vst [vmem:[#allocation2] sm:$0xff] %v11992_v0  ;;  %10141 = vmatprep.subr.bf16.mxu0 %v11591_v1  ;;  %v11594_v5 = vld [vmem:[#allocation6 + $0x58] sm:$0xff]   ;;  %v331_v6 = vld [vmem:[%s12225_s13] sm:$0xf] }
  0x6d   : > { %328 = vst [vmem:[#allocation2 + $0x8] sm:$0xf] %v11992_v0  ;;  %329 = vst [vmem:[#allocation2 + $0x88] sm:$0xf0] %v11992_v0  ;;  %10142 = vmatpush3.bf16.msra.mxu0 %v11591_v1  ;;  %v12237_v7 = vld [vmem:[%s12225_s13 + $0x4] sm:$0xff]   ;;  %v9346_v8 = vcombine.low %v331_v6, %v331_v6  ;;  %v12239_v9 = vshrl.u32 %v478_v4, 7 }
  0x6e   : > { %330 = vst [vmem:[#allocation2 + $0x90] sm:$0xff] %v11992_v0  ;;  %10143 = vmatprep.subr.bf16.mxu0 %v11592_v2  ;;  %462 = vst [vmem:[#allocation2 + $0x10] sm:$0xff] %v12237_v7  ;;  %v11595_v11 = vld [vmem:[#allocation6 + $0x60] sm:$0xff]   ;;  %v12244_v12 = vld [vmem:[%s12225_s13 + $0xc] sm:$0xff]   ;;  %v14036_v39 = vmov 1.0   ;;  %v1369_v46 = vrot.slane %v12237_v7, 4 }
  0x6f   : > { %461 = vst [vmem:[#allocation2 + $0x8] sm:$0xf0] %v9346_v8  ;;  %v480_v10 = vadd.s32 8, %v12239_v9  ;;  %v12249_v14 = vld [vmem:[%s12225_s13 + $0x14] sm:$0xff]   ;;  %v12252_v16 = vld [vmem:[%s12225_s13 + $0x1c] sm:$0xff]   ;;  %v11596_v17 = vld [vmem:[#allocation6 + $0x68] sm:$0xff]  }
  0x70   : > { %v481_v19 = vadd.s32 16, %v12239_v9  ;;  %v12257_v20 = vld [vmem:[%s12225_s13 + $0x24] sm:$0xff]   ;;  %v11597_v21 = vld [vmem:[#allocation6 + $0x70] sm:$0xff]   ;;  %v483_v23 = vadd.s32 32, %v12239_v9  ;;  %463 = vst [vmem:[#allocation2 + $0x18] sm:$0xff] %v12244_v12  ;;  %464 = vst [vmem:[#allocation2 + $0x20] sm:$0xff] %v12249_v14 }
  0x71   : > { %10144 = vmatpush3.bf16.msra.mxu0 %v11592_v2  ;;  %v522_v15 = vand.u32 15, %v480_v10  ;;  %v12264_v24 = vld [vmem:[%s12225_s13 + $0x2c] sm:$0xff]   ;;  %v12269_v26 = vld [vmem:[%s12225_s13 + $0x34] sm:$0xff]   ;;  %v12272_v27 = vld [vmem:[%s12225_s13 + $0x3c] sm:$0xff]   ;;  %465 = vst [vmem:[#allocation2 + $0x28] sm:$0xff] %v12252_v16  ;;  %v482_v41 = vadd.s32 24, %v12239_v9 }
  0x72   : > { %10145 = vmatprep.subr.bf16.mxu0 %v11593_v3  ;;  %v12276_v28 = vld [vmem:[%s12225_s13 + $0x44] sm:$0xff]   ;;  %v529_v30 = vand.u32 15, %v481_v19  ;;  %v12280_v31 = vld [vmem:[%s12225_s13 + $0x4c] sm:$0xff]   ;;  %v12283_v32 = vld [vmem:[%s12225_s13 + $0x54] sm:$0xff]   ;;  %v543_v36 = vand.u32 15, %v483_v23  ;;  %466 = vst [vmem:[#allocation2 + $0x30] sm:$0xff] %v12257_v20 }
  0x73   : > { %v12246_v13 = vld [vmem:[#allocation2] sm:$0xf0]  ;;  %vm1008_vm1 = vcmp.lt.s32.totalorder %v522_v15, 15  ;;  %v12287_v35 = vld [vmem:[%s12225_s13 + $0x5c] sm:$0xff]   ;;  %467 = vst [vmem:[#allocation2 + $0x38] sm:$0xff] %v12264_v24  ;;  %468 = vst [vmem:[#allocation2 + $0x40] sm:$0xff] %v12269_v26 }
  0x74   : > { %v1366_v18 = vrot.slane %v12246_v13, 4  ;;  %v9379_v34 = vsel %vm1008_vm1, 1.0, %v14034_v33  ;;  %v11598_v37 = vld [vmem:[#allocation6 + $0x78] sm:$0xff]   ;;  %v12293_v38 = vld [vmem:[%s12225_s13 + $0x64] sm:$0xff]   ;;  %469 = vst [vmem:[#allocation2 + $0x48] sm:$0xff] %v12272_v27  ;;  %470 = vst [vmem:[#allocation2 + $0x50] sm:$0xff] %v12276_v28 }
  0x75   : > { %10146 = vmatpush3.bf16.msra.mxu0 %v11593_v3  ;;  %v1103_v40 = vpack.c.bf16 %v9379_v34, %v14036_v39  ;;  %v12300_v42 = vld [vmem:[%s12225_s13 + $0x6c] sm:$0xff]   ;;  %v360_v43 = vld [vmem:[%s12225_s13 + $0x74] sm:$0xff]   ;;  %v484_v44 = vadd.s32 40, %v12239_v9  ;;  %vm12304_vm2 = vcmp.gt.s32.totalorder %v529_v30, 0  ;;  %471 = vst [vmem:[#allocation2 + $0x58] sm:$0xff] %v12280_v31  ;;  %472 = vst [vmem:[#allocation2 + $0x60] sm:$0xff] %v12283_v32 }
  0x76   : > { %10147 = vmatprep.subr.bf16.mxu0 %v11594_v5  ;;  %v12259_v22 = vld [vmem:[#allocation2 + $0x8] sm:$0xff]  ;;  %vm899_vm3 = vcmp.gt.s32.totalorder %v543_v36, 0  ;;  %473 = vst [vmem:[#allocation2 + $0x68] sm:$0xff] %v12287_v35  ;;  %v11601_v47 = vld [vmem:[#allocation6] sm:$0xff]   ;;  %v1371_v48 = vrot.slane %v12244_v12, 4  ;;  %474 = vst [vmem:[#allocation2 + $0x70] sm:$0xff] %v12293_v38 }
  0x77   : > { %v1367_v25 = vrot.slane %v12259_v22, 4  ;;  %v2004_v49 = vshrl.u32 %v1103_v40, 16  ;;  %v2007_v50 = vshll.u32 %v1103_v40, 16  ;;  %475 = vst [vmem:[#allocation2 + $0x78] sm:$0xff] %v12300_v42  ;;  %476 = vst [vmem:[#allocation2 + $0x80] sm:$0xff] %v360_v43  ;;  %v536_v51 = vand.u32 15, %v482_v41 }
  0x78   : > { %v9364_v52 = vsel %vm12304_vm2, 1.0, %v14034_v33  ;;  %v9365_v53 = vsel %vm899_vm3, 1.0, %v14034_v33  ;;  %v550_v55 = vand.u32 15, %v484_v44  ;;  %v1372_v56 = vsel %vm1365_vm0, %v1369_v46, %v1371_v48  ;;  %v11604_v57 = vld [vmem:[#allocation6 + $0x8] sm:$0xff]   ;;  %v11607_v0 = vld [vmem:[#allocation6 + $0x10] sm:$0xff]   ;;  %s13891_s21 = scalar_lea.vmem [#allocation9], %s9342_s22 }
  0x79   : > { %10148 = vmatpush3.bf16.msra.mxu0 %v11594_v5  ;;  %v1368_v29 = vsel %vm1365_vm0, %v1366_v18, %v1367_v25  ;;  %v1370_v54 = vsel %vm1365_vm0, %v1367_v25, %v1369_v46  ;;  %v2006_v58 = vrot.slane %v2004_v49, 3  ;;  %v2009_v59 = vrot.slane %v2007_v50, 4  ;;  %v11610_v18 = vld [vmem:[#allocation6 + $0x18] sm:$0xff]   ;;  %s9613_s23 = sshll.u32 %s12059_s28, 11  ;;  %s9241_s22 = sshll.u32 %s13891_s21, 4  ;;  %s13976_s22 = int_to_ptr.vmem [resolvable:$true] %s9241_s22 }
  0x7a   : > { %10149 = vmatprep.subr.bf16.mxu0 %v11595_v11  ;;  %10157 = vmatprep.mubr.bf16.mxu0 %v1368_v29  ;;  %v992_v60 = vpack.c.bf16 %v14036_v39, %v9364_v52  ;;  %v993_v61 = vpack.c.bf16 %v14036_v39, %v9365_v53  ;;  %vm1010_vm4 = vcmp.lt.s32.totalorder %v536_v51, 15  ;;  %v1373_v62 = vrot.slane %v12249_v14, 4  ;;  %s13974_s30 = scalar_lea.hbm %s14029_s7, %s9613_s23  ;;  %s9228_s28 = scalar_lea.sflag [#allocation5], %s12219_s20 }
  0x7b   : > { %vm1012_vm5 = vcmp.lt.s32.totalorder %v550_v55, 15  ;;  %v1375_v63 = vrot.slane %v12252_v16, 4  ;;  %v485_v1 = vadd.s32 48, %v12239_v9  ;;  %v12326_v2 = vor.u32 %v2009_v59, %v2006_v58  ;;  %s11915_s9 = scalar_lea.vmem %s13976_s22, 2048  ;;  %p14303_p0 = scmp.ne.s32.totalorder %s14140_s16, 0 }
  0x7c   : > { %v515_v3 = vand.u32 15, %v12239_v9  ;;  %v9380_v4 = vsel %vm1010_vm4, 1.0, %v14034_v33  ;;  %v1146_v5 = vshrl.u32 %v992_v60, 16  ;;  %v1149_v6 = vshll.u32 %v992_v60, 16  ;;  %p11916_p11 = scmp.ne.s32.totalorder %s13976_s22, %s11915_s9  ;;  %s11995_s29 = smov [#allocation9]  }
  0x7d   : > { %10150 = vmatpush3.bf16.msra.mxu0 %v11595_v11  ;;  %14148 = vst [vmem:[#allocation13_spill] sm:$0xff] %v12326_v2  ;;  %v1155_v8 = vshrl.u32 %v993_v61, 16  ;;  %v9381_v10 = vsel %vm1012_vm5, 1.0, %v14034_v33  ;;  %v1158_v11 = vshll.u32 %v993_v61, 16  ;;  %v1374_v15 = vsel %vm1365_vm0, %v1371_v48, %v1373_v62  ;;  %s11919_s11 = sshll.u32 %s11995_s29, 4  ;;  %s11920_s11 = int_to_ptr.vmem [resolvable:$false] %s11919_s11 }
  0x7e   : > { %10151 = vmatprep.subr.bf16.mxu0 %v11596_v17  ;;  %vm1136_vm6 = vsmask.f32 3328  ;;  %v557_v19 = vand.u32 15, %v485_v1  ;;  %v1104_v23 = vpack.c.bf16 %v9380_v4, %v14036_v39  ;;  %vm895_vm7 = vcmp.gt.s32.totalorder %v515_v3, 0  ;;  %v11619_v4 = vld [vmem:[#allocation6 + $0x30] sm:$0xff]   ;;  %p11917_p2 = pnand %p11916_p11, %p14303_p0  ;;  %s11921_s10 = scalar_lea.vmem %s11920_s11, 4096 }
  0x7f   : > { %v487_v25 = vadd.s32 64, %v12239_v9  ;;  %v1105_v29 = vpack.c.bf16 %v9381_v10, %v14036_v39  ;;  %v1148_v30 = vrot.slane %v1146_v5, 4  ;;  %v1151_v34 = vrot.slane %v1149_v6, 5  ;;  %p11922_p7 = scmp.lt.s32.totalorder %s13976_s22, %s11920_s11  ;;  %p11923_p9 = scmp.lt.s32.totalorder %s11921_s10, %s11915_s9 }
  0x80   : > { %v1157_v36 = vrot.slane %v1155_v8, 4  ;;  %v1377_v40 = vrot.slane %v12257_v20, 4  ;;  %v1379_v41 = vrot.slane %v12264_v24, 4  ;;  %v9363_v43 = vsel %vm895_vm7, 1.0, %v14034_v33  ;;  %p11918_p3 = pneg %p11917_p2 }
  0x81   : > { %10152 = vmatpush3.bf16.msra.mxu0 %v11596_v17  ;;  %v1376_v17 = vsel %vm1365_vm0, %v1373_v62, %v1375_v63  ;;  %vm901_vm8 = vcmp.gt.s32.totalorder %v557_v19, 0  ;;  %v2012_v46 = vshrl.u32 %v1104_v23, 16  ;;  %v12345_v48 = vor.u32 %v1151_v34, %v1148_v30  ;;  %p11924_p12 = por %p11923_p9, %p11922_p7 }
  0x82   : > { %10153 = vmatprep.subr.bf16.mxu0 %v11597_v21  ;;  %v2015_v49 = vshll.u32 %v1104_v23, 16  ;;  %v2021_v50 = vshrl.u32 %v1105_v29, 16  ;;  %v1378_v52 = vsel %vm1365_vm0, %v1375_v63, %v1377_v40  ;;  %v991_v53 = vpack.c.bf16 %v14036_v39, %v9363_v43 }
  0x83   : > { %v2024_v55 = vshll.u32 %v1105_v29, 16  ;;  %v489_v58 = vadd.s32 80, %v12239_v9  ;;  %v12354_v59 = vrot.slane %v2012_v46, 3  ;;  %v1381_v60 = vrot.slane %v12269_v26, 4  ;;  %v12380_v46 = vld [vmem:[#allocation6 + $0x80] sm:$0xff]   ;;  %p11925_p1 = pnand %p11924_p12, %p11918_p3 }
  0x84   : > { %v1138_v63 = vshrl.u32 %v991_v53, 16  ;;  %v2017_v1 = vrot.slane %v2015_v49, 4  ;;  %v1383_v3 = vrot.slane %v12272_v27, 4  ;;  %v2023_v6 = vrot.slane %v2021_v50, 3 }
  0x85   : > { %10154 = vmatpush3.bf16.msra.mxu0 %v11597_v21  ;;  %v12335_v21 = vmul.bf16 %v12326_v2, %v12246_v13  ;;  %v11613_v13 = vld [vmem:[#allocation6 + $0x20] sm:$0xff]   ;;  %v2026_v8 = vrot.slane %v2024_v55, 4  ;;  %v585_v10 = vand.u32 15, %v489_v58  ;;  %v493_v19 = vadd.s32 112, %v12239_v9 }
  0x86   : > { %10155 = vmatprep.subr.bf16.mxu0 %v11598_v37  ;;  %v1382_v23 = vsel %vm1365_vm0, %v1379_v41, %v1381_v60  ;;  %v1384_v34 = vsel %vm1365_vm0, %v1381_v60, %v1383_v3  ;;  %v1391_v43 = vrot.slane %v12287_v35, 4  ;;  %vm1624_vm15 = vsmask.f32 4352 }
  0x87   : > { %v2198_v44 = vshrl.u32 %v12335_v21, 16  ;;  %v2201_v45 = vshll.u32 %v12335_v21, 16  ;;  %vm12375_vm10 = vcmp.gt.s32.totalorder %v585_v10, 0  ;;  %v613_v50 = vand.u32 15, %v493_v19  ;;  %v12599_v21 = vld [vmem:[#allocation6 + $0xc0] sm:$0xff]  }
  0x88   : > { %v9368_v58 = vsel %vm12375_vm10, 1.0, %v14034_v33  ;;  %v1395_v10 = vrot.slane %v12300_v42, 4 }
  0x89   : > { %10156 = vmatpush3.bf16.msra.mxu0 %v11598_v37  ;;  %v1160_v37 = vrot.slane %v1158_v11, 5  ;;  %v491_v11 = vadd.s32 96, %v12239_v9  ;;  %vm909_vm12 = vcmp.gt.s32.totalorder %v613_v50, 0  ;;  %v996_v19 = vpack.c.bf16 %v14036_v39, %v9368_v58 }
  0x8a   : > { %10189 = vmatprep.subr.bf16.mxu0 %v11601_v47 }
  0x8b   : > { %v12347_v51 = vor.u32 %v1160_v37, %v1157_v36  ;;  %v1385_v36 = vrot.slane %v12276_v28, 4  ;;  %v1387_v37 = vrot.slane %v12280_v31, 4 }
  0x8c   : > { %10158 = vmatmul.mubr.bf16.vlgmr.msra.gmra.mrb[0].mxu0 %v1370_v54  ;;  %v9366_v54 = vsel %vm901_vm8, 1.0, %v14034_v33 }
  0x8d   : > { %10190 = vmatpush3.bf16.msra.mxu0 %v11601_v47  ;;  %10161 = vmatprep.mubr.bf16.mxu0 %v1372_v56  ;;  %v571_v47 = vand.u32 15, %v487_v25  ;;  %v1380_v56 = vsel %vm1365_vm0, %v1377_v40, %v1379_v41  ;;  %v994_v61 = vpack.c.bf16 %v14036_v39, %v9366_v54  ;;  %v12361_v62 = vsel %vm1136_vm6, %v12345_v48, %v12347_v51 }
  0x8e   : > { %10191 = vmatprep.subr.bf16.mxu0 %v11604_v57  ;;  %14149 = vst [vmem:[#allocation14_spill] sm:$0xff] %v12361_v62  ;;  %v1140_v25 = vrot.slane %v1138_v63, 4  ;;  %v1389_v40 = vrot.slane %v12283_v32, 4  ;;  %v599_v41 = vand.u32 15, %v491_v11  ;;  %v1388_v60 = vsel %vm1365_vm0, %v1385_v36, %v1387_v37  ;;  %v12397_v11 = vld [vmem:[#allocation2 + $0x80] sm:$0xf] }
  0x8f   : > { %vm903_vm9 = vcmp.gt.s32.totalorder %v571_v47, 0  ;;  %v1397_v50 = vrot.slane %v12397_v11, 4 }
  0x90   : > { %v9367_v5 = vsel %vm903_vm9, 1.0, %v14034_v33  ;;  %vm12390_vm11 = vcmp.gt.s32.totalorder %v599_v41, 0 }
  0x91   : > { %10192 = vmatpush3.bf16.msra.mxu0 %v11604_v57  ;;  %v11616_v57 = vld [vmem:[#allocation6 + $0x28] sm:$0xff]   ;;  %v995_v30 = vpack.c.bf16 %v14036_v39, %v9367_v5 }
  0x92   : > { %10193 = vmatprep.subr.bf16.mxu0 %v11607_v0 }
  0x93   : > { %v1173_v55 = vshrl.u32 %v995_v30, 16 }
  0x94   : > { %10162 = vmatmul.mubr.bf16.gmra.mrb[4].mxu0 %v1374_v15  ;;  %v1299_v15 = vmul.bf16 %v12361_v62, %v12237_v7  ;;  %v11622_v7 = vld [vmem:[#allocation6 + $0x38] sm:$0xff]  }
  0x95   : > { %10165 = vmatprep.mubr.bf16.mxu0 %v1376_v17  ;;  %10194 = vmatpush3.bf16.msra.mxu0 %v11607_v0  ;;  %v1141_v0 = vshll.u32 %v991_v53, 16  ;;  %v1164_v17 = vshrl.u32 %v994_v61, 16 }
  0x96   : > { %10195 = vmatprep.subr.bf16.mxu0 %v11610_v18  ;;  %v1643_v54 = vshrl.u32 %v1299_v15, 16 }
  0x97   : > { %v1143_v29 = vrot.slane %v1141_v0, 5  ;;  %v1166_v47 = vrot.slane %v1164_v17, 4  ;;  %v495_v0 = vadd.s32 128, %v12239_v9 }
  0x99   : > { %10196 = vmatpush3.bf16.msra.mxu0 %v11610_v18  ;;  %v1167_v18 = vshll.u32 %v994_v61, 16  ;;  %v12382_v53 = vor.u32 %v1143_v29, %v1140_v25  ;;  %v1393_v61 = vrot.slane %v12293_v38, 4  ;;  %v9369_v29 = vsel %vm12390_vm11, 1.0, %v14034_v33 }
  0x9a   : > { %10197 = vmatprep.subr.bf16.mxu0 %v11613_v13 }
  0x9b   : > { %v1169_v49 = vrot.slane %v1167_v18, 5  ;;  %14152 = vst [vmem:[#allocation15_spill] sm:$0xff] %v12382_v53  ;;  %v12402_v17 = vsel %vm1136_vm6, %v12382_v53, %v12345_v48  ;;  %v1645_v18 = vrot.slane %v1643_v54, 3  ;;  %v9370_v48 = vsel %vm909_vm12, 1.0, %v14034_v33 }
  0x9c   : > { %10166 = vmatmul.mubr.bf16.gmra.mrb[8].mxu0 %v1378_v52  ;;  %v1119_v52 = vld [vmem:[#allocation2] sm:$0xf8]  ;;  %14155 = vst [vmem:[#allocation16_spill] sm:$0xff] %v12402_v17 }
  0x9d   : > { %10169 = vmatprep.mubr.bf16.mxu0 %v1380_v56  ;;  %10198 = vmatpush3.bf16.msra.mxu0 %v11613_v13  ;;  %v1386_v56 = vsel %vm1365_vm0, %v1383_v3, %v1385_v36  ;;  %v1170_v5 = vor.u32 %v1169_v49, %v1166_v47  ;;  %v497_v3 = vadd.s32 144, %v12239_v9  ;;  %v627_v36 = vand.u32 15, %v495_v0 }
  0x9e   : > { %10199 = vmatprep.subr.bf16.mxu0 %v11616_v57  ;;  %v1390_v49 = vsel %vm1365_vm0, %v1387_v37, %v1389_v40 }
  0x9f   : > { %v12420_v41 = vsel %vm1136_vm6, %v12347_v51, %v1170_v5  ;;  %v641_v47 = vand.u32 15, %v497_v3  ;;  %vm911_vm13 = vcmp.gt.s32.totalorder %v627_v36, 0 }
  0xa0   : > { %14156 = vst [vmem:[#allocation17_spill] sm:$0xff] %v12420_v41  ;;  %v1300_v51 = vmul.bf16 %v12420_v41, %v12244_v12  ;;  %v9371_v3 = vsel %vm911_vm13, 1.0, %v14034_v33 }
  0xa1   : > { %10200 = vmatpush3.bf16.msra.mxu0 %v11616_v57  ;;  %v1176_v57 = vshll.u32 %v995_v30, 16  ;;  %v12411_v30 = vor.u32 %v2017_v1, %v12354_v59  ;;  %v1182_v59 = vshrl.u32 %v996_v19, 16  ;;  %v1185_v1 = vshll.u32 %v996_v19, 16 }
  0xa2   : > { %10201 = vmatprep.subr.bf16.mxu0 %v11619_v4  ;;  %vm913_vm14 = vcmp.gt.s32.totalorder %v641_v47, 0  ;;  %v501_v19 = vadd.s32 176, %v12239_v9  ;;  %v1652_v12 = vshrl.u32 %v1300_v51, 16 }
  0xa3   : > { %v1178_v25 = vrot.slane %v1176_v57, 5  ;;  %v499_v57 = vadd.s32 160, %v12239_v9  ;;  %v1184_v58 = vrot.slane %v1182_v59, 4 }
  0xa4   : > { %10170 = vmatmul.mubr.bf16.gmra.mrb[12].mxu0 %v1382_v23  ;;  %v1297_v23 = vmul.bf16 %v12382_v53, %v1119_v52  ;;  %v998_v52 = vpack.c.bf16 %v14036_v39, %v9370_v48  ;;  %v1655_v48 = vshll.u32 %v1300_v51, 16  ;;  %v503_v51 = vadd.s32 192, %v12239_v9 }
  0xa5   : > { %10173 = vmatprep.mubr.bf16.mxu0 %v1384_v34  ;;  %10202 = vmatpush3.bf16.msra.mxu0 %v11619_v4  ;;  %v1646_v4 = vshll.u32 %v1299_v15, 16  ;;  %v1175_v15 = vrot.slane %v1173_v55, 4  ;;  %v12413_v34 = vor.u32 %v2026_v8, %v2023_v6  ;;  %v997_v6 = vpack.c.bf16 %v14036_v39, %v9369_v29 }
  0xa6   : > { %10203 = vmatprep.subr.bf16.mxu0 %v11622_v7  ;;  %v1392_v8 = vsel %vm1365_vm0, %v1389_v40, %v1391_v43  ;;  %v1629_v54 = vshll.u32 %v1297_v23, 16  ;;  %v1394_v29 = vsel %vm1365_vm0, %v1391_v43, %v1393_v61 }
  0xa7   : > { %v1648_v13 = vrot.slane %v1646_v4, 4  ;;  %v1179_v55 = vor.u32 %v1178_v25, %v1175_v15  ;;  %v1191_v63 = vshrl.u32 %v997_v6, 16  ;;  %v1194_v40 = vshll.u32 %v997_v6, 16 }
  0xa8   : > { %v1200_v4 = vshrl.u32 %v998_v52, 16  ;;  %v1203_v15 = vshll.u32 %v998_v52, 16  ;;  %v9372_v25 = vsel %vm913_vm14, 1.0, %v14034_v33  ;;  %v999_v6 = vpack.c.bf16 %v14036_v39, %v9371_v3 }
  0xa9   : > { %10204 = vmatpush3.bf16.msra.mxu0 %v11622_v7  ;;  %v1298_v7 = vmul.bf16 %v12402_v17, %v12259_v22  ;;  %v1626_v22 = vshrl.u32 %v1297_v23, 16  ;;  %v1631_v23 = vrot.slane %v1629_v54, 4  ;;  %v12443_v36 = vsel %vm1136_vm6, %v1170_v5, %v1179_v55 }
  0xaa   : > { %10237 = vmatprep.subr.bf16.mxu0 %v12380_v46  ;;  %14157 = vst [vmem:[#allocation18_spill] sm:$0xff] %v12443_v36  ;;  %v1193_v59 = vrot.slane %v1191_v63, 4  ;;  %v1000_v43 = vpack.c.bf16 %v14036_v39, %v9372_v25  ;;  %v669_v52 = vand.u32 15, %v501_v19  ;;  %v1398_v5 = vsel %vm1365_vm0, %v1395_v10, %v1397_v50 }
  0xab   : > { %v1634_v37 = vshrl.u32 %v1298_v7, 16  ;;  %v12432_v0 = vrot.slane %v1626_v22, 3  ;;  %v1202_v22 = vrot.slane %v1200_v4, 4  ;;  %v1205_v54 = vrot.slane %v1203_v15, 5 }
  0xac   : > { %10174 = vmatmul.mubr.bf16.gmra.mrb[16].mxu0 %v1386_v56  ;;  %v1637_v56 = vshll.u32 %v1298_v7, 16  ;;  %v655_v7 = vand.u32 15, %v499_v57  ;;  %v1212_v4 = vshll.u32 %v999_v6, 16  ;;  %vm917_vm2 = vcmp.gt.s32.totalorder %v669_v52, 0 }
  0xad   : > { %10177 = vmatprep.mubr.bf16.mxu0 %v1388_v60  ;;  %v1187_v60 = vrot.slane %v1185_v1, 5  ;;  %v1196_v1 = vrot.slane %v1194_v40, 5  ;;  %v1636_v57 = vrot.slane %v1634_v37, 3  ;;  %v1632_v38 = vor.u32 %v1631_v23, %v12432_v0 }
  0xae   : > { %vm915_vm1 = vcmp.gt.s32.totalorder %v655_v7, 0  ;;  %v1209_v40 = vshrl.u32 %v999_v6, 16  ;;  %v683_v37 = vand.u32 15, %v503_v51  ;;  %v1221_v3 = vshll.u32 %v1000_v43, 16 }
  0xaf   : > { %v1188_v47 = vor.u32 %v1187_v60, %v1184_v58  ;;  %v1639_v58 = vrot.slane %v1637_v56, 4  ;;  %v1301_v60 = vmul.bf16 %v12443_v36, %v12249_v14  ;;  %v1197_v42 = vor.u32 %v1196_v1, %v1193_v59 }
  0xb0   : > { %v9373_v50 = vsel %vm915_vm1, 1.0, %v14034_v33  ;;  %v505_v0 = vadd.s32 208, %v12239_v9  ;;  %v1211_v23 = vrot.slane %v1209_v40, 4  ;;  %v1214_v25 = vrot.slane %v1212_v4, 5 }
  0xb1   : > { %v12460_v63 = vsel %vm1136_vm6, %v1179_v55, %v1188_v47  ;;  %v1640_v56 = vor.u32 %v1639_v58, %v1636_v57  ;;  %v1661_v14 = vshrl.u32 %v1301_v60, 16  ;;  %v1664_v19 = vshll.u32 %v1301_v60, 16 }
  0xb2   : > { %14158 = vst [vmem:[#allocation19_spill] sm:$0xff] %v12460_v63  ;;  %v1302_v55 = vmul.bf16 %v12460_v63, %v12252_v16  ;;  %v12468_v15 = vsel %vm1136_vm6, %v1188_v47, %v1197_v42  ;;  %vm919_vm3 = vcmp.gt.s32.totalorder %v683_v37, 0  ;;  %v507_v1 = vadd.s32 224, %v12239_v9 }
  0xb3   : > { %14159 = vst [vmem:[#allocation20_spill] sm:$0xff] %v12468_v15  ;;  %v1641_v16 = vsel %vm1624_vm15, %v1632_v38, %v1640_v56  ;;  %v1223_v6 = vrot.slane %v1221_v3, 5  ;;  %v1663_v47 = vrot.slane %v1661_v14, 3  ;;  %v1215_v57 = vor.u32 %v1214_v25, %v1211_v23  ;;  %v11624_v23 = vld [vmem:[#allocation6 + $0x88] sm:$0xff]  }
  0xb4   : > { %10178 = vmatmul.mubr.bf16.gmra.mrb[20].mxu0 %v1390_v49  ;;  %v1396_v49 = vsel %vm1365_vm0, %v1393_v61, %v1395_v10  ;;  %v1654_v61 = vrot.slane %v1652_v12, 3  ;;  %v1218_v10 = vshrl.u32 %v1000_v43, 16  ;;  %v9374_v12 = vsel %vm917_vm2, 1.0, %v14034_v33 }
  0xb5   : > { %10181 = vmatprep.mubr.bf16.mxu0 %v1392_v8  ;;  %v1649_v8 = vor.u32 %v1648_v13, %v1645_v18  ;;  %v1657_v18 = vrot.slane %v1655_v48, 4  ;;  %v1206_v13 = vor.u32 %v1205_v54, %v1202_v22  ;;  %v697_v22 = vand.u32 15, %v505_v0 }
  0xb6   : > { %v1220_v48 = vrot.slane %v1218_v10, 4  ;;  %v1666_v43 = vrot.slane %v1664_v19, 4  ;;  %v1670_v52 = vshrl.u32 %v1302_v55, 16  ;;  %v1303_v54 = vmul.bf16 %v12468_v15, %v12257_v20 }
  0xb7   : > { %v12471_v7 = vor.u32 %v1657_v18, %v1654_v61  ;;  %v12474_v59 = vsel %vm1136_vm6, %v1197_v42, %v1206_v13  ;;  %v9375_v60 = vsel %vm919_vm3, 1.0, %v14034_v33  ;;  %v1650_v61 = vsel %vm1624_vm15, %v1640_v56, %v1649_v8 }
  0xb8   : > { %14160 = vst [vmem:[#allocation21_spill] sm:$0xff] %v12474_v59  ;;  %v1304_v51 = vmul.bf16 %v12474_v59, %v12264_v24  ;;  %v711_v42 = vand.u32 15, %v507_v1  ;;  %v1224_v4 = vor.u32 %v1223_v6, %v1220_v48  ;;  %vm921_vm4 = vcmp.gt.s32.totalorder %v697_v22, 0 }
  0xb9   : > { %v1659_v38 = vsel %vm1624_vm15, %v1649_v8, %v12471_v7  ;;  %v1672_v20 = vrot.slane %v1670_v52, 3  ;;  %v1679_v24 = vshrl.u32 %v1303_v54, 16  ;;  %v1003_v37 = vpack.c.bf16 %v14036_v39, %v9375_v60 }
  0xba   : > { %v1682_v14 = vshll.u32 %v1303_v54, 16  ;;  %v1688_v3 = vshrl.u32 %v1304_v51, 16  ;;  %v12489_v56 = vsel %vm1136_vm6, %v1206_v13, %v1215_v57  ;;  %v9376_v19 = vsel %vm921_vm4, 1.0, %v14034_v33 }
  0xbb   : > { %14161 = vst [vmem:[#allocation22_spill] sm:$0xff] %v12489_v56  ;;  %vm923_vm5 = vcmp.gt.s32.totalorder %v711_v42, 0  ;;  %v12494_v25 = vsel %vm1136_vm6, %v1215_v57, %v1224_v4  ;;  %v1681_v1 = vrot.slane %v1679_v24, 3  ;;  %v1248_v6 = vshll.u32 %v1003_v37, 16 }
  0xbc   : > { %10182 = vmatmul.mubr.bf16.gmra.mrb[24].mxu0 %v1394_v29  ;;  %v1001_v29 = vpack.c.bf16 %v14036_v39, %v9373_v50  ;;  %v1673_v50 = vshll.u32 %v1302_v55, 16  ;;  %14162 = vst [vmem:[#allocation23_spill] sm:$0xff] %v12494_v25  ;;  %v1684_v13 = vrot.slane %v1682_v14, 4  ;;  %v1004_v22 = vpack.c.bf16 %v14036_v39, %v9376_v19  ;;  %v11625_v14 = vld [vmem:[#allocation6 + $0x90] sm:$0xff]  }
  0xbd   : > { %10185 = vmatprep.mubr.bf16.mxu0 %v1396_v49  ;;  %v1002_v49 = vpack.c.bf16 %v14036_v39, %v9374_v12  ;;  %v1691_v12 = vshll.u32 %v1304_v51, 16  ;;  %v9377_v52 = vsel %vm923_vm5, 1.0, %v14034_v33  ;;  %v12503_v54 = vsel %vm1624_vm15, %v12411_v30, %v12413_v34 }
  0xbe   : > { %v1227_v58 = vshrl.u32 %v1001_v29, 16  ;;  %v1230_v40 = vshll.u32 %v1001_v29, 16  ;;  %v1675_v29 = vrot.slane %v1673_v50, 4  ;;  %14163 = vst [vmem:[#allocation24_spill] sm:$0xff] %v12503_v54  ;;  %v1306_v51 = vmul.bf16 %v12494_v25, %v12272_v27 }
  0xbf   : > { %v1236_v10 = vshrl.u32 %v1002_v49, 16  ;;  %v1239_v18 = vshll.u32 %v1002_v49, 16  ;;  %v1305_v49 = vmul.bf16 %v12489_v56, %v12269_v26  ;;  %v1667_v60 = vor.u32 %v1666_v43, %v1663_v47 }
  0xc0   : > { %v1229_v0 = vrot.slane %v1227_v58, 4  ;;  %v1232_v8 = vrot.slane %v1230_v40, 5  ;;  %v1690_v40 = vrot.slane %v1688_v3, 3  ;;  %v1693_v42 = vrot.slane %v1691_v12, 4 }
  0xc1   : > { %v1238_v55 = vrot.slane %v1236_v10, 4  ;;  %v1241_v48 = vrot.slane %v1239_v18, 5  ;;  %v1676_v26 = vor.u32 %v1675_v29, %v1672_v20  ;;  %v1250_v50 = vrot.slane %v1248_v6, 5 }
  0xc2   : > { %v1233_v57 = vor.u32 %v1232_v8, %v1229_v0  ;;  %v1005_v24 = vpack.c.bf16 %v14036_v39, %v9377_v52  ;;  %v1697_v19 = vshrl.u32 %v1305_v49, 16  ;;  %v1254_v27 = vshrl.u32 %v1004_v22, 16 }
  0xc3   : > { %v1242_v10 = vor.u32 %v1241_v48, %v1238_v55  ;;  %v1257_v0 = vshll.u32 %v1004_v22, 16  ;;  %v1700_v8 = vshll.u32 %v1305_v49, 16  ;;  %v1709_v43 = vshll.u32 %v1306_v51, 16  ;;  %v11626_v48 = vld [vmem:[#allocation6 + $0x98] sm:$0xff]  }
  0xc4   : > { %10186 = vmatmul.mubr.bf16.gmra.mrb[28].mxu0 %v1398_v5  ;;  %v509_v5 = vadd.s32 240, %v12239_v9  ;;  %v12510_v47 = vsel %vm1136_vm6, %v1224_v4, %v1233_v57  ;;  %v486_v20 = vadd.s32 56, %v12239_v9  ;;  %v1677_v3 = vsel %vm1624_vm15, %v1667_v60, %v1676_v26 }
  0xc5   : > { %10205 = vmatprep.mubr.bf16.mxu0 %v1641_v16  ;;  %v1245_v16 = vshrl.u32 %v1003_v37, 16  ;;  %v1685_v37 = vor.u32 %v1684_v13, %v1681_v1  ;;  %14164 = vst [vmem:[#allocation25_spill] sm:$0xff] %v12510_v47  ;;  %v1263_v12 = vshrl.u32 %v1005_v24, 16  ;;  %v1266_v55 = vshll.u32 %v1005_v24, 16 }
  0xc6   : > { %v725_v58 = vand.u32 15, %v509_v5  ;;  %v1307_v4 = vmul.bf16 %v12510_v47, %v12276_v28  ;;  %v1256_v29 = vrot.slane %v1254_v27, 4  ;;  %v1259_v1 = vrot.slane %v1257_v0, 5  ;;  %v11627_v28 = vld [vmem:[#allocation6 + $0xa0] sm:$0xff]  }
  0xc7   : > { %v1247_v18 = vrot.slane %v1245_v16, 4  ;;  %v1686_v16 = vsel %vm1624_vm15, %v1676_v26, %v1685_v37  ;;  %v12523_v6 = vor.u32 %v1693_v42, %v1690_v40  ;;  %v1699_v13 = vrot.slane %v1697_v19, 3 }
  0xc8   : > { %vm925_vm7 = vcmp.gt.s32.totalorder %v725_v58, 0  ;;  %v1702_v49 = vrot.slane %v1700_v8, 4  ;;  %v1711_v52 = vrot.slane %v1709_v43, 4  ;;  %v1265_v58 = vrot.slane %v1263_v12, 4 }
  0xc9   : > { %v1251_v5 = vor.u32 %v1250_v50, %v1247_v18  ;;  %v1715_v42 = vshrl.u32 %v1307_v4, 16  ;;  %v1260_v26 = vor.u32 %v1259_v1, %v1256_v29  ;;  %v488_v18 = vadd.s32 72, %v12239_v9 }
  0xca   : > { %v1695_v50 = vsel %vm1624_vm15, %v1685_v37, %v12523_v6  ;;  %v1718_v24 = vshll.u32 %v1307_v4, 16  ;;  %v1703_v19 = vor.u32 %v1702_v49, %v1699_v13 }
  0xcb   : > { %v1717_v37 = vrot.slane %v1715_v42, 3 }
  0xcc   : > { %10206 = vmatmul.mubr.bf16.vlgmr.msra.gmra.mrb[0].mxu0 %v1650_v61  ;;  %v1706_v61 = vshrl.u32 %v1306_v51, 16  ;;  %v564_v51 = vand.u32 15, %v486_v20  ;;  %v11628_v20 = vld [vmem:[#allocation6 + $0xa8] sm:$0xff]   ;;  %v1720_v4 = vrot.slane %v1718_v24, 4 }
  0xcd   : > { %10238 = vmatpush3.bf16.msra.mxu0 %v12380_v46  ;;  %10209 = vmatprep.mubr.bf16.mxu0 %v1659_v38  ;;  %v1668_v46 = vsel %vm1624_vm15, %v12471_v7, %v1667_v60  ;;  %v12515_v38 = vsel %vm1136_vm6, %v1233_v57, %v1242_v10  ;;  %v9378_v7 = vsel %vm925_vm7, 1.0, %v14034_v33  ;;  %v12528_v57 = vsel %vm1136_vm6, %v1242_v10, %v1251_v5 }
  0xce   : > { %10239 = vmatprep.subr.bf16.mxu0 %v11624_v23  ;;  %14165 = vst [vmem:[#allocation26_spill] sm:$0xff] %v12515_v38  ;;  %v1708_v22 = vrot.slane %v1706_v61, 3  ;;  %14166 = vst [vmem:[#allocation27_spill] sm:$0xff] %v12528_v57  ;;  %v1268_v60 = vrot.slane %v1266_v55, 5  ;;  %v1006_v40 = vpack.c.bf16 %v14036_v39, %v9378_v7  ;;  %v1309_v0 = vmul.bf16 %v12528_v57, %v12283_v32 }
  0xcf   : > { %vm1014_vm8 = vcmp.lt.s32.totalorder %v564_v51, 15  ;;  %v578_v55 = vand.u32 15, %v488_v18 }
  0xd0   : > { %v1712_v8 = vor.u32 %v1711_v52, %v1708_v22  ;;  %v12542_v61 = vor.u32 %v1268_v60, %v1265_v58  ;;  %v1275_v12 = vshll.u32 %v1006_v40, 16  ;;  %v1733_v7 = vshrl.u32 %v1309_v0, 16 }
  0xd1   : > { %10240 = vmatpush3.bf16.msra.mxu0 %v11624_v23  ;;  %v1308_v23 = vmul.bf16 %v12515_v38, %v12280_v31  ;;  %v12534_v31 = vsel %vm1624_vm15, %v12326_v2, %v12411_v30  ;;  %v1272_v30 = vshrl.u32 %v1006_v40, 16  ;;  %v1736_v13 = vshll.u32 %v1309_v0, 16  ;;  %v11768_v40 = vld [vmem:[#allocation2 + $0x10] sm:$0xff] }
  0xd2   : > { %10241 = vmatprep.subr.bf16.mxu0 %v11625_v14  ;;  %14167 = vst [vmem:[#allocation28_spill] sm:$0xff] %v12534_v31  ;;  %v12559_v49 = vsel %vm1136_vm6, %v1260_v26, %v12542_v61  ;;  %v1277_v51 = vrot.slane %v1275_v12, 5  ;;  %vm1016_vm9 = vcmp.lt.s32.totalorder %v578_v55, 15  ;;  %v1721_v60 = vor.u32 %v1720_v4, %v1717_v37 }
  0xd3   : > { %v1724_v10 = vshrl.u32 %v1308_v23, 16  ;;  %v1727_v27 = vshll.u32 %v1308_v23, 16  ;;  %v12553_v23 = vrot.slane %v2198_v44, 4  ;;  %14169 = vst [vmem:[#allocation30_spill] sm:$0xff] %v12559_v49  ;;  %v1274_v22 = vrot.slane %v1272_v30, 4  ;;  %v11630_v30 = vld [vmem:[#allocation6 + $0xb8] sm:$0xff]  }
  0xd4   : > { %10210 = vmatmul.mubr.bf16.gmra.mrb[4].mxu0 %v1668_v46  ;;  %v11767_v46 = vld [vmem:[#allocation2 + $0x8] sm:$0xff]  ;;  %v492_v44 = vadd.s32 104, %v12239_v9  ;;  %v12570_v42 = vmul.bf16 %v11768_v40, %v12503_v54  ;;  %v1713_v18 = vsel %vm1624_vm15, %v1703_v19, %v1712_v8  ;;  %v1722_v37 = vsel %vm1624_vm15, %v1712_v8, %v1721_v60 }
  0xd5   : > { %10213 = vmatprep.mubr.bf16.mxu0 %v1677_v3  ;;  %10242 = vmatpush3.bf16.msra.mxu0 %v11625_v14  ;;  %v490_v14 = vadd.s32 88, %v12239_v9  ;;  %v12545_v43 = vmul.bf16 %v11767_v46, %v12534_v31  ;;  %v12548_v3 = vsel %vm1136_vm6, %v1251_v5, %v1260_v26  ;;  %v1726_v32 = vrot.slane %v1724_v10, 3  ;;  %v12575_v10 = vld [vmem:[#allocation2 + $0x70] sm:$0xff] }
  0xd6   : > { %10243 = vmatprep.subr.bf16.mxu0 %v11626_v48  ;;  %14168 = vst [vmem:[#allocation29_spill] sm:$0xff] %v12548_v3  ;;  %v1729_v1 = vrot.slane %v1727_v27, 4  ;;  %v1310_v5 = vmul.bf16 %v12548_v3, %v12287_v35  ;;  %v494_v35 = vadd.s32 120, %v12239_v9  ;;  %v1704_v26 = vsel %vm1624_vm15, %v12523_v6, %v1703_v19 }
  0xd7   : > { %v592_v29 = vand.u32 15, %v490_v14  ;;  %v2206_v52 = vshrl.u32 %v12545_v43, 16  ;;  %v1311_v14 = vmul.bf16 %v12575_v10, %v12559_v49  ;;  %v9383_v27 = vsel %vm1016_vm9, 1.0, %v14034_v33 }
  0xd8   : > { %v1745_v24 = vshll.u32 %v1310_v5, 16  ;;  %v12580_v0 = vor.u32 %v1277_v51, %v1274_v22  ;;  %v606_v19 = vand.u32 15, %v492_v44  ;;  %v620_v55 = vand.u32 15, %v494_v35 }
  0xd9   : > { %10244 = vmatpush3.bf16.msra.mxu0 %v11626_v48  ;;  %v9382_v48 = vsel %vm1014_vm8, 1.0, %v14034_v33  ;;  %vm12564_vm10 = vcmp.lt.s32.totalorder %v592_v29, 15  ;;  %v1735_v4 = vrot.slane %v1733_v7, 3  ;;  %v12588_v29 = vrot.slane %v2201_v45, 5 }
  0xda   : > { %10245 = vmatprep.subr.bf16.mxu0 %v11627_v28  ;;  %v1106_v58 = vpack.c.bf16 %v9382_v48, %v14036_v39  ;;  %14172 = vst [vmem:[#allocation31_spill] sm:$0xff] %v12580_v0  ;;  %v9384_v6 = vsel %vm12564_vm10, 1.0, %v14034_v33  ;;  %v1738_v48 = vrot.slane %v1736_v13, 4  ;;  %v1751_v22 = vshrl.u32 %v1311_v14, 16 }
  0xdb   : > { %v1754_v51 = vshll.u32 %v1311_v14, 16  ;;  %v1108_v8 = vpack.c.bf16 %v9384_v6, %v14036_v39  ;;  %v12597_v7 = vsel %vm1136_vm6, %v12542_v61, %v12580_v0  ;;  %vm1020_vm11 = vcmp.lt.s32.totalorder %v606_v19, 15  ;;  %v12609_v14 = vld [vmem:[#allocation2 + $0x78] sm:$0xff] }
  0xdc   : > { %10214 = vmatmul.mubr.bf16.gmra.mrb[8].mxu0 %v1686_v16  ;;  %v11629_v16 = vld [vmem:[#allocation6 + $0xb0] sm:$0xff]   ;;  %v2030_v46 = vshrl.u32 %v1106_v58, 16  ;;  %v2033_v12 = vshll.u32 %v1106_v58, 16  ;;  %14173 = vst [vmem:[#allocation32_spill] sm:$0xff] %v12597_v7  ;;  %vm12601_vm12 = vcmp.lt.s32.totalorder %v620_v55, 15  ;;  %v1739_v44 = vor.u32 %v1738_v48, %v1735_v4 }
  0xdd   : > { %10217 = vmatprep.mubr.bf16.mxu0 %v1695_v50  ;;  %10246 = vmatpush3.bf16.msra.mxu0 %v11627_v28  ;;  %v1742_v50 = vshrl.u32 %v1310_v5, 16  ;;  %v1107_v5 = vpack.c.bf16 %v9383_v27, %v14036_v39  ;;  %v12591_v28 = vrot.slane %v2206_v52, 4  ;;  %v496_v52 = vadd.s32 136, %v12239_v9 }
  0xde   : > { %10247 = vmatprep.subr.bf16.mxu0 %v11628_v20  ;;  %v2032_v45 = vrot.slane %v2030_v46, 3  ;;  %v2035_v13 = vrot.slane %v2033_v12, 4  ;;  %v2209_v61 = vshll.u32 %v12545_v43, 16  ;;  %v1312_v27 = vmul.bf16 %v12609_v14, %v12597_v7 }
  0xdf   : > { %v2039_v35 = vshrl.u32 %v1107_v5, 16  ;;  %v2042_v40 = vshll.u32 %v1107_v5, 16  ;;  %v1313_v46 = vmul.bf16 %v12580_v0, %v12397_v11  ;;  %v2215_v6 = vshrl.u32 %v12570_v42, 16 }
  0xe0   : > { %v2036_v19 = vor.u32 %v2035_v13, %v2032_v45  ;;  %v634_v48 = vand.u32 15, %v496_v52  ;;  %v2211_v11 = vrot.slane %v2209_v61, 5  ;;  %v1760_v58 = vshrl.u32 %v1312_v27, 16 }
  0xe1   : > { %10248 = vmatpush3.bf16.msra.mxu0 %v11628_v20  ;;  %v1730_v20 = vor.u32 %v1729_v1, %v1726_v32  ;;  %v1744_v32 = vrot.slane %v1742_v50, 3  ;;  %v1747_v1 = vrot.slane %v1745_v24, 4  ;;  %v9385_v50 = vsel %vm1020_vm11, 1.0, %v14034_v33 }
  0xe2   : > { %10249 = vmatprep.subr.bf16.mxu0 %v11629_v16  ;;  %v1753_v24 = vrot.slane %v1751_v22, 3  ;;  %v2041_v12 = vrot.slane %v2039_v35, 3  ;;  %v2044_v55 = vrot.slane %v2042_v40, 4  ;;  %v1109_v4 = vpack.c.bf16 %v9385_v50, %v14036_v39 }
  0xe3   : > { %v12619_v43 = vor.u32 %v1747_v1, %v1744_v32  ;;  %v1769_v32 = vshrl.u32 %v1313_v46, 16  ;;  %v1740_v1 = vsel %vm1624_vm15, %v1730_v20, %v1739_v44  ;;  %v1772_v45 = vshll.u32 %v1313_v46, 16 }
  0xe4   : > { %10218 = vmatmul.mubr.bf16.gmra.mrb[12].mxu0 %v1704_v26  ;;  %v2048_v26 = vshrl.u32 %v1108_v8, 16  ;;  %v498_v13 = vadd.s32 152, %v12239_v9  ;;  %v2057_v35 = vshrl.u32 %v1109_v4, 16  ;;  %vm12631_vm13 = vcmp.lt.s32.totalorder %v634_v48, 15 }
  0xe5   : > { %10221 = vmatprep.mubr.bf16.mxu0 %v1713_v18  ;;  %10250 = vmatpush3.bf16.msra.mxu0 %v11629_v16  ;;  %v1731_v16 = vsel %vm1624_vm15, %v1721_v60, %v1730_v20  ;;  %v2051_v18 = vshll.u32 %v1108_v8, 16  ;;  %v9386_v60 = vsel %vm12601_vm12, 1.0, %v14034_v33  ;;  %v1763_v33 = vshll.u32 %v1312_v27, 16 }
  0xe6   : > { %10251 = vmatprep.subr.bf16.mxu0 %v11630_v30  ;;  %v2050_v5 = vrot.slane %v2048_v26, 3  ;;  %v1110_v8 = vpack.c.bf16 %v9386_v60, %v14036_v39  ;;  %v2060_v26 = vshll.u32 %v1109_v4, 16  ;;  %v1749_v20 = vsel %vm1624_vm15, %v1739_v44, %v12619_v43 }
  0xe7   : > { %v2053_v22 = vrot.slane %v2051_v18, 4  ;;  %v1762_v50 = vrot.slane %v1760_v58, 3  ;;  %v1765_v27 = vrot.slane %v1763_v33, 4  ;;  %v12638_v60 = vrot.slane %v1769_v32, 3 }
  0xe8   : > { %v2066_v18 = vshrl.u32 %v1110_v8, 16  ;;  %v2059_v4 = vrot.slane %v2057_v35, 3  ;;  %v14180_v48 = vmov 0.0   ;;  %v500_v44 = vadd.s32 168, %v12239_v9 }
  0xe9   : > { %10252 = vmatpush3.bf16.msra.mxu0 %v11630_v30  ;;  %v1756_v30 = vrot.slane %v1754_v51, 4  ;;  %v2218_v51 = vshll.u32 %v12570_v42, 16  ;;  %v2054_v61 = vor.u32 %v2053_v22, %v2050_v5  ;;  %v2069_v42 = vshll.u32 %v1110_v8, 16 }
  0xea   : > { %10285 = vmatprep.subr.bf16.mxu0 %v12599_v21  ;;  %v9387_v5 = vsel %vm12631_vm13, 1.0, %v14180_v48  ;;  %v2062_v22 = vrot.slane %v2060_v26, 4  ;;  %v2068_v8 = vrot.slane %v2066_v18, 3  ;;  %v12655_v40 = vor.u32 %v2211_v11, %v12591_v28 }
  0xeb   : > { %v1757_v52 = vor.u32 %v1756_v30, %v1753_v24  ;;  %v1774_v24 = vrot.slane %v1772_v45, 4  ;;  %v2217_v30 = vrot.slane %v2215_v6, 4  ;;  %v2071_v58 = vrot.slane %v2069_v42, 4 }
  0xec   : > { %10222 = vmatmul.mubr.bf16.gmra.mrb[16].mxu0 %v1722_v37  ;;  %v12628_v37 = vsel %vm1624_vm15, %v12413_v34, %v2036_v19  ;;  %v11771_v34 = vld [vmem:[#allocation2 + $0x18] sm:$0xff]  ;;  %v1766_v6 = vor.u32 %v1765_v27, %v1762_v50  ;;  %v1111_v18 = vpack.c.bf16 %v9387_v5, %v14036_v39  ;;  %v662_v42 = vand.u32 15, %v500_v44 }
  0xed   : > { %10225 = vmatprep.mubr.bf16.mxu0 %v1731_v16  ;;  %14176 = vst [vmem:[#allocation33_spill] sm:$0xff] %v12628_v37  ;;  %v2045_v16 = vor.u32 %v2044_v55, %v2041_v12  ;;  %v2166_v46 = vmul.bf16 %v11771_v34, %v12628_v37  ;;  %v648_v12 = vand.u32 15, %v498_v13  ;;  %v11772_v13 = vld [vmem:[#allocation2 + $0x20] sm:$0xff]  ;;  %v2220_v50 = vrot.slane %v2218_v51, 5 }
  0xee   : > { %v2063_v27 = vor.u32 %v2062_v22, %v2059_v4  ;;  %v1775_v34 = vor.u32 %v1774_v24, %v12638_v60  ;;  %v2075_v44 = vshrl.u32 %v1111_v18, 16  ;;  %v2078_v39 = vshll.u32 %v1111_v18, 16 }
  0xef   : > { %v12641_v55 = vsel %vm1624_vm15, %v2036_v19, %v2045_v16  ;;  %v12648_v33 = vsel %vm1624_vm15, %v2045_v16, %v2054_v61  ;;  %v2224_v32 = vshrl.u32 %v2166_v46, 16  ;;  %v2204_v19 = vor.u32 %v12588_v29, %v12553_v23  ;;  %v11773_v16 = vld [vmem:[#allocation2 + $0x28] sm:$0xff] }
  0xf0   : > { %14179 = vst [vmem:[#allocation34_spill] sm:$0xff] %v12641_v55  ;;  %14181 = vst [vmem:[#allocation35_spill] sm:$0xff] %v12648_v33  ;;  %v2227_v45 = vshll.u32 %v2166_v46, 16  ;;  %v2167_v35 = vmul.bf16 %v11772_v13, %v12641_v55  ;;  %vm1026_vm14 = vcmp.lt.s32.totalorder %v648_v12, 15  ;;  %v2168_v26 = vmul.bf16 %v11773_v16, %v12648_v33 }
  0xf1   : > { %v2072_v23 = vor.u32 %v2071_v58, %v2068_v8  ;;  %v1767_v29 = vsel %vm1624_vm15, %v1757_v52, %v1766_v6  ;;  %v9388_v46 = vsel %vm1026_vm14, 1.0, %v14180_v48  ;;  %v2226_v11 = vrot.slane %v2224_v32, 4 }
  0xf2   : > { %v2229_v12 = vrot.slane %v2227_v45, 5  ;;  %v2233_v13 = vshrl.u32 %v2167_v35, 16  ;;  %v2236_v16 = vshll.u32 %v2167_v35, 16  ;;  %v2242_v5 = vshrl.u32 %v2168_v26, 16  ;;  %v11775_v35 = vld [vmem:[#allocation2 + $0x38] sm:$0xff] }
  0xf3   : > { %vm1028_vm1 = vcmp.lt.s32.totalorder %v662_v42, 15  ;;  %v12665_v51 = vsel %vm1624_vm15, %v2054_v61, %v2063_v27  ;;  %v14184_v60 = vmov 1.0   ;;  %v504_v22 = vadd.s32 200, %v12239_v9 }
  0xf4   : > { %10226 = vmatmul.mubr.bf16.gmra.mrb[20].mxu0 %v1740_v1  ;;  %v502_v1 = vadd.s32 184, %v12239_v9  ;;  %14182 = vst [vmem:[#allocation36_spill] sm:$0xff] %v12665_v51  ;;  %v1112_v24 = vpack.c.bf16 %v9388_v46, %v14184_v60  ;;  %v2213_v8 = vsel %vm1136_vm6, %v2204_v19, %v12655_v40  ;;  %v2221_v58 = vor.u32 %v2220_v50, %v2217_v30 }
  0xf5   : > { %10229 = vmatprep.mubr.bf16.mxu0 %v1749_v20  ;;  %v1758_v20 = vsel %vm1624_vm15, %v12619_v43, %v1757_v52  ;;  %v2245_v43 = vshll.u32 %v2168_v26, 16  ;;  %v12668_v52 = vsel %vm1624_vm15, %v2063_v27, %v2072_v23  ;;  %v9389_v32 = vsel %vm1028_vm1, 1.0, %v14180_v48 }
  0xf6   : > { %v676_v28 = vand.u32 15, %v502_v1  ;;  %14183 = vst [vmem:[#allocation37_spill] sm:$0xff] %v12668_v52  ;;  %v506_v61 = vadd.s32 216, %v12239_v9  ;;  %v11774_v1 = vld [vmem:[#allocation2 + $0x30] sm:$0xff]  ;;  %v2170_v26 = vmul.bf16 %v11775_v35, %v12668_v52  ;;  %v2077_v18 = vrot.slane %v2075_v44, 3 }
  0xf7   : > { %v2169_v45 = vmul.bf16 %v11774_v1, %v12665_v51  ;;  %v2080_v42 = vrot.slane %v2078_v39, 4  ;;  %v12683_v27 = vor.u32 %v2229_v12, %v2226_v11  ;;  %v2087_v46 = vshll.u32 %v1112_v24, 16 }
  0xf8   : > { %vm12671_vm2 = vcmp.lt.s32.totalorder %v676_v28, 15  ;;  %v2235_v19 = vrot.slane %v2233_v13, 4  ;;  %v1113_v30 = vpack.c.bf16 %v9389_v32, %v14184_v60  ;;  %v690_v28 = vand.u32 15, %v504_v22 }
  0xf9   : > { %v9390_v50 = vsel %vm12671_vm2, 1.0, %v14180_v48  ;;  %v2238_v1 = vrot.slane %v2236_v16, 5  ;;  %v2244_v51 = vrot.slane %v2242_v5, 4  ;;  %v2247_v33 = vrot.slane %v2245_v43, 5  ;;  %v11632_v5 = vld [vmem:[#allocation6 + $0xc8] sm:$0xff]  }
  0xfa   : > { %v704_v35 = vand.u32 15, %v506_v61  ;;  %v2251_v39 = vshrl.u32 %v2169_v45, 16  ;;  %v2254_v44 = vshll.u32 %v2169_v45, 16  ;;  %v2263_v11 = vshll.u32 %v2170_v26, 16 }
  0xfb   : > { %v2089_v13 = vrot.slane %v2087_v46, 4  ;;  %v2093_v32 = vshrl.u32 %v1113_v30, 16  ;;  %v2096_v52 = vshll.u32 %v1113_v30, 16  ;;  %vm1032_vm3 = vcmp.lt.s32.totalorder %v690_v28, 15 }
  0xfc   : > { %10230 = vmatmul.mubr.bf16.gmra.mrb[24].mxu0 %v1758_v20  ;;  %v1776_v20 = vsel %vm1624_vm15, %v1766_v6, %v1775_v34  ;;  %v2260_v6 = vshrl.u32 %v2170_v26, 16  ;;  %v2081_v34 = vor.u32 %v2080_v42, %v2077_v18  ;;  %v508_v4 = vadd.s32 232, %v12239_v9 }
  0xfd   : > { %10233 = vmatprep.mubr.bf16.mxu0 %v1767_v29  ;;  %v2084_v29 = vshrl.u32 %v1112_v24, 16  ;;  %v1114_v24 = vpack.c.bf16 %v9390_v50, %v14184_v60  ;;  %vm1034_vm4 = vcmp.lt.s32.totalorder %v704_v35, 15  ;;  %v510_v16 = vadd.s32 248, %v12239_v9 }
  0xfe   : > { %v12693_v43 = vsel %vm1624_vm15, %v2072_v23, %v2081_v34  ;;  %v2222_v22 = vsel %vm1136_vm6, %v12655_v40, %v2221_v58  ;;  %v9391_v45 = vsel %vm1032_vm3, 1.0, %v14180_v48  ;;  %v2231_v26 = vsel %vm1136_vm6, %v2221_v58, %v12683_v27 }
  0xff   : > { %v2086_v12 = vrot.slane %v2084_v29, 3  ;;  %v2102_v61 = vshrl.u32 %v1114_v24, 16  ;;  %v2105_v18 = vshll.u32 %v1114_v24, 16  ;;  %v718_v42 = vand.u32 15, %v508_v4  ;;  %v11776_v29 = vld [vmem:[#allocation2 + $0x40] sm:$0xff] }
 0x100   : > { %v2171_v9 = vmul.bf16 %v11776_v29, %v12693_v43  ;;  %v9392_v46 = vsel %vm1034_vm4, 1.0, %v14180_v48  ;;  %v732_v23 = vand.u32 15, %v510_v16  ;;  %v2248_v30 = vor.u32 %v2247_v33, %v2244_v51 }
 0x101   : > { %v2253_v50 = vrot.slane %v2251_v39, 4  ;;  %v2095_v40 = vrot.slane %v2093_v32, 3  ;;  %v2098_v28 = vrot.slane %v2096_v52, 4  ;;  %v2256_v35 = vrot.slane %v2254_v44, 5 }
 0x102   : > { %v2107_v24 = vrot.slane %v2105_v18, 4  ;;  %v1116_v4 = vpack.c.bf16 %v9392_v46, %v14184_v60  ;;  %vm1036_vm5 = vcmp.lt.s32.totalorder %v718_v42, 15  ;;  %v2265_v33 = vrot.slane %v2263_v11, 5 }
 0x103   : > { %v2269_v51 = vshrl.u32 %v2171_v9, 16  ;;  %v2272_v52 = vshll.u32 %v2171_v9, 16  ;;  %vm1038_vm7 = vcmp.lt.s32.totalorder %v732_v23, 15  ;;  %v2099_v39 = vor.u32 %v2098_v28, %v2095_v40 }
 0x104   : > { %10234 = vmatmul.mubr.bf16.gmra.mrb[28].mxu0 %v1776_v20  ;;  %v2239_v20 = vor.u32 %v2238_v1, %v2235_v19  ;;  %v1115_v19 = vpack.c.bf16 %v9391_v45, %v14184_v60  ;;  %v11633_v1 = vld [vmem:[#allocation6 + $0xd0] sm:$0xff]   ;;  %v9393_v16 = vsel %vm1036_vm5, 1.0, %v14180_v48  ;;  %v2120_v45 = vshrl.u32 %v1116_v4, 16 }
 0x105   : > { %10253 = vmatprep.mubr.bf16.mxu0 %v2213_v8  ;;  %v2090_v8 = vor.u32 %v2089_v13, %v2086_v12  ;;  %v2262_v12 = vrot.slane %v2260_v6, 4  ;;  %v2104_v13 = vrot.slane %v2102_v61, 3  ;;  %v11777_v6 = vld [vmem:[#allocation2 + $0x48] sm:$0xff]  ;;  %v9394_v18 = vsel %vm1038_vm7, 1.0, %v14180_v48 }
 0x106   : > { %v2240_v44 = vsel %vm1136_vm6, %v12683_v27, %v2239_v20  ;;  %v2111_v32 = vshrl.u32 %v1115_v19, 16  ;;  %v2114_v11 = vshll.u32 %v1115_v19, 16  ;;  %v2271_v42 = vrot.slane %v2269_v51, 4 }
 0x107   : > { %v12704_v58 = vsel %vm1624_vm15, %v2081_v34, %v2090_v8  ;;  %v2108_v61 = vor.u32 %v2107_v24, %v2104_v13  ;;  %v12715_v27 = vsel %vm1624_vm15, %v2090_v8, %v2099_v39  ;;  %v1117_v29 = vpack.c.bf16 %v9393_v16, %v14184_v60  ;;  %v11778_v8 = vld [vmem:[#allocation2 + $0x50] sm:$0xff] }
 0x108   : > { %14187 = vst [vmem:[#allocation38_spill] sm:$0xff] %v12704_v58  ;;  %v2172_v34 = vmul.bf16 %v11777_v6, %v12704_v58  ;;  %14188 = vst [vmem:[#allocation39_spill] sm:$0xff] %v12715_v27  ;;  %v2257_v9 = vor.u32 %v2256_v35, %v2253_v50  ;;  %v2266_v46 = vor.u32 %v2265_v33, %v2262_v12  ;;  %v2113_v28 = vrot.slane %v2111_v32, 3  ;;  %v11779_v33 = vld [vmem:[#allocation2 + $0x58] sm:$0xff] }
 0x109   : > { %v12719_v40 = vsel %vm1624_vm15, %v2099_v39, %v2108_v61  ;;  %v2116_v48 = vrot.slane %v2114_v11, 4  ;;  %v1118_v19 = vpack.c.bf16 %v9394_v18, %v14184_v60  ;;  %v2274_v13 = vrot.slane %v2272_v52, 5  ;;  %v11636_v52 = vld [vmem:[#allocation6 + $0xe8] sm:$0xff]  }
 0x10a   : > { %v2281_v23 = vshll.u32 %v2172_v34, 16  ;;  %14189 = vst [vmem:[#allocation40_spill] sm:$0xff] %v12719_v40  ;;  %v2173_v24 = vmul.bf16 %v11778_v8, %v12715_v27  ;;  %v2132_v50 = vshll.u32 %v1117_v29, 16  ;;  %v2258_v35 = vsel %vm1136_vm6, %v2248_v30, %v2257_v9 }
 0x10b   : > { %v2174_v39 = vmul.bf16 %v11779_v33, %v12719_v40  ;;  %v2267_v6 = vsel %vm1136_vm6, %v2257_v9, %v2266_v46  ;;  %v2117_v60 = vor.u32 %v2116_v48, %v2113_v28  ;;  %v2141_v32 = vshll.u32 %v1118_v19, 16 }
 0x10c   : > { %10254 = vmatmul.mubr.bf16.vlgmr.msra.gmra.mrb[0].mxu0 %v2222_v22  ;;  %v2249_v22 = vsel %vm1136_vm6, %v2239_v20, %v2248_v30  ;;  %v2278_v20 = vshrl.u32 %v2172_v34, 16  ;;  %v2138_v34 = vshrl.u32 %v1118_v19, 16  ;;  %v2287_v16 = vshrl.u32 %v2173_v24, 16 }
 0x10d   : > { %10286 = vmatpush3.bf16.msra.mxu0 %v12599_v21  ;;  %10257 = vmatprep.mubr.bf16.mxu0 %v2231_v26  ;;  %v11634_v21 = vld [vmem:[#allocation6 + $0xd8] sm:$0xff]   ;;  %v2123_v26 = vshll.u32 %v1116_v4, 16  ;;  %v2122_v4 = vrot.slane %v2120_v45, 3  ;;  %v2275_v45 = vor.u32 %v2274_v13, %v2271_v42  ;;  %v12727_v9 = vsel %vm1624_vm15, %v2108_v61, %v2117_v60 }
 0x10e   : > { %10287 = vmatprep.subr.bf16.mxu0 %v11632_v5  ;;  %v2280_v12 = vrot.slane %v2278_v20, 4  ;;  %v2299_v20 = vshll.u32 %v2174_v39, 16  ;;  %14190 = vst [vmem:[#allocation41_spill] sm:$0xff] %v12727_v9  ;;  %v2143_v28 = vrot.slane %v2141_v32, 4  ;;  %v362_v13 = vld [vmem:[%s12225_s13 + $0x7c] sm:$0xf] }
 0x10f   : > { %v2125_v51 = vrot.slane %v2123_v26, 4  ;;  %v11637_v26 = vld [vmem:[#allocation6 + $0xf0] sm:$0xff]   ;;  %v2276_v42 = vsel %vm1136_vm6, %v2266_v46, %v2275_v45  ;;  %v11638_v61 = vld [vmem:[#allocation6 + $0xf8] sm:$0xff]   ;;  %v9362_v46 = vcombine.low %v362_v13, %v362_v13 }
 0x110   : > { %v2606_v13 = vld [vmem:[#allocation2 + $0x8] sm:$0xf8] }
 0x111   : > { %10288 = vmatpush3.bf16.msra.mxu0 %v11632_v5  ;;  %v11635_v5 = vld [vmem:[#allocation6 + $0xe0] sm:$0xff]   ;;  %v2126_v11 = vor.u32 %v2125_v51, %v2122_v4  ;;  %477 = vst [vmem:[#allocation2 + $0x88] sm:$0xf] %v9362_v46 }
 0x112   : > { %10289 = vmatprep.subr.bf16.mxu0 %v11633_v1 }
 0x113   : > { %v12730_v48 = vsel %vm1624_vm15, %v2117_v60, %v2126_v11 }
 0x114   : > { %10258 = vmatmul.mubr.bf16.gmra.mrb[4].mxu0 %v2240_v44  ;;  %v2129_v44 = vshrl.u32 %v1117_v29, 16  ;;  %v2296_v29 = vshrl.u32 %v2174_v39, 16  ;;  %14191 = vst [vmem:[#allocation42_spill] sm:$0xff] %v12730_v48 }
 0x115   : > { %10261 = vmatprep.mubr.bf16.mxu0 %v2249_v22  ;;  %10290 = vmatpush3.bf16.msra.mxu0 %v11633_v1  ;;  %v2283_v1 = vrot.slane %v2281_v23, 5  ;;  %v2290_v22 = vshll.u32 %v2173_v24, 16  ;;  %v2140_v23 = vrot.slane %v2138_v34, 3  ;;  %v2289_v24 = vrot.slane %v2287_v16, 4 }
 0x116   : > { %10291 = vmatprep.subr.bf16.mxu0 %v11634_v21  ;;  %v2131_v30 = vrot.slane %v2129_v44, 3  ;;  %v2298_v44 = vrot.slane %v2296_v29, 4 }
 0x117   : > { %v2284_v18 = vor.u32 %v2283_v1, %v2280_v12  ;;  %v2292_v4 = vrot.slane %v2290_v22, 5  ;;  %v12737_v1 = vor.u32 %v2143_v28, %v2140_v23  ;;  %v12746_v22 = vld [vmem:[#allocation6 + $0x100] sm:$0xff]  }
 0x119   : > { %10292 = vmatpush3.bf16.msra.mxu0 %v11634_v21  ;;  %v2134_v21 = vrot.slane %v2132_v50, 4  ;;  %v2285_v8 = vsel %vm1136_vm6, %v2275_v45, %v2284_v18  ;;  %v2301_v50 = vrot.slane %v2299_v20, 5  ;;  %14192 = vst [vmem:[#allocation43_spill] sm:$0xff] %v12737_v1  ;;  %v2293_v39 = vor.u32 %v2292_v4, %v2289_v24  ;;  %v12755_v24 = vld [vmem:[#allocation2 + $0x10] sm:$0xff] }
 0x11a   : > { %10293 = vmatprep.subr.bf16.mxu0 %v11635_v5  ;;  %v2624_v46 = vmul.bf16 %v12755_v24, %v12402_v17 }
 0x11b   : > { %v2135_v19 = vor.u32 %v2134_v21, %v2131_v30  ;;  %v2294_v45 = vsel %vm1136_vm6, %v2284_v18, %v2293_v39 }
 0x11c   : > { %10262 = vmatmul.mubr.bf16.gmra.mrb[8].mxu0 %v2258_v35  ;;  %v11781_v35 = vld [vmem:[#allocation2 + $0x68] sm:$0xff] }
 0x11d   : > { %10265 = vmatprep.mubr.bf16.mxu0 %v2267_v6  ;;  %10294 = vmatpush3.bf16.msra.mxu0 %v11635_v5  ;;  %v11780_v5 = vld [vmem:[#allocation2 + $0x60] sm:$0xff]  ;;  %v2176_v12 = vmul.bf16 %v11781_v35, %v12730_v48  ;;  %v12740_v33 = vsel %vm1624_vm15, %v2126_v11, %v2135_v19  ;;  %v12744_v16 = vsel %vm1624_vm15, %v2135_v19, %v12737_v1 }
 0x11e   : > { %10295 = vmatprep.subr.bf16.mxu0 %v11636_v52  ;;  %v2175_v51 = vmul.bf16 %v11780_v5, %v12727_v9  ;;  %14193 = vst [vmem:[#allocation44_spill] sm:$0xff] %v12740_v33  ;;  %14194 = vst [vmem:[#allocation45_spill] sm:$0xff] %v12744_v16  ;;  %v2177_v11 = vmul.bf16 %v12575_v10, %v12740_v33  ;;  %v2002_v19 = vld [vmem:[#allocation2 + $0x80] sm:$0x1f] }
 0x11f   : > { %v2314_v34 = vshrl.u32 %v2176_v12, 16  ;;  %v2317_v32 = vshll.u32 %v2176_v12, 16  ;;  %v2179_v35 = vmul.bf16 %v12737_v1, %v2002_v19 }
 0x120   : > { %v2305_v6 = vshrl.u32 %v2175_v51, 16  ;;  %v2308_v60 = vshll.u32 %v2175_v51, 16  ;;  %v2323_v28 = vshrl.u32 %v2177_v11, 16  ;;  %v2623_v51 = vmul.bf16 %v2606_v13, %v12382_v53 }
 0x121   : > { %10296 = vmatpush3.bf16.msra.mxu0 %v11636_v52  ;;  %v2302_v52 = vor.u32 %v2301_v50, %v2298_v44  ;;  %v2316_v20 = vrot.slane %v2314_v34, 4  ;;  %v2319_v23 = vrot.slane %v2317_v32, 5  ;;  %v2341_v32 = vshrl.u32 %v2179_v35, 16 }
 0x122   : > { %10297 = vmatprep.subr.bf16.mxu0 %v11637_v26  ;;  %v2307_v30 = vrot.slane %v2305_v6, 4  ;;  %v2310_v21 = vrot.slane %v2308_v60, 5  ;;  %v2661_v6 = vshll.u32 %v2623_v51, 16  ;;  %v12763_v60 = vld [vmem:[#allocation2 + $0x18] sm:$0xff] }
 0x123   : > { %v2303_v29 = vsel %vm1136_vm6, %v2293_v39, %v2302_v52  ;;  %v2320_v4 = vor.u32 %v2319_v23, %v2316_v20  ;;  %v2658_v39 = vshrl.u32 %v2623_v51, 16  ;;  %v2343_v23 = vrot.slane %v2341_v32, 4 }
 0x124   : > { %10266 = vmatmul.mubr.bf16.gmra.mrb[12].mxu0 %v2276_v42  ;;  %v2326_v42 = vshll.u32 %v2177_v11, 16  ;;  %v2311_v10 = vor.u32 %v2310_v21, %v2307_v30  ;;  %v2344_v11 = vshll.u32 %v2179_v35, 16  ;;  %v2669_v30 = vshll.u32 %v2624_v46, 16  ;;  %v12765_v21 = vld [vmem:[#allocation2 + $0x20] sm:$0xff]  ;;  %v12775_v35 = vld [vmem:[#allocation2 + $0x30] sm:$0xff] }
 0x125   : > { %10269 = vmatprep.mubr.bf16.mxu0 %v2285_v8  ;;  %10298 = vmatpush3.bf16.msra.mxu0 %v11637_v26  ;;  %v2178_v26 = vmul.bf16 %v12609_v14, %v12744_v16  ;;  %v2325_v14 = vrot.slane %v2323_v28, 4 }
 0x126   : > { %10299 = vmatprep.subr.bf16.mxu0 %v11638_v61  ;;  %v2328_v5 = vrot.slane %v2326_v42, 5  ;;  %v2321_v12 = vsel %vm1136_vm6, %v2311_v10, %v2320_v4  ;;  %v2346_v28 = vrot.slane %v2344_v11, 5  ;;  %v2625_v42 = vmul.bf16 %v12763_v60, %v12361_v62 }
 0x127   : > { %v2332_v18 = vshrl.u32 %v2178_v26, 16  ;;  %v2335_v8 = vshll.u32 %v2178_v26, 16  ;;  %v2660_v26 = vrot.slane %v2658_v39, 3 }
 0x128   : > { %v2329_v34 = vor.u32 %v2328_v5, %v2325_v14  ;;  %v2675_v14 = vshrl.u32 %v2625_v42, 16  ;;  %v2678_v5 = vshll.u32 %v2625_v42, 16  ;;  %v12785_v42 = vld [vmem:[#allocation2 + $0x40] sm:$0xff] }
 0x129   : > { %10300 = vmatpush3.bf16.msra.mxu0 %v11638_v61  ;;  %v2312_v61 = vsel %vm1136_vm6, %v2302_v52, %v2311_v10  ;;  %v2334_v44 = vrot.slane %v2332_v18, 4  ;;  %v2337_v50 = vrot.slane %v2335_v8, 5  ;;  %v2666_v52 = vshrl.u32 %v2624_v46, 16 }
 0x12a   : > { %10333 = vmatprep.subr.bf16.mxu0 %v12746_v22  ;;  %v2330_v20 = vsel %vm1136_vm6, %v2320_v4, %v2329_v34  ;;  %v2671_v10 = vrot.slane %v2669_v30, 4  ;;  %v2626_v18 = vmul.bf16 %v12765_v21, %v12420_v41  ;;  %v2347_v8 = vor.u32 %v2346_v28, %v2343_v23  ;;  %v12783_v28 = vld [vmem:[#allocation2 + $0x38] sm:$0xff] }
 0x12b   : > { %v2668_v13 = vrot.slane %v2666_v52, 3  ;;  %v2677_v46 = vrot.slane %v2675_v14, 3  ;;  %v2680_v39 = vrot.slane %v2678_v5, 4  ;;  %v2628_v52 = vmul.bf16 %v12775_v35, %v12460_v63  ;;  %v11640_v14 = vld [vmem:[#allocation6 + $0x108] sm:$0xff]  }
 0x12c   : > { %10270 = vmatmul.mubr.bf16.gmra.mrb[16].mxu0 %v2294_v45  ;;  %v2338_v45 = vor.u32 %v2337_v50, %v2334_v44  ;;  %v2684_v4 = vshrl.u32 %v2626_v18, 16  ;;  %v2687_v44 = vshll.u32 %v2626_v18, 16  ;;  %v12773_v50 = vld [vmem:[#allocation2 + $0x28] sm:$0xff]  ;;  %v2629_v18 = vmul.bf16 %v12783_v28, %v12468_v15 }
 0x12d   : > { %10273 = vmatprep.mubr.bf16.mxu0 %v2303_v29  ;;  %v2663_v29 = vrot.slane %v2661_v6, 4  ;;  %v2627_v6 = vmul.bf16 %v12773_v50, %v12443_v36  ;;  %v2681_v30 = vor.u32 %v2680_v39, %v2677_v46  ;;  %v2702_v23 = vshrl.u32 %v2628_v52, 16  ;;  %v11641_v39 = vld [vmem:[#allocation6 + $0x110] sm:$0xff]  }
 0x12e   : > { %v2339_v19 = vsel %vm1136_vm6, %v2329_v34, %v2338_v45  ;;  %v2686_v32 = vrot.slane %v2684_v4, 3  ;;  %v2689_v11 = vrot.slane %v2687_v44, 4  ;;  %v2630_v4 = vmul.bf16 %v12785_v42, %v12474_v59 }
 0x12f   : > { %v2664_v51 = vor.u32 %v2663_v29, %v2660_v26  ;;  %v2693_v26 = vshrl.u32 %v2627_v6, 16  ;;  %v2696_v29 = vshll.u32 %v2627_v6, 16  ;;  %v2704_v5 = vrot.slane %v2702_v23, 3 }
 0x130   : > { %v2720_v6 = vshrl.u32 %v2630_v4, 16 }
 0x132   : > { %v2722_v23 = vrot.slane %v2720_v6, 3 }
 0x134   : > { %10274 = vmatmul.mubr.bf16.gmra.mrb[20].mxu0 %v2312_v61  ;;  %v2672_v61 = vor.u32 %v2671_v10, %v2668_v13  ;;  %v2695_v13 = vrot.slane %v2693_v26, 3  ;;  %v2698_v10 = vrot.slane %v2696_v29, 4 }
 0x135   : > { %10277 = vmatprep.mubr.bf16.mxu0 %v2321_v12  ;;  %v2348_v12 = vsel %vm1136_vm6, %v2338_v45, %v2347_v8  ;;  %v2705_v45 = vshll.u32 %v2628_v52, 16 }
 0x136   : > { %v2673_v34 = vsel %vm1624_vm15, %v2664_v51, %v2672_v61  ;;  %v2699_v44 = vor.u32 %v2698_v10, %v2695_v13 }
 0x137   : > { %v2707_v51 = vrot.slane %v2705_v45, 4 }
 0x139   : > { %v2708_v46 = vor.u32 %v2707_v51, %v2704_v5  ;;  %v12804_v51 = vld [vmem:[#allocation2 + $0x58] sm:$0xff] }
 0x13b   : > { %v2709_v29 = vsel %vm1624_vm15, %v2699_v44, %v2708_v46 }
 0x13c   : > { %10278 = vmatmul.mubr.bf16.gmra.mrb[24].mxu0 %v2330_v20  ;;  %v2690_v20 = vor.u32 %v2689_v11, %v2686_v32  ;;  %v12794_v32 = vld [vmem:[#allocation2 + $0x48] sm:$0xff]  ;;  %v12796_v11 = vld [vmem:[#allocation2 + $0x50] sm:$0xff] }
 0x13d   : > { %10281 = vmatprep.mubr.bf16.mxu0 %v2339_v19  ;;  %v2682_v19 = vsel %vm1624_vm15, %v2672_v61, %v2681_v30  ;;  %v2714_v61 = vshll.u32 %v2629_v18, 16  ;;  %v2632_v13 = vmul.bf16 %v12796_v11, %v12494_v25 }
 0x13e   : > { %v2691_v8 = vsel %vm1624_vm15, %v2681_v30, %v2690_v20  ;;  %v2700_v52 = vsel %vm1624_vm15, %v2690_v20, %v2699_v44  ;;  %v12806_v44 = vld [vmem:[#allocation2 + $0x60] sm:$0xff] }
 0x13f   : > { %v2716_v26 = vrot.slane %v2714_v61, 4  ;;  %v2741_v5 = vshll.u32 %v2632_v13, 16 }
 0x144   : > { %10282 = vmatmul.mubr.bf16.gmra.mrb[28].mxu0 %v2348_v12  ;;  %v2711_v12 = vshrl.u32 %v2629_v18, 16 }
 0x145   : > { %10301 = vmatprep.mubr.bf16.mxu0 %v2673_v34  ;;  %v2723_v34 = vshll.u32 %v2630_v4, 16  ;;  %v11643_v4 = vld [vmem:[#allocation6 + $0x120] sm:$0xff]  }
 0x146   : > { %v2713_v30 = vrot.slane %v2711_v12, 3 }
 0x147   : > { %v2725_v45 = vrot.slane %v2723_v34, 4  ;;  %v2633_v34 = vmul.bf16 %v12804_v51, %v12510_v47 }
 0x148   : > { %v2717_v10 = vor.u32 %v2716_v26, %v2713_v30  ;;  %v2743_v30 = vrot.slane %v2741_v5, 4  ;;  %v2634_v26 = vmul.bf16 %v12806_v44, %v12515_v38 }
 0x14a   : > { %v2718_v12 = vsel %vm1624_vm15, %v2708_v46, %v2717_v10  ;;  %v2750_v46 = vshll.u32 %v2633_v34, 16 }
 0x14c   : > { %10302 = vmatmul.mubr.bf16.vlgmr.msra.gmra.mrb[0].mxu0 %v2682_v19  ;;  %v11642_v19 = vld [vmem:[#allocation6 + $0x118] sm:$0xff]   ;;  %v2752_v38 = vrot.slane %v2750_v46, 4 }
 0x14d   : > { %10334 = vmatpush3.bf16.msra.mxu0 %v12746_v22  ;;  %10305 = vmatprep.mubr.bf16.mxu0 %v2691_v8  ;;  %v2631_v22 = vmul.bf16 %v12794_v32, %v12489_v56  ;;  %v2726_v8 = vor.u32 %v2725_v45, %v2722_v23  ;;  %v2747_v23 = vshrl.u32 %v2633_v34, 16 }
 0x14e   : > { %10335 = vmatprep.subr.bf16.mxu0 %v11640_v14 }
 0x14f   : > { %v2729_v20 = vshrl.u32 %v2631_v22, 16  ;;  %v2732_v18 = vshll.u32 %v2631_v22, 16  ;;  %v11644_v22 = vld [vmem:[#allocation6 + $0x128] sm:$0xff]   ;;  %v2749_v5 = vrot.slane %v2747_v23, 3 }
 0x151   : > { %10336 = vmatpush3.bf16.msra.mxu0 %v11640_v14  ;;  %v2738_v14 = vshrl.u32 %v2632_v13, 16  ;;  %v2731_v61 = vrot.slane %v2729_v20, 3  ;;  %v2734_v6 = vrot.slane %v2732_v18, 4  ;;  %v2759_v13 = vshll.u32 %v2634_v26, 16  ;;  %v12814_v20 = vld [vmem:[#allocation2 + $0x68] sm:$0xff]  ;;  %v12816_v18 = vld [vmem:[#allocation2 + $0x70] sm:$0xff] }
 0x152   : > { %10337 = vmatprep.subr.bf16.mxu0 %v11641_v39  ;;  %v2636_v34 = vmul.bf16 %v12816_v18, %v12548_v3 }
 0x154   : > { %10306 = vmatmul.mubr.bf16.gmra.mrb[4].mxu0 %v2700_v52  ;;  %v2740_v52 = vrot.slane %v2738_v14, 3  ;;  %v2774_v23 = vshrl.u32 %v2636_v34, 16  ;;  %v2777_v46 = vshll.u32 %v2636_v34, 16 }
 0x155   : > { %10309 = vmatprep.mubr.bf16.mxu0 %v2709_v29  ;;  %10338 = vmatpush3.bf16.msra.mxu0 %v11641_v39  ;;  %v2727_v39 = vsel %vm1624_vm15, %v2717_v10, %v2726_v8  ;;  %v2735_v29 = vor.u32 %v2734_v6, %v2731_v61  ;;  %v11645_v10 = vld [vmem:[#allocation6 + $0x130] sm:$0xff]   ;;  %v2761_v6 = vrot.slane %v2759_v13, 4 }
 0x156   : > { %10339 = vmatprep.subr.bf16.mxu0 %v11642_v19  ;;  %v2744_v45 = vor.u32 %v2743_v30, %v2740_v52  ;;  %v2753_v52 = vor.u32 %v2752_v38, %v2749_v5  ;;  %v2779_v5 = vrot.slane %v2777_v46, 4 }
 0x157   : > { %v2736_v14 = vsel %vm1624_vm15, %v2726_v8, %v2735_v29 }
 0x158   : > { %v2745_v61 = vsel %vm1624_vm15, %v2735_v29, %v2744_v45  ;;  %v12826_v29 = vld [vmem:[#allocation2 + $0x80] sm:$0xff] }
 0x159   : > { %10340 = vmatpush3.bf16.msra.mxu0 %v11642_v19  ;;  %v2756_v19 = vshrl.u32 %v2634_v26, 16 }
 0x15a   : > { %10341 = vmatprep.subr.bf16.mxu0 %v11643_v4 }
 0x15c   : > { %10310 = vmatmul.mubr.bf16.gmra.mrb[8].mxu0 %v2718_v12  ;;  %v2635_v12 = vmul.bf16 %v12814_v20, %v12528_v57  ;;  %v12824_v57 = vld [vmem:[#allocation2 + $0x78] sm:$0xff] }
 0x15d   : > { %10313 = vmatprep.mubr.bf16.mxu0 %v2727_v39  ;;  %10342 = vmatpush3.bf16.msra.mxu0 %v11643_v4  ;;  %v2758_v4 = vrot.slane %v2756_v19, 3  ;;  %v11647_v39 = vld [vmem:[#allocation6 + $0x138] sm:$0xff]   ;;  %v2754_v19 = vsel %vm1624_vm15, %v2744_v45, %v2753_v52 }
 0x15e   : > { %10343 = vmatprep.subr.bf16.mxu0 %v11644_v22  ;;  %v2765_v30 = vshrl.u32 %v2635_v12, 16  ;;  %v2768_v8 = vshll.u32 %v2635_v12, 16  ;;  %v2638_v12 = vmul.bf16 %v12826_v29, %v12597_v7 }
 0x15f   : > { %v2762_v26 = vor.u32 %v2761_v6, %v2758_v4 }
 0x160   : > { %v2767_v13 = vrot.slane %v2765_v30, 3  ;;  %v2770_v3 = vrot.slane %v2768_v8, 4  ;;  %v2792_v34 = vshrl.u32 %v2638_v12, 16  ;;  %v2795_v30 = vshll.u32 %v2638_v12, 16  ;;  %v12834_v8 = vld [vmem:[#allocation2 + $0x88] sm:$0xf] }
 0x161   : > { %10344 = vmatpush3.bf16.msra.mxu0 %v11644_v22  ;;  %v11648_v22 = vld [vmem:[#allocation6 + $0x140] sm:$0xff]   ;;  %v2763_v38 = vsel %vm1624_vm15, %v2753_v52, %v2762_v26 }
 0x162   : > { %10345 = vmatprep.subr.bf16.mxu0 %v11645_v10  ;;  %v2794_v7 = vrot.slane %v2792_v34, 3  ;;  %v3102_v34 = vrot.slane %v12755_v24, 4 }
 0x164   : > { %10314 = vmatmul.mubr.bf16.gmra.mrb[12].mxu0 %v2736_v14  ;;  %v2637_v14 = vmul.bf16 %v12824_v57, %v12559_v49 }
 0x165   : > { %10317 = vmatprep.mubr.bf16.mxu0 %v2745_v61  ;;  %10346 = vmatpush3.bf16.msra.mxu0 %v11645_v10  ;;  %v2776_v10 = vrot.slane %v2774_v23, 3  ;;  %v2771_v61 = vor.u32 %v2770_v3, %v2767_v13  ;;  %v2639_v23 = vmul.bf16 %v12834_v8, %v12580_v0 }
 0x166   : > { %10347 = vmatprep.subr.bf16.mxu0 %v11647_v39  ;;  %v2783_v4 = vshrl.u32 %v2637_v14, 16  ;;  %v2786_v6 = vshll.u32 %v2637_v14, 16 }
 0x167   : > { %v2780_v45 = vor.u32 %v2779_v5, %v2776_v10  ;;  %v2801_v13 = vshrl.u32 %v2639_v23, 16  ;;  %v2804_v14 = vshll.u32 %v2639_v23, 16  ;;  %v11649_v23 = vld [vmem:[#allocation6 + $0x148] sm:$0xff]  }
 0x168   : > { %v2785_v49 = vrot.slane %v2783_v4, 3  ;;  %v2788_v52 = vrot.slane %v2786_v6, 4  ;;  %v12842_v4 = vld [vmem:[#allocation2 + $0x8] sm:$0xf0] }
 0x169   : > { %10348 = vmatpush3.bf16.msra.mxu0 %v11647_v39  ;;  %v2772_v39 = vsel %vm1624_vm15, %v2762_v26, %v2771_v61  ;;  %v2781_v46 = vsel %vm1624_vm15, %v2771_v61, %v2780_v45  ;;  %v2803_v5 = vrot.slane %v2801_v13, 3  ;;  %v2806_v12 = vrot.slane %v2804_v14, 4 }
 0x16a   : > { %10381 = vmatprep.subr.bf16.mxu0 %v11648_v22  ;;  %v2789_v3 = vor.u32 %v2788_v52, %v2785_v49  ;;  %v3101_v61 = vrot.slane %v12842_v4, 4 }
 0x16b   : > { %v2807_v6 = vor.u32 %v2806_v12, %v2803_v5  ;;  %v11652_v5 = vld [vmem:[#allocation6 + $0x160] sm:$0xff]  }
 0x16c   : > { %10318 = vmatmul.mubr.bf16.gmra.mrb[16].mxu0 %v2754_v19  ;;  %v2797_v19 = vrot.slane %v2795_v30, 4  ;;  %v2790_v10 = vsel %vm1624_vm15, %v2780_v45, %v2789_v3  ;;  %v3103_v30 = vsel %vm1365_vm0, %v3101_v61, %v3102_v34  ;;  %v3106_v45 = vrot.slane %v12765_v21, 4 }
 0x16d   : > { %10321 = vmatprep.mubr.bf16.mxu0 %v2763_v38  ;;  %v3116_v61 = vrot.slane %v12794_v32, 4 }
 0x16e   : > { %v2798_v38 = vor.u32 %v2797_v19, %v2794_v7  ;;  %v12849_v7 = vrot.slane %v12763_v60, 4  ;;  %v3110_v19 = vrot.slane %v12775_v35, 4 }
 0x170   : > { %v2799_v26 = vsel %vm1624_vm15, %v2789_v3, %v2798_v38  ;;  %v2808_v49 = vsel %vm1624_vm15, %v2798_v38, %v2807_v6  ;;  %v12856_v52 = vsel %vm1365_vm0, %v12849_v7, %v3106_v45  ;;  %v11650_v3 = vld [vmem:[#allocation6 + $0x150] sm:$0xff]   ;;  %v11651_v38 = vld [vmem:[#allocation6 + $0x158] sm:$0xff]   ;;  %v11653_v6 = vld [vmem:[#allocation6 + $0x168] sm:$0xff]  }
 0x174   : > { %10322 = vmatmul.mubr.bf16.gmra.mrb[20].mxu0 %v2772_v39  ;;  %v3105_v39 = vsel %vm1365_vm0, %v3102_v34, %v12849_v7  ;;  %v3118_v34 = vrot.slane %v12796_v11, 4 }
 0x175   : > { %10325 = vmatprep.mubr.bf16.mxu0 %v2781_v46  ;;  %v3108_v46 = vrot.slane %v12773_v50, 4 }
 0x177   : > { %v12862_v13 = vsel %vm1365_vm0, %v3106_v45, %v3108_v46  ;;  %v12865_v14 = vsel %vm1365_vm0, %v3108_v46, %v3110_v19  ;;  %v12885_v45 = vsel %vm1365_vm0, %v3116_v61, %v3118_v34  ;;  %v3122_v46 = vrot.slane %v12806_v44, 4 }
 0x178   : > { %14198 = vst [vmem:[#allocation49_spill] sm:$0xff] %v12885_v45 }
 0x17c   : > { %10326 = vmatmul.mubr.bf16.gmra.mrb[24].mxu0 %v2790_v10  ;;  %v3114_v10 = vrot.slane %v12785_v42, 4 }
 0x17d   : > { %10329 = vmatprep.mubr.bf16.mxu0 %v2799_v26 }
 0x184   : > { %10330 = vmatmul.mubr.bf16.gmra.mrb[28].mxu0 %v2808_v49  ;;  %v11654_v49 = vld [vmem:[#allocation6 + $0x170] sm:$0xff]  }
 0x185   : > { %10349 = vmatprep.mubr.bf16.mxu0 %v3103_v30  ;;  %v12882_v30 = vsel %vm1365_vm0, %v3114_v10, %v3116_v61 }
 0x186   : > { %14197 = vst [vmem:[#allocation48_spill] sm:$0xff] %v12882_v30 }
 0x18c   : > { %10350 = vmatmul.mubr.bf16.vlgmr.msra.gmra.mrb[0].mxu0 %v3105_v39  ;;  %v11655_v39 = vld [vmem:[#allocation6 + $0x178] sm:$0xff]  }
 0x18d   : > { %10382 = vmatpush3.bf16.msra.mxu0 %v11648_v22  ;;  %10353 = vmatprep.mubr.bf16.mxu0 %v12856_v52  ;;  %v3112_v22 = vrot.slane %v12783_v28, 4 }
 0x18e   : > { %10383 = vmatprep.subr.bf16.mxu0 %v11649_v23 }
 0x18f   : > { %v12872_v12 = vsel %vm1365_vm0, %v3110_v19, %v3112_v22  ;;  %v12875_v26 = vsel %vm1365_vm0, %v3112_v22, %v3114_v10  ;;  %v12891_v19 = vld [vmem:[#allocation6 + $0x180] sm:$0xff]   ;;  %v3124_v22 = vrot.slane %v12814_v20, 4  ;;  %v3126_v10 = vrot.slane %v12816_v18, 4 }
 0x190   : > { %14195 = vst [vmem:[#allocation46_spill] sm:$0xff] %v12872_v12  ;;  %14196 = vst [vmem:[#allocation47_spill] sm:$0xff] %v12875_v26 }
 0x191   : > { %10384 = vmatpush3.bf16.msra.mxu0 %v11649_v23  ;;  %v3120_v23 = vrot.slane %v12804_v51, 4  ;;  %v12910_v61 = vsel %vm1365_vm0, %v3124_v22, %v3126_v10 }
 0x192   : > { %10385 = vmatprep.subr.bf16.mxu0 %v11650_v3  ;;  %14202 = vst [vmem:[#allocation53_spill] sm:$0xff] %v12910_v61 }
 0x194   : > { %10354 = vmatmul.mubr.bf16.gmra.mrb[4].mxu0 %v12862_v13 }
 0x195   : > { %10357 = vmatprep.mubr.bf16.mxu0 %v12865_v14  ;;  %10386 = vmatpush3.bf16.msra.mxu0 %v11650_v3  ;;  %v12894_v3 = vsel %vm1365_vm0, %v3118_v34, %v3120_v23  ;;  %v3393_v34 = vmul.bf16 %v12755_v24, %v12534_v31 }
 0x196   : > { %10387 = vmatprep.subr.bf16.mxu0 %v11651_v38  ;;  %14199 = vst [vmem:[#allocation50_spill] sm:$0xff] %v12894_v3 }
 0x199   : > { %10388 = vmatpush3.bf16.msra.mxu0 %v11651_v38  ;;  %v12897_v38 = vsel %vm1365_vm0, %v3120_v23, %v3122_v46 }
 0x19a   : > { %10389 = vmatprep.subr.bf16.mxu0 %v11652_v5  ;;  %14200 = vst [vmem:[#allocation51_spill] sm:$0xff] %v12897_v38 }
 0x19c   : > { %10358 = vmatmul.mubr.bf16.gmra.mrb[8].mxu0 %v12872_v12  ;;  %v14206_v12 = vld [vmem:[#allocation35_spill] sm:$0xff] }
 0x19d   : > { %10361 = vmatprep.mubr.bf16.mxu0 %v12875_v26  ;;  %10390 = vmatpush3.bf16.msra.mxu0 %v11652_v5  ;;  %v12905_v5 = vsel %vm1365_vm0, %v3122_v46, %v3124_v22 }
 0x19e   : > { %10391 = vmatprep.subr.bf16.mxu0 %v11653_v6  ;;  %14201 = vst [vmem:[#allocation52_spill] sm:$0xff] %v12905_v5 }
 0x1a1   : > { %10392 = vmatpush3.bf16.msra.mxu0 %v11653_v6  ;;  %v3392_v6 = vmul.bf16 %v12842_v4, %v12326_v2 }
 0x1a2   : > { %10393 = vmatprep.subr.bf16.mxu0 %v11654_v49 }
 0x1a3   : > { %v3427_v23 = vshrl.u32 %v3392_v6, 16  ;;  %v3430_v46 = vshll.u32 %v3392_v6, 16 }
 0x1a4   : > { %10362 = vmatmul.mubr.bf16.gmra.mrb[12].mxu0 %v12882_v30 }
 0x1a5   : > { %10365 = vmatprep.mubr.bf16.mxu0 %v12885_v45  ;;  %10394 = vmatpush3.bf16.msra.mxu0 %v11654_v49  ;;  %v3128_v49 = vrot.slane %v12824_v57, 4  ;;  %v3429_v24 = vrot.slane %v3427_v23, 4  ;;  %v3432_v31 = vrot.slane %v3430_v46, 5  ;;  %v3395_v45 = vmul.bf16 %v12765_v21, %v12628_v37 }
 0x1a6   : > { %10395 = vmatprep.subr.bf16.mxu0 %v11655_v39  ;;  %v3396_v37 = vmul.bf16 %v12773_v50, %v12641_v55  ;;  %v14207_v55 = vld [vmem:[#allocation36_spill] sm:$0xff] }
 0x1a7   : > { %v12921_v4 = vsel %vm1365_vm0, %v3126_v10, %v3128_v49  ;;  %v3132_v10 = vrot.slane %v12834_v8, 4  ;;  %v3453_v23 = vshrl.u32 %v3395_v45, 16  ;;  %v3456_v26 = vshll.u32 %v3395_v45, 16 }
 0x1a8   : > { %14204 = vst [vmem:[#allocation55_spill] sm:$0xff] %v12921_v4  ;;  %v3397_v8 = vmul.bf16 %v12775_v35, %v14206_v12  ;;  %v3465_v45 = vshll.u32 %v3396_v37, 16 }
 0x1a9   : > { %10396 = vmatpush3.bf16.msra.mxu0 %v11655_v39  ;;  %v12918_v39 = vrot.slane %v12826_v29, 4 }
 0x1aa   : > { %10429 = vmatprep.subr.bf16.mxu0 %v12891_v19 }
 0x1ab   : > { %14203 = vst [vmem:[#allocation54_spill] sm:$0xff] %v12918_v39  ;;  %v12925_v22 = vsel %vm1365_vm0, %v3128_v49, %v12918_v39  ;;  %v3433_v49 = vor.u32 %v3432_v31, %v3429_v24  ;;  %v3133_v46 = vsel %vm1365_vm0, %v12918_v39, %v3132_v10  ;;  %v3462_v31 = vshrl.u32 %v3396_v37, 16 }
 0x1ac   : > { %10366 = vmatmul.mubr.bf16.gmra.mrb[16].mxu0 %v12894_v3  ;;  %v3438_v3 = vshll.u32 %v3393_v34, 16  ;;  %14205 = vst [vmem:[#allocation56_spill] sm:$0xff] %v12925_v22  ;;  %v3474_v24 = vshll.u32 %v3397_v8, 16 }
 0x1ad   : > { %10369 = vmatprep.mubr.bf16.mxu0 %v12897_v38  ;;  %v3435_v38 = vshrl.u32 %v3393_v34, 16 }
 0x1ae   : > { %v3476_v12 = vrot.slane %v3474_v24, 5 }
 0x1af   : > { %v3437_v2 = vrot.slane %v3435_v38, 4 }
 0x1b4   : > { %10370 = vmatmul.mubr.bf16.gmra.mrb[20].mxu0 %v12905_v5  ;;  %v3440_v5 = vrot.slane %v3438_v3, 5 }
 0x1b5   : > { %10373 = vmatprep.mubr.bf16.mxu0 %v12910_v61  ;;  %v3394_v61 = vmul.bf16 %v12763_v60, %v12503_v54 }
 0x1b6   : > { %v3441_v30 = vor.u32 %v3440_v5, %v3437_v2 }
 0x1b7   : > { %v3444_v6 = vshrl.u32 %v3394_v61, 16  ;;  %v3447_v34 = vshll.u32 %v3394_v61, 16  ;;  %v3471_v61 = vshrl.u32 %v3397_v8, 16 }
 0x1b8   : > { %v3442_v54 = vsel %vm1136_vm6, %v3433_v49, %v3441_v30  ;;  %v3398_v49 = vmul.bf16 %v12783_v28, %v14207_v55 }
 0x1b9   : > { %v3446_v38 = vrot.slane %v3444_v6, 4  ;;  %v3449_v3 = vrot.slane %v3447_v34, 5  ;;  %v3464_v6 = vrot.slane %v3462_v31, 4  ;;  %v3467_v34 = vrot.slane %v3465_v45, 5 }
 0x1ba   : > { %v3473_v39 = vrot.slane %v3471_v61, 4  ;;  %v3400_v61 = vmul.bf16 %v12794_v32, %v12693_v43 }
 0x1bb   : > { %v3450_v2 = vor.u32 %v3449_v3, %v3446_v38  ;;  %v3468_v37 = vor.u32 %v3467_v34, %v3464_v6  ;;  %v11658_v38 = vld [vmem:[#allocation6 + $0x190] sm:$0xff]   ;;  %v11659_v6 = vld [vmem:[#allocation6 + $0x198] sm:$0xff]  }
 0x1bc   : > { %10374 = vmatmul.mubr.bf16.gmra.mrb[24].mxu0 %v12921_v4  ;;  %v3455_v4 = vrot.slane %v3453_v23, 4  ;;  %v11657_v23 = vld [vmem:[#allocation6 + $0x188] sm:$0xff]   ;;  %v3501_v34 = vshll.u32 %v3400_v61, 16 }
 0x1bd   : > { %10377 = vmatprep.mubr.bf16.mxu0 %v12925_v22  ;;  %v3458_v22 = vrot.slane %v3456_v26, 5  ;;  %v3451_v10 = vsel %vm1136_vm6, %v3441_v30, %v3450_v2  ;;  %v3483_v30 = vshll.u32 %v3398_v49, 16 }
 0x1bf   : > { %v3459_v5 = vor.u32 %v3458_v22, %v3455_v4  ;;  %v3480_v4 = vshrl.u32 %v3398_v49, 16  ;;  %v3477_v22 = vor.u32 %v3476_v12, %v3473_v39  ;;  %v3485_v45 = vrot.slane %v3483_v30, 5 }
 0x1c0   : > { %v3401_v12 = vmul.bf16 %v12796_v11, %v12704_v58  ;;  %v3503_v30 = vrot.slane %v3501_v34, 5 }
 0x1c1   : > { %v3460_v26 = vsel %vm1136_vm6, %v3450_v2, %v3459_v5  ;;  %v3469_v2 = vsel %vm1136_vm6, %v3459_v5, %v3468_v37  ;;  %v3482_v31 = vrot.slane %v3480_v4, 4  ;;  %v3478_v24 = vsel %vm1136_vm6, %v3468_v37, %v3477_v22 }
 0x1c2   : > { %v3498_v5 = vshrl.u32 %v3400_v61, 16 }
 0x1c3   : > { %v3486_v39 = vor.u32 %v3485_v45, %v3482_v31  ;;  %v11661_v45 = vld [vmem:[#allocation6 + $0x1a8] sm:$0xff]  }
 0x1c4   : > { %10378 = vmatmul.mubr.bf16.gmra.mrb[28].mxu0 %v3133_v46  ;;  %v14208_v46 = vld [vmem:[#allocation37_spill] sm:$0xff]  ;;  %v3500_v4 = vrot.slane %v3498_v5, 4 }
 0x1c5   : > { %10397 = vmatprep.mubr.bf16.mxu0 %v3442_v54  ;;  %v3399_v54 = vmul.bf16 %v12785_v42, %v14208_v46  ;;  %v3487_v37 = vsel %vm1136_vm6, %v3477_v22, %v3486_v39 }
 0x1c6   : > { %v3504_v61 = vor.u32 %v3503_v30, %v3500_v4  ;;  %v11663_v30 = vld [vmem:[#allocation6 + $0x1b8] sm:$0xff]  }
 0x1c7   : > { %v3489_v3 = vshrl.u32 %v3399_v54, 16  ;;  %v3492_v8 = vshll.u32 %v3399_v54, 16  ;;  %v11660_v54 = vld [vmem:[#allocation6 + $0x1a0] sm:$0xff]  }
 0x1cc   : > { %10398 = vmatmul.mubr.bf16.vlgmr.msra.gmra.mrb[0].mxu0 %v3451_v10  ;;  %v3494_v10 = vrot.slane %v3492_v8, 5 }
 0x1cd   : > { %10430 = vmatpush3.bf16.msra.mxu0 %v12891_v19  ;;  %10401 = vmatprep.mubr.bf16.mxu0 %v3460_v26  ;;  %v3491_v19 = vrot.slane %v3489_v3, 4  ;;  %v3507_v26 = vshrl.u32 %v3401_v12, 16  ;;  %v3402_v3 = vmul.bf16 %v12804_v51, %v12715_v27 }
 0x1ce   : > { %10431 = vmatprep.subr.bf16.mxu0 %v11657_v23 }
 0x1cf   : > { %v3495_v49 = vor.u32 %v3494_v10, %v3491_v19  ;;  %v3519_v22 = vshll.u32 %v3402_v3, 16 }
 0x1d1   : > { %10432 = vmatpush3.bf16.msra.mxu0 %v11657_v23  ;;  %v3510_v23 = vshll.u32 %v3401_v12, 16  ;;  %v3496_v8 = vsel %vm1136_vm6, %v3486_v39, %v3495_v49  ;;  %v11662_v12 = vld [vmem:[#allocation6 + $0x1b0] sm:$0xff]   ;;  %v3505_v39 = vsel %vm1136_vm6, %v3495_v49, %v3504_v61  ;;  %v3521_v34 = vrot.slane %v3519_v22, 5 }
 0x1d2   : > { %10433 = vmatprep.subr.bf16.mxu0 %v11658_v38 }
 0x1d3   : > { %v3512_v31 = vrot.slane %v3510_v23, 5 }
 0x1d4   : > { %10402 = vmatmul.mubr.bf16.gmra.mrb[4].mxu0 %v3469_v2  ;;  %v3509_v2 = vrot.slane %v3507_v26, 4  ;;  %v3404_v26 = vmul.bf16 %v12814_v20, %v12727_v9 }
 0x1d5   : > { %10405 = vmatprep.mubr.bf16.mxu0 %v3478_v24  ;;  %10434 = vmatpush3.bf16.msra.mxu0 %v11658_v38  ;;  %v3403_v38 = vmul.bf16 %v12806_v44, %v12719_v40  ;;  %v3516_v24 = vshrl.u32 %v3402_v3, 16 }
 0x1d6   : > { %10435 = vmatprep.subr.bf16.mxu0 %v11659_v6  ;;  %v3513_v19 = vor.u32 %v3512_v31, %v3509_v2  ;;  %v3537_v49 = vshll.u32 %v3404_v26, 16 }
 0x1d7   : > { %v3525_v10 = vshrl.u32 %v3403_v38, 16  ;;  %v3518_v5 = vrot.slane %v3516_v24, 4 }
 0x1d8   : > { %v3514_v23 = vsel %vm1136_vm6, %v3504_v61, %v3513_v19  ;;  %v3406_v61 = vmul.bf16 %v12824_v57, %v12740_v33 }
 0x1d9   : > { %10436 = vmatpush3.bf16.msra.mxu0 %v11659_v6  ;;  %v3528_v6 = vshll.u32 %v3403_v38, 16  ;;  %v3522_v3 = vor.u32 %v3521_v34, %v3518_v5 }
 0x1da   : > { %10437 = vmatprep.subr.bf16.mxu0 %v11660_v54  ;;  %v3552_v34 = vshrl.u32 %v3406_v61, 16 }
 0x1db   : > { %v3530_v4 = vrot.slane %v3528_v6, 5  ;;  %v3523_v24 = vsel %vm1136_vm6, %v3513_v19, %v3522_v3  ;;  %v3407_v6 = vmul.bf16 %v12826_v29, %v12744_v16  ;;  %v3391_v19 = vld [vmem:[#allocation2 + $0x88] sm:$0x1f] }
 0x1dc   : > { %10406 = vmatmul.mubr.bf16.gmra.mrb[8].mxu0 %v3487_v37  ;;  %v3527_v37 = vrot.slane %v3525_v10, 4  ;;  %v3539_v10 = vrot.slane %v3537_v49, 5  ;;  %v3554_v49 = vrot.slane %v3552_v34, 4 }
 0x1dd   : > { %10409 = vmatprep.mubr.bf16.mxu0 %v3496_v8  ;;  %10438 = vmatpush3.bf16.msra.mxu0 %v11660_v54  ;;  %v3405_v54 = vmul.bf16 %v12816_v18, %v12730_v48  ;;  %v3534_v8 = vshrl.u32 %v3404_v26, 16  ;;  %v3555_v26 = vshll.u32 %v3406_v61, 16  ;;  %v3853_v61 = vmul.bf16 %v12763_v60, %v12402_v17 }
 0x1de   : > { %10439 = vmatprep.subr.bf16.mxu0 %v11661_v45  ;;  %v3531_v2 = vor.u32 %v3530_v4, %v3527_v37  ;;  %v3561_v37 = vshrl.u32 %v3407_v6, 16  ;;  %v3564_v4 = vshll.u32 %v3407_v6, 16  ;;  %v3854_v60 = vmul.bf16 %v12765_v21, %v12361_v62 }
 0x1df   : > { %v3543_v31 = vshrl.u32 %v3405_v54, 16  ;;  %v3546_v38 = vshll.u32 %v3405_v54, 16  ;;  %v3536_v22 = vrot.slane %v3534_v8, 4  ;;  %v3835_v8 = vld [vmem:[#allocation2 + $0x10] sm:$0xf8]  ;;  %v3557_v33 = vrot.slane %v3555_v26, 5 }
 0x1e0   : > { %v3852_v16 = vmul.bf16 %v3835_v8, %v12382_v53  ;;  %v3895_v34 = vshrl.u32 %v3853_v61, 16  ;;  %v3898_v26 = vshll.u32 %v3853_v61, 16  ;;  %v3856_v21 = vmul.bf16 %v12775_v35, %v12443_v36 }
 0x1e1   : > { %10440 = vmatpush3.bf16.msra.mxu0 %v11661_v45  ;;  %v12966_v45 = vld [vmem:[#allocation6 + $0x1c0] sm:$0xff]   ;;  %v3548_v5 = vrot.slane %v3546_v38, 5  ;;  %v3566_v38 = vrot.slane %v3564_v4, 5  ;;  %v3858_v35 = vmul.bf16 %v12785_v42, %v12468_v15 }
 0x1e2   : > { %10441 = vmatprep.subr.bf16.mxu0 %v11662_v12 }
 0x1e4   : > { %10410 = vmatmul.mubr.bf16.gmra.mrb[12].mxu0 %v3505_v39  ;;  %v3532_v39 = vsel %vm1136_vm6, %v3522_v3, %v3531_v2 }
 0x1e5   : > { %10413 = vmatprep.mubr.bf16.mxu0 %v3514_v23  ;;  %10442 = vmatpush3.bf16.msra.mxu0 %v11662_v12  ;;  %v3545_v12 = vrot.slane %v3543_v31, 4  ;;  %v3540_v23 = vor.u32 %v3539_v10, %v3536_v22  ;;  %v3563_v31 = vrot.slane %v3561_v37, 4  ;;  %v3558_v22 = vor.u32 %v3557_v33, %v3554_v49 }
 0x1e6   : > { %10443 = vmatprep.subr.bf16.mxu0 %v11663_v30  ;;  %v3897_v33 = vrot.slane %v3895_v34, 3  ;;  %v3900_v49 = vrot.slane %v3898_v26, 4  ;;  %v3857_v34 = vmul.bf16 %v12783_v28, %v12460_v63 }
 0x1e7   : > { %v3549_v54 = vor.u32 %v3548_v5, %v3545_v12  ;;  %v3541_v3 = vsel %vm1136_vm6, %v3531_v2, %v3540_v23  ;;  %v3567_v6 = vor.u32 %v3566_v38, %v3563_v31  ;;  %v3887_v12 = vshrl.u32 %v3852_v16, 16 }
 0x1e8   : > { %v3890_v5 = vshll.u32 %v3852_v16, 16  ;;  %v3907_v31 = vshll.u32 %v3854_v60, 16  ;;  %v3901_v38 = vor.u32 %v3900_v49, %v3897_v33  ;;  %v11665_v49 = vld [vmem:[#allocation6 + $0x1c8] sm:$0xff]  }
 0x1e9   : > { %10444 = vmatpush3.bf16.msra.mxu0 %v11663_v30  ;;  %v3408_v30 = vmul.bf16 %v3391_v19, %v12737_v1  ;;  %v3559_v2 = vsel %vm1136_vm6, %v3549_v54, %v3558_v22  ;;  %v3568_v4 = vsel %vm1136_vm6, %v3558_v22, %v3567_v6 }
 0x1ea   : > { %10477 = vmatprep.subr.bf16.mxu0 %v12966_v45  ;;  %v3892_v8 = vrot.slane %v3890_v5, 4 }
 0x1eb   : > { %v3570_v10 = vshrl.u32 %v3408_v30, 16 }
 0x1ec   : > { %10414 = vmatmul.mubr.bf16.gmra.mrb[16].mxu0 %v3523_v24  ;;  %v3550_v24 = vsel %vm1136_vm6, %v3540_v23, %v3549_v54  ;;  %v3889_v23 = vrot.slane %v3887_v12, 3 }
 0x1ed   : > { %10417 = vmatprep.mubr.bf16.mxu0 %v3532_v39  ;;  %v3573_v39 = vshll.u32 %v3408_v30, 16  ;;  %v3572_v37 = vrot.slane %v3570_v10, 4  ;;  %v3855_v30 = vmul.bf16 %v12773_v50, %v12420_v41 }
 0x1ee   : > { %v3893_v54 = vor.u32 %v3892_v8, %v3889_v23 }
 0x1ef   : > { %v3575_v19 = vrot.slane %v3573_v39, 5  ;;  %v3916_v61 = vshll.u32 %v3855_v30, 16  ;;  %v3909_v39 = vrot.slane %v3907_v31, 4  ;;  %v3940_v31 = vshrl.u32 %v3858_v35, 16 }
 0x1f0   : > { %v3902_v12 = vsel %vm1624_vm15, %v3893_v54, %v3901_v38  ;;  %v3943_v54 = vshll.u32 %v3858_v35, 16 }
 0x1f1   : > { %v3576_v16 = vor.u32 %v3575_v19, %v3572_v37  ;;  %v3918_v50 = vrot.slane %v3916_v61, 4  ;;  %v3925_v37 = vshll.u32 %v3856_v21, 16  ;;  %v3931_v19 = vshrl.u32 %v3857_v34, 16 }
 0x1f3   : > { %v3577_v22 = vsel %vm1136_vm6, %v3567_v6, %v3576_v16  ;;  %v3934_v6 = vshll.u32 %v3857_v34, 16  ;;  %v3927_v8 = vrot.slane %v3925_v37, 4  ;;  %v3859_v16 = vmul.bf16 %v12794_v32, %v12474_v59 }
 0x1f4   : > { %10418 = vmatmul.mubr.bf16.gmra.mrb[20].mxu0 %v3541_v3  ;;  %v3904_v3 = vshrl.u32 %v3854_v60, 16  ;;  %v3860_v32 = vmul.bf16 %v12796_v11, %v12489_v56  ;;  %v11668_v11 = vld [vmem:[#allocation6 + $0x1e0] sm:$0xff]  }
 0x1f5   : > { %10421 = vmatprep.mubr.bf16.mxu0 %v3550_v24  ;;  %v3913_v24 = vshrl.u32 %v3855_v30, 16  ;;  %v3933_v30 = vrot.slane %v3931_v19, 3  ;;  %v3936_v28 = vrot.slane %v3934_v6, 4  ;;  %v3949_v61 = vshrl.u32 %v3859_v16, 16 }
 0x1f6   : > { %v3906_v10 = vrot.slane %v3904_v3, 3  ;;  %v3952_v42 = vshll.u32 %v3859_v16, 16 }
 0x1f7   : > { %v3915_v5 = vrot.slane %v3913_v24, 3  ;;  %v11666_v24 = vld [vmem:[#allocation6 + $0x1d0] sm:$0xff]  }
 0x1f8   : > { %v3910_v26 = vor.u32 %v3909_v39, %v3906_v10  ;;  %v3942_v10 = vrot.slane %v3940_v31, 3  ;;  %v3945_v39 = vrot.slane %v3943_v54, 4 }
 0x1fa   : > { %v3911_v23 = vsel %vm1624_vm15, %v3901_v38, %v3910_v26  ;;  %v3937_v38 = vor.u32 %v3936_v28, %v3933_v30  ;;  %v3946_v34 = vor.u32 %v3945_v39, %v3942_v10  ;;  %v11669_v28 = vld [vmem:[#allocation6 + $0x1e8] sm:$0xff]   ;;  %v14210_v10 = vld [vmem:[#allocation27_spill] sm:$0xff] }
 0x1fb   : > { %v3864_v39 = vmul.bf16 %v12816_v18, %v14210_v10  ;;  %v11672_v18 = vld [vmem:[#allocation6 + $0x200] sm:$0xff]  }
 0x1fc   : > { %10422 = vmatmul.mubr.bf16.gmra.mrb[24].mxu0 %v3559_v2  ;;  %v3922_v2 = vshrl.u32 %v3856_v21, 16  ;;  %v3947_v6 = vsel %vm1624_vm15, %v3937_v38, %v3946_v34 }
 0x1fd   : > { %10425 = vmatprep.mubr.bf16.mxu0 %v3568_v4  ;;  %v3919_v4 = vor.u32 %v3918_v50, %v3915_v5  ;;  %v11667_v5 = vld [vmem:[#allocation6 + $0x1d8] sm:$0xff]   ;;  %v3861_v50 = vmul.bf16 %v12804_v51, %v12494_v25 }
 0x1fe   : > { %v3924_v60 = vrot.slane %v3922_v2, 3  ;;  %v3961_v2 = vshll.u32 %v3860_v32, 16 }
 0x1ff   : > { %v3920_v33 = vsel %vm1624_vm15, %v3910_v26, %v3919_v4  ;;  %v3958_v26 = vshrl.u32 %v3860_v32, 16  ;;  %v3970_v19 = vshll.u32 %v3861_v50, 16 }
 0x200   : > { %v3928_v3 = vor.u32 %v3927_v8, %v3924_v60  ;;  %v3963_v60 = vrot.slane %v3961_v2, 4  ;;  %v3862_v8 = vmul.bf16 %v12806_v44, %v12510_v47  ;;  %v11670_v44 = vld [vmem:[#allocation6 + $0x1f0] sm:$0xff]  }
 0x202   : > { %v3938_v21 = vsel %vm1624_vm15, %v3928_v3, %v3937_v38  ;;  %v3979_v31 = vshll.u32 %v3862_v8, 16 }
 0x204   : > { %10426 = vmatmul.mubr.bf16.gmra.mrb[28].mxu0 %v3577_v22  ;;  %v3929_v22 = vsel %vm1624_vm15, %v3919_v4, %v3928_v3  ;;  %v3967_v4 = vshrl.u32 %v3861_v50, 16  ;;  %v3976_v3 = vshrl.u32 %v3862_v8, 16 }
 0x205   : > { %10445 = vmatprep.mubr.bf16.mxu0 %v3902_v12  ;;  %v3954_v12 = vrot.slane %v3952_v42, 4 }
 0x206   : > { %v3969_v35 = vrot.slane %v3967_v4, 3  ;;  %v3978_v42 = vrot.slane %v3976_v3, 3 }
 0x20c   : > { %10446 = vmatmul.mubr.bf16.vlgmr.msra.gmra.mrb[0].mxu0 %v3911_v23  ;;  %v3960_v23 = vrot.slane %v3958_v26, 3  ;;  %v3997_v26 = vshll.u32 %v3864_v39, 16 }
 0x20d   : > { %10478 = vmatpush3.bf16.msra.mxu0 %v12966_v45  ;;  %10449 = vmatprep.mubr.bf16.mxu0 %v3920_v33  ;;  %v3951_v45 = vrot.slane %v3949_v61, 3  ;;  %v3972_v33 = vrot.slane %v3970_v19, 4  ;;  %v13018_v19 = vld [vmem:[#allocation2 + $0x88] sm:$0xff] }
 0x20e   : > { %10479 = vmatprep.subr.bf16.mxu0 %v11665_v49  ;;  %v3964_v16 = vor.u32 %v3963_v60, %v3960_v23  ;;  %v3999_v23 = vrot.slane %v3997_v26, 4 }
 0x20f   : > { %v3955_v37 = vor.u32 %v3954_v12, %v3951_v45  ;;  %v3973_v54 = vor.u32 %v3972_v33, %v3969_v35  ;;  %v14211_v45 = vld [vmem:[#allocation29_spill] sm:$0xff]  ;;  %v14213_v33 = vld [vmem:[#allocation32_spill] sm:$0xff] }
 0x210   : > { %v3865_v12 = vmul.bf16 %v12824_v57, %v14211_v45  ;;  %v14212_v57 = vld [vmem:[#allocation30_spill] sm:$0xff] }
 0x211   : > { %10480 = vmatpush3.bf16.msra.mxu0 %v11665_v49  ;;  %v3956_v51 = vsel %vm1624_vm15, %v3946_v34, %v3955_v37  ;;  %v14209_v49 = vld [vmem:[#allocation26_spill] sm:$0xff]  ;;  %v3965_v61 = vsel %vm1624_vm15, %v3955_v37, %v3964_v16  ;;  %v3994_v34 = vshrl.u32 %v3864_v39, 16  ;;  %v3866_v60 = vmul.bf16 %v12826_v29, %v14212_v57 }
 0x212   : > { %10481 = vmatprep.subr.bf16.mxu0 %v11666_v24  ;;  %v3863_v30 = vmul.bf16 %v12814_v20, %v14209_v49  ;;  %v3974_v20 = vsel %vm1624_vm15, %v3964_v16, %v3973_v54  ;;  %v4003_v37 = vshrl.u32 %v3865_v12, 16  ;;  %v4006_v4 = vshll.u32 %v3865_v12, 16 }
 0x213   : > { %v4012_v16 = vshrl.u32 %v3866_v60, 16  ;;  %v4015_v3 = vshll.u32 %v3866_v60, 16  ;;  %v11680_v60 = vld [vmem:[#allocation8 + $0x40] sm:$0xff]  }
 0x214   : > { %10450 = vmatmul.mubr.bf16.gmra.mrb[4].mxu0 %v3929_v22  ;;  %v3985_v38 = vshrl.u32 %v3863_v30, 16  ;;  %v3981_v22 = vrot.slane %v3979_v31, 4  ;;  %v4008_v35 = vrot.slane %v4006_v4, 4  ;;  %10573 = vmatprep.subr.bf16.mxu1 %v11680_v60 }
 0x215   : > { %10453 = vmatprep.mubr.bf16.mxu0 %v3938_v21  ;;  %10482 = vmatpush3.bf16.msra.mxu0 %v11666_v24  ;;  %v3988_v24 = vshll.u32 %v3863_v30, 16  ;;  %v3867_v30 = vmul.bf16 %v13018_v19, %v14213_v33 }
 0x216   : > { %10483 = vmatprep.subr.bf16.mxu0 %v11667_v5  ;;  %v3987_v32 = vrot.slane %v3985_v38, 3  ;;  %v3982_v50 = vor.u32 %v3981_v22, %v3978_v42  ;;  %10574 = vmatpush3.bf16.msra.mxu1 %v11680_v60 }
 0x217   : > { %v3990_v21 = vrot.slane %v3988_v24, 4  ;;  %v4024_v38 = vshll.u32 %v3867_v30, 16  ;;  %v13026_v24 = vld [vmem:[#allocation2 + $0x90] sm:$0xf] }
 0x218   : > { %v3868_v42 = vmul.bf16 %v13026_v24, %v12580_v0 }
 0x219   : > { %10484 = vmatpush3.bf16.msra.mxu0 %v11667_v5  ;;  %v11671_v5 = vld [vmem:[#allocation6 + $0x1f8] sm:$0xff]   ;;  %v3991_v2 = vor.u32 %v3990_v21, %v3987_v32 }
 0x21a   : > { %10485 = vmatprep.subr.bf16.mxu0 %v11668_v11  ;;  %v4030_v21 = vshrl.u32 %v3868_v42, 16  ;;  %v4033_v12 = vshll.u32 %v3868_v42, 16  ;;  %v14222_v42 = vld [vmem:[#allocation28_spill] sm:$0xff] }
 0x21b   : > { %v3992_v8 = vsel %vm1624_vm15, %v3982_v50, %v3991_v2 }
 0x21c   : > { %10454 = vmatmul.mubr.bf16.gmra.mrb[8].mxu0 %v3947_v6  ;;  %v3996_v6 = vrot.slane %v3994_v34, 3  ;;  %v4032_v34 = vrot.slane %v4030_v21, 3  ;;  %v4035_v26 = vrot.slane %v4033_v12, 4 }
 0x21d   : > { %10457 = vmatprep.mubr.bf16.mxu0 %v3956_v51  ;;  %10486 = vmatpush3.bf16.msra.mxu0 %v11668_v11  ;;  %v3983_v11 = vsel %vm1624_vm15, %v3973_v54, %v3982_v50  ;;  %v4005_v51 = vrot.slane %v4003_v37, 3  ;;  %v4021_v54 = vshrl.u32 %v3867_v30, 16  ;;  %v4295_v37 = vld [vmem:[#allocation2 + $0x10] sm:$0xf0] }
 0x21e   : > { %10487 = vmatprep.subr.bf16.mxu0 %v11669_v28  ;;  %v4036_v4 = vor.u32 %v4035_v26, %v4032_v34  ;;  %v11675_v30 = vld [vmem:[#allocation6 + $0x218] sm:$0xff]   ;;  %v14225_v34 = vld [vmem:[#allocation54_spill] sm:$0xff] }
 0x21f   : > { %v4009_v31 = vor.u32 %v4008_v35, %v4005_v51  ;;  %v4023_v39 = vrot.slane %v4021_v54, 3  ;;  %v11673_v51 = vld [vmem:[#allocation6 + $0x208] sm:$0xff]   ;;  %v11674_v35 = vld [vmem:[#allocation6 + $0x210] sm:$0xff]  }
 0x220   : > { %v14219_v54 = vld [vmem:[#allocation51_spill] sm:$0xff] }
 0x221   : > { %10488 = vmatpush3.bf16.msra.mxu0 %v11669_v28  ;;  %v4000_v28 = vor.u32 %v3999_v23, %v3996_v6 }
 0x222   : > { %10489 = vmatprep.subr.bf16.mxu0 %v11670_v44 }
 0x223   : > { %v4001_v29 = vsel %vm1624_vm15, %v3991_v2, %v4000_v28  ;;  %v4010_v22 = vsel %vm1624_vm15, %v4000_v28, %v4009_v31  ;;  %v11676_v28 = vld [vmem:[#allocation6 + $0x220] sm:$0xff]  }
 0x224   : > { %10458 = vmatmul.mubr.bf16.gmra.mrb[12].mxu0 %v3965_v61  ;;  %v4017_v61 = vrot.slane %v4015_v3, 4  ;;  %v14215_v3 = vld [vmem:[#allocation47_spill] sm:$0xff] }
 0x225   : > { %10461 = vmatprep.mubr.bf16.mxu0 %v3974_v20  ;;  %10490 = vmatpush3.bf16.msra.mxu0 %v11670_v44  ;;  %v4014_v44 = vrot.slane %v4012_v16, 3  ;;  %v4026_v20 = vrot.slane %v4024_v38, 4  ;;  %v11677_v16 = vld [vmem:[#allocation6 + $0x228] sm:$0xff]   ;;  %v14220_v38 = vld [vmem:[#allocation52_spill] sm:$0xff] }
 0x226   : > { %10491 = vmatprep.subr.bf16.mxu0 %v11671_v5 }
 0x227   : > { %v4018_v32 = vor.u32 %v4017_v61, %v4014_v44  ;;  %v11782_v61 = vld [vmem:[#allocation2 + $0x18] sm:$0xff] }
 0x229   : > { %10492 = vmatpush3.bf16.msra.mxu0 %v11671_v5  ;;  %v4027_v5 = vor.u32 %v4026_v20, %v4023_v39  ;;  %v4019_v50 = vsel %vm1624_vm15, %v4009_v31, %v4018_v32  ;;  %v14217_v31 = vld [vmem:[#allocation49_spill] sm:$0xff]  ;;  %v14224_v20 = vld [vmem:[#allocation55_spill] sm:$0xff] }
 0x22a   : > { %10525 = vmatprep.subr.bf16.mxu0 %v11672_v18  ;;  %v14223_v39 = vld [vmem:[#allocation53_spill] sm:$0xff] }
 0x22b   : > { %v4028_v2 = vsel %vm1624_vm15, %v4018_v32, %v4027_v5  ;;  %v4037_v6 = vsel %vm1624_vm15, %v4027_v5, %v4036_v4  ;;  %v4359_v32 = vrot.slane %v13018_v19, 4  ;;  %v11783_v4 = vld [vmem:[#allocation2 + $0x20] sm:$0xff] }
 0x22c   : > { %10462 = vmatmul.mubr.bf16.gmra.mrb[16].mxu0 %v3983_v11  ;;  %v4330_v11 = vrot.slane %v4295_v37, 4 }
 0x22d   : > { %10465 = vmatprep.mubr.bf16.mxu0 %v3992_v8  ;;  %v11681_v8 = vld [vmem:[#allocation8 + $0x48] sm:$0xff]   ;;  %v4360_v26 = vsel %vm1365_vm0, %v14225_v34, %v4359_v32 }
 0x22e   : > { %v4332_v23 = vsel %vm1365_vm0, %v4330_v11, %v12849_v7  ;;  %10575 = vmatprep.subr.bf16.mxu1 %v11681_v8  ;;  %v14214_v7 = vld [vmem:[#allocation46_spill] sm:$0xff]  ;;  %v14226_v11 = vld [vmem:[#allocation24_spill] sm:$0xff] }
 0x22f   : > { %10576 = vmatpush3.bf16.msra.mxu1 %v11681_v8  ;;  %v11784_v8 = vld [vmem:[#allocation2 + $0x28] sm:$0xff] }
 0x234   : > { %10466 = vmatmul.mubr.bf16.gmra.mrb[20].mxu0 %v4001_v29  ;;  %v14221_v29 = vld [vmem:[#allocation13_spill] sm:$0xff] }
 0x235   : > { %10469 = vmatprep.mubr.bf16.mxu0 %v4010_v22  ;;  %v4621_v44 = vmul.bf16 %v4295_v37, %v14221_v29  ;;  %v4622_v22 = vmul.bf16 %v11782_v61, %v14222_v42  ;;  %v4623_v37 = vmul.bf16 %v11783_v4, %v14226_v11 }
 0x237   : > { %v4656_v21 = vshrl.u32 %v4621_v44, 16  ;;  %v4659_v12 = vshll.u32 %v4621_v44, 16  ;;  %v4664_v5 = vshrl.u32 %v4622_v22, 16  ;;  %v14229_v44 = vld [vmem:[#allocation34_spill] sm:$0xff] }
 0x23c   : > { %10470 = vmatmul.mubr.bf16.gmra.mrb[24].mxu0 %v4019_v50  ;;  %v4667_v50 = vshll.u32 %v4622_v22, 16 }
 0x23d   : > { %10473 = vmatprep.mubr.bf16.mxu0 %v4028_v2  ;;  %v4658_v2 = vrot.slane %v4656_v21, 4  ;;  %v11786_v21 = vld [vmem:[#allocation2 + $0x38] sm:$0xff] }
 0x23e   : > { %v4669_v60 = vrot.slane %v4667_v50, 5 }
 0x244   : > { %10474 = vmatmul.mubr.bf16.gmra.mrb[28].mxu0 %v4037_v6  ;;  %v4661_v6 = vrot.slane %v4659_v12, 5  ;;  %v14230_v12 = vld [vmem:[#allocation35_spill] sm:$0xff] }
 0x245   : > { %10493 = vmatprep.mubr.bf16.mxu0 %v4332_v23  ;;  %v4666_v23 = vrot.slane %v4664_v5, 4 }
 0x24c   : > { %10494 = vmatmul.mubr.bf16.vlgmr.msra.gmra.mrb[0].mxu0 %v12856_v52  ;;  %v14216_v52 = vld [vmem:[#allocation48_spill] sm:$0xff] }
 0x24d   : > { %10526 = vmatpush3.bf16.msra.mxu0 %v11672_v18  ;;  %10497 = vmatprep.mubr.bf16.mxu0 %v12862_v13  ;;  %v11678_v13 = vld [vmem:[#allocation6 + $0x230] sm:$0xff]   ;;  %v11679_v18 = vld [vmem:[#allocation6 + $0x238] sm:$0xff]  }
 0x24e   : > { %10527 = vmatprep.subr.bf16.mxu0 %v11673_v51 }
 0x251   : > { %10528 = vmatpush3.bf16.msra.mxu0 %v11673_v51  ;;  %v14227_v51 = vld [vmem:[#allocation33_spill] sm:$0xff] }
 0x252   : > { %10529 = vmatprep.subr.bf16.mxu0 %v11674_v35 }
 0x254   : > { %10498 = vmatmul.mubr.bf16.gmra.mrb[4].mxu0 %v12865_v14  ;;  %v14218_v14 = vld [vmem:[#allocation50_spill] sm:$0xff] }
 0x255   : > { %10501 = vmatprep.mubr.bf16.mxu0 %v14214_v7  ;;  %10530 = vmatpush3.bf16.msra.mxu0 %v11674_v35  ;;  %v4624_v35 = vmul.bf16 %v11784_v8, %v14227_v51  ;;  %v4361_v7 = vrot.slane %v13026_v24, 4  ;;  %v4626_v24 = vmul.bf16 %v11786_v21, %v14230_v12 }
 0x256   : > { %10531 = vmatprep.subr.bf16.mxu0 %v11675_v30 }
 0x259   : > { %10532 = vmatpush3.bf16.msra.mxu0 %v11675_v30  ;;  %v14228_v30 = vld [vmem:[#allocation56_spill] sm:$0xff] }
 0x25a   : > { %10533 = vmatprep.subr.bf16.mxu0 %v11676_v28 }
 0x25c   : > { %10502 = vmatmul.mubr.bf16.gmra.mrb[8].mxu0 %v14215_v3  ;;  %v4662_v3 = vor.u32 %v4661_v6, %v4658_v2  ;;  %v4700_v2 = vshrl.u32 %v4626_v24, 16 }
 0x25d   : > { %10505 = vmatprep.mubr.bf16.mxu0 %v14216_v52  ;;  %10534 = vmatpush3.bf16.msra.mxu0 %v11676_v28  ;;  %v4673_v28 = vshrl.u32 %v4623_v37, 16  ;;  %v4670_v52 = vor.u32 %v4669_v60, %v4666_v23  ;;  %v11787_v23 = vld [vmem:[#allocation2 + $0x40] sm:$0xff] }
 0x25e   : > { %10535 = vmatprep.subr.bf16.mxu0 %v11677_v16  ;;  %v4627_v60 = vmul.bf16 %v11787_v23, %v14207_v55 }
 0x25f   : > { %v4671_v22 = vsel %vm1136_vm6, %v4662_v3, %v4670_v52 }
 0x260   : > { %v4709_v3 = vshrl.u32 %v4627_v60, 16 }
 0x261   : > { %10536 = vmatpush3.bf16.msra.mxu0 %v11677_v16  ;;  %v4676_v16 = vshll.u32 %v4623_v37, 16 }
 0x262   : > { %10537 = vmatprep.subr.bf16.mxu0 %v11678_v13 }
 0x264   : > { %10506 = vmatmul.mubr.bf16.gmra.mrb[12].mxu0 %v14217_v31  ;;  %v4362_v31 = vsel %vm1365_vm0, %v4359_v32, %v4361_v7  ;;  %v4703_v32 = vshll.u32 %v4626_v24, 16  ;;  %v11788_v7 = vld [vmem:[#allocation2 + $0x48] sm:$0xff]  ;;  %v11790_v24 = vld [vmem:[#allocation2 + $0x58] sm:$0xff] }
 0x265   : > { %10509 = vmatprep.mubr.bf16.mxu0 %v14218_v14  ;;  %10538 = vmatpush3.bf16.msra.mxu0 %v11678_v13  ;;  %v4682_v13 = vshrl.u32 %v4624_v35, 16  ;;  %v4675_v14 = vrot.slane %v4673_v28, 4  ;;  %v4628_v28 = vmul.bf16 %v11788_v7, %v14208_v46 }
 0x266   : > { %10539 = vmatprep.subr.bf16.mxu0 %v11679_v18 }
 0x269   : > { %10540 = vmatpush3.bf16.msra.mxu0 %v11679_v18  ;;  %v4685_v18 = vshll.u32 %v4624_v35, 16  ;;  %v4702_v35 = vrot.slane %v4700_v2, 4 }
 0x26c   : > { %10510 = vmatmul.mubr.bf16.gmra.mrb[16].mxu0 %v14219_v54  ;;  %v4678_v54 = vrot.slane %v4676_v16, 5 }
 0x26d   : > { %10513 = vmatprep.mubr.bf16.mxu0 %v14220_v38  ;;  %v11785_v38 = vld [vmem:[#allocation2 + $0x30] sm:$0xff] }
 0x26e   : > { %v4625_v61 = vmul.bf16 %v11785_v38, %v14229_v44  ;;  %v4679_v5 = vor.u32 %v4678_v54, %v4675_v14  ;;  %v4711_v54 = vrot.slane %v4709_v3, 4 }
 0x270   : > { %v4691_v50 = vshrl.u32 %v4625_v61, 16  ;;  %v4694_v34 = vshll.u32 %v4625_v61, 16  ;;  %v4680_v4 = vsel %vm1136_vm6, %v4670_v52, %v4679_v5  ;;  %v4721_v52 = vshll.u32 %v4628_v28, 16  ;;  %v11789_v61 = vld [vmem:[#allocation2 + $0x50] sm:$0xff] }
 0x272   : > { %v4693_v37 = vrot.slane %v4691_v50, 4  ;;  %v4696_v6 = vrot.slane %v4694_v34, 5  ;;  %v4723_v21 = vrot.slane %v4721_v52, 5 }
 0x274   : > { %10514 = vmatmul.mubr.bf16.gmra.mrb[20].mxu0 %v14223_v39  ;;  %v4684_v39 = vrot.slane %v4682_v13, 4  ;;  %v4697_v16 = vor.u32 %v4696_v6, %v4693_v37  ;;  %v4712_v13 = vshll.u32 %v4627_v60, 16  ;;  %v11791_v60 = vld [vmem:[#allocation2 + $0x60] sm:$0xff] }
 0x275   : > { %10517 = vmatprep.mubr.bf16.mxu0 %v14224_v20  ;;  %v4687_v20 = vrot.slane %v4685_v18, 5 }
 0x276   : > { %v4714_v38 = vrot.slane %v4712_v13, 5 }
 0x278   : > { %v4715_v50 = vor.u32 %v4714_v38, %v4711_v54 }
 0x27c   : > { %10518 = vmatmul.mubr.bf16.gmra.mrb[24].mxu0 %v14228_v30  ;;  %v4705_v30 = vrot.slane %v4703_v32, 5 }
 0x27d   : > { %10521 = vmatprep.mubr.bf16.mxu0 %v4360_v26  ;;  %v4688_v26 = vor.u32 %v4687_v20, %v4684_v39 }
 0x27e   : > { %v4706_v18 = vor.u32 %v4705_v30, %v4702_v35 }
 0x27f   : > { %v4689_v8 = vsel %vm1136_vm6, %v4679_v5, %v4688_v26  ;;  %v4698_v14 = vsel %vm1136_vm6, %v4688_v26, %v4697_v16  ;;  %v4630_v5 = vmul.bf16 %v11790_v24, %v12704_v58 }
 0x280   : > { %v4707_v39 = vsel %vm1136_vm6, %v4697_v16, %v4706_v18  ;;  %v4716_v37 = vsel %vm1136_vm6, %v4706_v18, %v4715_v50 }
 0x281   : > { %v4739_v26 = vshll.u32 %v4630_v5, 16 }
 0x283   : > { %v4741_v7 = vrot.slane %v4739_v26, 5 }
 0x284   : > { %10522 = vmatmul.mubr.bf16.gmra.mrb[28].mxu0 %v4362_v31  ;;  %v4718_v31 = vshrl.u32 %v4628_v28, 16  ;;  %v11792_v28 = vld [vmem:[#allocation2 + $0x68] sm:$0xff] }
 0x285   : > { %10541 = vmatprep.mubr.bf16.mxu0 %v4671_v22  ;;  %v4629_v22 = vmul.bf16 %v11789_v61, %v12693_v43  ;;  %v4632_v16 = vmul.bf16 %v11792_v28, %v12719_v40 }
 0x286   : > { %v4720_v20 = vrot.slane %v4718_v31, 4 }
 0x287   : > { %v4727_v34 = vshrl.u32 %v4629_v22, 16  ;;  %v4730_v2 = vshll.u32 %v4629_v22, 16  ;;  %v4757_v18 = vshll.u32 %v4632_v16, 16  ;;  %v11793_v22 = vld [vmem:[#allocation2 + $0x70] sm:$0xff] }
 0x288   : > { %v4724_v32 = vor.u32 %v4723_v21, %v4720_v20 }
 0x289   : > { %v4729_v6 = vrot.slane %v4727_v34, 4  ;;  %v4732_v23 = vrot.slane %v4730_v2, 5  ;;  %v4759_v24 = vrot.slane %v4757_v18, 5 }
 0x28a   : > { %v4725_v35 = vsel %vm1136_vm6, %v4715_v50, %v4724_v32 }
 0x28b   : > { %v4733_v3 = vor.u32 %v4732_v23, %v4729_v6 }
 0x28c   : > { %10542 = vmatmul.mubr.bf16.vlgmr.msra.gmra.mrb[0].mxu0 %v4680_v4  ;;  %v4736_v4 = vshrl.u32 %v4630_v5, 16  ;;  %v11794_v5 = vld [vmem:[#allocation2 + $0x78] sm:$0xff] }
 0x28d   : > { %10545 = vmatprep.mubr.bf16.mxu0 %v4689_v8  ;;  %v4631_v8 = vmul.bf16 %v11791_v60, %v12715_v27  ;;  %v4734_v54 = vsel %vm1136_vm6, %v4724_v32, %v4733_v3  ;;  %v4634_v50 = vmul.bf16 %v11794_v5, %v12730_v48 }
 0x28e   : > { %v4738_v30 = vrot.slane %v4736_v4, 4 }
 0x28f   : > { %v4745_v13 = vshrl.u32 %v4631_v8, 16  ;;  %v4748_v31 = vshll.u32 %v4631_v8, 16  ;;  %v4775_v32 = vshll.u32 %v4634_v50, 16  ;;  %v11795_v8 = vld [vmem:[#allocation2 + $0x80] sm:$0xff] }
 0x290   : > { %v4742_v52 = vor.u32 %v4741_v7, %v4738_v30 }
 0x291   : > { %v4747_v38 = vrot.slane %v4745_v13, 4  ;;  %v4750_v61 = vrot.slane %v4748_v31, 5 }
 0x292   : > { %v4743_v20 = vsel %vm1136_vm6, %v4733_v3, %v4742_v52  ;;  %v14232_v3 = vld [vmem:[#allocation45_spill] sm:$0xff] }
 0x293   : > { %v4751_v34 = vor.u32 %v4750_v61, %v4747_v38  ;;  %v4636_v13 = vmul.bf16 %v13018_v19, %v14232_v3  ;;  %v4620_v61 = vld [vmem:[#allocation2 + $0x90] sm:$0x1f] }
 0x294   : > { %10546 = vmatmul.mubr.bf16.gmra.mrb[4].mxu0 %v4698_v14  ;;  %v4754_v14 = vshrl.u32 %v4632_v16, 16  ;;  %v4777_v16 = vrot.slane %v4775_v32, 5 }
 0x295   : > { %10549 = vmatprep.mubr.bf16.mxu0 %v4707_v39  ;;  %v4633_v39 = vmul.bf16 %v11793_v22, %v12727_v9  ;;  %v4752_v6 = vsel %vm1136_vm6, %v4742_v52, %v4751_v34  ;;  %v4790_v38 = vshrl.u32 %v4636_v13, 16  ;;  %v4793_v52 = vshll.u32 %v4636_v13, 16  ;;  %v11687_v13 = vld [vmem:[#allocation8 + $0x78] sm:$0xff]  }
 0x296   : > { %v4756_v21 = vrot.slane %v4754_v14, 4 }
 0x297   : > { %v4763_v2 = vshrl.u32 %v4633_v39, 16  ;;  %v4766_v4 = vshll.u32 %v4633_v39, 16  ;;  %v4792_v5 = vrot.slane %v4790_v38, 4  ;;  %v5271_v38 = vld [vmem:[#allocation2] sm:$0xf8] }
 0x298   : > { %v4760_v26 = vor.u32 %v4759_v24, %v4756_v21  ;;  %v4637_v21 = vmul.bf16 %v4620_v61, %v12737_v1 }
 0x299   : > { %v4765_v23 = vrot.slane %v4763_v2, 4  ;;  %v4768_v60 = vrot.slane %v4766_v4, 5 }
 0x29a   : > { %v4761_v7 = vsel %vm1136_vm6, %v4751_v34, %v4760_v26  ;;  %v4799_v34 = vshrl.u32 %v4637_v21, 16  ;;  %v4802_v2 = vshll.u32 %v4637_v21, 16 }
 0x29b   : > { %v4769_v31 = vor.u32 %v4768_v60, %v4765_v23 }
 0x29c   : > { %10550 = vmatmul.mubr.bf16.gmra.mrb[8].mxu0 %v4716_v37  ;;  %v4772_v37 = vshrl.u32 %v4634_v50, 16  ;;  %v4795_v50 = vrot.slane %v4793_v52, 5  ;;  %v4801_v32 = vrot.slane %v4799_v34, 4 }
 0x29d   : > { %10553 = vmatprep.mubr.bf16.mxu0 %v4725_v35  ;;  %v14231_v35 = vld [vmem:[#allocation44_spill] sm:$0xff]  ;;  %v4770_v22 = vsel %vm1136_vm6, %v4760_v26, %v4769_v31 }
 0x29e   : > { %v4635_v30 = vmul.bf16 %v11795_v8, %v14231_v35  ;;  %v4774_v28 = vrot.slane %v4772_v37, 4  ;;  %v4796_v4 = vor.u32 %v4795_v50, %v4792_v5  ;;  %v11682_v8 = vld [vmem:[#allocation8 + $0x50] sm:$0xff]   ;;  %v5288_v5 = vmul.bf16 %v5271_v38, %v12382_v53 }
 0x29f   : > { %10577 = vmatprep.subr.bf16.mxu1 %v11682_v8 }
 0x2a0   : > { %v4781_v14 = vshrl.u32 %v4635_v30, 16  ;;  %v4784_v18 = vshll.u32 %v4635_v30, 16  ;;  %10578 = vmatpush3.bf16.msra.mxu1 %v11682_v8  ;;  %v11683_v30 = vld [vmem:[#allocation8 + $0x58] sm:$0xff]   ;;  %v5618_v8 = vshll.u32 %v5288_v5, 16 }
 0x2a1   : > { %10579 = vmatprep.subr.bf16.mxu1 %v11683_v30 }
 0x2a2   : > { %v4783_v39 = vrot.slane %v4781_v14, 4  ;;  %v13095_v14 = vld [vmem:[%s14024_s2] ss:$0 sm:$0xff] }
 0x2a4   : > { %10554 = vmatmul.mubr.bf16.gmra.mrb[12].mxu0 %v4734_v54  ;;  %v4778_v54 = vor.u32 %v4777_v16, %v4774_v28  ;;  %10580 = vmatpush3.bf16.msra.mxu1 %v11683_v30  ;;  %v11685_v28 = vld [vmem:[#allocation8 + $0x68] sm:$0xff]   ;;  %v11686_v16 = vld [vmem:[#allocation8 + $0x70] sm:$0xff]  }
 0x2a5   : > { %10557 = vmatprep.mubr.bf16.mxu0 %v4743_v20  ;;  %v4786_v20 = vrot.slane %v4784_v18, 5 }
 0x2a6   : > { %v4779_v24 = vsel %vm1136_vm6, %v4769_v31, %v4778_v54  ;;  %v13089_v31 = vld [vmem:[#allocation8] sm:$0xff]  }
 0x2a7   : > { %v4787_v19 = vor.u32 %v4786_v20, %v4783_v39 }
 0x2a9   : > { %v4788_v37 = vsel %vm1136_vm6, %v4778_v54, %v4787_v19  ;;  %v4797_v26 = vsel %vm1136_vm6, %v4787_v19, %v4796_v4  ;;  %v13100_v54 = vld [vmem:[%s14025_s3] ss:$0 sm:$0xff] }
 0x2ac   : > { %10558 = vmatmul.mubr.bf16.gmra.mrb[16].mxu0 %v4752_v6  ;;  %v4804_v6 = vrot.slane %v4802_v2, 5 }
 0x2ad   : > { %10561 = vmatprep.mubr.bf16.mxu0 %v4761_v7  ;;  %v11684_v7 = vld [vmem:[#allocation8 + $0x60] sm:$0xff]  }
 0x2ae   : > { %v4805_v23 = vor.u32 %v4804_v6, %v4801_v32  ;;  %10581 = vmatprep.subr.bf16.mxu1 %v11684_v7  ;;  %v13111_v32 = vld [vmem:[#allocation2] sm:$0xf0]  ;;  %v5615_v6 = vshrl.u32 %v5288_v5, 16 }
 0x2af   : > { %10582 = vmatpush3.bf16.msra.mxu1 %v11684_v7  ;;  %v5992_v38 = vmul.bf16 %v13111_v32, %v14221_v29 }
 0x2b0   : > { %v4806_v60 = vsel %vm1136_vm6, %v4796_v4, %v4805_v23  ;;  %10583 = vmatprep.subr.bf16.mxu1 %v11685_v28 }
 0x2b3   : > { %10584 = vmatpush3.bf16.msra.mxu1 %v11685_v28 }
 0x2b4   : > { %10562 = vmatmul.mubr.bf16.gmra.mrb[20].mxu0 %v4770_v22  ;;  %10585 = vmatprep.subr.bf16.mxu1 %v11686_v16 }
 0x2b5   : > { %10565 = vmatprep.mubr.bf16.mxu0 %v4779_v24 }
 0x2b7   : > { %10586 = vmatpush3.bf16.msra.mxu1 %v11686_v16 }
 0x2b8   : > { %10587 = vmatprep.subr.bf16.mxu1 %v11687_v13 }
 0x2bb   : > { %10588 = vmatpush3.bf16.msra.mxu1 %v11687_v13 }
 0x2bc   : > { %10566 = vmatmul.mubr.bf16.gmra.mrb[24].mxu0 %v4788_v37  ;;  %10621 = vmatprep.subr.bf16.mxu1 %v13089_v31 }
 0x2bd   : > { %10569 = vmatprep.mubr.bf16.mxu0 %v4797_v26 }
 0x2c4   : > { %10570 = vmatmul.mubr.bf16.gmra.mrb[28].mxu0 %v4806_v60 }
 0x35f   : > { %v10543_v18 = vpop.f32.mrb[0].mxu0 }
 0x360   : > { %v5073_v52 = vmul.f32 %v10543_v18, %v13095_v14  ;;  %v4905_v61 = vpop.f32.mrb[1].mxu0 }
 0x361   : > { %v5071_v22 = vmul.f32 %v13095_v14, %v4905_v61  ;;  %v10544_v39 = vpop.f32.mrb[2].mxu0 }
 0x362   : > { %v5112_v20 = vadd.f32 %v13100_v54, %v5073_v52  ;;  %v5074_v21 = vmul.f32 %v10544_v39, %v13095_v14  ;;  %v4908_v24 = vpop.f32.mrb[3].mxu0 }
 0x363   : > { %v5110_v50 = vadd.f32 %v13100_v54, %v5071_v22  ;;  %v5072_v19 = vmul.f32 %v13095_v14, %v4908_v24 }
 0x364   : > { %v5113_v34 = vadd.f32 %v13100_v54, %v5074_v21  ;;  %v5144_v4 = vmax.f32 %v5112_v20, 0.0  ;;  %v13119_v20 = vrot.slane %v5615_v6, 3 }
 0x365   : > { %v5111_v2 = vadd.f32 %v13100_v54, %v5072_v19  ;;  %v5142_v26 = vmax.f32 %v5110_v50, 0.0  ;;  %v13123_v50 = vrot.slane %v5618_v8, 4 }
 0x366   : > { %v5145_v37 = vmax.f32 %v5113_v34, 0.0 }
 0x367   : > { %v5143_v23 = vmax.f32 %v5111_v2, 0.0  ;;  %v10547_v60 = vpop.f32.mrb[4].mxu0 }
 0x368   : > { %v5175_v30 = vpack.c.bf16 %v5145_v37, %v5144_v4  ;;  %v5077_v7 = vmul.f32 %v10547_v60, %v13095_v14  ;;  %v4921_v28 = vpop.f32.mrb[5].mxu0  ;;  %v6027_v4 = vshrl.u32 %v5992_v38, 16  ;;  %v6030_v37 = vshll.u32 %v5992_v38, 16 }
 0x369   : > { %v5174_v16 = vpack.c.bf16 %v5143_v23, %v5142_v26  ;;  %v5075_v13 = vmul.f32 %v13095_v14, %v4921_v28  ;;  %v10548_v18 = vpop.f32.mrb[6].mxu0  ;;  %v5356_v28 = vrot.slane %v13111_v32, 4 }
 0x36a   : > { %v5207_v52 = vrot.slane %v5175_v30, 4  ;;  %v5116_v61 = vadd.f32 %v13100_v54, %v5077_v7  ;;  %v5078_v22 = vmul.f32 %v10548_v18, %v13095_v14  ;;  %v4924_v39 = vpop.f32.mrb[7].mxu0 }
 0x36b   : > { %v5206_v21 = vrot.slane %v5174_v16, 4  ;;  %v5114_v24 = vadd.f32 %v13100_v54, %v5075_v13  ;;  %v5076_v5 = vmul.f32 %v13095_v14, %v4924_v39 }
 0x36c   : > { %v5117_v19 = vadd.f32 %v13100_v54, %v5078_v22  ;;  %v5148_v6 = vmax.f32 %v5116_v61, 0.0 }
 0x36d   : > { %v13127_v34 = vsel %vm1365_vm0, %v5206_v21, %v5207_v52  ;;  %5254 = vst [vmem:[#allocation2 + $0x8] sm:$0xf0] %v5206_v21  ;;  %v5115_v2 = vadd.f32 %v13100_v54, %v5076_v5  ;;  %v5146_v8 = vmax.f32 %v5114_v24, 0.0  ;;  %v13144_v24 = vrot.slane %v6030_v37, 5 }
 0x36e   : > { %5255 = vst [vmem:[#allocation2 + $0x10] sm:$0xff] %v13127_v34  ;;  %v5149_v26 = vmax.f32 %v5117_v19, 0.0  ;;  %v5290_v23 = vmul.bf16 %v13127_v34, %v12361_v62  ;;  %v5994_v60 = vmul.bf16 %v13127_v34, %v14226_v11  ;;  %v13142_v19 = vrot.slane %v6027_v4, 4 }
 0x36f   : > { %v5147_v30 = vmax.f32 %v5115_v2, 0.0  ;;  %v10551_v7 = vpop.f32.mrb[8].mxu0 }
 0x370   : > { %v13138_v13 = vpack.c.bf16 %v5149_v26, %v5148_v6  ;;  %v5081_v18 = vmul.f32 %v10551_v7, %v13095_v14  ;;  %v4937_v38 = vpop.f32.mrb[9].mxu0  ;;  %v5632_v61 = vshrl.u32 %v5290_v23, 16  ;;  %v5635_v22 = vshll.u32 %v5290_v23, 16 }
 0x371   : > { %v5176_v39 = vpack.c.bf16 %v5147_v30, %v5146_v8  ;;  %v5079_v21 = vmul.f32 %v13095_v14, %v4937_v38  ;;  %v10552_v5 = vpop.f32.mrb[10].mxu0  ;;  %v6044_v16 = vshrl.u32 %v5994_v60, 16  ;;  %v5359_v8 = vrot.slane %v13127_v34, 4 }
 0x372   : > { %v5211_v32 = vrot.slane %v13138_v13, 4  ;;  %v5120_v2 = vadd.f32 %v13100_v54, %v5081_v18  ;;  %v5082_v6 = vmul.f32 %v10552_v5, %v13095_v14  ;;  %v4940_v26 = vpop.f32.mrb[11].mxu0  ;;  %v5634_v37 = vrot.slane %v5632_v61, 3 }
 0x373   : > { %v5209_v7 = vrot.slane %v5176_v39, 4  ;;  %v5118_v11 = vadd.f32 %v13100_v54, %v5079_v21  ;;  %v5080_v23 = vmul.f32 %v13095_v14, %v4940_v26  ;;  %v5637_v38 = vrot.slane %v5635_v22, 4 }
 0x374   : > { %v5121_v4 = vadd.f32 %v13100_v54, %v5082_v6  ;;  %v5272_v30 = vld [vmem:[#allocation2 + $0x8] sm:$0xff]  ;;  %v6047_v29 = vshll.u32 %v5994_v60, 16  ;;  %v5152_v5 = vmax.f32 %v5120_v2, 0.0  ;;  %v13162_v26 = vrot.slane %v6044_v16, 4  ;;  %v11689_v16 = vld [vmem:[#allocation8 + $0x8] sm:$0xff]  }
 0x375   : > { %v13154_v13 = vsel %vm1365_vm0, %v5207_v52, %v5209_v7  ;;  %v13157_v18 = vsel %vm1365_vm0, %v5209_v7, %v5211_v32  ;;  %v5119_v39 = vadd.f32 %v13100_v54, %v5080_v23  ;;  %v5150_v34 = vmax.f32 %v5118_v11, 0.0 }
 0x376   : > { %5256 = vst [vmem:[#allocation2 + $0x18] sm:$0xff] %v13154_v13  ;;  %5257 = vst [vmem:[#allocation2 + $0x20] sm:$0xff] %v13157_v18  ;;  %v5153_v21 = vmax.f32 %v5121_v4, 0.0  ;;  %v5357_v6 = vrot.slane %v5272_v30, 4  ;;  %v13165_v52 = vmul.bf16 %v5272_v30, %v12402_v17  ;;  %v5361_v22 = vrot.slane %v13154_v13, 4 }
 0x377   : > { %v5151_v61 = vmax.f32 %v5119_v39, 0.0  ;;  %v10555_v60 = vpop.f32.mrb[12].mxu0  ;;  %v5363_v2 = vrot.slane %v13157_v18, 4  ;;  %v13180_v3 = vrot.slane %v6047_v29, 5 }
 0x378   : > { %v13169_v7 = vpack.c.bf16 %v5153_v21, %v5152_v5  ;;  %v5085_v23 = vmul.f32 %v10555_v60, %v13095_v14  ;;  %v4953_v62 = vpop.f32.mrb[13].mxu0  ;;  %v5358_v11 = vsel %vm1365_vm0, %v5356_v28, %v5357_v6  ;;  %v5360_v4 = vsel %vm1365_vm0, %v5357_v6, %v5359_v8 }
 0x379   : > { %v5178_v53 = vpack.c.bf16 %v5151_v61, %v5150_v34  ;;  %v5083_v39 = vmul.f32 %v13095_v14, %v4953_v62  ;;  %10589 = vmatprep.mubr.bf16.mxu1 %v5358_v11  ;;  %v10556_v17 = vpop.f32.mrb[14].mxu0  ;;  %v5362_v1 = vsel %vm1365_vm0, %v5359_v8, %v5361_v22  ;;  %v5364_v0 = vsel %vm1365_vm0, %v5361_v22, %v5363_v2  ;;  %v11690_v22 = vld [vmem:[#allocation8 + $0x10] sm:$0xff]  }
 0x37a   : > { %v14091_v5 = vrot.slane %v13169_v7, 4  ;;  %v5124_v21 = vadd.f32 %v13100_v54, %v5085_v23  ;;  %v5086_v60 = vmul.f32 %v10556_v17, %v13095_v14  ;;  %10590 = vmatmul.mubr.bf16.vlgmr.msra.gmra.mrb[0].mxu1 %v5360_v4  ;;  %v4956_v28 = vpop.f32.mrb[15].mxu0  ;;  %v13184_v62 = vmul.bf16 %v5272_v30, %v14222_v42 }
 0x37b   : > { %v5213_v6 = vrot.slane %v5178_v53, 4  ;;  %v5122_v34 = vadd.f32 %v13100_v54, %v5083_v39  ;;  %v5084_v8 = vmul.f32 %v13095_v14, %v4956_v28  ;;  %10622 = vmatpush3.bf16.msra.mxu1 %v13089_v31  ;;  %10593 = vmatprep.mubr.bf16.mxu1 %v5362_v1  ;;  %v5623_v17 = vshrl.u32 %v13165_v52, 16 }
 0x37c   : > { %v5125_v61 = vadd.f32 %v13100_v54, %v5086_v60  ;;  %10623 = vmatprep.subr.bf16.mxu1 %v11689_v16  ;;  %v13190_v23 = vor.u32 %v5637_v38, %v5634_v37  ;;  %v5291_v53 = vmul.bf16 %v13154_v13, %v12420_v41  ;;  %v5626_v31 = vshll.u32 %v13165_v52, 16 }
 0x37d   : > { %v13195_v29 = vsel %vm1365_vm0, %v5211_v32, %v5213_v6  ;;  %v13200_v30 = vsel %vm1365_vm0, %v5213_v6, %v14091_v5  ;;  %v5123_v1 = vadd.f32 %v13100_v54, %v5084_v8  ;;  %v5156_v37 = vmax.f32 %v5124_v21, 0.0 }
 0x37e   : > { %5258 = vst [vmem:[#allocation2 + $0x28] sm:$0xff] %v13195_v29  ;;  %5259 = vst [vmem:[#allocation2 + $0x30] sm:$0xff] %v13200_v30  ;;  %v5157_v38 = vmax.f32 %v5125_v61, 0.0  ;;  %v5365_v11 = vrot.slane %v13195_v29, 4  ;;  %v5367_v32 = vrot.slane %v13200_v30, 4  ;;  %v5154_v4 = vmax.f32 %v5122_v34, 0.0 }
 0x37f   : > { %v5155_v39 = vmax.f32 %v5123_v1, 0.0  ;;  %v10559_v60 = vpop.f32.mrb[16].mxu0  ;;  %10624 = vmatpush3.bf16.msra.mxu1 %v11689_v16  ;;  %v5641_v28 = vshrl.u32 %v5291_v53, 16  ;;  %v5644_v6 = vshll.u32 %v5291_v53, 16  ;;  %v11691_v61 = vld [vmem:[#allocation8 + $0x18] sm:$0xff]   ;;  %v13214_v1 = vrot.slane %v5623_v17, 3 }
 0x380   : > { %v13208_v5 = vpack.c.bf16 %v5157_v38, %v5156_v37  ;;  %v5089_v52 = vmul.f32 %v10559_v60, %v13095_v14  ;;  %v4969_v8 = vpop.f32.mrb[17].mxu0  ;;  %v5366_v42 = vsel %vm1365_vm0, %v5363_v2, %v5365_v11  ;;  %v5368_v21 = vsel %vm1365_vm0, %v5365_v11, %v5367_v32  ;;  %10625 = vmatprep.subr.bf16.mxu1 %v11690_v22 }
 0x381   : > { %v5180_v41 = vpack.c.bf16 %v5155_v39, %v5154_v4  ;;  %v5087_v35 = vmul.f32 %v13095_v14, %v4969_v8  ;;  %v10560_v34 = vpop.f32.mrb[18].mxu0  ;;  %v5643_v16 = vrot.slane %v5641_v28, 3  ;;  %v5646_v2 = vrot.slane %v5644_v6, 4 }
 0x382   : > { %v14097_v53 = vrot.slane %v13208_v5, 4  ;;  %v5128_v37 = vadd.f32 %v13100_v54, %v5089_v52  ;;  %v5090_v38 = vmul.f32 %v10560_v34, %v13095_v14  ;;  %v4972_v60 = vpop.f32.mrb[19].mxu0  ;;  %10594 = vmatmul.mubr.bf16.gmra.mrb[4].mxu1 %v5364_v0  ;;  %v5292_v17 = vmul.bf16 %v13157_v18, %v12443_v36  ;;  %v11692_v52 = vld [vmem:[#allocation8 + $0x20] sm:$0xff]   ;;  %v11693_v36 = vld [vmem:[#allocation8 + $0x28] sm:$0xff]  }
 0x383   : > { %v5217_v48 = vrot.slane %v5180_v41, 4  ;;  %v5126_v11 = vadd.f32 %v13100_v54, %v5087_v35  ;;  %v5088_v4 = vmul.f32 %v13095_v14, %v4972_v60  ;;  %10597 = vmatprep.mubr.bf16.mxu1 %v5366_v42  ;;  %10626 = vmatpush3.bf16.msra.mxu1 %v11690_v22  ;;  %v13224_v8 = vrot.slane %v5626_v31, 4 }
 0x384   : > { %v5160_v39 = vmax.f32 %v5128_v37, 0.0  ;;  %v5129_v28 = vadd.f32 %v13100_v54, %v5090_v38  ;;  %10627 = vmatprep.subr.bf16.mxu1 %v11691_v61  ;;  %v5647_v34 = vor.u32 %v5646_v2, %v5643_v16  ;;  %v14233_v0 = vrot.slane %v13169_v7, 4 }
 0x385   : > { %v13234_v42 = vsel %vm1365_vm0, %v5217_v48, %v14097_v53  ;;  %v5158_v35 = vmax.f32 %v5126_v11, 0.0  ;;  %v5127_v22 = vadd.f32 %v13100_v54, %v5088_v4  ;;  %v5653_v60 = vshll.u32 %v5292_v17, 16 }
 0x386   : > { %v13229_v41 = vsel %vm1365_vm0, %v14233_v0, %v5217_v48  ;;  %5261 = vst [vmem:[#allocation2 + $0x40] sm:$0xff] %v13234_v42  ;;  %v5161_v31 = vmax.f32 %v5129_v28, 0.0  ;;  %v5371_v7 = vrot.slane %v13234_v42, 4  ;;  %v13243_v16 = vsel %vm1624_vm15, %v13190_v23, %v5647_v34 }
 0x387   : > { %5260 = vst [vmem:[#allocation2 + $0x38] sm:$0xff] %v13229_v41  ;;  %v5369_v6 = vrot.slane %v13229_v41, 4  ;;  %14234 = vst [vmem:[#allocation36_spill] sm:$0xff] %v13243_v16  ;;  %v5159_v37 = vmax.f32 %v5127_v22, 0.0  ;;  %v10563_v38 = vpop.f32.mrb[20].mxu0  ;;  %10628 = vmatpush3.bf16.msra.mxu1 %v11691_v61  ;;  %v5650_v48 = vshrl.u32 %v5292_v17, 16  ;;  %v5293_v2 = vmul.bf16 %v13195_v29, %v12460_v63 }
 0x388   : > { %v13247_v11 = vpack.c.bf16 %v5161_v31, %v5160_v39  ;;  %v5093_v4 = vmul.f32 %v10563_v38, %v13095_v14  ;;  %v4985_v28 = vpop.f32.mrb[21].mxu0  ;;  %10629 = vmatprep.subr.bf16.mxu1 %v11692_v52  ;;  %v5655_v17 = vrot.slane %v5653_v60, 4  ;;  %v11694_v60 = vld [vmem:[#allocation8 + $0x30] sm:$0xff]  }
 0x389   : > { %v5370_v0 = vsel %vm1365_vm0, %v5367_v32, %v5369_v6  ;;  %v5372_v53 = vsel %vm1365_vm0, %v5369_v6, %v5371_v7  ;;  %v5182_v9 = vpack.c.bf16 %v5159_v37, %v5158_v35  ;;  %v5091_v22 = vmul.f32 %v13095_v14, %v4985_v28  ;;  %v10564_v61 = vpop.f32.mrb[22].mxu0 }
 0x38a   : > { %v5652_v40 = vrot.slane %v5650_v48, 3  ;;  %v14108_v16 = vrot.slane %v13247_v11, 4  ;;  %v5132_v39 = vadd.f32 %v13100_v54, %v5093_v4  ;;  %v5094_v31 = vmul.f32 %v10564_v61, %v13095_v14  ;;  %v4988_v38 = vpop.f32.mrb[23].mxu0  ;;  %10598 = vmatmul.mubr.bf16.gmra.mrb[8].mxu1 %v5368_v21 }
 0x38b   : > { %v5659_v63 = vshrl.u32 %v5293_v2, 16  ;;  %v5221_v32 = vrot.slane %v5182_v9, 4  ;;  %v5130_v6 = vadd.f32 %v13100_v54, %v5091_v22  ;;  %v5092_v27 = vmul.f32 %v13095_v14, %v4988_v38  ;;  %10601 = vmatprep.mubr.bf16.mxu1 %v5370_v0  ;;  %10630 = vmatpush3.bf16.msra.mxu1 %v11692_v52 }
 0x38c   : > { %v5656_v35 = vor.u32 %v5655_v17, %v5652_v40  ;;  %v5164_v37 = vmax.f32 %v5132_v39, 0.0  ;;  %v5133_v48 = vadd.f32 %v13100_v54, %v5094_v31  ;;  %10631 = vmatprep.subr.bf16.mxu1 %v11693_v36  ;;  %v5662_v4 = vshll.u32 %v5293_v2, 16 }
 0x38d   : > { %v5661_v28 = vrot.slane %v5659_v63, 3  ;;  %v14235_v61 = vrot.slane %v13208_v5, 4  ;;  %v13267_v9 = vsel %vm1365_vm0, %v5221_v32, %v14108_v16  ;;  %v5162_v0 = vmax.f32 %v5130_v6, 0.0 }
 0x38e   : > { %v5131_v40 = vadd.f32 %v13100_v54, %v5092_v27  ;;  %5263 = vst [vmem:[#allocation2 + $0x50] sm:$0xff] %v13267_v9  ;;  %v5165_v52 = vmax.f32 %v5133_v48, 0.0  ;;  %v5375_v5 = vrot.slane %v13267_v9, 4  ;;  %v13275_v2 = vsel %vm1624_vm15, %v5647_v34, %v5656_v35 }
 0x38f   : > { %v13262_v21 = vsel %vm1365_vm0, %v14235_v61, %v5221_v32  ;;  %14236 = vst [vmem:[#allocation37_spill] sm:$0xff] %v13275_v2  ;;  %v10567_v17 = vpop.f32.mrb[24].mxu0  ;;  %10632 = vmatpush3.bf16.msra.mxu1 %v11693_v36  ;;  %v5664_v39 = vrot.slane %v5662_v4, 4  ;;  %v5294_v31 = vmul.bf16 %v13200_v30, %v12468_v15  ;;  %v13281_v27 = vmul.bf16 %v13229_v41, %v12474_v59  ;;  %v11695_v61 = vld [vmem:[#allocation8 + $0x38] sm:$0xff]  }
 0x390   : > { %5262 = vst [vmem:[#allocation2 + $0x48] sm:$0xff] %v13262_v21  ;;  %v5373_v63 = vrot.slane %v13262_v21, 4  ;;  %v5163_v22 = vmax.f32 %v5131_v40, 0.0  ;;  %v13283_v38 = vpack.c.bf16 %v5165_v52, %v5164_v37  ;;  %v5097_v32 = vmul.f32 %v10567_v17, %v13095_v14  ;;  %v5001_v6 = vpop.f32.mrb[25].mxu0  ;;  %10633 = vmatprep.subr.bf16.mxu1 %v11694_v60 }
 0x391   : > { %v5095_v4 = vmul.f32 %v13095_v14, %v5001_v6  ;;  %v10568_v40 = vpop.f32.mrb[26].mxu0  ;;  %v5665_v16 = vor.u32 %v5664_v39, %v5661_v28  ;;  %v5668_v15 = vshrl.u32 %v5294_v31, 16  ;;  %v5671_v2 = vshll.u32 %v5294_v31, 16  ;;  %v13298_v39 = vld [vmem:[#allocation8 + $0x80] sm:$0xff]  }
 0x392   : > { %v5374_v48 = vsel %vm1365_vm0, %v5371_v7, %v5373_v63  ;;  %v5376_v34 = vsel %vm1365_vm0, %v5373_v63, %v5375_v5  ;;  %v5184_v36 = vpack.c.bf16 %v5163_v22, %v5162_v0  ;;  %v5227_v59 = vrot.slane %v13283_v38, 4  ;;  %v5004_v17 = vpop.f32.mrb[27].mxu0  ;;  %10602 = vmatmul.mubr.bf16.gmra.mrb[12].mxu1 %v5372_v53 }
 0x393   : > { %v5136_v37 = vadd.f32 %v13100_v54, %v5097_v32  ;;  %v5098_v52 = vmul.f32 %v10568_v40, %v13095_v14  ;;  %v5134_v63 = vadd.f32 %v13100_v54, %v5095_v4  ;;  %v5096_v58 = vmul.f32 %v13095_v14, %v5004_v17  ;;  %10605 = vmatprep.mubr.bf16.mxu1 %v5374_v48 }
 0x394   : > { %v5225_v7 = vrot.slane %v5184_v36, 4  ;;  %10634 = vmatpush3.bf16.msra.mxu1 %v11694_v60  ;;  %v13295_v0 = vsel %vm1624_vm15, %v5656_v35, %v5665_v16  ;;  %v5670_v38 = vrot.slane %v5668_v15, 3  ;;  %v5673_v32 = vrot.slane %v5671_v2, 4 }
 0x395   : > { %v5168_v28 = vmax.f32 %v5136_v37, 0.0  ;;  %v5137_v22 = vadd.f32 %v13100_v54, %v5098_v52  ;;  %10635 = vmatprep.subr.bf16.mxu1 %v11695_v61  ;;  %v14237_v53 = vrot.slane %v13247_v11, 4  ;;  %v5166_v60 = vmax.f32 %v5134_v63, 0.0 }
 0x396   : > { %v13306_v6 = vsel %vm1365_vm0, %v5225_v7, %v5227_v59  ;;  %v5135_v35 = vadd.f32 %v13100_v54, %v5096_v58  ;;  %v5674_v2 = vor.u32 %v5673_v32, %v5670_v38  ;;  %v5677_v40 = vshrl.u32 %v13281_v27, 16 }
 0x397   : > { %v13303_v31 = vsel %vm1365_vm0, %v14237_v53, %v5225_v7  ;;  %5265 = vst [vmem:[#allocation2 + $0x60] sm:$0xff] %v13306_v6  ;;  %v5169_v48 = vmax.f32 %v5137_v22, 0.0  ;;  %v5379_v15 = vrot.slane %v13306_v6, 4  ;;  %v10571_v4 = vpop.f32.mrb[28].mxu0  ;;  %v5680_v37 = vshll.u32 %v13281_v27, 16 }
 0x398   : > { %5264 = vst [vmem:[#allocation2 + $0x58] sm:$0xff] %v13303_v31  ;;  %v5377_v36 = vrot.slane %v13303_v31, 4  ;;  %v5167_v11 = vmax.f32 %v5135_v35, 0.0  ;;  %10636 = vmatpush3.bf16.msra.mxu1 %v11695_v61  ;;  %v5296_v58 = vmul.bf16 %v13234_v42, %v12489_v56  ;;  %v5101_v17 = vmul.f32 %v10571_v4, %v13095_v14  ;;  %v5017_v7 = vpop.f32.mrb[29].mxu0 }
 0x399   : > { %v13317_v52 = vpack.c.bf16 %v5169_v48, %v5168_v28  ;;  %10669 = vmatprep.subr.bf16.mxu1 %v13298_v39  ;;  %v5099_v61 = vmul.f32 %v13095_v14, %v5017_v7  ;;  %v10572_v32 = vpop.f32.mrb[30].mxu0  ;;  %v13325_v27 = vsel %vm1624_vm15, %v5665_v16, %v5674_v2  ;;  %v5679_v53 = vrot.slane %v5677_v40, 3 }
 0x39a   : > { %v5378_v63 = vsel %vm1365_vm0, %v5375_v5, %v5377_v36  ;;  %v5380_v22 = vsel %vm1365_vm0, %v5377_v36, %v5379_v15  ;;  %v5186_v38 = vpack.c.bf16 %v5167_v11, %v5166_v60  ;;  %14238 = vst [vmem:[#allocation27_spill] sm:$0xff] %v13325_v27  ;;  %v5140_v35 = vadd.f32 %v13100_v54, %v5101_v17  ;;  %v5020_v4 = vpop.f32.mrb[31].mxu0 }
 0x39b   : > { %v5231_v28 = vrot.slane %v13317_v52, 4  ;;  %v5102_v48 = vmul.f32 %v10572_v32, %v13095_v14  ;;  %10606 = vmatmul.mubr.bf16.gmra.mrb[16].mxu1 %v5376_v34  ;;  %v5682_v5 = vrot.slane %v5680_v37, 4  ;;  %v5138_v56 = vadd.f32 %v13100_v54, %v5099_v61 }
 0x39c   : > { %v5229_v36 = vrot.slane %v5186_v38, 4  ;;  %v5100_v60 = vmul.f32 %v13095_v14, %v5020_v4  ;;  %10609 = vmatprep.mubr.bf16.mxu1 %v5378_v63  ;;  %v5686_v11 = vshrl.u32 %v5296_v58, 16  ;;  %v5172_v7 = vmax.f32 %v5140_v35, 0.0 }
 0x39d   : > { %v5141_v16 = vadd.f32 %v13100_v54, %v5102_v48  ;;  %v5683_v40 = vor.u32 %v5682_v5, %v5679_v53  ;;  %v5689_v27 = vshll.u32 %v5296_v58, 16  ;;  %v5170_v34 = vmax.f32 %v5138_v56, 0.0 }
 0x39e   : > { %v13334_v52 = vsel %vm1365_vm0, %v5227_v59, %v5229_v36  ;;  %v13337_v17 = vsel %vm1365_vm0, %v5229_v36, %v5231_v28  ;;  %v5139_v37 = vadd.f32 %v13100_v54, %v5100_v60  ;;  %v5688_v61 = vrot.slane %v5686_v11, 3 }
 0x39f   : > { %5266 = vst [vmem:[#allocation2 + $0x68] sm:$0xff] %v13334_v52  ;;  %5267 = vst [vmem:[#allocation2 + $0x70] sm:$0xff] %v13337_v17  ;;  %v5173_v14 = vmax.f32 %v5141_v16, 0.0  ;;  %v5381_v63 = vrot.slane %v13334_v52, 4  ;;  %v5383_v38 = vrot.slane %v13337_v17, 4  ;;  %v13345_v58 = vsel %vm1624_vm15, %v5674_v2, %v5683_v40 }
 0x3a0   : > { %v5171_v59 = vmax.f32 %v5139_v37, 0.0  ;;  %v5691_v32 = vrot.slane %v5689_v27, 4  ;;  %v5297_v56 = vmul.bf16 %v13262_v21, %v12494_v25  ;;  %v5298_v48 = vmul.bf16 %v13267_v9, %v12510_v47 }
 0x3a1   : > { %v5189_v53 = vpack.c.bf16 %v5173_v14, %v5172_v7  ;;  %v5382_v54 = vsel %vm1365_vm0, %v5379_v15, %v5381_v63  ;;  %v5384_v35 = vsel %vm1365_vm0, %v5381_v63, %v5383_v38  ;;  %v5299_v27 = vmul.bf16 %v13303_v31, %v14209_v49 }
 0x3a2   : > { %v5188_v4 = vpack.c.bf16 %v5171_v59, %v5170_v34  ;;  %v5692_v5 = vor.u32 %v5691_v32, %v5688_v61  ;;  %v5695_v36 = vshrl.u32 %v5297_v56, 16  ;;  %v5698_v60 = vshll.u32 %v5297_v56, 16 }
 0x3a3   : > { %v5235_v2 = vrot.slane %v5189_v53, 4  ;;  %10610 = vmatmul.mubr.bf16.gmra.mrb[20].mxu1 %v5380_v22  ;;  %v5704_v16 = vshrl.u32 %v5298_v48, 16  ;;  %v5707_v11 = vshll.u32 %v5298_v48, 16  ;;  %v5713_v59 = vshrl.u32 %v5299_v27, 16 }
 0x3a4   : > { %v5233_v37 = vrot.slane %v5188_v4, 4  ;;  %10613 = vmatprep.mubr.bf16.mxu1 %v5382_v54  ;;  %v13356_v15 = vsel %vm1624_vm15, %v5683_v40, %v5692_v5  ;;  %v5697_v7 = vrot.slane %v5695_v36, 3  ;;  %v5700_v14 = vrot.slane %v5698_v60, 4 }
 0x3a5   : > { %5270 = vst [vmem:[#allocation2 + $0x88] sm:$0xf] %v5235_v2  ;;  %v5706_v63 = vrot.slane %v5704_v16, 3  ;;  %v5709_v34 = vrot.slane %v5707_v11, 4  ;;  %v5716_v61 = vshll.u32 %v5299_v27, 16  ;;  %v5300_v53 = vmul.bf16 %v13306_v6, %v14210_v10 }
 0x3a6   : > { %v13359_v32 = vsel %vm1365_vm0, %v5231_v28, %v5233_v37  ;;  %v5236_v22 = vsel %vm1365_vm0, %v5233_v37, %v5235_v2  ;;  %v5701_v56 = vor.u32 %v5700_v14, %v5697_v7  ;;  %v5715_v48 = vrot.slane %v5713_v59, 3 }
 0x3a7   : > { %5268 = vst [vmem:[#allocation2 + $0x78] sm:$0xff] %v13359_v32  ;;  %5269 = vst [vmem:[#allocation2 + $0x80] sm:$0xff] %v5236_v22  ;;  %v5385_v40 = vrot.slane %v13359_v32, 4  ;;  %v5710_v54 = vor.u32 %v5709_v34, %v5706_v63  ;;  %v5718_v4 = vrot.slane %v5716_v61, 4  ;;  %v5722_v60 = vshrl.u32 %v5300_v53, 16 }
 0x3a8   : > { %v13367_v36 = vsel %vm1624_vm15, %v5692_v5, %v5701_v56  ;;  %v5725_v28 = vshll.u32 %v5300_v53, 16  ;;  %v5301_v2 = vmul.bf16 %v13334_v52, %v14211_v45  ;;  %v5302_v37 = vmul.bf16 %v13337_v17, %v14212_v57 }
 0x3a9   : > { %v5386_v16 = vsel %vm1365_vm0, %v5383_v38, %v5385_v40  ;;  %v13373_v11 = vsel %vm1624_vm15, %v5701_v56, %v5710_v54  ;;  %v5719_v27 = vor.u32 %v5718_v4, %v5715_v48  ;;  %v5724_v7 = vrot.slane %v5722_v60, 3 }
 0x3aa   : > { %v5727_v14 = vrot.slane %v5725_v28, 4  ;;  %v5731_v63 = vshrl.u32 %v5301_v2, 16  ;;  %v5734_v34 = vshll.u32 %v5301_v2, 16  ;;  %v5740_v59 = vshrl.u32 %v5302_v37, 16 }
 0x3ab   : > { %10614 = vmatmul.mubr.bf16.gmra.mrb[24].mxu1 %v5384_v35  ;;  %v13378_v5 = vsel %vm1624_vm15, %v5710_v54, %v5719_v27  ;;  %v5743_v61 = vshll.u32 %v5302_v37, 16  ;;  %v5303_v38 = vmul.bf16 %v13359_v32, %v14213_v33  ;;  %v6035_v48 = vshrl.u32 %v13184_v62, 16 }
 0x3ac   : > { %10617 = vmatprep.mubr.bf16.mxu1 %v5386_v16  ;;  %v5728_v22 = vor.u32 %v5727_v14, %v5724_v7  ;;  %v5733_v56 = vrot.slane %v5731_v63, 3  ;;  %v5736_v53 = vrot.slane %v5734_v34, 4  ;;  %v5742_v4 = vrot.slane %v5740_v59, 3 }
 0x3ad   : > { %v5745_v60 = vrot.slane %v5743_v61, 4  ;;  %v5749_v28 = vshrl.u32 %v5303_v38, 16  ;;  %v5752_v57 = vshll.u32 %v5303_v38, 16  ;;  %v6037_v37 = vrot.slane %v6035_v48, 4 }
 0x3ae   : > { %v13383_v2 = vld [vmem:[#allocation2 + $0x80] sm:$0xf]  ;;  %v13386_v35 = vsel %vm1624_vm15, %v5719_v27, %v5728_v22  ;;  %v5737_v54 = vor.u32 %v5736_v53, %v5733_v56  ;;  %v6038_v45 = vshll.u32 %v13184_v62, 16  ;;  %v5629_v7 = vor.u32 %v13224_v8, %v13214_v1 }
 0x3af   : > { %v5387_v16 = vrot.slane %v13383_v2, 4  ;;  %v5746_v14 = vor.u32 %v5745_v60, %v5742_v4  ;;  %v5751_v63 = vrot.slane %v5749_v28, 3  ;;  %v5754_v59 = vrot.slane %v5752_v57, 4 }
 0x3b0   : > { %v13393_v34 = vsel %vm1624_vm15, %v5728_v22, %v5737_v54  ;;  %v6033_v61 = vor.u32 %v13144_v24, %v13142_v19  ;;  %v6040_v27 = vrot.slane %v6038_v45, 5  ;;  %v6050_v62 = vor.u32 %v13180_v3, %v13162_v26 }
 0x3b1   : > { %v5388_v38 = vsel %vm1365_vm0, %v5385_v40, %v5387_v16  ;;  %v13399_v56 = vsel %vm1624_vm15, %v5737_v54, %v5746_v14  ;;  %v13403_v53 = vor.u32 %v5754_v59, %v5751_v63  ;;  %v5995_v8 = vmul.bf16 %v13154_v13, %v14227_v51 }
 0x3b2   : > { %v6041_v1 = vor.u32 %v6040_v27, %v6037_v37  ;;  %v5996_v57 = vmul.bf16 %v13157_v18, %v14229_v44  ;;  %v14239_v45 = vor.u32 %v13123_v50, %v13119_v20  ;;  %v5997_v24 = vmul.bf16 %v13195_v29, %v14230_v12 }
 0x3b3   : > { %10618 = vmatmul.mubr.bf16.gmra.mrb[28].mxu1 %v5388_v38  ;;  %v5998_v3 = vmul.bf16 %v13200_v30, %v14207_v55  ;;  %v13419_v26 = vsel %vm1624_vm15, %v5746_v14, %v13403_v53  ;;  %v6053_v20 = vshrl.u32 %v5995_v8, 16  ;;  %v6056_v50 = vshll.u32 %v5995_v8, 16 }
 0x3b4   : > { %v5630_v19 = vsel %vm1624_vm15, %v14239_v45, %v5629_v7  ;;  %v13422_v13 = vsel %vm1136_vm6, %v6033_v61, %v6041_v1  ;;  %v13425_v18 = vsel %vm1136_vm6, %v6041_v1, %v6050_v62  ;;  %v6062_v40 = vshrl.u32 %v5996_v57, 16  ;;  %v11697_v61 = vld [vmem:[#allocation8 + $0x88] sm:$0xff]  }
 0x3b5   : > { %10637 = vmatprep.mubr.bf16.mxu1 %v5630_v19  ;;  %v6065_v22 = vshll.u32 %v5996_v57, 16  ;;  %v6055_v48 = vrot.slane %v6053_v20, 4  ;;  %v6071_v29 = vshrl.u32 %v5997_v24, 16  ;;  %v6074_v4 = vshll.u32 %v5997_v24, 16  ;;  %v14240_v19 = vld [vmem:[#allocation38_spill] sm:$0xff] }
 0x3b6   : > { %v6080_v60 = vshrl.u32 %v5998_v3, 16  ;;  %v5639_v30 = vsel %vm1624_vm15, %v5629_v7, %v13190_v23  ;;  %v6058_v28 = vrot.slane %v6056_v50, 5  ;;  %v6064_v54 = vrot.slane %v6062_v40, 4  ;;  %v14241_v7 = vld [vmem:[#allocation39_spill] sm:$0xff]  ;;  %v14242_v40 = vld [vmem:[#allocation36_spill] sm:$0xff] }
 0x3b7   : > { %v6067_v37 = vrot.slane %v6065_v22, 5  ;;  %v6073_v16 = vrot.slane %v6071_v29, 4  ;;  %v6076_v14 = vrot.slane %v6074_v4, 5  ;;  %v6083_v59 = vshll.u32 %v5998_v3, 16 }
 0x3b8   : > { %v6082_v63 = vrot.slane %v6080_v60, 4  ;;  %v6059_v27 = vor.u32 %v6058_v28, %v6055_v48  ;;  %v5999_v1 = vmul.bf16 %v13229_v41, %v14208_v46  ;;  %v6000_v8 = vmul.bf16 %v13234_v42, %v12693_v43 }
 0x3b9   : > { %v6068_v38 = vor.u32 %v6067_v37, %v6064_v54  ;;  %v6077_v57 = vor.u32 %v6076_v14, %v6073_v16  ;;  %v6085_v45 = vrot.slane %v6083_v59, 5  ;;  %v6001_v23 = vmul.bf16 %v13262_v21, %v14240_v19 }
 0x3ba   : > { %v6002_v24 = vmul.bf16 %v13267_v9, %v14241_v7  ;;  %v13438_v3 = vsel %vm1136_vm6, %v6050_v62, %v6059_v27  ;;  %v6089_v50 = vshrl.u32 %v5999_v1, 16  ;;  %v6092_v41 = vshll.u32 %v5999_v1, 16  ;;  %v11698_v9 = vld [vmem:[#allocation8 + $0x90] sm:$0xff]  }
 0x3bb   : > { %10638 = vmatmul.mubr.bf16.vlgmr.msra.gmra.mrb[0].mxu1 %v5639_v30  ;;  %v13441_v20 = vsel %vm1136_vm6, %v6059_v27, %v6068_v38  ;;  %v13446_v42 = vsel %vm1136_vm6, %v6068_v38, %v6077_v57  ;;  %v6086_v21 = vor.u32 %v6085_v45, %v6082_v63  ;;  %v6098_v22 = vshrl.u32 %v6000_v8, 16  ;;  %v14243_v38 = vld [vmem:[#allocation40_spill] sm:$0xff] }
 0x3bc   : > { %10641 = vmatprep.mubr.bf16.mxu1 %v14242_v40  ;;  %10670 = vmatpush3.bf16.msra.mxu1 %v13298_v39  ;;  %v6101_v48 = vshll.u32 %v6000_v8, 16  ;;  %v6091_v29 = vrot.slane %v6089_v50, 4  ;;  %v6094_v62 = vrot.slane %v6092_v41, 5  ;;  %v6107_v4 = vshrl.u32 %v6001_v23, 16  ;;  %v14244_v8 = vld [vmem:[#allocation41_spill] sm:$0xff]  ;;  %v14245_v40 = vld [vmem:[#allocation42_spill] sm:$0xff] }
 0x3bd   : > { %10671 = vmatprep.subr.bf16.mxu1 %v11697_v61  ;;  %v6110_v60 = vshll.u32 %v6001_v23, 16  ;;  %v13449_v30 = vsel %vm1136_vm6, %v6077_v57, %v6086_v21  ;;  %v6100_v28 = vrot.slane %v6098_v22, 4  ;;  %v6116_v37 = vshrl.u32 %v6002_v24, 16  ;;  %v11699_v23 = vld [vmem:[#allocation8 + $0x98] sm:$0xff]  }
 0x3be   : > { %v6103_v54 = vrot.slane %v6101_v48, 5  ;;  %v6095_v16 = vor.u32 %v6094_v62, %v6091_v29  ;;  %v6109_v39 = vrot.slane %v6107_v4, 4  ;;  %v6119_v59 = vshll.u32 %v6002_v24, 16 }
 0x3bf   : > { %v6112_v14 = vrot.slane %v6110_v60, 5  ;;  %v6118_v27 = vrot.slane %v6116_v37, 4  ;;  %v6003_v1 = vmul.bf16 %v13303_v31, %v14243_v38  ;;  %v6004_v45 = vmul.bf16 %v13306_v6, %v14244_v8  ;;  %v14246_v31 = vld [vmem:[#allocation37_spill] sm:$0xff] }
 0x3c0   : > { %10672 = vmatpush3.bf16.msra.mxu1 %v11697_v61  ;;  %v6104_v63 = vor.u32 %v6103_v54, %v6100_v28  ;;  %v13456_v57 = vsel %vm1136_vm6, %v6086_v21, %v6095_v16  ;;  %v6121_v41 = vrot.slane %v6119_v59, 5  ;;  %v6005_v22 = vmul.bf16 %v13334_v52, %v14245_v40  ;;  %v11700_v37 = vld [vmem:[#allocation8 + $0xa0] sm:$0xff]   ;;  %v14247_v59 = vld [vmem:[#allocation44_spill] sm:$0xff] }
 0x3c1   : > { %10673 = vmatprep.subr.bf16.mxu1 %v11698_v9  ;;  %v6113_v50 = vor.u32 %v6112_v14, %v6109_v39  ;;  %v6125_v24 = vshrl.u32 %v6003_v1, 16  ;;  %v6128_v48 = vshll.u32 %v6003_v1, 16  ;;  %v6134_v29 = vshrl.u32 %v6004_v45, 16 }
 0x3c2   : > { %v13461_v61 = vsel %vm1136_vm6, %v6095_v16, %v6104_v63  ;;  %v6122_v62 = vor.u32 %v6121_v41, %v6118_v27  ;;  %v6137_v4 = vshll.u32 %v6004_v45, 16  ;;  %v6143_v21 = vshrl.u32 %v6005_v22, 16  ;;  %v14248_v45 = vld [vmem:[#allocation45_spill] sm:$0xff] }
 0x3c3   : > { %10642 = vmatmul.mubr.bf16.gmra.mrb[4].mxu1 %v14246_v31  ;;  %v13465_v6 = vsel %vm1136_vm6, %v6104_v63, %v6113_v50  ;;  %v6127_v60 = vrot.slane %v6125_v24, 4  ;;  %v6130_v28 = vrot.slane %v6128_v48, 5  ;;  %v6136_v52 = vrot.slane %v6134_v29, 4  ;;  %v11701_v31 = vld [vmem:[#allocation8 + $0xa8] sm:$0xff]  }
 0x3c4   : > { %10645 = vmatprep.mubr.bf16.mxu1 %v13295_v0  ;;  %10674 = vmatpush3.bf16.msra.mxu1 %v11698_v9  ;;  %v6146_v54 = vshll.u32 %v6005_v22, 16  ;;  %v13469_v16 = vsel %vm1136_vm6, %v6113_v50, %v6122_v62  ;;  %v6139_v39 = vrot.slane %v6137_v4, 5  ;;  %v6145_v14 = vrot.slane %v6143_v21, 4 }
 0x3c5   : > { %10675 = vmatprep.subr.bf16.mxu1 %v11699_v23  ;;  %v6006_v63 = vmul.bf16 %v13337_v17, %v14247_v59  ;;  %v6131_v27 = vor.u32 %v6130_v28, %v6127_v60  ;;  %v6007_v0 = vmul.bf16 %v13359_v32, %v14248_v45 }
 0x3c6   : > { %v6148_v1 = vrot.slane %v6146_v54, 5  ;;  %v6140_v9 = vor.u32 %v6139_v39, %v6136_v52  ;;  %v14249_v52 = vld [vmem:[#allocation27_spill] sm:$0xff] }
 0x3c7   : > { %v6152_v41 = vshrl.u32 %v6006_v63, 16  ;;  %v6155_v24 = vshll.u32 %v6006_v63, 16  ;;  %v13476_v22 = vsel %vm1136_vm6, %v6122_v62, %v6131_v27  ;;  %v6161_v50 = vshrl.u32 %v6007_v0, 16  ;;  %v11702_v54 = vld [vmem:[#allocation8 + $0xb0] sm:$0xff]   ;;  %v11703_v63 = vld [vmem:[#allocation8 + $0xb8] sm:$0xff]  }
 0x3c8   : > { %10676 = vmatpush3.bf16.msra.mxu1 %v11699_v23  ;;  %v6149_v48 = vor.u32 %v6148_v1, %v6145_v14  ;;  %v6164_v29 = vshll.u32 %v6007_v0, 16  ;;  %v13479_v4 = vsel %vm1136_vm6, %v6131_v27, %v6140_v9 }
 0x3c9   : > { %10677 = vmatprep.subr.bf16.mxu1 %v11700_v37  ;;  %v6154_v17 = vrot.slane %v6152_v41, 4  ;;  %v6157_v21 = vrot.slane %v6155_v24, 5  ;;  %v6163_v32 = vrot.slane %v6161_v50, 4 }
 0x3ca   : > { %v13482_v60 = vsel %vm1136_vm6, %v6140_v9, %v6149_v48  ;;  %v6166_v28 = vrot.slane %v6164_v29, 5  ;;  %v13529_v29 = vld [vmem:[#allocation2 + $0x80] sm:$0xff] }
 0x3cb   : > { %10646 = vmatmul.mubr.bf16.gmra.mrb[8].mxu1 %v14249_v52  ;;  %v6158_v23 = vor.u32 %v6157_v21, %v6154_v17  ;;  %v13531_v17 = vld [vmem:[#allocation2 + $0x18] sm:$0xff]  ;;  %v13533_v21 = vld [vmem:[#allocation2 + $0x20] sm:$0xff] }
 0x3cc   : > { %10649 = vmatprep.mubr.bf16.mxu1 %v13345_v58  ;;  %10678 = vmatpush3.bf16.msra.mxu1 %v11700_v37  ;;  %v13486_v62 = vor.u32 %v6166_v28, %v6163_v32  ;;  %v11704_v58 = vld [vmem:[#allocation8 + $0xc0] sm:$0xff]   ;;  %v14250_v37 = vld [vmem:[#allocation31_spill] sm:$0xff]  ;;  %v7680_v28 = vld [vmem:[#allocation2 + $0x90] sm:$0xf] }
 0x3cd   : > { %10679 = vmatprep.subr.bf16.mxu1 %v11701_v31  ;;  %v13489_v39 = vsel %vm1136_vm6, %v6149_v48, %v6158_v23  ;;  %v5304_v27 = vmul.bf16 %v13383_v2, %v14250_v37  ;;  %v11706_v2 = vld [vmem:[#allocation8 + $0xd0] sm:$0xff]  }
 0x3ce   : > { %v13493_v14 = vsel %vm1136_vm6, %v6158_v23, %v13486_v62  ;;  %v7679_v32 = vld [vmem:[#allocation2 + $0x88] sm:$0xff] }
 0x3cf   : > { %v5758_v1 = vshrl.u32 %v5304_v27, 16 }
 0x3d0   : > { %10680 = vmatpush3.bf16.msra.mxu1 %v11701_v31 }
 0x3d1   : > { %10681 = vmatprep.subr.bf16.mxu1 %v11702_v54  ;;  %v5760_v0 = vrot.slane %v5758_v1, 3 }
 0x3d3   : > { %10650 = vmatmul.mubr.bf16.gmra.mrb[12].mxu1 %v13356_v15  ;;  %v5761_v15 = vshll.u32 %v5304_v27, 16 }
 0x3d4   : > { %10653 = vmatprep.mubr.bf16.mxu1 %v13367_v36  ;;  %10682 = vmatpush3.bf16.msra.mxu1 %v11702_v54 }
 0x3d5   : > { %10683 = vmatprep.subr.bf16.mxu1 %v11703_v63  ;;  %v5763_v36 = vrot.slane %v5761_v15, 4  ;;  %v14255_v15 = vld [vmem:[#allocation17_spill] sm:$0xff] }
 0x3d7   : > { %v5764_v9 = vor.u32 %v5763_v36, %v5760_v0  ;;  %v6455_v0 = vmul.bf16 %v13533_v21, %v14255_v15  ;;  %v8188_v36 = vrot.slane %v7679_v32, 4 }
 0x3d8   : > { %10684 = vmatpush3.bf16.msra.mxu1 %v11703_v63 }
 0x3d9   : > { %10717 = vmatprep.subr.bf16.mxu1 %v11704_v58 }
 0x3db   : > { %10654 = vmatmul.mubr.bf16.gmra.mrb[16].mxu1 %v13373_v11  ;;  %v5765_v11 = vsel %vm1624_vm15, %v13403_v53, %v5764_v9  ;;  %v11710_v53 = vld [vmem:[#allocation8 + $0xf0] sm:$0xff]   ;;  %v8190_v9 = vrot.slane %v7680_v28, 4 }
 0x3dc   : > { %10657 = vmatprep.mubr.bf16.mxu1 %v13378_v5  ;;  %v11705_v5 = vld [vmem:[#allocation8 + $0xc8] sm:$0xff]  }
 0x3e3   : > { %10658 = vmatmul.mubr.bf16.gmra.mrb[20].mxu1 %v13386_v35  ;;  %v11707_v35 = vld [vmem:[#allocation8 + $0xd8] sm:$0xff]  }
 0x3e4   : > { %10661 = vmatprep.mubr.bf16.mxu1 %v13393_v34  ;;  %v11708_v34 = vld [vmem:[#allocation8 + $0xe0] sm:$0xff]  }
 0x3eb   : > { %10662 = vmatmul.mubr.bf16.gmra.mrb[24].mxu1 %v13399_v56  ;;  %v11709_v56 = vld [vmem:[#allocation8 + $0xe8] sm:$0xff]  }
 0x3ec   : > { %10665 = vmatprep.mubr.bf16.mxu1 %v13419_v26  ;;  %v11711_v26 = vld [vmem:[#allocation8 + $0xf8] sm:$0xff]  }
 0x3f3   : > { %10666 = vmatmul.mubr.bf16.gmra.mrb[28].mxu1 %v5765_v11 }
 0x3f4   : > { %10685 = vmatprep.mubr.bf16.mxu1 %v13422_v13  ;;  %v13516_v13 = vld [vmem:[#allocation8 + $0x100] sm:$0xff]  }
 0x3fb   : > { %10686 = vmatmul.mubr.bf16.vlgmr.msra.gmra.mrb[0].mxu1 %v13425_v18  ;;  %v5991_v18 = vld [vmem:[#allocation2 + $0x80] sm:$0x1f] }
 0x3fc   : > { %10689 = vmatprep.mubr.bf16.mxu1 %v13438_v3  ;;  %10718 = vmatpush3.bf16.msra.mxu1 %v11704_v58  ;;  %v6435_v3 = vld [vmem:[#allocation2 + $0x8] sm:$0xf8]  ;;  %v14254_v58 = vld [vmem:[#allocation14_spill] sm:$0xff] }
 0x3fd   : > { %10719 = vmatprep.subr.bf16.mxu1 %v11705_v5  ;;  %v6454_v27 = vmul.bf16 %v13531_v17, %v14254_v58 }
 0x400   : > { %10720 = vmatpush3.bf16.msra.mxu1 %v11705_v5  ;;  %v13549_v5 = vsel %vm1365_vm0, %v8188_v36, %v8190_v9  ;;  %v14260_v9 = vld [vmem:[#allocation20_spill] sm:$0xff] }
 0x401   : > { %10721 = vmatprep.subr.bf16.mxu1 %v11706_v2  ;;  %14257 = vst [vmem:[#allocation46_spill] sm:$0xff] %v13549_v5 }
 0x403   : > { %10690 = vmatmul.mubr.bf16.gmra.mrb[4].mxu1 %v13441_v20  ;;  %v13521_v20 = vld [vmem:[#allocation2 + $0x10] sm:$0xff] }
 0x404   : > { %10693 = vmatprep.mubr.bf16.mxu1 %v13446_v42  ;;  %10722 = vmatpush3.bf16.msra.mxu1 %v11706_v2  ;;  %v14251_v42 = vld [vmem:[#allocation43_spill] sm:$0xff] }
 0x405   : > { %10723 = vmatprep.subr.bf16.mxu1 %v11707_v35 }
 0x408   : > { %10724 = vmatpush3.bf16.msra.mxu1 %v11707_v35  ;;  %v6504_v35 = vshrl.u32 %v6454_v27, 16 }
 0x409   : > { %10725 = vmatprep.subr.bf16.mxu1 %v11708_v34 }
 0x40b   : > { %10694 = vmatmul.mubr.bf16.gmra.mrb[8].mxu1 %v13449_v30  ;;  %v6008_v30 = vmul.bf16 %v5991_v18, %v14251_v42  ;;  %v13551_v18 = vld [vmem:[#allocation2 + $0x28] sm:$0xff] }
 0x40c   : > { %10697 = vmatprep.mubr.bf16.mxu1 %v13456_v57  ;;  %10726 = vmatpush3.bf16.msra.mxu1 %v11708_v34  ;;  %v14252_v57 = vld [vmem:[#allocation15_spill] sm:$0xff]  ;;  %v6507_v34 = vshll.u32 %v6454_v27, 16  ;;  %v11713_v27 = vld [vmem:[#allocation8 + $0x108] sm:$0xff]  }
 0x40d   : > { %10727 = vmatprep.subr.bf16.mxu1 %v11709_v56  ;;  %v6170_v24 = vshrl.u32 %v6008_v30, 16  ;;  %v6173_v48 = vshll.u32 %v6008_v30, 16  ;;  %v6506_v30 = vrot.slane %v6504_v35, 3 }
 0x40f   : > { %v6172_v52 = vrot.slane %v6170_v24, 4  ;;  %v6175_v23 = vrot.slane %v6173_v48, 5 }
 0x410   : > { %10728 = vmatpush3.bf16.msra.mxu1 %v11709_v56 }
 0x411   : > { %10729 = vmatprep.subr.bf16.mxu1 %v11710_v53  ;;  %v6176_v2 = vor.u32 %v6175_v23, %v6172_v52 }
 0x413   : > { %10698 = vmatmul.mubr.bf16.gmra.mrb[12].mxu1 %v13461_v61  ;;  %v6452_v61 = vmul.bf16 %v6435_v3, %v14252_v57  ;;  %v13553_v3 = vld [vmem:[#allocation2 + $0x30] sm:$0xff] }
 0x414   : > { %10701 = vmatprep.mubr.bf16.mxu1 %v13465_v6  ;;  %10730 = vmatpush3.bf16.msra.mxu1 %v11710_v53  ;;  %v14253_v6 = vld [vmem:[#allocation16_spill] sm:$0xff]  ;;  %v6513_v53 = vshrl.u32 %v6455_v0, 16 }
 0x415   : > { %10731 = vmatprep.subr.bf16.mxu1 %v11711_v26  ;;  %v6453_v41 = vmul.bf16 %v13521_v20, %v14253_v6  ;;  %v6490_v50 = vshll.u32 %v6452_v61, 16 }
 0x417   : > { %v6498_v31 = vshll.u32 %v6453_v41, 16  ;;  %v6492_v54 = vrot.slane %v6490_v50, 4 }
 0x418   : > { %10732 = vmatpush3.bf16.msra.mxu1 %v11711_v26  ;;  %v6516_v26 = vshll.u32 %v6455_v0, 16 }
 0x419   : > { %10765 = vmatprep.subr.bf16.mxu1 %v13516_v13  ;;  %v6500_v1 = vrot.slane %v6498_v31, 4 }
 0x41a   : > { %v6518_v50 = vrot.slane %v6516_v26, 4 }
 0x41b   : > { %10702 = vmatmul.mubr.bf16.gmra.mrb[16].mxu1 %v13469_v16  ;;  %v6487_v16 = vshrl.u32 %v6452_v61, 16  ;;  %v6509_v61 = vrot.slane %v6507_v34, 4 }
 0x41c   : > { %10705 = vmatprep.mubr.bf16.mxu1 %v13476_v22  ;;  %v6495_v22 = vshrl.u32 %v6453_v41, 16  ;;  %v14258_v41 = vld [vmem:[#allocation18_spill] sm:$0xff] }
 0x41d   : > { %v6456_v24 = vmul.bf16 %v13551_v18, %v14258_v41  ;;  %v6510_v32 = vor.u32 %v6509_v61, %v6506_v30 }
 0x41e   : > { %v6497_v63 = vrot.slane %v6495_v22, 3  ;;  %v14259_v22 = vld [vmem:[#allocation19_spill] sm:$0xff] }
 0x41f   : > { %v6457_v31 = vmul.bf16 %v13553_v3, %v14259_v22  ;;  %v6522_v28 = vshrl.u32 %v6456_v24, 16  ;;  %v6525_v52 = vshll.u32 %v6456_v24, 16 }
 0x421   : > { %v6524_v0 = vrot.slane %v6522_v28, 3 }
 0x423   : > { %10706 = vmatmul.mubr.bf16.gmra.mrb[20].mxu1 %v13479_v4  ;;  %v13536_v4 = vrot.slane %v13529_v29, 4 }
 0x424   : > { %10709 = vmatprep.mubr.bf16.mxu1 %v13482_v60  ;;  %v6489_v60 = vrot.slane %v6487_v16, 3  ;;  %v6515_v16 = vrot.slane %v6513_v53, 3  ;;  %v14261_v53 = vld [vmem:[#allocation21_spill] sm:$0xff] }
 0x425   : > { %v13546_v11 = vsel %vm1365_vm0, %v13536_v4, %v8188_v36  ;;  %v6527_v36 = vrot.slane %v6525_v52, 4 }
 0x426   : > { %14256 = vst [vmem:[#allocation32_spill] sm:$0xff] %v13546_v11  ;;  %v6493_v56 = vor.u32 %v6492_v54, %v6489_v60  ;;  %v6519_v23 = vor.u32 %v6518_v50, %v6515_v16  ;;  %v6531_v60 = vshrl.u32 %v6457_v31, 16  ;;  %v13562_v54 = vld [vmem:[#allocation2 + $0x38] sm:$0xff]  ;;  %v13573_v50 = vld [vmem:[#allocation2 + $0x48] sm:$0xff] }
 0x427   : > { %v6528_v30 = vor.u32 %v6527_v36, %v6524_v0  ;;  %v13593_v11 = vld [vmem:[#allocation2 + $0x68] sm:$0xff] }
 0x428   : > { %v6520_v35 = vsel %vm1624_vm15, %v6510_v32, %v6519_v23  ;;  %v6533_v34 = vrot.slane %v6531_v60, 3 }
 0x429   : > { %v6529_v28 = vsel %vm1624_vm15, %v6519_v23, %v6528_v30 }
 0x42b   : > { %10710 = vmatmul.mubr.bf16.gmra.mrb[24].mxu1 %v13489_v39  ;;  %v6501_v39 = vor.u32 %v6500_v1, %v6497_v63  ;;  %v13564_v63 = vld [vmem:[#allocation2 + $0x40] sm:$0xff] }
 0x42c   : > { %10713 = vmatprep.mubr.bf16.mxu1 %v13493_v14  ;;  %v6177_v14 = vsel %vm1136_vm6, %v13486_v62, %v6176_v2  ;;  %v6534_v62 = vshll.u32 %v6457_v31, 16  ;;  %v6458_v2 = vmul.bf16 %v13562_v54, %v14260_v9  ;;  %v6459_v26 = vmul.bf16 %v13564_v63, %v14261_v53  ;;  %v13575_v31 = vld [vmem:[#allocation2 + $0x50] sm:$0xff] }
 0x42d   : > { %v6502_v48 = vsel %vm1624_vm15, %v6493_v56, %v6501_v39  ;;  %v6511_v1 = vsel %vm1624_vm15, %v6501_v39, %v6510_v32  ;;  %v11715_v32 = vld [vmem:[#allocation8 + $0x118] sm:$0xff]  }
 0x42e   : > { %v6536_v56 = vrot.slane %v6534_v62, 4  ;;  %v6540_v39 = vshrl.u32 %v6458_v2, 16  ;;  %v6543_v61 = vshll.u32 %v6458_v2, 16  ;;  %v6552_v16 = vshll.u32 %v6459_v26, 16 }
 0x42f   : > { %v6461_v2 = vmul.bf16 %v13575_v31, %v12494_v25  ;;  %v13603_v25 = vld [vmem:[#allocation2 + $0x78] sm:$0xff] }
 0x430   : > { %v6537_v24 = vor.u32 %v6536_v56, %v6533_v34  ;;  %v6542_v52 = vrot.slane %v6540_v39, 3  ;;  %v6545_v60 = vrot.slane %v6543_v61, 4  ;;  %v6554_v36 = vrot.slane %v6552_v16, 4  ;;  %v13583_v61 = vld [vmem:[#allocation2 + $0x58] sm:$0xff] }
 0x431   : > { %v6570_v39 = vshll.u32 %v6461_v2, 16 }
 0x433   : > { %10714 = vmatmul.mubr.bf16.gmra.mrb[28].mxu1 %v6177_v14  ;;  %v11714_v14 = vld [vmem:[#allocation8 + $0x110] sm:$0xff]  }
 0x434   : > { %10733 = vmatprep.mubr.bf16.mxu1 %v6502_v48  ;;  %v6549_v48 = vshrl.u32 %v6459_v26, 16  ;;  %v6567_v26 = vshrl.u32 %v6461_v2, 16 }
 0x436   : > { %v6551_v0 = vrot.slane %v6549_v48, 3 }
 0x438   : > { %v6555_v56 = vor.u32 %v6554_v36, %v6551_v0 }
 0x43b   : > { %10734 = vmatmul.mubr.bf16.vlgmr.msra.gmra.mrb[0].mxu1 %v6511_v1  ;;  %v6538_v1 = vsel %vm1624_vm15, %v6528_v30, %v6537_v24  ;;  %v11717_v30 = vld [vmem:[#allocation8 + $0x128] sm:$0xff]  }
 0x43c   : > { %10737 = vmatprep.mubr.bf16.mxu1 %v6520_v35  ;;  %10766 = vmatpush3.bf16.msra.mxu1 %v13516_v13  ;;  %v14262_v13 = vld [vmem:[#allocation22_spill] sm:$0xff]  ;;  %v6546_v35 = vor.u32 %v6545_v60, %v6542_v52  ;;  %v6569_v60 = vrot.slane %v6567_v26, 3 }
 0x43d   : > { %10767 = vmatprep.subr.bf16.mxu1 %v11713_v27  ;;  %v6460_v62 = vmul.bf16 %v13573_v50, %v14262_v13 }
 0x43e   : > { %v6547_v48 = vsel %vm1624_vm15, %v6537_v24, %v6546_v35  ;;  %v6556_v52 = vsel %vm1624_vm15, %v6546_v35, %v6555_v56  ;;  %v11719_v35 = vld [vmem:[#allocation8 + $0x138] sm:$0xff]  }
 0x43f   : > { %v6558_v34 = vshrl.u32 %v6460_v62, 16  ;;  %v6561_v23 = vshll.u32 %v6460_v62, 16  ;;  %v6572_v62 = vrot.slane %v6570_v39, 4 }
 0x440   : > { %10768 = vmatpush3.bf16.msra.mxu1 %v11713_v27  ;;  %v11716_v27 = vld [vmem:[#allocation8 + $0x120] sm:$0xff]  }
 0x441   : > { %10769 = vmatprep.subr.bf16.mxu1 %v11714_v14  ;;  %v6560_v16 = vrot.slane %v6558_v34, 3  ;;  %v6573_v34 = vor.u32 %v6572_v62, %v6569_v60  ;;  %v14263_v60 = vld [vmem:[#allocation29_spill] sm:$0xff] }
 0x443   : > { %10738 = vmatmul.mubr.bf16.gmra.mrb[4].mxu1 %v6529_v28  ;;  %v13585_v28 = vld [vmem:[#allocation2 + $0x60] sm:$0xff] }
 0x444   : > { %10741 = vmatprep.mubr.bf16.mxu1 %v6538_v1  ;;  %10770 = vmatpush3.bf16.msra.mxu1 %v11714_v14  ;;  %v6563_v1 = vrot.slane %v6561_v23, 4  ;;  %v6462_v14 = vmul.bf16 %v13583_v61, %v12510_v47  ;;  %v6463_v0 = vmul.bf16 %v13585_v28, %v14209_v49 }
 0x445   : > { %10771 = vmatprep.subr.bf16.mxu1 %v11715_v32 }
 0x446   : > { %v6564_v36 = vor.u32 %v6563_v1, %v6560_v16  ;;  %v6576_v2 = vshrl.u32 %v6462_v14, 16  ;;  %v6579_v24 = vshll.u32 %v6462_v14, 16  ;;  %v6585_v23 = vshrl.u32 %v6463_v0, 16 }
 0x447   : > { %v6588_v5 = vshll.u32 %v6463_v0, 16 }
 0x448   : > { %10772 = vmatpush3.bf16.msra.mxu1 %v11715_v32  ;;  %v11718_v32 = vld [vmem:[#allocation8 + $0x130] sm:$0xff]   ;;  %v6565_v26 = vsel %vm1624_vm15, %v6555_v56, %v6564_v36  ;;  %v6578_v39 = vrot.slane %v6576_v2, 3  ;;  %v6574_v16 = vsel %vm1624_vm15, %v6564_v36, %v6573_v34  ;;  %v6587_v1 = vrot.slane %v6585_v23, 3 }
 0x449   : > { %10773 = vmatprep.subr.bf16.mxu1 %v11716_v27  ;;  %v6590_v14 = vrot.slane %v6588_v5, 4 }
 0x44b   : > { %10742 = vmatmul.mubr.bf16.gmra.mrb[8].mxu1 %v6547_v48  ;;  %v13595_v48 = vld [vmem:[#allocation2 + $0x70] sm:$0xff]  ;;  %v6591_v2 = vor.u32 %v6590_v14, %v6587_v1 }
 0x44c   : > { %10745 = vmatprep.mubr.bf16.mxu1 %v6556_v52  ;;  %10774 = vmatpush3.bf16.msra.mxu1 %v11716_v27  ;;  %v6581_v52 = vrot.slane %v6579_v24, 4  ;;  %v6464_v27 = vmul.bf16 %v13593_v11, %v14210_v10  ;;  %v6465_v62 = vmul.bf16 %v13595_v48, %v14263_v60 }
 0x44d   : > { %10775 = vmatprep.subr.bf16.mxu1 %v11717_v30 }
 0x44e   : > { %v6582_v0 = vor.u32 %v6581_v52, %v6578_v39  ;;  %v6594_v49 = vshrl.u32 %v6464_v27, 16  ;;  %v6597_v56 = vshll.u32 %v6464_v27, 16  ;;  %v6603_v24 = vshrl.u32 %v6465_v62, 16 }
 0x44f   : > { %v6606_v47 = vshll.u32 %v6465_v62, 16  ;;  %v6467_v27 = vmul.bf16 %v13529_v29, %v14213_v33 }
 0x450   : > { %10776 = vmatpush3.bf16.msra.mxu1 %v11717_v30  ;;  %v11720_v30 = vld [vmem:[#allocation8 + $0x140] sm:$0xff]   ;;  %v6583_v36 = vsel %vm1624_vm15, %v6573_v34, %v6582_v0  ;;  %v6596_v5 = vrot.slane %v6594_v49, 3  ;;  %v6599_v23 = vrot.slane %v6597_v56, 4  ;;  %v6605_v39 = vrot.slane %v6603_v24, 3  ;;  %v13611_v49 = vld [vmem:[#allocation2 + $0x88] sm:$0xf] }
 0x451   : > { %10777 = vmatprep.subr.bf16.mxu1 %v11718_v32  ;;  %v6608_v52 = vrot.slane %v6606_v47, 4  ;;  %v6621_v60 = vshrl.u32 %v6467_v27, 16  ;;  %v6624_v34 = vshll.u32 %v6467_v27, 16 }
 0x452   : > { %v6600_v1 = vor.u32 %v6599_v23, %v6596_v5  ;;  %v6468_v5 = vmul.bf16 %v13611_v49, %v14250_v37 }
 0x453   : > { %10746 = vmatmul.mubr.bf16.gmra.mrb[12].mxu1 %v6565_v26  ;;  %v14264_v26 = vld [vmem:[#allocation30_spill] sm:$0xff]  ;;  %v6609_v62 = vor.u32 %v6608_v52, %v6605_v39  ;;  %v6623_v47 = vrot.slane %v6621_v60, 3  ;;  %v6626_v24 = vrot.slane %v6624_v34, 4 }
 0x454   : > { %10749 = vmatprep.mubr.bf16.mxu1 %v6574_v16  ;;  %10778 = vmatpush3.bf16.msra.mxu1 %v11718_v32  ;;  %v6466_v16 = vmul.bf16 %v13603_v25, %v14264_v26  ;;  %v6592_v32 = vsel %vm1624_vm15, %v6582_v0, %v6591_v2  ;;  %v6601_v56 = vsel %vm1624_vm15, %v6591_v2, %v6600_v1  ;;  %v6633_v39 = vshll.u32 %v6468_v5, 16 }
 0x455   : > { %10779 = vmatprep.subr.bf16.mxu1 %v11719_v35  ;;  %v6610_v0 = vsel %vm1624_vm15, %v6600_v1, %v6609_v62  ;;  %v6931_v1 = vrot.slane %v13521_v20, 4 }
 0x456   : > { %v6612_v14 = vshrl.u32 %v6466_v16, 16 }
 0x458   : > { %10780 = vmatpush3.bf16.msra.mxu1 %v11719_v35  ;;  %v6615_v35 = vshll.u32 %v6466_v16, 16  ;;  %v6614_v26 = vrot.slane %v6612_v14, 3  ;;  %v6627_v16 = vor.u32 %v6626_v24, %v6623_v47  ;;  %v6635_v14 = vrot.slane %v6633_v39, 4 }
 0x459   : > { %10813 = vmatprep.subr.bf16.mxu1 %v11720_v30 }
 0x45b   : > { %10750 = vmatmul.mubr.bf16.gmra.mrb[16].mxu1 %v6583_v36  ;;  %v6617_v36 = vrot.slane %v6615_v35, 4  ;;  %v13619_v35 = vld [vmem:[#allocation2 + $0x8] sm:$0xf0] }
 0x45c   : > { %10753 = vmatprep.mubr.bf16.mxu1 %v6592_v32  ;;  %v6630_v32 = vshrl.u32 %v6468_v5, 16  ;;  %v6930_v60 = vrot.slane %v13619_v35, 4  ;;  %v11722_v5 = vld [vmem:[#allocation8 + $0x150] sm:$0xff]  }
 0x45d   : > { %v6618_v23 = vor.u32 %v6617_v36, %v6614_v26  ;;  %v6935_v36 = vrot.slane %v13533_v21, 4 }
 0x45e   : > { %v6632_v27 = vrot.slane %v6630_v32, 3  ;;  %v11723_v32 = vld [vmem:[#allocation8 + $0x158] sm:$0xff]  }
 0x45f   : > { %v6619_v52 = vsel %vm1624_vm15, %v6609_v62, %v6618_v23  ;;  %v6628_v2 = vsel %vm1624_vm15, %v6618_v23, %v6627_v16  ;;  %v13626_v62 = vrot.slane %v13531_v17, 4  ;;  %v6937_v23 = vrot.slane %v13551_v18, 4 }
 0x460   : > { %v6636_v34 = vor.u32 %v6635_v14, %v6632_v27  ;;  %v6943_v27 = vrot.slane %v13564_v63, 4  ;;  %v11725_v14 = vld [vmem:[#allocation8 + $0x168] sm:$0xff]  }
 0x461   : > { %14265 = vst [vmem:[#allocation47_spill] sm:$0xff] %v13626_v62  ;;  %v6934_v47 = vsel %vm1365_vm0, %v6931_v1, %v13626_v62  ;;  %v13633_v24 = vsel %vm1365_vm0, %v13626_v62, %v6935_v36  ;;  %v13639_v39 = vsel %vm1365_vm0, %v6935_v36, %v6937_v23  ;;  %v11727_v36 = vld [vmem:[#allocation8 + $0x178] sm:$0xff]  }
 0x462   : > { %v6637_v26 = vsel %vm1624_vm15, %v6627_v16, %v6636_v34  ;;  %14266 = vst [vmem:[#allocation48_spill] sm:$0xff] %v13633_v24  ;;  %v6939_v16 = vrot.slane %v13553_v3, 4  ;;  %14267 = vst [vmem:[#allocation49_spill] sm:$0xff] %v13639_v39  ;;  %v11726_v34 = vld [vmem:[#allocation8 + $0x170] sm:$0xff]  }
 0x463   : > { %10754 = vmatmul.mubr.bf16.gmra.mrb[20].mxu1 %v6601_v56  ;;  %v6932_v56 = vsel %vm1365_vm0, %v6930_v60, %v6931_v1 }
 0x464   : > { %10757 = vmatprep.mubr.bf16.mxu1 %v6610_v0  ;;  %v11721_v0 = vld [vmem:[#allocation8 + $0x148] sm:$0xff]  }
 0x46b   : > { %10758 = vmatmul.mubr.bf16.gmra.mrb[24].mxu1 %v6619_v52  ;;  %v13643_v52 = vsel %vm1365_vm0, %v6937_v23, %v6939_v16  ;;  %v6949_v23 = vrot.slane %v13583_v61, 4 }
 0x46c   : > { %10761 = vmatprep.mubr.bf16.mxu1 %v6628_v2  ;;  %14268 = vst [vmem:[#allocation50_spill] sm:$0xff] %v13643_v52  ;;  %v6941_v2 = vrot.slane %v13562_v54, 4 }
 0x46e   : > { %v13649_v60 = vsel %vm1365_vm0, %v6939_v16, %v6941_v2  ;;  %v13653_v1 = vsel %vm1365_vm0, %v6941_v2, %v6943_v27  ;;  %v6951_v16 = vrot.slane %v13585_v28, 4  ;;  %v6953_v2 = vrot.slane %v13593_v11, 4 }
 0x46f   : > { %14269 = vst [vmem:[#allocation51_spill] sm:$0xff] %v13649_v60  ;;  %14270 = vst [vmem:[#allocation52_spill] sm:$0xff] %v13653_v1 }
 0x473   : > { %10762 = vmatmul.mubr.bf16.gmra.mrb[28].mxu1 %v6637_v26  ;;  %v6945_v26 = vrot.slane %v13573_v50, 4 }
 0x474   : > { %10781 = vmatprep.mubr.bf16.mxu1 %v6932_v56  ;;  %v6947_v56 = vrot.slane %v13575_v31, 4 }
 0x47b   : > { %10782 = vmatmul.mubr.bf16.vlgmr.msra.gmra.mrb[0].mxu1 %v6934_v47  ;;  %v13663_v47 = vsel %vm1365_vm0, %v6945_v26, %v6947_v56 }
 0x47c   : > { %10785 = vmatprep.mubr.bf16.mxu1 %v13633_v24  ;;  %10814 = vmatpush3.bf16.msra.mxu1 %v11720_v30  ;;  %v11724_v30 = vld [vmem:[#allocation8 + $0x160] sm:$0xff]   ;;  %14272 = vst [vmem:[#allocation55_spill] sm:$0xff] %v13663_v47  ;;  %v6961_v24 = vrot.slane %v13611_v49, 4 }
 0x47d   : > { %10815 = vmatprep.subr.bf16.mxu1 %v11721_v0 }
 0x480   : > { %10816 = vmatpush3.bf16.msra.mxu1 %v11721_v0  ;;  %v13659_v0 = vsel %vm1365_vm0, %v6943_v27, %v6945_v26  ;;  %v6955_v27 = vrot.slane %v13595_v48, 4 }
 0x481   : > { %10817 = vmatprep.subr.bf16.mxu1 %v11722_v5  ;;  %14271 = vst [vmem:[#allocation53_spill] sm:$0xff] %v13659_v0 }
 0x483   : > { %10786 = vmatmul.mubr.bf16.gmra.mrb[4].mxu1 %v13639_v39 }
 0x484   : > { %10789 = vmatprep.mubr.bf16.mxu1 %v13643_v52  ;;  %10818 = vmatpush3.bf16.msra.mxu1 %v11722_v5  ;;  %v13666_v5 = vld [vmem:[#allocation8 + $0x180] sm:$0xff]  }
 0x485   : > { %10819 = vmatprep.subr.bf16.mxu1 %v11723_v32 }
 0x488   : > { %10820 = vmatpush3.bf16.msra.mxu1 %v11723_v32  ;;  %v13672_v32 = vsel %vm1365_vm0, %v6947_v56, %v6949_v23  ;;  %v13688_v56 = vsel %vm1365_vm0, %v6953_v2, %v6955_v27 }
 0x489   : > { %10821 = vmatprep.subr.bf16.mxu1 %v11724_v30  ;;  %14273 = vst [vmem:[#allocation54_spill] sm:$0xff] %v13672_v32  ;;  %14277 = vst [vmem:[#allocation35_spill] sm:$0xff] %v13688_v56 }
 0x48b   : > { %10790 = vmatmul.mubr.bf16.gmra.mrb[8].mxu1 %v13649_v60 }
 0x48c   : > { %10793 = vmatprep.mubr.bf16.mxu1 %v13653_v1  ;;  %10822 = vmatpush3.bf16.msra.mxu1 %v11724_v30  ;;  %v13676_v30 = vsel %vm1365_vm0, %v6949_v23, %v6951_v16 }
 0x48d   : > { %10823 = vmatprep.subr.bf16.mxu1 %v11725_v14  ;;  %14274 = vst [vmem:[#allocation56_spill] sm:$0xff] %v13676_v30 }
 0x490   : > { %10824 = vmatpush3.bf16.msra.mxu1 %v11725_v14  ;;  %v13682_v14 = vsel %vm1365_vm0, %v6951_v16, %v6953_v2  ;;  %v14279_v2 = vld [vmem:[#allocation24_spill] sm:$0xff] }
 0x491   : > { %10825 = vmatprep.subr.bf16.mxu1 %v11726_v34  ;;  %14275 = vst [vmem:[#allocation34_spill] sm:$0xff] %v13682_v14 }
 0x493   : > { %10794 = vmatmul.mubr.bf16.gmra.mrb[12].mxu1 %v13659_v0 }
 0x494   : > { %10797 = vmatprep.mubr.bf16.mxu1 %v13663_v47  ;;  %10826 = vmatpush3.bf16.msra.mxu1 %v11726_v34  ;;  %v14276_v34 = vld [vmem:[#allocation13_spill] sm:$0xff] }
 0x495   : > { %10827 = vmatprep.subr.bf16.mxu1 %v11727_v36  ;;  %v7221_v26 = vmul.bf16 %v13619_v35, %v14276_v34  ;;  %v7223_v34 = vmul.bf16 %v13531_v17, %v14279_v2  ;;  %v6962_v2 = vsel %vm1365_vm0, %v13536_v4, %v6961_v24  ;;  %v11729_v24 = vld [vmem:[#allocation8 + $0x188] sm:$0xff]  }
 0x497   : > { %v7259_v47 = vshll.u32 %v7221_v26, 16 }
 0x498   : > { %10828 = vmatpush3.bf16.msra.mxu1 %v11727_v36  ;;  %v14278_v36 = vld [vmem:[#allocation28_spill] sm:$0xff] }
 0x499   : > { %10861 = vmatprep.subr.bf16.mxu1 %v13666_v5  ;;  %v7222_v23 = vmul.bf16 %v13521_v20, %v14278_v36  ;;  %v7224_v20 = vmul.bf16 %v13533_v21, %v14227_v51 }
 0x49b   : > { %10798 = vmatmul.mubr.bf16.gmra.mrb[16].mxu1 %v13672_v32  ;;  %v7256_v32 = vshrl.u32 %v7221_v26, 16  ;;  %v7264_v0 = vshrl.u32 %v7222_v23, 16  ;;  %v7267_v16 = vshll.u32 %v7222_v23, 16  ;;  %v7276_v23 = vshll.u32 %v7223_v34, 16 }
 0x49c   : > { %10801 = vmatprep.mubr.bf16.mxu1 %v13676_v30  ;;  %v6957_v30 = vrot.slane %v13603_v25, 4  ;;  %v7285_v39 = vshll.u32 %v7224_v20, 16 }
 0x49d   : > { %v7258_v36 = vrot.slane %v7256_v32, 4  ;;  %v7266_v26 = vrot.slane %v7264_v0, 4  ;;  %v7278_v62 = vrot.slane %v7276_v23, 5 }
 0x49e   : > { %v13695_v1 = vsel %vm1365_vm0, %v6955_v27, %v6957_v30  ;;  %v13699_v35 = vsel %vm1365_vm0, %v6957_v30, %v13536_v4  ;;  %v7273_v27 = vshrl.u32 %v7223_v34, 16  ;;  %v7282_v30 = vshrl.u32 %v7224_v20, 16 }
 0x4a0   : > { %v7275_v51 = vrot.slane %v7273_v27, 4  ;;  %v7284_v32 = vrot.slane %v7282_v30, 4 }
 0x4a2   : > { %v7279_v34 = vor.u32 %v7278_v62, %v7275_v51  ;;  %v7228_v51 = vmul.bf16 %v13564_v63, %v14208_v46  ;;  %v11730_v62 = vld [vmem:[#allocation8 + $0x190] sm:$0xff]  }
 0x4a3   : > { %10802 = vmatmul.mubr.bf16.gmra.mrb[20].mxu1 %v13682_v14  ;;  %v7269_v14 = vrot.slane %v7267_v16, 5  ;;  %v7287_v16 = vrot.slane %v7285_v39, 5 }
 0x4a4   : > { %10805 = vmatprep.mubr.bf16.mxu1 %v13688_v56  ;;  %v7261_v56 = vrot.slane %v7259_v47, 5  ;;  %v7225_v47 = vmul.bf16 %v13551_v18, %v14229_v44 }
 0x4a5   : > { %v7270_v52 = vor.u32 %v7269_v14, %v7266_v26  ;;  %v7226_v14 = vmul.bf16 %v13553_v3, %v14230_v12 }
 0x4a6   : > { %v7262_v60 = vor.u32 %v7261_v56, %v7258_v36  ;;  %v7291_v56 = vshrl.u32 %v7225_v47, 16  ;;  %v7294_v49 = vshll.u32 %v7225_v47, 16  ;;  %v7288_v36 = vor.u32 %v7287_v16, %v7284_v32 }
 0x4a7   : > { %v7300_v20 = vshrl.u32 %v7226_v14, 16  ;;  %v7303_v4 = vshll.u32 %v7226_v14, 16  ;;  %v7280_v26 = vsel %vm1136_vm6, %v7270_v52, %v7279_v34  ;;  %v7318_v16 = vshrl.u32 %v7228_v51, 16 }
 0x4a8   : > { %v7271_v0 = vsel %vm1136_vm6, %v7262_v60, %v7270_v52  ;;  %v7293_v27 = vrot.slane %v7291_v56, 4  ;;  %v7296_v23 = vrot.slane %v7294_v49, 5  ;;  %v7227_v60 = vmul.bf16 %v13562_v54, %v14207_v55  ;;  %v11731_v56 = vld [vmem:[#allocation8 + $0x198] sm:$0xff]  }
 0x4a9   : > { %v7289_v39 = vsel %vm1136_vm6, %v7279_v34, %v7288_v36  ;;  %v7305_v30 = vrot.slane %v7303_v4, 5  ;;  %v7321_v14 = vshll.u32 %v7228_v51, 16  ;;  %v7229_v4 = vmul.bf16 %v13573_v50, %v12693_v43 }
 0x4aa   : > { %v7297_v47 = vor.u32 %v7296_v23, %v7293_v27  ;;  %v7309_v52 = vshrl.u32 %v7227_v60, 16  ;;  %v7230_v23 = vmul.bf16 %v13575_v31, %v14240_v19 }
 0x4ab   : > { %10806 = vmatmul.mubr.bf16.gmra.mrb[24].mxu1 %v13695_v1  ;;  %v7323_v27 = vrot.slane %v7321_v14, 5  ;;  %v7231_v14 = vmul.bf16 %v13583_v61, %v14241_v7 }
 0x4ac   : > { %10809 = vmatprep.mubr.bf16.mxu1 %v13699_v35  ;;  %v7298_v34 = vsel %vm1136_vm6, %v7288_v36, %v7297_v47  ;;  %v7311_v49 = vrot.slane %v7309_v52, 4  ;;  %v7330_v36 = vshll.u32 %v7229_v4, 16  ;;  %v7339_v51 = vshll.u32 %v7230_v23, 16  ;;  %v11733_v52 = vld [vmem:[#allocation8 + $0x1a8] sm:$0xff]  }
 0x4b3   : > { %10810 = vmatmul.mubr.bf16.gmra.mrb[28].mxu1 %v6962_v2  ;;  %v7302_v2 = vrot.slane %v7300_v20, 4 }
 0x4b4   : > { %10829 = vmatprep.mubr.bf16.mxu1 %v7271_v0  ;;  %v7312_v0 = vshll.u32 %v7227_v60, 16 }
 0x4b5   : > { %v7306_v32 = vor.u32 %v7305_v30, %v7302_v2  ;;  %v7336_v30 = vshrl.u32 %v7230_v23, 16 }
 0x4b6   : > { %v7314_v20 = vrot.slane %v7312_v0, 5 }
 0x4b8   : > { %v7315_v60 = vor.u32 %v7314_v20, %v7311_v49  ;;  %v7341_v49 = vrot.slane %v7339_v51, 5  ;;  %v7232_v20 = vmul.bf16 %v13585_v28, %v14243_v38  ;;  %v7233_v51 = vmul.bf16 %v13593_v11, %v14244_v8 }
 0x4ba   : > { %v7357_v23 = vshll.u32 %v7232_v20, 16 }
 0x4bb   : > { %10830 = vmatmul.mubr.bf16.vlgmr.msra.gmra.mrb[0].mxu1 %v7280_v26  ;;  %v7320_v26 = vrot.slane %v7318_v16, 4  ;;  %v7332_v16 = vrot.slane %v7330_v36, 5 }
 0x4bc   : > { %10833 = vmatprep.mubr.bf16.mxu1 %v7289_v39  ;;  %10862 = vmatpush3.bf16.msra.mxu1 %v13666_v5  ;;  %v7307_v5 = vsel %vm1136_vm6, %v7297_v47, %v7306_v32  ;;  %v7327_v39 = vshrl.u32 %v7229_v4, 16  ;;  %v7316_v47 = vsel %vm1136_vm6, %v7306_v32, %v7315_v60  ;;  %v7348_v32 = vshll.u32 %v7231_v14, 16 }
 0x4bd   : > { %10863 = vmatprep.subr.bf16.mxu1 %v11729_v24  ;;  %v7324_v2 = vor.u32 %v7323_v27, %v7320_v26  ;;  %v7354_v27 = vshrl.u32 %v7232_v20, 16 }
 0x4be   : > { %v7329_v0 = vrot.slane %v7327_v39, 4  ;;  %v11735_v39 = vld [vmem:[#allocation8 + $0x1b8] sm:$0xff]  }
 0x4c0   : > { %10864 = vmatpush3.bf16.msra.mxu1 %v11729_v24  ;;  %v11732_v24 = vld [vmem:[#allocation8 + $0x1a0] sm:$0xff]   ;;  %v7333_v4 = vor.u32 %v7332_v16, %v7329_v0  ;;  %v7359_v0 = vrot.slane %v7357_v23, 5  ;;  %v7234_v16 = vmul.bf16 %v13595_v48, %v14245_v40 }
 0x4c1   : > { %10865 = vmatprep.subr.bf16.mxu1 %v11730_v62 }
 0x4c2   : > { %v7375_v20 = vshll.u32 %v7234_v16, 16 }
 0x4c3   : > { %10834 = vmatmul.mubr.bf16.gmra.mrb[4].mxu1 %v7298_v34  ;;  %v7338_v34 = vrot.slane %v7336_v30, 4  ;;  %v7350_v30 = vrot.slane %v7348_v32, 5 }
 0x4c4   : > { %10837 = vmatprep.mubr.bf16.mxu1 %v7307_v5  ;;  %10866 = vmatpush3.bf16.msra.mxu1 %v11730_v62  ;;  %v7325_v62 = vsel %vm1136_vm6, %v7315_v60, %v7324_v2  ;;  %v7345_v5 = vshrl.u32 %v7231_v14, 16  ;;  %v7334_v60 = vsel %vm1136_vm6, %v7324_v2, %v7333_v4  ;;  %v7363_v2 = vshrl.u32 %v7233_v51, 16 }
 0x4c5   : > { %10867 = vmatprep.subr.bf16.mxu1 %v11731_v56  ;;  %v7342_v26 = vor.u32 %v7341_v49, %v7338_v34  ;;  %v7372_v49 = vshrl.u32 %v7234_v16, 16 }
 0x4c6   : > { %v7347_v36 = vrot.slane %v7345_v5, 4  ;;  %v7365_v5 = vrot.slane %v7363_v2, 4 }
 0x4c7   : > { %v7374_v23 = vrot.slane %v7372_v49, 4 }
 0x4c8   : > { %10868 = vmatpush3.bf16.msra.mxu1 %v11731_v56  ;;  %v11734_v56 = vld [vmem:[#allocation8 + $0x1b0] sm:$0xff]   ;;  %v7351_v14 = vor.u32 %v7350_v30, %v7347_v36  ;;  %v7236_v36 = vmul.bf16 %v13529_v29, %v14248_v45  ;;  %v7682_v29 = vmul.bf16 %v13531_v17, %v14253_v6 }
 0x4c9   : > { %10869 = vmatprep.subr.bf16.mxu1 %v11732_v24 }
 0x4cb   : > { %10838 = vmatmul.mubr.bf16.gmra.mrb[8].mxu1 %v7316_v47  ;;  %v7356_v47 = vrot.slane %v7354_v27, 4  ;;  %v7235_v27 = vmul.bf16 %v13603_v25, %v14247_v59 }
 0x4cc   : > { %10841 = vmatprep.mubr.bf16.mxu1 %v7325_v62  ;;  %10870 = vmatpush3.bf16.msra.mxu1 %v11732_v24  ;;  %v7343_v24 = vsel %vm1136_vm6, %v7333_v4, %v7342_v26  ;;  %v7366_v62 = vshll.u32 %v7233_v51, 16  ;;  %v7352_v4 = vsel %vm1136_vm6, %v7342_v26, %v7351_v14  ;;  %v7393_v26 = vshll.u32 %v7236_v36, 16 }
 0x4cd   : > { %10871 = vmatprep.subr.bf16.mxu1 %v11733_v52  ;;  %v7360_v34 = vor.u32 %v7359_v0, %v7356_v47  ;;  %v7384_v51 = vshll.u32 %v7235_v27, 16  ;;  %v7390_v47 = vshrl.u32 %v7236_v36, 16  ;;  %v7220_v0 = vld [vmem:[#allocation2 + $0x88] sm:$0x1f] }
 0x4ce   : > { %v7368_v32 = vrot.slane %v7366_v62, 5 }
 0x4cf   : > { %v7386_v62 = vrot.slane %v7384_v51, 5  ;;  %v7392_v49 = vrot.slane %v7390_v47, 4  ;;  %v7683_v47 = vmul.bf16 %v13533_v21, %v14254_v58 }
 0x4d0   : > { %10872 = vmatpush3.bf16.msra.mxu1 %v11733_v52  ;;  %v13740_v52 = vld [vmem:[#allocation8 + $0x1c0] sm:$0xff]   ;;  %v7369_v30 = vor.u32 %v7368_v32, %v7365_v5  ;;  %v7237_v5 = vmul.bf16 %v7220_v0, %v14251_v42 }
 0x4d1   : > { %10873 = vmatprep.subr.bf16.mxu1 %v11734_v56 }
 0x4d2   : > { %v7370_v16 = vsel %vm1136_vm6, %v7360_v34, %v7369_v30  ;;  %v7402_v36 = vshll.u32 %v7237_v5, 16 }
 0x4d3   : > { %10842 = vmatmul.mubr.bf16.gmra.mrb[12].mxu1 %v7334_v60  ;;  %v7377_v60 = vrot.slane %v7375_v20, 5  ;;  %v7395_v20 = vrot.slane %v7393_v26, 5 }
 0x4d4   : > { %10845 = vmatprep.mubr.bf16.mxu1 %v7343_v24  ;;  %10874 = vmatpush3.bf16.msra.mxu1 %v11734_v56  ;;  %v7361_v56 = vsel %vm1136_vm6, %v7351_v14, %v7360_v34  ;;  %v7727_v34 = vshll.u32 %v7682_v29, 16 }
 0x4d5   : > { %10875 = vmatprep.subr.bf16.mxu1 %v11735_v39  ;;  %v7378_v24 = vor.u32 %v7377_v60, %v7374_v23  ;;  %v7724_v23 = vshrl.u32 %v7682_v29, 16  ;;  %v7399_v60 = vshrl.u32 %v7237_v5, 16 }
 0x4d6   : > { %v7729_v26 = vrot.slane %v7727_v34, 4  ;;  %v7686_v34 = vmul.bf16 %v13562_v54, %v14259_v22  ;;  %v7688_v54 = vmul.bf16 %v13573_v50, %v14261_v53  ;;  %v7689_v53 = vmul.bf16 %v13575_v31, %v14262_v13  ;;  %v11741_v31 = vld [vmem:[#allocation8 + $0x1e8] sm:$0xff]  }
 0x4d7   : > { %v7379_v14 = vsel %vm1136_vm6, %v7369_v30, %v7378_v24  ;;  %v7726_v17 = vrot.slane %v7724_v23, 3  ;;  %v7401_v0 = vrot.slane %v7399_v60, 4 }
 0x4d8   : > { %10876 = vmatpush3.bf16.msra.mxu1 %v11735_v39  ;;  %v7381_v39 = vshrl.u32 %v7235_v27, 16 }
 0x4d9   : > { %10909 = vmatprep.subr.bf16.mxu1 %v13740_v52 }
 0x4da   : > { %v7383_v2 = vrot.slane %v7381_v39, 4 }
 0x4db   : > { %10846 = vmatmul.mubr.bf16.gmra.mrb[16].mxu1 %v7352_v4  ;;  %v7664_v4 = vld [vmem:[#allocation2 + $0x10] sm:$0xf8] }
 0x4dc   : > { %10849 = vmatprep.mubr.bf16.mxu1 %v7361_v56  ;;  %v7681_v32 = vmul.bf16 %v7664_v4, %v14252_v57  ;;  %v7387_v27 = vor.u32 %v7386_v62, %v7383_v2  ;;  %v7396_v56 = vor.u32 %v7395_v20, %v7392_v49  ;;  %v7684_v57 = vmul.bf16 %v13551_v18, %v14255_v15 }
 0x4dd   : > { %v7733_v4 = vshrl.u32 %v7683_v47, 16  ;;  %v7730_v49 = vor.u32 %v7729_v26, %v7726_v17 }
 0x4de   : > { %v7716_v39 = vshrl.u32 %v7681_v32, 16  ;;  %v7719_v51 = vshll.u32 %v7681_v32, 16  ;;  %v7388_v30 = vsel %vm1136_vm6, %v7378_v24, %v7387_v27  ;;  %v7397_v6 = vsel %vm1136_vm6, %v7387_v27, %v7396_v56 }
 0x4df   : > { %v7742_v24 = vshrl.u32 %v7684_v57, 16  ;;  %v7745_v20 = vshll.u32 %v7684_v57, 16  ;;  %v7735_v5 = vrot.slane %v7733_v4, 3  ;;  %v7685_v27 = vmul.bf16 %v13553_v3, %v14258_v41 }
 0x4e0   : > { %v7718_v2 = vrot.slane %v7716_v39, 3  ;;  %v7721_v62 = vrot.slane %v7719_v51, 4  ;;  %v7687_v41 = vmul.bf16 %v13564_v63, %v14260_v9  ;;  %v11739_v63 = vld [vmem:[#allocation8 + $0x1d8] sm:$0xff]  }
 0x4e1   : > { %v7744_v18 = vrot.slane %v7742_v24, 3  ;;  %v7747_v23 = vrot.slane %v7745_v20, 4  ;;  %v7754_v39 = vshll.u32 %v7685_v27, 16 }
 0x4e2   : > { %v7722_v21 = vor.u32 %v7721_v62, %v7718_v2  ;;  %v7769_v2 = vshrl.u32 %v7687_v41, 16  ;;  %v7772_v62 = vshll.u32 %v7687_v41, 16 }
 0x4e3   : > { %10850 = vmatmul.mubr.bf16.gmra.mrb[20].mxu1 %v7370_v16  ;;  %v7404_v16 = vrot.slane %v7402_v36, 5  ;;  %v7751_v36 = vshrl.u32 %v7685_v27, 16  ;;  %v7748_v51 = vor.u32 %v7747_v23, %v7744_v18  ;;  %v7756_v3 = vrot.slane %v7754_v39, 4  ;;  %v14281_v39 = vld [vmem:[#allocation25_spill] sm:$0xff] }
 0x4e4   : > { %10853 = vmatprep.mubr.bf16.mxu1 %v7379_v14  ;;  %v7736_v14 = vshll.u32 %v7683_v47, 16  ;;  %v7731_v15 = vsel %vm1624_vm15, %v7722_v21, %v7730_v49  ;;  %v11737_v47 = vld [vmem:[#allocation8 + $0x1c8] sm:$0xff]   ;;  %v7771_v24 = vrot.slane %v7769_v2, 3  ;;  %v7774_v20 = vrot.slane %v7772_v62, 4  ;;  %v14280_v21 = vld [vmem:[#allocation23_spill] sm:$0xff] }
 0x4e5   : > { %v7405_v29 = vor.u32 %v7404_v16, %v7401_v0  ;;  %v7753_v17 = vrot.slane %v7751_v36, 3  ;;  %v11738_v0 = vld [vmem:[#allocation8 + $0x1d0] sm:$0xff]   ;;  %v7787_v27 = vshrl.u32 %v7689_v53, 16 }
 0x4e6   : > { %v7738_v32 = vrot.slane %v7736_v14, 4  ;;  %v7778_v14 = vshrl.u32 %v7688_v54, 16 }
 0x4e7   : > { %v7406_v58 = vsel %vm1136_vm6, %v7396_v56, %v7405_v29  ;;  %v7763_v56 = vshll.u32 %v7686_v34, 16  ;;  %v7757_v16 = vor.u32 %v7756_v3, %v7753_v17  ;;  %v11742_v17 = vld [vmem:[#allocation8 + $0x1f0] sm:$0xff]  }
 0x4e8   : > { %v7739_v60 = vor.u32 %v7738_v32, %v7735_v5  ;;  %v11740_v5 = vld [vmem:[#allocation8 + $0x1e0] sm:$0xff]   ;;  %v7775_v32 = vor.u32 %v7774_v20, %v7771_v24 }
 0x4e9   : > { %v7765_v22 = vrot.slane %v7763_v56, 4  ;;  %v7758_v9 = vsel %vm1624_vm15, %v7748_v51, %v7757_v16 }
 0x4ea   : > { %v7749_v26 = vsel %vm1624_vm15, %v7739_v60, %v7748_v51 }
 0x4eb   : > { %10854 = vmatmul.mubr.bf16.gmra.mrb[24].mxu1 %v7388_v30  ;;  %v7760_v30 = vshrl.u32 %v7686_v34, 16 }
 0x4ec   : > { %10857 = vmatprep.mubr.bf16.mxu1 %v7397_v6  ;;  %v7740_v6 = vsel %vm1624_vm15, %v7730_v49, %v7739_v60  ;;  %v7781_v49 = vshll.u32 %v7688_v54, 16  ;;  %v7789_v60 = vrot.slane %v7787_v27, 3 }
 0x4ed   : > { %v7762_v57 = vrot.slane %v7760_v30, 3 }
 0x4ee   : > { %v7783_v29 = vrot.slane %v7781_v49, 4  ;;  %v14283_v49 = vld [vmem:[#allocation29_spill] sm:$0xff] }
 0x4ef   : > { %v7766_v4 = vor.u32 %v7765_v22, %v7762_v57 }
 0x4f1   : > { %v7767_v50 = vsel %vm1624_vm15, %v7757_v16, %v7766_v4  ;;  %v7776_v13 = vsel %vm1624_vm15, %v7766_v4, %v7775_v32 }
 0x4f3   : > { %10858 = vmatmul.mubr.bf16.gmra.mrb[28].mxu1 %v7406_v58  ;;  %v7690_v58 = vmul.bf16 %v13583_v61, %v14280_v21  ;;  %v7691_v61 = vmul.bf16 %v13585_v28, %v14281_v39  ;;  %v11743_v28 = vld [vmem:[#allocation8 + $0x1f8] sm:$0xff]  }
 0x4f4   : > { %10877 = vmatprep.mubr.bf16.mxu1 %v7731_v15  ;;  %v7790_v15 = vshll.u32 %v7689_v53, 16 }
 0x4f5   : > { %v7796_v23 = vshrl.u32 %v7690_v58, 16  ;;  %v7799_v34 = vshll.u32 %v7690_v58, 16  ;;  %v7805_v41 = vshrl.u32 %v7691_v61, 16  ;;  %v13793_v58 = vld [vmem:[#allocation2 + $0x80] sm:$0xff] }
 0x4f6   : > { %v7792_v36 = vrot.slane %v7790_v15, 4 }
 0x4f7   : > { %v7798_v30 = vrot.slane %v7796_v23, 3  ;;  %v7801_v56 = vrot.slane %v7799_v34, 4  ;;  %v7807_v16 = vrot.slane %v7805_v41, 3 }
 0x4f8   : > { %v7793_v3 = vor.u32 %v7792_v36, %v7789_v60 }
 0x4f9   : > { %v7802_v57 = vor.u32 %v7801_v56, %v7798_v30  ;;  %v11798_v56 = vld [vmem:[#allocation2 + $0x90] sm:$0xf] }
 0x4fb   : > { %10878 = vmatmul.mubr.bf16.vlgmr.msra.gmra.mrb[0].mxu1 %v7740_v6  ;;  %v7803_v62 = vsel %vm1624_vm15, %v7793_v3, %v7802_v57 }
 0x4fc   : > { %10881 = vmatprep.mubr.bf16.mxu1 %v7749_v26  ;;  %10910 = vmatpush3.bf16.msra.mxu1 %v13740_v52  ;;  %v7780_v52 = vrot.slane %v7778_v14, 3  ;;  %v7808_v26 = vshll.u32 %v7691_v61, 16 }
 0x4fd   : > { %10911 = vmatprep.subr.bf16.mxu1 %v11737_v47 }
 0x4fe   : > { %v7784_v18 = vor.u32 %v7783_v29, %v7780_v52  ;;  %v7810_v2 = vrot.slane %v7808_v26, 4 }
 0x500   : > { %10912 = vmatpush3.bf16.msra.mxu1 %v11737_v47  ;;  %v7785_v51 = vsel %vm1624_vm15, %v7775_v32, %v7784_v18  ;;  %v14282_v47 = vld [vmem:[#allocation26_spill] sm:$0xff]  ;;  %v7811_v24 = vor.u32 %v7810_v2, %v7807_v16 }
 0x501   : > { %10913 = vmatprep.subr.bf16.mxu1 %v11738_v0  ;;  %v7692_v6 = vmul.bf16 %v13593_v11, %v14282_v47  ;;  %v7693_v11 = vmul.bf16 %v13595_v48, %v14210_v10  ;;  %v7697_v47 = vmul.bf16 %v11798_v56, %v14250_v37  ;;  %v8124_v37 = vld [vmem:[#allocation2 + $0x10] sm:$0xf0] }
 0x502   : > { %v7812_v10 = vsel %vm1624_vm15, %v7802_v57, %v7811_v24  ;;  %v8159_v2 = vrot.slane %v8124_v37, 4  ;;  %v14299_v56 = vld [vmem:[#allocation24_spill] sm:$0xff] }
 0x503   : > { %10882 = vmatmul.mubr.bf16.gmra.mrb[4].mxu1 %v7758_v9  ;;  %v7814_v22 = vshrl.u32 %v7692_v6, 16  ;;  %v7817_v54 = vshll.u32 %v7692_v6, 16  ;;  %v11744_v9 = vld [vmem:[#allocation8 + $0x200] sm:$0xff]   ;;  %v7823_v20 = vshrl.u32 %v7693_v11, 16  ;;  %v7826_v53 = vshll.u32 %v7693_v11, 16 }
 0x504   : > { %10885 = vmatprep.mubr.bf16.mxu1 %v7767_v50  ;;  %10914 = vmatpush3.bf16.msra.mxu1 %v11738_v0  ;;  %v7794_v0 = vsel %vm1624_vm15, %v7784_v18, %v7793_v3  ;;  %v13798_v18 = vld [vmem:[#allocation2 + $0x88] sm:$0xff]  ;;  %v7859_v41 = vshrl.u32 %v7697_v47, 16  ;;  %v7862_v26 = vshll.u32 %v7697_v47, 16 }
 0x505   : > { %10915 = vmatprep.subr.bf16.mxu1 %v11739_v63  ;;  %v7816_v4 = vrot.slane %v7814_v22, 3  ;;  %v7819_v14 = vrot.slane %v7817_v54, 4  ;;  %v7825_v48 = vrot.slane %v7823_v20, 3  ;;  %v7828_v21 = vrot.slane %v7826_v53, 4  ;;  %v11747_v20 = vld [vmem:[#allocation8 + $0x218] sm:$0xff]   ;;  %v14288_v53 = vld [vmem:[#allocation50_spill] sm:$0xff] }
 0x506   : > { %v7696_v23 = vmul.bf16 %v13798_v18, %v14213_v33  ;;  %v7861_v54 = vrot.slane %v7859_v41, 3 }
 0x507   : > { %v7820_v50 = vor.u32 %v7819_v14, %v7816_v4  ;;  %v7829_v34 = vor.u32 %v7828_v21, %v7825_v48  ;;  %v11745_v14 = vld [vmem:[#allocation8 + $0x208] sm:$0xff]   ;;  %v14291_v48 = vld [vmem:[#allocation53_spill] sm:$0xff]  ;;  %v11751_v21 = vld [vmem:[#allocation8 + $0x238] sm:$0xff]  }
 0x508   : > { %10916 = vmatpush3.bf16.msra.mxu1 %v11739_v63  ;;  %v7694_v63 = vmul.bf16 %v13603_v25, %v14283_v49  ;;  %v7850_v36 = vshrl.u32 %v7696_v23, 16  ;;  %v7853_v39 = vshll.u32 %v7696_v23, 16  ;;  %v14286_v49 = vld [vmem:[#allocation48_spill] sm:$0xff]  ;;  %v11799_v23 = vld [vmem:[#allocation2 + $0x18] sm:$0xff] }
 0x509   : > { %10917 = vmatprep.subr.bf16.mxu1 %v11740_v5  ;;  %v7821_v32 = vsel %vm1624_vm15, %v7811_v24, %v7820_v50  ;;  %v7830_v61 = vsel %vm1624_vm15, %v7820_v50, %v7829_v34  ;;  %v11746_v24 = vld [vmem:[#allocation8 + $0x210] sm:$0xff]  }
 0x50a   : > { %v7832_v52 = vshrl.u32 %v7694_v63, 16  ;;  %v7835_v29 = vshll.u32 %v7694_v63, 16  ;;  %v7855_v3 = vrot.slane %v7853_v39, 4  ;;  %v14287_v63 = vld [vmem:[#allocation49_spill] sm:$0xff]  ;;  %v14289_v50 = vld [vmem:[#allocation51_spill] sm:$0xff] }
 0x50b   : > { %10886 = vmatmul.mubr.bf16.gmra.mrb[8].mxu1 %v7776_v13 }
 0x50c   : > { %10889 = vmatprep.mubr.bf16.mxu1 %v7785_v51  ;;  %10918 = vmatpush3.bf16.msra.mxu1 %v11740_v5  ;;  %v14284_v5 = vld [vmem:[#allocation30_spill] sm:$0xff]  ;;  %v7834_v27 = vrot.slane %v7832_v52, 3  ;;  %v7837_v15 = vrot.slane %v7835_v29, 4  ;;  %v11748_v52 = vld [vmem:[#allocation8 + $0x220] sm:$0xff]  }
 0x50d   : > { %10919 = vmatprep.subr.bf16.mxu1 %v11741_v31  ;;  %v7695_v25 = vmul.bf16 %v13793_v58, %v14284_v5  ;;  %v11749_v29 = vld [vmem:[#allocation8 + $0x228] sm:$0xff]   ;;  %v14292_v5 = vld [vmem:[#allocation55_spill] sm:$0xff] }
 0x50e   : > { %v7838_v60 = vor.u32 %v7837_v15, %v7834_v27  ;;  %v14295_v27 = vld [vmem:[#allocation34_spill] sm:$0xff]  ;;  %v14296_v15 = vld [vmem:[#allocation35_spill] sm:$0xff] }
 0x50f   : > { %v7844_v13 = vshll.u32 %v7695_v25, 16 }
 0x510   : > { %10920 = vmatpush3.bf16.msra.mxu1 %v11741_v31  ;;  %v7841_v31 = vshrl.u32 %v7695_v25, 16  ;;  %v7839_v6 = vsel %vm1624_vm15, %v7829_v34, %v7838_v60  ;;  %v14293_v25 = vld [vmem:[#allocation54_spill] sm:$0xff]  ;;  %v14297_v34 = vld [vmem:[#allocation28_spill] sm:$0xff] }
 0x511   : > { %10921 = vmatprep.subr.bf16.mxu1 %v11742_v17  ;;  %v7846_v30 = vrot.slane %v7844_v13, 4  ;;  %v14298_v13 = vld [vmem:[#allocation13_spill] sm:$0xff] }
 0x512   : > { %v7843_v51 = vrot.slane %v7841_v31, 3  ;;  %v8451_v31 = vmul.bf16 %v11799_v23, %v14297_v34 }
 0x513   : > { %10890 = vmatmul.mubr.bf16.gmra.mrb[12].mxu1 %v7794_v0 }
 0x514   : > { %10893 = vmatprep.mubr.bf16.mxu1 %v7803_v62  ;;  %10922 = vmatpush3.bf16.msra.mxu1 %v11742_v17  ;;  %v7852_v17 = vrot.slane %v7850_v36, 3  ;;  %v7847_v33 = vor.u32 %v7846_v30, %v7843_v51  ;;  %v14285_v62 = vld [vmem:[#allocation47_spill] sm:$0xff]  ;;  %v8493_v36 = vshrl.u32 %v8451_v31, 16  ;;  %v8496_v39 = vshll.u32 %v8451_v31, 16  ;;  %v11800_v30 = vld [vmem:[#allocation2 + $0x20] sm:$0xff] }
 0x515   : > { %10923 = vmatprep.subr.bf16.mxu1 %v11743_v28  ;;  %v8161_v4 = vsel %vm1365_vm0, %v8159_v2, %v14285_v62  ;;  %v8452_v47 = vmul.bf16 %v11800_v30, %v14299_v56  ;;  %v11802_v62 = vld [vmem:[#allocation2 + $0x30] sm:$0xff] }
 0x516   : > { %v7856_v57 = vor.u32 %v7855_v3, %v7852_v17  ;;  %v7848_v22 = vsel %vm1624_vm15, %v7838_v60, %v7847_v33  ;;  %v8450_v60 = vmul.bf16 %v8124_v37, %v14298_v13  ;;  %v8498_v17 = vrot.slane %v8496_v39, 5  ;;  %v11801_v3 = vld [vmem:[#allocation2 + $0x28] sm:$0xff] }
 0x518   : > { %10924 = vmatpush3.bf16.msra.mxu1 %v11743_v28  ;;  %v7864_v28 = vrot.slane %v7862_v26, 4  ;;  %v7857_v0 = vsel %vm1624_vm15, %v7847_v33, %v7856_v57  ;;  %v8488_v51 = vshll.u32 %v8450_v60, 16  ;;  %v14300_v33 = vld [vmem:[#allocation33_spill] sm:$0xff]  ;;  %v14301_v26 = vld [vmem:[#allocation32_spill] sm:$0xff] }
 0x519   : > { %10957 = vmatprep.subr.bf16.mxu1 %v11744_v9  ;;  %v8453_v41 = vmul.bf16 %v11801_v3, %v14300_v33 }
 0x51a   : > { %v7865_v16 = vor.u32 %v7864_v28, %v7861_v54  ;;  %v8505_v54 = vshll.u32 %v8452_v47, 16 }
 0x51b   : > { %10894 = vmatmul.mubr.bf16.gmra.mrb[16].mxu1 %v7812_v10  ;;  %v14290_v10 = vld [vmem:[#allocation52_spill] sm:$0xff] }
 0x51c   : > { %10897 = vmatprep.mubr.bf16.mxu1 %v7821_v32  ;;  %v7866_v11 = vsel %vm1624_vm15, %v7856_v57, %v7865_v16  ;;  %v14294_v32 = vld [vmem:[#allocation56_spill] sm:$0xff]  ;;  %v8514_v16 = vshll.u32 %v8453_v41, 16 }
 0x523   : > { %10898 = vmatmul.mubr.bf16.gmra.mrb[20].mxu1 %v7830_v61  ;;  %v8485_v61 = vshrl.u32 %v8450_v60, 16 }
 0x524   : > { %10901 = vmatprep.mubr.bf16.mxu1 %v7839_v6  ;;  %v8495_v6 = vrot.slane %v8493_v36, 4 }
 0x525   : > { %v8487_v57 = vrot.slane %v8485_v61, 4 }
 0x526   : > { %v8499_v28 = vor.u32 %v8498_v17, %v8495_v6 }
 0x52b   : > { %10902 = vmatmul.mubr.bf16.gmra.mrb[24].mxu1 %v7848_v22  ;;  %v8502_v22 = vshrl.u32 %v8452_v47, 16 }
 0x52c   : > { %10905 = vmatprep.mubr.bf16.mxu1 %v7857_v0  ;;  %v8511_v0 = vshrl.u32 %v8453_v41, 16 }
 0x52d   : > { %v8504_v2 = vrot.slane %v8502_v22, 4 }
 0x533   : > { %10906 = vmatmul.mubr.bf16.gmra.mrb[28].mxu1 %v7866_v11  ;;  %v8507_v11 = vrot.slane %v8505_v54, 5 }
 0x534   : > { %10925 = vmatprep.mubr.bf16.mxu1 %v8161_v4  ;;  %v14302_v4 = vld [vmem:[#allocation46_spill] sm:$0xff] }
 0x53b   : > { %10926 = vmatmul.mubr.bf16.vlgmr.msra.gmra.mrb[0].mxu1 %v14286_v49  ;;  %v8513_v49 = vrot.slane %v8511_v0, 4 }
 0x53c   : > { %10929 = vmatprep.mubr.bf16.mxu1 %v14287_v63  ;;  %10958 = vmatpush3.bf16.msra.mxu1 %v11744_v9  ;;  %v11750_v9 = vld [vmem:[#allocation8 + $0x230] sm:$0xff]   ;;  %v8516_v63 = vrot.slane %v8514_v16, 5 }
 0x53d   : > { %10959 = vmatprep.subr.bf16.mxu1 %v11745_v14 }
 0x540   : > { %10960 = vmatpush3.bf16.msra.mxu1 %v11745_v14 }
 0x541   : > { %10961 = vmatprep.subr.bf16.mxu1 %v11746_v24 }
 0x543   : > { %10930 = vmatmul.mubr.bf16.gmra.mrb[4].mxu1 %v14288_v53  ;;  %v8508_v53 = vor.u32 %v8507_v11, %v8504_v2 }
 0x544   : > { %10933 = vmatprep.mubr.bf16.mxu1 %v14289_v50  ;;  %10962 = vmatpush3.bf16.msra.mxu1 %v11746_v24  ;;  %v11803_v24 = vld [vmem:[#allocation2 + $0x38] sm:$0xff] }
 0x545   : > { %10963 = vmatprep.subr.bf16.mxu1 %v11747_v20 }
 0x548   : > { %10964 = vmatpush3.bf16.msra.mxu1 %v11747_v20  ;;  %v8455_v20 = vmul.bf16 %v11803_v24, %v14230_v12  ;;  %v11805_v12 = vld [vmem:[#allocation2 + $0x48] sm:$0xff] }
 0x549   : > { %10965 = vmatprep.subr.bf16.mxu1 %v11748_v52  ;;  %v8457_v23 = vmul.bf16 %v11805_v12, %v14208_v46  ;;  %v11807_v46 = vld [vmem:[#allocation2 + $0x58] sm:$0xff] }
 0x54a   : > { %v8459_v3 = vmul.bf16 %v11807_v46, %v14240_v19  ;;  %v11809_v19 = vld [vmem:[#allocation2 + $0x68] sm:$0xff] }
 0x54b   : > { %10934 = vmatmul.mubr.bf16.gmra.mrb[8].mxu1 %v14290_v10  ;;  %v8529_v10 = vshrl.u32 %v8455_v20, 16  ;;  %v8547_v36 = vshrl.u32 %v8457_v23, 16  ;;  %v8550_v39 = vshll.u32 %v8457_v23, 16 }
 0x54c   : > { %10937 = vmatprep.mubr.bf16.mxu1 %v14291_v48  ;;  %10966 = vmatpush3.bf16.msra.mxu1 %v11748_v52  ;;  %v8532_v48 = vshll.u32 %v8455_v20, 16  ;;  %v8568_v22 = vshll.u32 %v8459_v3, 16 }
 0x54d   : > { %10967 = vmatprep.subr.bf16.mxu1 %v11749_v29  ;;  %v8549_v6 = vrot.slane %v8547_v36, 4  ;;  %v8552_v17 = vrot.slane %v8550_v39, 5 }
 0x54e   : > { %v8570_v11 = vrot.slane %v8568_v22, 5 }
 0x550   : > { %10968 = vmatpush3.bf16.msra.mxu1 %v11749_v29  ;;  %v8517_v29 = vor.u32 %v8516_v63, %v8513_v49 }
 0x551   : > { %10969 = vmatprep.subr.bf16.mxu1 %v11750_v9 }
 0x553   : > { %10938 = vmatmul.mubr.bf16.gmra.mrb[12].mxu1 %v14292_v5  ;;  %v11804_v5 = vld [vmem:[#allocation2 + $0x40] sm:$0xff] }
 0x554   : > { %10941 = vmatprep.mubr.bf16.mxu1 %v14293_v25  ;;  %10970 = vmatpush3.bf16.msra.mxu1 %v11750_v9  ;;  %v8509_v9 = vsel %vm1136_vm6, %v8499_v28, %v8508_v53  ;;  %v8456_v25 = vmul.bf16 %v11804_v5, %v14207_v55  ;;  %v11806_v55 = vld [vmem:[#allocation2 + $0x50] sm:$0xff] }
 0x555   : > { %10971 = vmatprep.subr.bf16.mxu1 %v11751_v21  ;;  %v8458_v56 = vmul.bf16 %v11806_v55, %v12693_v43  ;;  %v11808_v43 = vld [vmem:[#allocation2 + $0x60] sm:$0xff] }
 0x556   : > { %v8538_v31 = vshrl.u32 %v8456_v25, 16  ;;  %v8541_v13 = vshll.u32 %v8456_v25, 16  ;;  %v8460_v16 = vmul.bf16 %v11808_v43, %v14241_v7  ;;  %v11810_v7 = vld [vmem:[#allocation2 + $0x70] sm:$0xff] }
 0x557   : > { %v8556_v41 = vshrl.u32 %v8458_v56, 16 }
 0x558   : > { %10972 = vmatpush3.bf16.msra.mxu1 %v11751_v21  ;;  %v8543_v30 = vrot.slane %v8541_v13, 5 }
 0x55b   : > { %10942 = vmatmul.mubr.bf16.gmra.mrb[16].mxu1 %v14294_v32  ;;  %v8518_v32 = vsel %vm1136_vm6, %v8508_v53, %v8517_v29 }
 0x55c   : > { %10945 = vmatprep.mubr.bf16.mxu1 %v14295_v27  ;;  %v8531_v27 = vrot.slane %v8529_v10, 4 }
 0x563   : > { %10946 = vmatmul.mubr.bf16.gmra.mrb[20].mxu1 %v14296_v15  ;;  %v8534_v15 = vrot.slane %v8532_v48, 5 }
 0x564   : > { %10949 = vmatprep.mubr.bf16.mxu1 %v13695_v1  ;;  %v8490_v1 = vrot.slane %v8488_v51, 5  ;;  %v8540_v51 = vrot.slane %v8538_v31, 4 }
 0x565   : > { %v8535_v60 = vor.u32 %v8534_v15, %v8531_v27 }
 0x566   : > { %v8491_v37 = vor.u32 %v8490_v1, %v8487_v57  ;;  %v8544_v33 = vor.u32 %v8543_v30, %v8540_v51  ;;  %v8553_v57 = vor.u32 %v8552_v17, %v8549_v6  ;;  %v8565_v1 = vshrl.u32 %v8459_v3, 16  ;;  %v8449_v51 = vld [vmem:[#allocation2 + $0x90] sm:$0x1f] }
 0x568   : > { %v8500_v14 = vsel %vm1136_vm6, %v8491_v37, %v8499_v28  ;;  %v8545_v54 = vsel %vm1136_vm6, %v8535_v60, %v8544_v33  ;;  %v8558_v28 = vrot.slane %v8556_v41, 4  ;;  %v8554_v37 = vsel %vm1136_vm6, %v8544_v33, %v8553_v57 }
 0x569   : > { %v8567_v2 = vrot.slane %v8565_v1, 4 }
 0x56b   : > { %10950 = vmatmul.mubr.bf16.gmra.mrb[24].mxu1 %v13699_v35  ;;  %v8454_v35 = vmul.bf16 %v11802_v62, %v14229_v44  ;;  %v8461_v62 = vmul.bf16 %v11809_v19, %v14243_v38  ;;  %v8571_v49 = vor.u32 %v8570_v11, %v8567_v2  ;;  %v11811_v38 = vld [vmem:[#allocation2 + $0x78] sm:$0xff] }
 0x56c   : > { %10953 = vmatprep.mubr.bf16.mxu1 %v14301_v26  ;;  %v8559_v26 = vshll.u32 %v8458_v56, 16  ;;  %v11813_v19 = vld [vmem:[%s12225_s13] sm:$0xf] }
 0x56d   : > { %v8520_v50 = vshrl.u32 %v8454_v35, 16  ;;  %v8523_v52 = vshll.u32 %v8454_v35, 16  ;;  %v8583_v63 = vshrl.u32 %v8461_v62, 16  ;;  %v8586_v24 = vshll.u32 %v8461_v62, 16 }
 0x56e   : > { %v8561_v0 = vrot.slane %v8559_v26, 5  ;;  %v8971_v62 = vunpack.c.l.bf16 %v11813_v19 }
 0x56f   : > { %v8522_v21 = vrot.slane %v8520_v50, 4  ;;  %v8525_v44 = vrot.slane %v8523_v52, 5  ;;  %v8462_v52 = vmul.bf16 %v11810_v7, %v14244_v8  ;;  %v8585_v10 = vrot.slane %v8583_v63, 4 }
 0x570   : > { %v8562_v35 = vor.u32 %v8561_v0, %v8558_v28  ;;  %v8588_v48 = vrot.slane %v8586_v24, 5  ;;  %v8464_v8 = vmul.bf16 %v13793_v58, %v14247_v59  ;;  %v8466_v58 = vmul.bf16 %v8449_v51, %v14251_v42  ;;  %v13868_v0 = vld [vmem:[%s14028_s6] ss:$0 sm:$0xff] }
 0x571   : > { %v8526_v34 = vor.u32 %v8525_v44, %v8522_v21  ;;  %v8592_v44 = vshrl.u32 %v8462_v52, 16  ;;  %v8595_v5 = vshll.u32 %v8462_v52, 16 }
 0x572   : > { %v8563_v20 = vsel %vm1136_vm6, %v8553_v57, %v8562_v35  ;;  %v8589_v25 = vor.u32 %v8588_v48, %v8585_v10  ;;  %v8610_v36 = vshrl.u32 %v8464_v8, 16  ;;  %v8613_v39 = vshll.u32 %v8464_v8, 16 }
 0x573   : > { %10954 = vmatmul.mubr.bf16.gmra.mrb[28].mxu1 %v14302_v4  ;;  %v8527_v61 = vsel %vm1136_vm6, %v8517_v29, %v8526_v34  ;;  %v8536_v47 = vsel %vm1136_vm6, %v8526_v34, %v8535_v60  ;;  %v8574_v4 = vshrl.u32 %v8460_v16, 16  ;;  %v8572_v29 = vsel %vm1136_vm6, %v8562_v35, %v8571_v49 }
 0x574   : > { %10973 = vmatprep.mubr.bf16.mxu1 %v8500_v14  ;;  %v8577_v14 = vshll.u32 %v8460_v16, 16  ;;  %v8594_v12 = vrot.slane %v8592_v44, 4  ;;  %v8597_v23 = vrot.slane %v8595_v5, 5  ;;  %v8615_v59 = vrot.slane %v8613_v39, 5  ;;  %v11812_v16 = vld [vmem:[%s12225_s13 + $0x4] sm:$0xff]  }
 0x575   : > { %v8576_v53 = vrot.slane %v8574_v4, 4  ;;  %v8631_v3 = vshll.u32 %v8466_v58, 16 }
 0x576   : > { %v8579_v50 = vrot.slane %v8577_v14, 5  ;;  %v8598_v60 = vor.u32 %v8597_v23, %v8594_v12 }
 0x577   : > { %v8633_v57 = vrot.slane %v8631_v3, 5 }
 0x578   : > { %v8580_v21 = vor.u32 %v8579_v50, %v8576_v53  ;;  %v8599_v56 = vsel %vm1136_vm6, %v8589_v25, %v8598_v60  ;;  %v8972_v50 = vunpack.c.l.bf16 %v11812_v16 }
 0x57a   : > { %v8581_v15 = vsel %vm1136_vm6, %v8571_v49, %v8580_v21  ;;  %v8590_v34 = vsel %vm1136_vm6, %v8580_v21, %v8589_v25  ;;  %v11814_v49 = vld [vmem:[%s12225_s13 + $0xc] sm:$0xff]   ;;  %v11815_v25 = vld [vmem:[%s12225_s13 + $0x14] sm:$0xff]  }
 0x57b   : > { %10974 = vmatmul.mubr.bf16.vlgmr.msra.gmra.mrb[0].mxu1 %v8509_v9  ;;  %v8463_v9 = vmul.bf16 %v11811_v38, %v14245_v40  ;;  %v8465_v40 = vmul.bf16 %v13798_v18, %v14248_v45  ;;  %v8628_v18 = vshrl.u32 %v8466_v58, 16  ;;  %v8974_v63 = vunpack.c.l.bf16 %v11814_v49 }
 0x57c   : > { %10977 = vmatprep.mubr.bf16.mxu1 %v8518_v32  ;;  %v8975_v8 = vunpack.c.h.bf16 %v11814_v49 }
 0x57d   : > { %v8601_v32 = vshrl.u32 %v8463_v9, 16  ;;  %v8604_v27 = vshll.u32 %v8463_v9, 16  ;;  %v8619_v30 = vshrl.u32 %v8465_v40, 16  ;;  %v8622_v55 = vshll.u32 %v8465_v40, 16 }
 0x57e   : > { %v8630_v26 = vrot.slane %v8628_v18, 4 }
 0x57f   : > { %v8603_v31 = vrot.slane %v8601_v32, 4  ;;  %v8606_v13 = vrot.slane %v8604_v27, 5  ;;  %v8621_v17 = vrot.slane %v8619_v30, 4  ;;  %v8624_v46 = vrot.slane %v8622_v55, 5 }
 0x580   : > { %v8634_v42 = vor.u32 %v8633_v57, %v8630_v26  ;;  %v8977_v32 = vunpack.c.h.bf16 %v11815_v25  ;;  %v8976_v55 = vunpack.c.l.bf16 %v11815_v25 }
 0x581   : > { %v8625_v33 = vor.u32 %v8624_v46, %v8621_v17 }
 0x583   : > { %10978 = vmatmul.mubr.bf16.gmra.mrb[4].mxu1 %v8527_v61  ;;  %v8607_v61 = vor.u32 %v8606_v13, %v8603_v31  ;;  %v8635_v22 = vsel %vm1136_vm6, %v8625_v33, %v8634_v42 }
 0x584   : > { %10981 = vmatprep.mubr.bf16.mxu1 %v8536_v47  ;;  %v8612_v47 = vrot.slane %v8610_v36, 4 }
 0x585   : > { %v8608_v6 = vsel %vm1136_vm6, %v8598_v60, %v8607_v61  ;;  %v11816_v60 = vld [vmem:[%s12225_s13 + $0x1c] sm:$0xff]  }
 0x586   : > { %v8616_v45 = vor.u32 %v8615_v59, %v8612_v47  ;;  %v8978_v36 = vunpack.c.l.bf16 %v11816_v60 }
 0x588   : > { %v8617_v41 = vsel %vm1136_vm6, %v8607_v61, %v8616_v45  ;;  %v8626_v1 = vsel %vm1136_vm6, %v8616_v45, %v8625_v33  ;;  %v11817_v33 = vld [vmem:[%s12225_s13 + $0x24] sm:$0xff]  }
 0x58b   : > { %10982 = vmatmul.mubr.bf16.gmra.mrb[8].mxu1 %v8545_v54  ;;  %v13863_v54 = vld [vmem:[%s14027_s5] ss:$0 sm:$0xff] }
 0x58c   : > { %10985 = vmatprep.mubr.bf16.mxu1 %v8554_v37  ;;  %v8973_v37 = vunpack.c.h.bf16 %v11812_v16 }
 0x593   : > { %10986 = vmatmul.mubr.bf16.gmra.mrb[12].mxu1 %v8563_v20 }
 0x594   : > { %10989 = vmatprep.mubr.bf16.mxu1 %v8572_v29 }
 0x59b   : > { %10990 = vmatmul.mubr.bf16.gmra.mrb[16].mxu1 %v8581_v15 }
 0x59c   : > { %10993 = vmatprep.mubr.bf16.mxu1 %v8590_v34 }
 0x5a3   : > { %10994 = vmatmul.mubr.bf16.gmra.mrb[20].mxu1 %v8599_v56 }
 0x5a4   : > { %10997 = vmatprep.mubr.bf16.mxu1 %v8608_v6 }
 0x5ab   : > { %10998 = vmatmul.mubr.bf16.gmra.mrb[24].mxu1 %v8617_v41  ;;  %v8981_v41 = vunpack.c.h.bf16 %v11817_v33 }
 0x5ac   : > { %11001 = vmatprep.mubr.bf16.mxu1 %v8626_v1 }
 0x5b3   : > { %11002 = vmatmul.mubr.bf16.gmra.mrb[28].mxu1 %v8635_v22  ;;  %v8979_v22 = vunpack.c.h.bf16 %v11816_v60 }
 0x64e   : > { %v10975_v28 = vpop.f32.mrb[0].mxu1 }
 0x64f   : > { %v8902_v43 = vmul.f32 %v10975_v28, %v13863_v54  ;;  %v8734_v2 = vpop.f32.mrb[1].mxu1 }
 0x650   : > { %v8900_v11 = vmul.f32 %v13863_v54, %v8734_v2  ;;  %v10976_v35 = vpop.f32.mrb[2].mxu1  ;;  %v11818_v2 = vld [vmem:[%s12225_s13 + $0x2c] sm:$0xff]  }
 0x651   : > { %v8941_v4 = vadd.f32 %v13868_v0, %v8902_v43  ;;  %v8903_v14 = vmul.f32 %v10976_v35, %v13863_v54  ;;  %v8737_v24 = vpop.f32.mrb[3].mxu1  ;;  %v8983_v25 = vunpack.c.h.bf16 %v11818_v2 }
 0x652   : > { %v8939_v20 = vadd.f32 %v13868_v0, %v8900_v11  ;;  %v8901_v53 = vmul.f32 %v13863_v54, %v8737_v24  ;;  %v8982_v11 = vunpack.c.l.bf16 %v11818_v2 }
 0x653   : > { %v9005_v7 = vadd.f32 %v8973_v37, %v8941_v4  ;;  %v8942_v52 = vadd.f32 %v13868_v0, %v8903_v14  ;;  %v8980_v14 = vunpack.c.l.bf16 %v11817_v33 }
 0x654   : > { %v9003_v29 = vadd.f32 %v8971_v62, %v8939_v20  ;;  %v8940_v10 = vadd.f32 %v13868_v0, %v8901_v53 }
 0x655   : > { %v9006_v48 = vadd.f32 %v8974_v63, %v8942_v52  ;;  %v9037_v21 = vmax.f32 %v9005_v7, 0.0 }
 0x656   : > { %v9004_v38 = vadd.f32 %v8972_v50, %v8940_v10  ;;  %v10979_v9 = vpop.f32.mrb[4].mxu1  ;;  %v9035_v15 = vmax.f32 %v9003_v29, 0.0 }
 0x657   : > { %v9038_v44 = vmax.f32 %v9006_v48, 0.0  ;;  %v8906_v5 = vmul.f32 %v10979_v9, %v13863_v54  ;;  %v8750_v27 = vpop.f32.mrb[5].mxu1  ;;  %v11819_v48 = vld [vmem:[%s12225_s13 + $0x34] sm:$0xff]  }
 0x658   : > { %v9036_v12 = vmax.f32 %v9004_v38, 0.0  ;;  %v8904_v23 = vmul.f32 %v13863_v54, %v8750_v27  ;;  %v10980_v34 = vpop.f32.mrb[6].mxu1  ;;  %v8985_v38 = vunpack.c.h.bf16 %v11819_v48  ;;  %v8984_v60 = vunpack.c.l.bf16 %v11819_v48 }
 0x659   : > { %v9622_v31 = vpack.c.bf16 %v9038_v44, %v9037_v21  ;;  %v8945_v13 = vadd.f32 %v13868_v0, %v8906_v5  ;;  %v8907_v40 = vmul.f32 %v10980_v34, %v13863_v54  ;;  %v8753_v39 = vpop.f32.mrb[7].mxu1 }
 0x65a   : > { %v9617_v61 = vpack.c.bf16 %v9036_v12, %v9035_v15  ;;  %v8943_v51 = vadd.f32 %v13868_v0, %v8904_v23  ;;  %v8905_v30 = vmul.f32 %v13863_v54, %v8753_v39  ;;  %v11820_v23 = vld [vmem:[%s12225_s13 + $0x3c] sm:$0xff]  }
 0x65b   : > { %9694 = vst [vmem:[%s13891_s21 + $0x8] sm:$0xff] %v9622_v31   ;;  %v9009_v56 = vadd.f32 %v8977_v32, %v8945_v13  ;;  %v8946_v47 = vadd.f32 %v13868_v0, %v8907_v40  ;;  %v8987_v33 = vunpack.c.h.bf16 %v11820_v23 }
 0x65c   : > { %9618 = vst [vmem:[%s13891_s21] sm:$0xff] %v9617_v61   ;;  %v9007_v59 = vadd.f32 %v8975_v8, %v8943_v51  ;;  %v8944_v58 = vadd.f32 %v13868_v0, %v8905_v30  ;;  %v8986_v8 = vunpack.c.l.bf16 %v11820_v23 }
 0x65d   : > { %v9010_v6 = vadd.f32 %v8978_v36, %v8946_v47  ;;  %v9041_v45 = vmax.f32 %v9009_v56, 0.0 }
 0x65e   : > { %v9008_v17 = vadd.f32 %v8976_v55, %v8944_v58  ;;  %v10983_v46 = vpop.f32.mrb[8].mxu1  ;;  %v9039_v57 = vmax.f32 %v9007_v59, 0.0 }
 0x65f   : > { %v9042_v18 = vmax.f32 %v9010_v6, 0.0  ;;  %v8910_v3 = vmul.f32 %v10983_v46, %v13863_v54  ;;  %v8766_v26 = vpop.f32.mrb[9].mxu1  ;;  %v11821_v6 = vld [vmem:[%s12225_s13 + $0x44] sm:$0xff]  }
 0x660   : > { %v9040_v1 = vmax.f32 %v9008_v17, 0.0  ;;  %v8908_v42 = vmul.f32 %v13863_v54, %v8766_v26  ;;  %v10984_v28 = vpop.f32.mrb[10].mxu1  ;;  %v8989_v17 = vunpack.c.h.bf16 %v11821_v6  ;;  %v8988_v2 = vunpack.c.l.bf16 %v11821_v6 }
 0x661   : > { %v9632_v43 = vpack.c.bf16 %v9042_v18, %v9041_v45  ;;  %v8949_v16 = vadd.f32 %v13868_v0, %v8910_v3  ;;  %v8911_v37 = vmul.f32 %v10984_v28, %v13863_v54  ;;  %v8769_v19 = vpop.f32.mrb[11].mxu1 }
 0x662   : > { %v9627_v62 = vpack.c.bf16 %v9040_v1, %v9039_v57  ;;  %v8947_v35 = vadd.f32 %v13868_v0, %v8908_v42  ;;  %v8909_v4 = vmul.f32 %v13863_v54, %v8769_v19  ;;  %v11822_v42 = vld [vmem:[%s12225_s13 + $0x4c] sm:$0xff]  }
 0x663   : > { %9696 = vst [vmem:[%s13891_s21 + $0x18] sm:$0xff] %v9632_v43   ;;  %v9013_v49 = vadd.f32 %v8981_v41, %v8949_v16  ;;  %v8950_v63 = vadd.f32 %v13868_v0, %v8911_v37  ;;  %v8991_v48 = vunpack.c.h.bf16 %v11822_v42 }
 0x664   : > { %9695 = vst [vmem:[%s13891_s21 + $0x10] sm:$0xff] %v9627_v62   ;;  %v9011_v24 = vadd.f32 %v8979_v22, %v8947_v35  ;;  %v8948_v20 = vadd.f32 %v13868_v0, %v8909_v4  ;;  %v8990_v22 = vunpack.c.l.bf16 %v11822_v42 }
 0x665   : > { %v9014_v53 = vadd.f32 %v8982_v11, %v8950_v63  ;;  %v9045_v52 = vmax.f32 %v9013_v49, 0.0 }
 0x666   : > { %v9012_v50 = vadd.f32 %v8980_v14, %v8948_v20  ;;  %v10987_v7 = vpop.f32.mrb[12].mxu1  ;;  %v9043_v21 = vmax.f32 %v9011_v24, 0.0 }
 0x667   : > { %v9046_v29 = vmax.f32 %v9014_v53, 0.0  ;;  %v8914_v10 = vmul.f32 %v10987_v7, %v13863_v54  ;;  %v8782_v9 = vpop.f32.mrb[13].mxu1  ;;  %v11823_v53 = vld [vmem:[%s12225_s13 + $0x54] sm:$0xff]  }
 0x668   : > { %v9044_v44 = vmax.f32 %v9012_v50, 0.0  ;;  %v8912_v5 = vmul.f32 %v13863_v54, %v8782_v9  ;;  %v10988_v32 = vpop.f32.mrb[14].mxu1  ;;  %v8993_v50 = vunpack.c.h.bf16 %v11823_v53  ;;  %v8992_v23 = vunpack.c.l.bf16 %v11823_v53 }
 0x669   : > { %v9642_v27 = vpack.c.bf16 %v9046_v29, %v9045_v52  ;;  %v8953_v15 = vadd.f32 %v13868_v0, %v8914_v10  ;;  %v8915_v12 = vmul.f32 %v10988_v32, %v13863_v54  ;;  %v8785_v34 = vpop.f32.mrb[15].mxu1 }
 0x66a   : > { %v9637_v31 = vpack.c.bf16 %v9044_v44, %v9043_v21  ;;  %v8951_v13 = vadd.f32 %v13868_v0, %v8912_v5  ;;  %v8913_v40 = vmul.f32 %v13863_v54, %v8785_v34  ;;  %v11824_v5 = vld [vmem:[%s12225_s13 + $0x5c] sm:$0xff]  }
 0x66b   : > { %9698 = vst [vmem:[%s13891_s21 + $0x28] sm:$0xff] %v9642_v27   ;;  %v9017_v36 = vadd.f32 %v8985_v38, %v8953_v15  ;;  %v8954_v39 = vadd.f32 %v13868_v0, %v8915_v12  ;;  %v8995_v6 = vunpack.c.h.bf16 %v11824_v5 }
 0x66c   : > { %9697 = vst [vmem:[%s13891_s21 + $0x20] sm:$0xff] %v9637_v31   ;;  %v9015_v61 = vadd.f32 %v8983_v25, %v8951_v13  ;;  %v8952_v51 = vadd.f32 %v13868_v0, %v8913_v40  ;;  %v8994_v25 = vunpack.c.l.bf16 %v11824_v5 }
 0x66d   : > { %v9018_v30 = vadd.f32 %v8986_v8, %v8954_v39  ;;  %v9049_v47 = vmax.f32 %v9017_v36, 0.0 }
 0x66e   : > { %v9016_v55 = vadd.f32 %v8984_v60, %v8952_v51  ;;  %v10991_v56 = vpop.f32.mrb[16].mxu1  ;;  %v9047_v45 = vmax.f32 %v9015_v61, 0.0 }
 0x66f   : > { %v9050_v59 = vmax.f32 %v9018_v30, 0.0  ;;  %v8918_v58 = vmul.f32 %v10991_v56, %v13863_v54  ;;  %v8798_v46 = vpop.f32.mrb[17].mxu1  ;;  %v11825_v30 = vld [vmem:[%s12225_s13 + $0x64] sm:$0xff]  }
 0x670   : > { %v9048_v18 = vmax.f32 %v9016_v55, 0.0  ;;  %v8916_v3 = vmul.f32 %v13863_v54, %v8798_v46  ;;  %v10992_v41 = vpop.f32.mrb[18].mxu1  ;;  %v8997_v55 = vunpack.c.h.bf16 %v11825_v30  ;;  %v8996_v42 = vunpack.c.l.bf16 %v11825_v30 }
 0x671   : > { %v9652_v26 = vpack.c.bf16 %v9050_v59, %v9049_v47  ;;  %v8957_v57 = vadd.f32 %v13868_v0, %v8918_v58  ;;  %v8919_v1 = vmul.f32 %v10992_v41, %v13863_v54  ;;  %v8801_v28 = vpop.f32.mrb[19].mxu1 }
 0x672   : > { %v9647_v43 = vpack.c.bf16 %v9048_v18, %v9047_v45  ;;  %v8955_v16 = vadd.f32 %v13868_v0, %v8916_v3  ;;  %v8917_v37 = vmul.f32 %v13863_v54, %v8801_v28  ;;  %v11826_v3 = vld [vmem:[%s12225_s13 + $0x6c] sm:$0xff]  }
 0x673   : > { %9700 = vst [vmem:[%s13891_s21 + $0x38] sm:$0xff] %v9652_v26   ;;  %v9021_v11 = vadd.f32 %v8989_v17, %v8957_v57  ;;  %v8958_v19 = vadd.f32 %v13868_v0, %v8919_v1  ;;  %v8999_v53 = vunpack.c.h.bf16 %v11826_v3 }
 0x674   : > { %9699 = vst [vmem:[%s13891_s21 + $0x30] sm:$0xff] %v9647_v43   ;;  %v9019_v62 = vadd.f32 %v8987_v33, %v8955_v16  ;;  %v8956_v35 = vadd.f32 %v13868_v0, %v8917_v37  ;;  %v8998_v33 = vunpack.c.l.bf16 %v11826_v3 }
 0x675   : > { %v9022_v4 = vadd.f32 %v8990_v22, %v8958_v19  ;;  %v9053_v63 = vmax.f32 %v9021_v11, 0.0 }
 0x676   : > { %v9020_v14 = vadd.f32 %v8988_v2, %v8956_v35  ;;  %v10995_v49 = vpop.f32.mrb[20].mxu1  ;;  %v9051_v52 = vmax.f32 %v9019_v62, 0.0 }
 0x677   : > { %v9054_v24 = vmax.f32 %v9022_v4, 0.0  ;;  %v8922_v20 = vmul.f32 %v10995_v49, %v13863_v54  ;;  %v8814_v7 = vpop.f32.mrb[21].mxu1  ;;  %v11827_v4 = vld [vmem:[%s12225_s13 + $0x74] sm:$0xff]  }
 0x678   : > { %v9052_v29 = vmax.f32 %v9020_v14, 0.0  ;;  %v8920_v10 = vmul.f32 %v13863_v54, %v8814_v7  ;;  %v10996_v38 = vpop.f32.mrb[22].mxu1  ;;  %v9001_v14 = vunpack.c.h.bf16 %v11827_v4  ;;  %v9000_v5 = vunpack.c.l.bf16 %v11827_v4 }
 0x679   : > { %v9662_v9 = vpack.c.bf16 %v9054_v24, %v9053_v63  ;;  %v8961_v21 = vadd.f32 %v13868_v0, %v8922_v20  ;;  %v8923_v44 = vmul.f32 %v10996_v38, %v13863_v54  ;;  %v8817_v32 = vpop.f32.mrb[23].mxu1 }
 0x67a   : > { %v9657_v27 = vpack.c.bf16 %v9052_v29, %v9051_v52  ;;  %v8959_v15 = vadd.f32 %v13868_v0, %v8920_v10  ;;  %v8921_v12 = vmul.f32 %v13863_v54, %v8817_v32  ;;  %v11828_v10 = vld [vmem:[%s12225_s13 + $0x7c] sm:$0xf] }
 0x67b   : > { %9702 = vst [vmem:[%s13891_s21 + $0x48] sm:$0xff] %v9662_v9   ;;  %v9025_v8 = vadd.f32 %v8993_v50, %v8961_v21  ;;  %v8962_v34 = vadd.f32 %v13868_v0, %v8923_v44 }
 0x67c   : > { %9701 = vst [vmem:[%s13891_s21 + $0x40] sm:$0xff] %v9657_v27   ;;  %v9023_v31 = vadd.f32 %v8991_v48, %v8959_v15  ;;  %v8960_v13 = vadd.f32 %v13868_v0, %v8921_v12  ;;  %v9002_v48 = vunpack.c.l.bf16 %v11828_v10 }
 0x67d   : > { %v9026_v40 = vadd.f32 %v8994_v25, %v8962_v34  ;;  %v9057_v39 = vmax.f32 %v9025_v8, 0.0 }
 0x67e   : > { %v9024_v60 = vadd.f32 %v8992_v23, %v8960_v13  ;;  %v10999_v36 = vpop.f32.mrb[24].mxu1  ;;  %v9055_v47 = vmax.f32 %v9023_v31, 0.0 }
 0x67f   : > { %v9058_v61 = vmax.f32 %v9026_v40, 0.0  ;;  %v8926_v51 = vmul.f32 %v10999_v36, %v13863_v54  ;;  %v8830_v56 = vpop.f32.mrb[25].mxu1 }
 0x680   : > { %v9056_v59 = vmax.f32 %v9024_v60, 0.0  ;;  %v8924_v58 = vmul.f32 %v13863_v54, %v8830_v56  ;;  %v11000_v17 = vpop.f32.mrb[26].mxu1 }
 0x681   : > { %v9672_v46 = vpack.c.bf16 %v9058_v61, %v9057_v39  ;;  %v8965_v45 = vadd.f32 %v13868_v0, %v8926_v51  ;;  %v8927_v18 = vmul.f32 %v11000_v17, %v13863_v54  ;;  %v8833_v41 = vpop.f32.mrb[27].mxu1 }
 0x682   : > { %v9667_v26 = vpack.c.bf16 %v9056_v59, %v9055_v47  ;;  %v8963_v57 = vadd.f32 %v13868_v0, %v8924_v58  ;;  %v8925_v1 = vmul.f32 %v13863_v54, %v8833_v41 }
 0x683   : > { %9704 = vst [vmem:[%s13891_s21 + $0x58] sm:$0xff] %v9672_v46   ;;  %v9029_v22 = vadd.f32 %v8997_v55, %v8965_v45  ;;  %v8966_v28 = vadd.f32 %v13868_v0, %v8927_v18 }
 0x684   : > { %9703 = vst [vmem:[%s13891_s21 + $0x50] sm:$0xff] %v9667_v26   ;;  %v9027_v43 = vadd.f32 %v8995_v6, %v8963_v57  ;;  %v8964_v16 = vadd.f32 %v13868_v0, %v8925_v1 }
 0x685   : > { %v9030_v37 = vadd.f32 %v8998_v33, %v8966_v28  ;;  %v9061_v19 = vmax.f32 %v9029_v22, 0.0 }
 0x686   : > { %v9028_v2 = vadd.f32 %v8996_v42, %v8964_v16  ;;  %v11003_v11 = vpop.f32.mrb[28].mxu1  ;;  %v9059_v63 = vmax.f32 %v9027_v43, 0.0 }
 0x687   : > { %v9062_v62 = vmax.f32 %v9030_v37, 0.0  ;;  %v8930_v35 = vmul.f32 %v11003_v11, %v13863_v54  ;;  %v8846_v49 = vpop.f32.mrb[29].mxu1 }
 0x688   : > { %v9060_v24 = vmax.f32 %v9028_v2, 0.0  ;;  %v8928_v20 = vmul.f32 %v13863_v54, %v8846_v49  ;;  %v11004_v50 = vpop.f32.mrb[30].mxu1 }
 0x689   : > { %v9682_v7 = vpack.c.bf16 %v9062_v62, %v9061_v19  ;;  %v8969_v52 = vadd.f32 %v13868_v0, %v8930_v35  ;;  %v8931_v29 = vmul.f32 %v11004_v50, %v13863_v54  ;;  %v8849_v38 = vpop.f32.mrb[31].mxu1 }
 0x68a   : > { %v9677_v9 = vpack.c.bf16 %v9060_v24, %v9059_v63  ;;  %v8967_v21 = vadd.f32 %v13868_v0, %v8928_v20  ;;  %v8929_v44 = vmul.f32 %v13863_v54, %v8849_v38 }
 0x68b   : > { %9706 = vst [vmem:[%s13891_s21 + $0x68] sm:$0xff] %v9682_v7   ;;  %v9033_v25 = vadd.f32 %v9001_v14, %v8969_v52  ;;  %v8970_v32 = vadd.f32 %v13868_v0, %v8931_v29 }
 0x68c   : > { %9705 = vst [vmem:[%s13891_s21 + $0x60] sm:$0xff] %v9677_v9   ;;  %v9031_v27 = vadd.f32 %v8999_v53, %v8967_v21  ;;  %v8968_v15 = vadd.f32 %v13868_v0, %v8929_v44 }
 0x68d   : > { %v9034_v12 = vadd.f32 %v9002_v48, %v8970_v32  ;;  %v9065_v8 = vmax.f32 %v9033_v25, 0.0 }
 0x68e   : > { %v9032_v23 = vadd.f32 %v9000_v5, %v8968_v15  ;;  %v9063_v54 = vmax.f32 %v9031_v27, 0.0 }
 0x68f   : > { %v9066_v34 = vmax.f32 %v9034_v12, 0.0 }
 0x690   : > { %v9064_v31 = vmax.f32 %v9032_v23, 0.0 }
 0x691   : > { %v9692_v13 = vpack.c.bf16 %v9066_v34, %v9065_v8 }
 0x692   : > { %v9687_v0 = vpack.c.bf16 %v9064_v31, %v9063_v54 }
 0x693   : > { %9708 = vst [vmem:[%s13891_s21 + $0x78] sm:$0xff] %v9692_v13  }
 0x694   : > { %9707 = vst [vmem:[%s13891_s21 + $0x70] sm:$0xff] %v9687_v0  }
 0x695   : > { %11928 = shalt.err (!%p11925_p1)
}
 0x696   : > { %s11929_s15 = scalar_lea.hbm %s13974_s30, 2048  ;;  %s11933_s21 = scalar_lea.hbm %s14029_s7, 4096 }
 0x697   : > { %p11930_p13 = scmp.ne.s32.totalorder %s13974_s30, %s11929_s15  ;;  %p11934_p4 = scmp.lt.u32.totalorder %s13974_s30, %s14029_s7 }
 0x698   : > { %p11935_p5 = scmp.lt.u32.totalorder %s11933_s21, %s11929_s15  ;;  %p11937_p11 = scmp.lt.u32.totalorder %s11929_s15, %s13974_s30 }
 0x699   : > { %p11931_p6 = pnand %p11930_p13, %p14303_p0 }
 0x69a   : > { %p11936_p8 = por %p11935_p5, %p11934_p4 }
 0x69b   : > { %p11932_p10 = pneg %p11931_p6 }
 0x69c   : > { %p11938_p2 = por %p11937_p11, %p11936_p8 }
 0x69e   : > { %p11939_p3 = pnand %p11938_p2, %p11932_p10 }
 0x6a0   : > { %11942 = shalt.err (!%p11939_p3)
}
 0x6a1   : > { %s11996_s13 = smov 64   ;;  %s11997_s9 = smov 4  }
 0x6a2   : > { %11527 = dma.vmem_to_hbm [thread:$0]  (%p14303_p0), %s13976_s22, 2048, %s13974_s30, %s9228_s28, %s11996_s13, %s11996_s13, %s11997_s9  }
 0x6a3 PF: > { %s9256_s29 = sand.u32 1, %s11973_s24   ;;  %p14304_p7 = scmp.ne.s32.totalorder %s14136_s8, 0 }
 0x6a4   : > { %p14305_p9 = scmp.ge.s32.totalorder %s11985_s27, 2  ;;  %s9257_s11 = scalar_lea.sflag [#allocation5], %s9256_s29 }
 0x6a6   : > { %p11541_p12 = pnand %p14305_p9, %p14304_p7 }
 0x6a8   : > { %11968 = dma.done.wait (!%p11541_p12), %s9257_s11, 2048  }
 0x6a9   : > { %11970 = vsyncadd (!%p11541_p12), %s9257_s11, 4294965248  ;;  %p21_p1 = scmp.ge.s32.totalorder %s12154_s12, 4   ;;  %s14306_s24 = smov %s11977_s25 }
 0x6aa   : > { %s14307_s25 = smov %s11981_s26  ;;  %s14308_s26 = smov %s12170_s17 }
 0x6ab   : > { %s14309_s27 = smov %s12154_s12  ;;  %23 = sbr.rel (!%p21_p1) target bundleno = 6 (0x6), region = 117 }
 0x6b2   :  { %9262 = vsyncpa [#allocation4], 1 }
 0x6b3   :  { %9264 = vsyncpa [#allocation4 + $0x1], 1 }
 0x6b4   :  { %9265 = vsyncpa [#allocation7], 1 }
 0x6b5   :  { %9266 = vsyncpa [#allocation5], 1 }
 0x6b6   :  { %9268 = vsyncpa [#allocation5 + $0x1], 1 }

</bundles_post_ra>
